<compile_context>
chip_gen: v5e
topology: v5e:2x2
jax: 0.10.0
libtpu: 0.0.40
codegen_flags: <defaults>
</compile_context>

<pallas_src>
import jax
import jax.numpy as jnp
from jax.experimental import pallas as pl
from jax.experimental.pallas import tpu as pltpu

# Small, self-consistent config (num_features % pred_len == 0 so the final
# .view(B, N, pred_len, -1) of the reference forward is valid).
B, T, N, F, H, P = 2, 8, 8, 32, 32, 4
BN = B * N                         # GRU "batch" rows per timestep (== torch B*N)
R = T * BN                         # rows of the time-major slab
H2, H3, H4, H5, H6 = 2 * H, 3 * H, 4 * H, 5 * H, 6 * H
EPS = 1e-5                         # torch.nn.LayerNorm default eps

# ---- w32 slab (K = 32 weights), column offsets -----------------------------
W_FP, W_SP, W_IH0, W_HH1F, W_O1 = 0, 32, 64, 256, 352
W32_COLS = 416
# ---- w64 slab (K = 64 weights), column offsets -----------------------------
W_HH0G, W_IH1F, W_IH1B, W_PR, W_O2 = 0, 192, 384, 480, 512
W64_COLS = 544
# ---- vt (7, 192) f32 bias / LayerNorm table, row indices --------------------
VT_FPSP, VT_BIH0, VT_BHH0, VT_BIH1F, VT_B1B, VT_MISC, VT_OUT = 0, 1, 2, 3, 4, 5, 6


def _layernorm(x, gamma, beta):
    mu = jnp.mean(x, axis=-1, keepdims=True)
    var = jnp.mean((x - mu) ** 2, axis=-1, keepdims=True)
    return (x - mu) * jax.lax.rsqrt(var + EPS) * gamma + beta


def _full(shape):
    # whole-array block (legal because block dims equal the full array dims)
    return pl.BlockSpec(shape, lambda i: (0,) * len(shape))


# ---------------------------------------------------------------------------
# Fused kernel.  Input rows are time-major: row = t*BN + b*N + n.
# ---------------------------------------------------------------------------
def fused_kernel(x_ref, w32_ref, w64_ref, vt_ref, o_ref, g0_ref, g1_ref, s_ref):
    f32, bf16 = jnp.float32, jnp.bfloat16
    sig, tanh = jax.nn.sigmoid, jnp.tanh

    def mm(a, b):                     # bf16 operands, f32 MXU accumulation
        return jnp.dot(a, b, preferred_element_type=f32)

    vtab = vt_ref[...]                # (7, 192) f32, 2 vregs; slice the value

    def vrow(r, lo, hi):
        return vtab[r:r + 1, lo:hi]

    # ---- feature_proj (Linear+LN+ReLU) then spatial MLP (+ residual) --------
    x = x_ref[...].astype(bf16)                                      # (R, F)
    h1 = jnp.maximum(
        _layernorm(mm(x, w32_ref[:, W_FP:W_FP + H]) + vrow(VT_FPSP, 0, H),
                   vrow(VT_FPSP, H, H2), vrow(VT_FPSP, H2, H3)), 0.0)
    spat = jnp.maximum(
        _layernorm(mm(h1.astype(bf16), w32_ref[:, W_SP:W_SP + H]) + vrow(VT_FPSP, H3, H4),
                   vrow(VT_FPSP, H4, H5), vrow(VT_FPSP, H5, H6)), 0.0)
    h = spat + h1                                                    # (R, H) f32

    # ---- GRU layer 0: ONE hoisted (R,H)@(H,6H) input projection (b_ih folded)
    # slab columns: [d0: r z n | d1: r z n]
    g0_ref[...] = (mm(h.astype(bf16), w32_ref[:, W_IH0:W_IH0 + H6])
                   + vtab[VT_BIH0:VT_BIH0 + 1, :])

    # stacked fwd+bwd recurrence: hidden (BN, 2H) = [fwd | bwd], block-diagonal
    # recurrent weights, gate-major output layout [r01 | z01 | n01].
    whh0 = w64_ref[:, W_HH0G:W_HH0G + H6]                            # (2H, 6H) bf16
    bhh0_rz = jnp.broadcast_to(vrow(VT_BHH0, 0, H4), (BN, H4))
    bhh0_n = jnp.broadcast_to(vrow(VT_BHH0, H4, H6), (BN, H2))
    hp = jnp.zeros((BN, H2), f32)
    hp_bf = hp.astype(bf16)
    # NOTE: plain Python unroll (T=8); per-step live set is small after the
    # fusions, so no lax.fori_loop needed (revisit only if spills show up).
    for step in range(T):
        lof, lob = step * BN, (T - 1 - step) * BN
        gf = g0_ref[lof:lof + BN, 0:H3]          # fwd-dir gates at time step
        gb = g0_ref[lob:lob + BN, H3:H6]         # bwd-dir gates at time T-1-step
        gi_rz = jnp.concatenate([gf[:, 0:H], gb[:, 0:H],
                                 gf[:, H:H2], gb[:, H:H2]], axis=1)  # (BN, 4H)
        gi_n = jnp.concatenate([gf[:, H2:H3], gb[:, H2:H3]], axis=1)  # (BN, 2H)
        gh = mm(hp_bf, whh0)                                          # (BN, 6H)
        rz = sig(gi_rz + gh[:, 0:H4] + bhh0_rz)
        r, z = rz[:, 0:H2], rz[:, H2:H4]
        n = tanh(gi_n + r * (gh[:, H4:H6] + bhh0_n))
        hp = (1.0 - z) * n + z * hp
        hp_bf = hp.astype(bf16)
        s_ref[lof:lof + BN, :] = hp_bf           # row s = [h_fwd[s] | h_bwd[T-1-s]]

    # ---- GRU layer 1 forward: ONE hoisted (R,2H)@(2H,6H) input projection ---
    # cols 0:3H from the fwd half (time-aligned), cols 3H:6H from the bwd half
    # (time-reversed in the slab); b_ih (fwd dir) folded into cols 0:3H only.
    g1_ref[...] = (mm(s_ref[...], w64_ref[:, W_IH1F:W_IH1F + H6])
                   + vtab[VT_BIH1F:VT_BIH1F + 1, :])

    whh1 = w32_ref[:, W_HH1F:W_HH1F + H3]                            # (H, 3H) bf16
    bhh1_rz = jnp.broadcast_to(vrow(VT_MISC, 0, H2), (BN, H2))
    bhh1_n = jnp.broadcast_to(vrow(VT_MISC, H2, H3), (BN, H))
    h1f = jnp.zeros((BN, H), f32)
    h1f_bf = h1f.astype(bf16)
    for t in range(T):
        lo, lor = t * BN, (T - 1 - t) * BN
        gi = g1_ref[lo:lo + BN, 0:H3] + g1_ref[lor:lor + BN, H3:H6]   # (BN, 3H)
        gh = mm(h1f_bf, whh1)                                         # (BN, 3H)
        rz = sig(gi[:, 0:H2] + gh[:, 0:H2] + bhh1_rz)
        r, z = rz[:, 0:H], rz[:, H:H2]
        n = tanh(gi[:, H2:H3] + r * (gh[:, H2:H3] + bhh1_n))
        h1f = (1.0 - z) * n + z * h1f
        h1f_bf = h1f.astype(bf16)

    # ---- GRU layer 1 backward: single step from h0 = 0 ----------------------
    # NOTE: valid only because the graph consumes output[:, -1] exclusively
    # (proj(output[:, -1:]) in the reference); the backward output at t=T-1 is
    # its first step.
    loT = (T - 1) * BN
    xb = jnp.concatenate([s_ref[loT:loT + BN, 0:H],      # h_fwd(layer0)[T-1]
                          s_ref[0:BN, H:H2]], axis=1)    # h_bwd(layer0)[T-1]
    gib = mm(xb, w64_ref[:, W_IH1B:W_IH1B + H3]) + vrow(VT_B1B, 0, H3)
    rz = sig(gib[:, 0:H2] + vrow(VT_B1B, H3, H5))        # h_prev = 0 => gh = b_hh
    r, z = rz[:, 0:H], rz[:, H:H2]
    n = tanh(gib[:, H2:H3] + r * vrow(VT_B1B, H5, H6))
    h1b = (1.0 - z) * n

    # ---- proj Linear(2H,H) on [h1f | h1b], then output head -----------------
    hcat = jnp.concatenate([h1f, h1b], axis=1).astype(bf16)          # (BN, 2H)
    z1 = mm(hcat, w64_ref[:, W_PR:W_PR + H]) + vrow(VT_MISC, H3, H4)
    o1 = jnp.maximum(
        _layernorm(mm(z1.astype(bf16), w32_ref[:, W_O1:W_O1 + H2]) + vrow(VT_OUT, 0, H2),
                   vrow(VT_OUT, H2, H4), vrow(VT_OUT, H4, H6)), 0.0)
    o_ref[...] = mm(o1.astype(bf16), w64_ref[:, W_O2:W_O2 + F]) + vrow(VT_MISC, H4, H5)


def fused_forward(x_tm, kp):
    return pl.pallas_call(
        fused_kernel,
        out_shape=jax.ShapeDtypeStruct((BN, F), jnp.float32),
        grid=(1,),
        in_specs=[_full((R, F)),
                  _full((H, W32_COLS)),
                  _full((H2, W64_COLS)),
                  _full((7, H6))],
        out_specs=_full((BN, F)),
        scratch_shapes=[pltpu.VMEM((R, H6), jnp.float32),    # layer-0 input proj (b_ih folded)
                        pltpu.VMEM((R, H6), jnp.float32),    # layer-1 fwd input proj
                        pltpu.VMEM((R, H2), jnp.bfloat16)],  # layer-0 outputs [fwd | rev-bwd]
        compiler_params=pltpu.CompilerParams(
            dimension_semantics=("arbitrary",)),
    )(x_tm, kp["w32"], kp["w64"], kp["vt"])


# ---------------------------------------------------------------------------
# Parameters.  Natural (torch-layout, pre-transposed to (in,out)) tensors are
# generated in f32; matmul weights are bf16-quantised once so the kernel (bf16
# operands) and the f32 reference use identical parameter values.
# ---------------------------------------------------------------------------
def init_params(key):
    def nrm(k, shape, scale=0.1):
        return scale * jax.random.normal(k, shape, jnp.float32)

    def q(w):   # shared bf16 weight quantisation
        return w.astype(jnp.bfloat16).astype(jnp.float32)

    ks = iter(jax.random.split(key, 24))
    nat = {}
    nat["fp_w"] = q(nrm(next(ks), (F, H)))          # feature_proj Linear(F,H).weight.T
    nat["fp_b"] = nrm(next(ks), (H,))
    nat["fp_g"] = 1.0 + nrm(next(ks), (H,))
    nat["fp_be"] = nrm(next(ks), (H,))
    nat["sp_w"] = q(nrm(next(ks), (H, H)))          # spatial Linear(H,H).weight.T
    nat["sp_b"] = nrm(next(ks), (H,))
    nat["sp_g"] = 1.0 + nrm(next(ks), (H,))
    nat["sp_be"] = nrm(next(ks), (H,))
    # GRU weights, gate order (r, z, n), already transposed to (in, out):
    nat["wih0"] = q(nrm(next(ks), (2, 3, H, H)))    # [dir, gate] weight_ih_l0(_rev)[gH:(g+1)H,:].T
    nat["whh0"] = q(nrm(next(ks), (2, 3, H, H)))
    nat["wih1"] = q(nrm(next(ks), (2, 3, H2, H)))   # layer-1 input is 2H wide
    nat["whh1"] = q(nrm(next(ks), (2, 3, H, H)))
    nat["bih0"] = nrm(next(ks), (2, 3, H))
    nat["bhh0"] = nrm(next(ks), (2, 3, H))
    nat["bih1"] = nrm(next(ks), (2, 3, H))
    nat["bhh1"] = nrm(next(ks), (2, 3, H))
    nat["pr_w"] = q(nrm(next(ks), (H2, H)))         # proj Linear(2H,H).weight.T
    nat["pr_b"] = nrm(next(ks), (H,))
    nat["o1_w"] = q(nrm(next(ks), (H, H2)))         # output_proj Linear(H,2H).weight.T
    nat["o1_b"] = nrm(next(ks), (H2,))
    nat["o_g"] = 1.0 + nrm(next(ks), (H2,))
    nat["o_be"] = nrm(next(ks), (H2,))
    nat["o2_w"] = q(nrm(next(ks), (H2, F)))         # output_proj Linear(2H,F).weight.T
    nat["o2_b"] = nrm(next(ks), (F,))
    return nat


def pack_params(nat):
    bf = jnp.bfloat16
    wih0, whh0, wih1, whh1 = nat["wih0"], nat["whh0"], nat["wih1"], nat["whh1"]

    # layer-0 input weights fused over (dir, gate) along the output dim
    wih0f = jnp.concatenate([wih0[d, g] for d in range(2) for g in range(3)], axis=1)  # (H, 6H)

    # layer-0 stacked-direction recurrent weights, block-diagonal per gate,
    # output layout [r_d0 r_d1 | z_d0 z_d1 | n_d0 n_d1]
    whh0g = jnp.zeros((H2, H6), jnp.float32)
    for g in range(3):
        for d in range(2):
            whh0g = whh0g.at[d * H:(d + 1) * H,
                             (2 * g + d) * H:(2 * g + d + 1) * H].set(whh0[d, g])

    # layer-1 fwd-dir input weights on the [fwd | time-reversed-bwd] slab:
    #   cols 0:3H  <- fwd input half   (consumed at row block t)
    #   cols 3H:6H <- bwd input half   (consumed at row block T-1-t)
    wih1f = jnp.zeros((H2, H6), jnp.float32)
    for g in range(3):
        wih1f = wih1f.at[0:H, g * H:(g + 1) * H].set(wih1[0, g, 0:H, :])
        wih1f = wih1f.at[H:H2, H3 + g * H:H3 + (g + 1) * H].set(wih1[0, g, H:H2, :])

    wih1b = jnp.concatenate([wih1[1, g] for g in range(3)], axis=1)    # (2H, 3H)
    whh1f = jnp.concatenate([whh1[0, g] for g in range(3)], axis=1)    # (H, 3H)

    w32 = jnp.concatenate([nat["fp_w"], nat["sp_w"], wih0f, whh1f, nat["o1_w"]],
                          axis=1).astype(bf)                           # (32, 416)
    w64 = jnp.concatenate([whh0g, wih1f, wih1b, nat["pr_w"], nat["o2_w"]],
                          axis=1).astype(bf)                           # (64, 544)

    bih0, bhh0, bih1, bhh1 = nat["bih0"], nat["bhh0"], nat["bih1"], nat["bhh1"]
    z32 = jnp.zeros((H,), jnp.float32)
    z96 = jnp.zeros((H3,), jnp.float32)
    rows = [
        jnp.concatenate([nat["fp_b"], nat["fp_g"], nat["fp_be"],
                         nat["sp_b"], nat["sp_g"], nat["sp_be"]]),                       # VT_FPSP
        jnp.concatenate([bih0[d, g] for d in range(2) for g in range(3)]),               # VT_BIH0
        jnp.concatenate([bhh0[0, 0], bhh0[1, 0], bhh0[0, 1],
                         bhh0[1, 1], bhh0[0, 2], bhh0[1, 2]]),                           # VT_BHH0
        jnp.concatenate([bih1[0, 0], bih1[0, 1], bih1[0, 2], z96]),                      # VT_BIH1F
        jnp.concatenate([bih1[1, 0], bih1[1, 1], bih1[1, 2],
                         bhh1[1, 0], bhh1[1, 1], bhh1[1, 2]]),                           # VT_B1B
        jnp.concatenate([bhh1[0, 0], bhh1[0, 1], bhh1[0, 2],
                         nat["pr_b"], nat["o2_b"], z32]),                                # VT_MISC
        jnp.concatenate([nat["o1_b"], nat["o_g"], nat["o_be"]]),                         # VT_OUT
    ]
    vt = jnp.stack(rows, axis=0)                                       # (7, 192) f32
    return {"w32": w32, "w64": w64, "vt": vt}


# ---------------------------------------------------------------------------
# Forward wrapper: only a 16 KB input permute + the final view/permute in XLA.
# ---------------------------------------------------------------------------
@jax.jit
def modular_traffic_predictor(x, kparams):
    # x: (B, T, N, F) -> time-major rows (t, b, n)
    x_tm = jnp.transpose(x, (1, 0, 2, 3)).reshape(R, F)
    out = fused_forward(x_tm, kparams)            # (B*N, F)
    out = out.reshape(B, N, P, F // P)            # .view(B, N, pred_len, -1)
    return jnp.transpose(out, (0, 2, 1, 3))       # .permute(0, 2, 1, 3)


# ---------------------------------------------------------------------------
# Pure-JAX f32 reference (full bidirectional GRU, no shortcuts).
# ---------------------------------------------------------------------------
def reference_forward(x, nat):
    dot = lambda a, b: jnp.dot(a, b, precision=jax.lax.Precision.HIGHEST)

    def ln(v, g, b):
        mu = v.mean(-1, keepdims=True)
        var = ((v - mu) ** 2).mean(-1, keepdims=True)
        return (v - mu) / jnp.sqrt(var + EPS) * g + b

    xr = jnp.transpose(x, (1, 0, 2, 3)).reshape(R, F)
    h1 = jnp.maximum(ln(dot(xr, nat["fp_w"]) + nat["fp_b"], nat["fp_g"], nat["fp_be"]), 0.0)
    spat = jnp.maximum(ln(dot(h1, nat["sp_w"]) + nat["sp_b"], nat["sp_g"], nat["sp_be"]), 0.0)
    h = (spat + h1).reshape(T, BN, H)

    def gru_dir(seq, wih, whh, bih, bhh, reverse):
        hp = jnp.zeros((BN, H), jnp.float32)
        out = [None] * T
        order = range(T - 1, -1, -1) if reverse else range(T)
        for t in order:
            r = jax.nn.sigmoid(dot(seq[t], wih[0]) + bih[0] + dot(hp, whh[0]) + bhh[0])
            z = jax.nn.sigmoid(dot(seq[t], wih[1]) + bih[1] + dot(hp, whh[1]) + bhh[1])
            n = jnp.tanh(dot(seq[t], wih[2]) + bih[2] + r * (dot(hp, whh[2]) + bhh[2]))
            hp = (1.0 - z) * n + z * hp
            out[t] = hp
        return jnp.stack(out, 0)

    outs0 = [gru_dir(h, nat["wih0"][d], nat["whh0"][d], nat["bih0"][d], nat["bhh0"][d],
                     reverse=(d == 1)) for d in range(2)]
    seq1 = jnp.concatenate(outs0, axis=-1)                           # (T, BN, 2H)
    outs1 = [gru_dir(seq1, nat["wih1"][d], nat["whh1"][d], nat["bih1"][d], nat["bhh1"][d],
                     reverse=(d == 1)) for d in range(2)]
    out_last = jnp.concatenate([outs1[0][T - 1], outs1[1][T - 1]], axis=-1)
    z1 = dot(out_last, nat["pr_w"]) + nat["pr_b"]
    o1 = jnp.maximum(ln(dot(z1, nat["o1_w"]) + nat["o1_b"], nat["o_g"], nat["o_be"]), 0.0)
    out = dot(o1, nat["o2_w"]) + nat["o2_b"]
    out = out.reshape(B, N, P, F // P)
    return jnp.transpose(out, (0, 2, 1, 3))


if __name__ == "__main__":
    key = jax.random.PRNGKey(0)
    kx, kp = jax.random.split(key)
    x = jax.random.normal(kx, (B, T, N, F), jnp.float32)
    nat = init_params(kp)
    kparams = pack_params(nat)

    out = jax.block_until_ready(modular_traffic_predictor(x, kparams))
    assert out.shape == (B, P, N, F // P), out.shape

    ref = jax.block_until_ready(jax.jit(reference_forward)(x, nat))
    err = float(jnp.max(jnp.abs(out - ref)))
    # Error budget: weights are bf16-quantised identically on both sides, so
    # the kernel-vs-reference gap is only activation bf16 rounding on MXU
    # operands (f32 accumulation) -- ~1e-2 expected; assert with margin.
    assert err < 1e-1, f"kernel/reference mismatch: max abs err {err}"
    print("KERNEL_OK")
</pallas_src>

<mosaic_0001>
module attributes {stable_mosaic.version = 11 : i64} {
  func.func @fused_kernel(%arg0: i32, %arg1: memref<128x32xf32, #tpu.memory_space<vmem>>, %arg2: memref<32x416xbf16, #tpu.memory_space<vmem>>, %arg3: memref<64x544xbf16, #tpu.memory_space<vmem>>, %arg4: memref<7x192xf32, #tpu.memory_space<vmem>>, %arg5: memref<16x32xf32, #tpu.memory_space<vmem>>, %arg6: memref<128x192xf32, #tpu.memory_space<vmem>>, %arg7: memref<128x192xf32, #tpu.memory_space<vmem>>, %arg8: memref<128x64xbf16, #tpu.memory_space<vmem>>) attributes {dimension_semantics = [#tpu.dimension_semantics<arbitrary>], iteration_bounds = array<i64: 1>, scalar_prefetch = 0 : i64, scratch_operands = 3 : i64, tpu.core_type = #tpu.core_type<tc>, window_params = [{pipeline_mode = #tpu.pipeline_mode<synchronous>, transform_indices = @transform_0, window_bounds = array<i64: 128, 32>}, {pipeline_mode = #tpu.pipeline_mode<synchronous>, transform_indices = @transform_1, window_bounds = array<i64: 32, 416>}, {pipeline_mode = #tpu.pipeline_mode<synchronous>, transform_indices = @transform_2, window_bounds = array<i64: 64, 544>}, {pipeline_mode = #tpu.pipeline_mode<synchronous>, transform_indices = @transform_3, window_bounds = array<i64: 7, 192>}, {pipeline_mode = #tpu.pipeline_mode<synchronous>, transform_indices = @transform_4, window_bounds = array<i64: 16, 32>}]} {
    %c0 = arith.constant 0 : index
    %c0_0 = arith.constant 0 : index
    %0 = vector.load %arg4[%c0, %c0_0] : memref<7x192xf32, #tpu.memory_space<vmem>>, vector<7x192xf32>
    %c0_1 = arith.constant 0 : index
    %c0_2 = arith.constant 0 : index
    %1 = vector.load %arg1[%c0_1, %c0_2] : memref<128x32xf32, #tpu.memory_space<vmem>>, vector<128x32xf32>
    %2 = arith.truncf %1 : vector<128x32xf32> to vector<128x32xbf16>
    %c0_3 = arith.constant 0 : index
    %c0_4 = arith.constant 0 : index
    %3 = vector.load %arg2[%c0_3, %c0_4] : memref<32x416xbf16, #tpu.memory_space<vmem>>, vector<32x32xbf16>
    %cst = arith.constant dense<0.000000e+00> : vector<128x32xf32>
    %4 = tpu.matmul %2, %3, %cst {dimension_numbers = #tpu.dot_dimension_numbers<[1], [0], [0], [1], [0, 0, 1, 1], [], []>} : vector<128x32xbf16>, vector<32x32xbf16>, vector<128x32xf32> -> vector<128x32xf32>
    %5 = vector.extract_strided_slice %0 {offsets = [0, 0], sizes = [1, 32], strides = [1, 1]} : vector<7x192xf32> to vector<1x32xf32>
    %6 = vector.broadcast %5 : vector<1x32xf32> to vector<128x32xf32>
    %7 = arith.addf %4, %6 : vector<128x32xf32>
    %8 = vector.extract_strided_slice %0 {offsets = [0, 32], sizes = [1, 32], strides = [1, 1]} : vector<7x192xf32> to vector<1x32xf32>
    %9 = vector.extract_strided_slice %0 {offsets = [0, 64], sizes = [1, 32], strides = [1, 1]} : vector<7x192xf32> to vector<1x32xf32>
    %cst_5 = arith.constant dense<0.000000e+00> : vector<128xf32>
    %10 = vector.multi_reduction <add>, %7, %cst_5 [1] : vector<128x32xf32> to vector<128xf32>
    %11 = vector.shape_cast %10 : vector<128xf32> to vector<128x1xf32>
    %cst_6 = arith.constant 3.200000e+01 : f32
    %12 = vector.broadcast %cst_6 : f32 to vector<128x1xf32>
    %13 = arith.divf %11, %12 : vector<128x1xf32>
    %14 = vector.broadcast %13 : vector<128x1xf32> to vector<128x32xf32>
    %15 = arith.subf %7, %14 : vector<128x32xf32>
    %16 = arith.mulf %15, %15 : vector<128x32xf32>
    %cst_7 = arith.constant dense<0.000000e+00> : vector<128xf32>
    %17 = vector.multi_reduction <add>, %16, %cst_7 [1] : vector<128x32xf32> to vector<128xf32>
    %18 = vector.shape_cast %17 : vector<128xf32> to vector<128x1xf32>
    %cst_8 = arith.constant 3.200000e+01 : f32
    %19 = vector.broadcast %cst_8 : f32 to vector<128x1xf32>
    %20 = arith.divf %18, %19 : vector<128x1xf32>
    %21 = vector.broadcast %13 : vector<128x1xf32> to vector<128x32xf32>
    %22 = arith.subf %7, %21 : vector<128x32xf32>
    %cst_9 = arith.constant 9.99999974E-6 : f32
    %23 = vector.broadcast %cst_9 : f32 to vector<128x1xf32>
    %24 = arith.addf %20, %23 : vector<128x1xf32>
    %25 = math.rsqrt %24 : vector<128x1xf32>
    %26 = vector.broadcast %25 : vector<128x1xf32> to vector<128x32xf32>
    %27 = arith.mulf %22, %26 : vector<128x32xf32>
    %28 = vector.broadcast %8 : vector<1x32xf32> to vector<128x32xf32>
    %29 = arith.mulf %27, %28 : vector<128x32xf32>
    %30 = vector.broadcast %9 : vector<1x32xf32> to vector<128x32xf32>
    %31 = arith.addf %29, %30 : vector<128x32xf32>
    %cst_10 = arith.constant 0.000000e+00 : f32
    %32 = vector.broadcast %cst_10 : f32 to vector<128x32xf32>
    %33 = arith.maximumf %31, %32 : vector<128x32xf32>
    %34 = arith.truncf %33 : vector<128x32xf32> to vector<128x32xbf16>
    %c0_11 = arith.constant 0 : index
    %c32 = arith.constant 32 : index
    %35 = vector.load %arg2[%c0_11, %c32] : memref<32x416xbf16, #tpu.memory_space<vmem>>, vector<32x32xbf16>
    %cst_12 = arith.constant dense<0.000000e+00> : vector<128x32xf32>
    %36 = tpu.matmul %34, %35, %cst_12 {dimension_numbers = #tpu.dot_dimension_numbers<[1], [0], [0], [1], [0, 0, 1, 1], [], []>} : vector<128x32xbf16>, vector<32x32xbf16>, vector<128x32xf32> -> vector<128x32xf32>
    %37 = vector.extract_strided_slice %0 {offsets = [0, 96], sizes = [1, 32], strides = [1, 1]} : vector<7x192xf32> to vector<1x32xf32>
    %38 = vector.broadcast %37 : vector<1x32xf32> to vector<128x32xf32>
    %39 = arith.addf %36, %38 : vector<128x32xf32>
    %40 = vector.extract_strided_slice %0 {offsets = [0, 128], sizes = [1, 32], strides = [1, 1]} : vector<7x192xf32> to vector<1x32xf32>
    %41 = vector.extract_strided_slice %0 {offsets = [0, 160], sizes = [1, 32], strides = [1, 1]} : vector<7x192xf32> to vector<1x32xf32>
    %cst_13 = arith.constant dense<0.000000e+00> : vector<128xf32>
    %42 = vector.multi_reduction <add>, %39, %cst_13 [1] : vector<128x32xf32> to vector<128xf32>
    %43 = vector.shape_cast %42 : vector<128xf32> to vector<128x1xf32>
    %cst_14 = arith.constant 3.200000e+01 : f32
    %44 = vector.broadcast %cst_14 : f32 to vector<128x1xf32>
    %45 = arith.divf %43, %44 : vector<128x1xf32>
    %46 = vector.broadcast %45 : vector<128x1xf32> to vector<128x32xf32>
    %47 = arith.subf %39, %46 : vector<128x32xf32>
    %48 = arith.mulf %47, %47 : vector<128x32xf32>
    %cst_15 = arith.constant dense<0.000000e+00> : vector<128xf32>
    %49 = vector.multi_reduction <add>, %48, %cst_15 [1] : vector<128x32xf32> to vector<128xf32>
    %50 = vector.shape_cast %49 : vector<128xf32> to vector<128x1xf32>
    %cst_16 = arith.constant 3.200000e+01 : f32
    %51 = vector.broadcast %cst_16 : f32 to vector<128x1xf32>
    %52 = arith.divf %50, %51 : vector<128x1xf32>
    %53 = vector.broadcast %45 : vector<128x1xf32> to vector<128x32xf32>
    %54 = arith.subf %39, %53 : vector<128x32xf32>
    %cst_17 = arith.constant 9.99999974E-6 : f32
    %55 = vector.broadcast %cst_17 : f32 to vector<128x1xf32>
    %56 = arith.addf %52, %55 : vector<128x1xf32>
    %57 = math.rsqrt %56 : vector<128x1xf32>
    %58 = vector.broadcast %57 : vector<128x1xf32> to vector<128x32xf32>
    %59 = arith.mulf %54, %58 : vector<128x32xf32>
    %60 = vector.broadcast %40 : vector<1x32xf32> to vector<128x32xf32>
    %61 = arith.mulf %59, %60 : vector<128x32xf32>
    %62 = vector.broadcast %41 : vector<1x32xf32> to vector<128x32xf32>
    %63 = arith.addf %61, %62 : vector<128x32xf32>
    %cst_18 = arith.constant 0.000000e+00 : f32
    %64 = vector.broadcast %cst_18 : f32 to vector<128x32xf32>
    %65 = arith.maximumf %63, %64 : vector<128x32xf32>
    %66 = arith.addf %65, %33 : vector<128x32xf32>
    %67 = arith.truncf %66 : vector<128x32xf32> to vector<128x32xbf16>
    %c0_19 = arith.constant 0 : index
    %c64 = arith.constant 64 : index
    %68 = vector.load %arg2[%c0_19, %c64] : memref<32x416xbf16, #tpu.memory_space<vmem>>, vector<32x192xbf16>
    %cst_20 = arith.constant dense<0.000000e+00> : vector<128x192xf32>
    %69 = tpu.matmul %67, %68, %cst_20 {dimension_numbers = #tpu.dot_dimension_numbers<[1], [0], [0], [1], [0, 0, 1, 1], [], []>} : vector<128x32xbf16>, vector<32x192xbf16>, vector<128x192xf32> -> vector<128x192xf32>
    %70 = vector.extract_strided_slice %0 {offsets = [1, 0], sizes = [1, 192], strides = [1, 1]} : vector<7x192xf32> to vector<1x192xf32>
    %71 = vector.broadcast %70 : vector<1x192xf32> to vector<128x192xf32>
    %72 = arith.addf %69, %71 : vector<128x192xf32>
    %c0_21 = arith.constant 0 : index
    %c0_22 = arith.constant 0 : index
    %73 = vector.load %arg6[%c0_21, %c0_22] : memref<128x192xf32, #tpu.memory_space<vmem>>, vector<128x192xf32>
    tpu.vector_store %arg6[%c0_21, %c0_22], %72 {strides = array<i32>} : memref<128x192xf32, #tpu.memory_space<vmem>>, vector<128x192xf32>,
    %c0_23 = arith.constant 0 : index
    %c0_24 = arith.constant 0 : index
    %74 = vector.load %arg3[%c0_23, %c0_24] : memref<64x544xbf16, #tpu.memory_space<vmem>>, vector<64x192xbf16>
    %75 = vector.extract_strided_slice %0 {offsets = [2, 0], sizes = [1, 128], strides = [1, 1]} : vector<7x192xf32> to vector<1x128xf32>
    %76 = vector.shape_cast %75 : vector<1x128xf32> to vector<1x128xf32>
    %77 = vector.broadcast %76 : vector<1x128xf32> to vector<16x128xf32>
    %78 = vector.extract_strided_slice %0 {offsets = [2, 128], sizes = [1, 64], strides = [1, 1]} : vector<7x192xf32> to vector<1x64xf32>
    %79 = vector.shape_cast %78 : vector<1x64xf32> to vector<1x64xf32>
    %80 = vector.broadcast %79 : vector<1x64xf32> to vector<16x64xf32>
    %cst_25 = arith.constant 0.000000e+00 : f32
    %81 = vector.broadcast %cst_25 : f32 to vector<16x64xf32>
    %82 = arith.truncf %81 : vector<16x64xf32> to vector<16x64xbf16>
    %c0_26 = arith.constant 0 : index
    %c0_27 = arith.constant 0 : index
    %83 = vector.load %arg6[%c0_26, %c0_27] : memref<128x192xf32, #tpu.memory_space<vmem>>, vector<16x96xf32>
    %c112 = arith.constant 112 : index
    %c96 = arith.constant 96 : index
    %84 = vector.load %arg6[%c112, %c96] : memref<128x192xf32, #tpu.memory_space<vmem>>, vector<16x96xf32>
    %85 = vector.extract_strided_slice %83 {offsets = [0, 0], sizes = [16, 32], strides = [1, 1]} : vector<16x96xf32> to vector<16x32xf32>
    %86 = vector.extract_strided_slice %84 {offsets = [0, 0], sizes = [16, 32], strides = [1, 1]} : vector<16x96xf32> to vector<16x32xf32>
    %87 = vector.extract_strided_slice %83 {offsets = [0, 32], sizes = [16, 32], strides = [1, 1]} : vector<16x96xf32> to vector<16x32xf32>
    %88 = vector.extract_strided_slice %84 {offsets = [0, 32], sizes = [16, 32], strides = [1, 1]} : vector<16x96xf32> to vector<16x32xf32>
    %89 = tpu.concatenate %85, %86, %87, %88 in 1 : vector<16x32xf32>, vector<16x32xf32>, vector<16x32xf32>, vector<16x32xf32> -> vector<16x128xf32>
    %90 = vector.extract_strided_slice %83 {offsets = [0, 64], sizes = [16, 32], strides = [1, 1]} : vector<16x96xf32> to vector<16x32xf32>
    %91 = vector.extract_strided_slice %84 {offsets = [0, 64], sizes = [16, 32], strides = [1, 1]} : vector<16x96xf32> to vector<16x32xf32>
    %92 = tpu.concatenate %90, %91 in 1 : vector<16x32xf32>, vector<16x32xf32> -> vector<16x64xf32>
    %cst_28 = arith.constant dense<0.000000e+00> : vector<16x192xf32>
    %93 = tpu.matmul %82, %74, %cst_28 {dimension_numbers = #tpu.dot_dimension_numbers<[1], [0], [0], [1], [0, 0, 1, 1], [], []>} : vector<16x64xbf16>, vector<64x192xbf16>, vector<16x192xf32> -> vector<16x192xf32>
    %94 = vector.extract_strided_slice %93 {offsets = [0, 0], sizes = [16, 128], strides = [1, 1]} : vector<16x192xf32> to vector<16x128xf32>
    %95 = arith.addf %89, %94 : vector<16x128xf32>
    %96 = arith.addf %95, %77 : vector<16x128xf32>
    %97 = arith.negf %96 : vector<16x128xf32>
    %98 = math.exp %97 : vector<16x128xf32>
    %cst_29 = arith.constant 1.000000e+00 : f32
    %99 = vector.broadcast %cst_29 : f32 to vector<16x128xf32>
    %100 = arith.addf %99, %98 : vector<16x128xf32>
    %101 = arith.divf %99, %100 : vector<16x128xf32>
    %102 = vector.extract_strided_slice %101 {offsets = [0, 0], sizes = [16, 64], strides = [1, 1]} : vector<16x128xf32> to vector<16x64xf32>
    %103 = vector.extract_strided_slice %101 {offsets = [0, 64], sizes = [16, 64], strides = [1, 1]} : vector<16x128xf32> to vector<16x64xf32>
    %104 = vector.extract_strided_slice %93 {offsets = [0, 128], sizes = [16, 64], strides = [1, 1]} : vector<16x192xf32> to vector<16x64xf32>
    %105 = arith.addf %104, %80 : vector<16x64xf32>
    %106 = arith.mulf %102, %105 : vector<16x64xf32>
    %107 = arith.addf %92, %106 : vector<16x64xf32>
    %108 = math.tanh %107 : vector<16x64xf32>
    %cst_30 = arith.constant 1.000000e+00 : f32
    %109 = vector.broadcast %cst_30 : f32 to vector<16x64xf32>
    %110 = arith.subf %109, %103 : vector<16x64xf32>
    %111 = arith.mulf %110, %108 : vector<16x64xf32>
    %112 = arith.mulf %103, %81 : vector<16x64xf32>
    %113 = arith.addf %111, %112 : vector<16x64xf32>
    %114 = arith.truncf %113 : vector<16x64xf32> to vector<16x64xbf16>
    %c0_31 = arith.constant 0 : index
    %c0_32 = arith.constant 0 : index
    %115 = vector.load %arg8[%c0_31, %c0_32] : memref<128x64xbf16, #tpu.memory_space<vmem>>, vector<16x64xbf16>
    tpu.vector_store %arg8[%c0_31, %c0_32], %114 {strides = array<i32>} : memref<128x64xbf16, #tpu.memory_space<vmem>>, vector<16x64xbf16>,
    %c16 = arith.constant 16 : index
    %c0_33 = arith.constant 0 : index
    %116 = vector.load %arg6[%c16, %c0_33] : memref<128x192xf32, #tpu.memory_space<vmem>>, vector<16x96xf32>
    %c96_34 = arith.constant 96 : index
    %c96_35 = arith.constant 96 : index
    %117 = vector.load %arg6[%c96_34, %c96_35] : memref<128x192xf32, #tpu.memory_space<vmem>>, vector<16x96xf32>
    %118 = vector.extract_strided_slice %116 {offsets = [0, 0], sizes = [16, 32], strides = [1, 1]} : vector<16x96xf32> to vector<16x32xf32>
    %119 = vector.extract_strided_slice %117 {offsets = [0, 0], sizes = [16, 32], strides = [1, 1]} : vector<16x96xf32> to vector<16x32xf32>
    %120 = vector.extract_strided_slice %116 {offsets = [0, 32], sizes = [16, 32], strides = [1, 1]} : vector<16x96xf32> to vector<16x32xf32>
    %121 = vector.extract_strided_slice %117 {offsets = [0, 32], sizes = [16, 32], strides = [1, 1]} : vector<16x96xf32> to vector<16x32xf32>
    %122 = tpu.concatenate %118, %119, %120, %121 in 1 : vector<16x32xf32>, vector<16x32xf32>, vector<16x32xf32>, vector<16x32xf32> -> vector<16x128xf32>
    %123 = vector.extract_strided_slice %116 {offsets = [0, 64], sizes = [16, 32], strides = [1, 1]} : vector<16x96xf32> to vector<16x32xf32>
    %124 = vector.extract_strided_slice %117 {offsets = [0, 64], sizes = [16, 32], strides = [1, 1]} : vector<16x96xf32> to vector<16x32xf32>
    %125 = tpu.concatenate %123, %124 in 1 : vector<16x32xf32>, vector<16x32xf32> -> vector<16x64xf32>
    %cst_36 = arith.constant dense<0.000000e+00> : vector<16x192xf32>
    %126 = tpu.matmul %114, %74, %cst_36 {dimension_numbers = #tpu.dot_dimension_numbers<[1], [0], [0], [1], [0, 0, 1, 1], [], []>} : vector<16x64xbf16>, vector<64x192xbf16>, vector<16x192xf32> -> vector<16x192xf32>
    %127 = vector.extract_strided_slice %126 {offsets = [0, 0], sizes = [16, 128], strides = [1, 1]} : vector<16x192xf32> to vector<16x128xf32>
    %128 = arith.addf %122, %127 : vector<16x128xf32>
    %129 = arith.addf %128, %77 : vector<16x128xf32>
    %130 = arith.negf %129 : vector<16x128xf32>
    %131 = math.exp %130 : vector<16x128xf32>
    %cst_37 = arith.constant 1.000000e+00 : f32
    %132 = vector.broadcast %cst_37 : f32 to vector<16x128xf32>
    %133 = arith.addf %132, %131 : vector<16x128xf32>
    %134 = arith.divf %132, %133 : vector<16x128xf32>
    %135 = vector.extract_strided_slice %134 {offsets = [0, 0], sizes = [16, 64], strides = [1, 1]} : vector<16x128xf32> to vector<16x64xf32>
    %136 = vector.extract_strided_slice %134 {offsets = [0, 64], sizes = [16, 64], strides = [1, 1]} : vector<16x128xf32> to vector<16x64xf32>
    %137 = vector.extract_strided_slice %126 {offsets = [0, 128], sizes = [16, 64], strides = [1, 1]} : vector<16x192xf32> to vector<16x64xf32>
    %138 = arith.addf %137, %80 : vector<16x64xf32>
    %139 = arith.mulf %135, %138 : vector<16x64xf32>
    %140 = arith.addf %125, %139 : vector<16x64xf32>
    %141 = math.tanh %140 : vector<16x64xf32>
    %cst_38 = arith.constant 1.000000e+00 : f32
    %142 = vector.broadcast %cst_38 : f32 to vector<16x64xf32>
    %143 = arith.subf %142, %136 : vector<16x64xf32>
    %144 = arith.mulf %143, %141 : vector<16x64xf32>
    %145 = arith.mulf %136, %113 : vector<16x64xf32>
    %146 = arith.addf %144, %145 : vector<16x64xf32>
    %147 = arith.truncf %146 : vector<16x64xf32> to vector<16x64xbf16>
    %c16_39 = arith.constant 16 : index
    %c0_40 = arith.constant 0 : index
    %148 = vector.load %arg8[%c16_39, %c0_40] : memref<128x64xbf16, #tpu.memory_space<vmem>>, vector<16x64xbf16>
    tpu.vector_store %arg8[%c16_39, %c0_40], %147 {strides = array<i32>} : memref<128x64xbf16, #tpu.memory_space<vmem>>, vector<16x64xbf16>,
    %c32_41 = arith.constant 32 : index
    %c0_42 = arith.constant 0 : index
    %149 = vector.load %arg6[%c32_41, %c0_42] : memref<128x192xf32, #tpu.memory_space<vmem>>, vector<16x96xf32>
    %c80 = arith.constant 80 : index
    %c96_43 = arith.constant 96 : index
    %150 = vector.load %arg6[%c80, %c96_43] : memref<128x192xf32, #tpu.memory_space<vmem>>, vector<16x96xf32>
    %151 = vector.extract_strided_slice %149 {offsets = [0, 0], sizes = [16, 32], strides = [1, 1]} : vector<16x96xf32> to vector<16x32xf32>
    %152 = vector.extract_strided_slice %150 {offsets = [0, 0], sizes = [16, 32], strides = [1, 1]} : vector<16x96xf32> to vector<16x32xf32>
    %153 = vector.extract_strided_slice %149 {offsets = [0, 32], sizes = [16, 32], strides = [1, 1]} : vector<16x96xf32> to vector<16x32xf32>
    %154 = vector.extract_strided_slice %150 {offsets = [0, 32], sizes = [16, 32], strides = [1, 1]} : vector<16x96xf32> to vector<16x32xf32>
    %155 = tpu.concatenate %151, %152, %153, %154 in 1 : vector<16x32xf32>, vector<16x32xf32>, vector<16x32xf32>, vector<16x32xf32> -> vector<16x128xf32>
    %156 = vector.extract_strided_slice %149 {offsets = [0, 64], sizes = [16, 32], strides = [1, 1]} : vector<16x96xf32> to vector<16x32xf32>
    %157 = vector.extract_strided_slice %150 {offsets = [0, 64], sizes = [16, 32], strides = [1, 1]} : vector<16x96xf32> to vector<16x32xf32>
    %158 = tpu.concatenate %156, %157 in 1 : vector<16x32xf32>, vector<16x32xf32> -> vector<16x64xf32>
    %cst_44 = arith.constant dense<0.000000e+00> : vector<16x192xf32>
    %159 = tpu.matmul %147, %74, %cst_44 {dimension_numbers = #tpu.dot_dimension_numbers<[1], [0], [0], [1], [0, 0, 1, 1], [], []>} : vector<16x64xbf16>, vector<64x192xbf16>, vector<16x192xf32> -> vector<16x192xf32>
    %160 = vector.extract_strided_slice %159 {offsets = [0, 0], sizes = [16, 128], strides = [1, 1]} : vector<16x192xf32> to vector<16x128xf32>
    %161 = arith.addf %155, %160 : vector<16x128xf32>
    %162 = arith.addf %161, %77 : vector<16x128xf32>
    %163 = arith.negf %162 : vector<16x128xf32>
    %164 = math.exp %163 : vector<16x128xf32>
    %cst_45 = arith.constant 1.000000e+00 : f32
    %165 = vector.broadcast %cst_45 : f32 to vector<16x128xf32>
    %166 = arith.addf %165, %164 : vector<16x128xf32>
    %167 = arith.divf %165, %166 : vector<16x128xf32>
    %168 = vector.extract_strided_slice %167 {offsets = [0, 0], sizes = [16, 64], strides = [1, 1]} : vector<16x128xf32> to vector<16x64xf32>
    %169 = vector.extract_strided_slice %167 {offsets = [0, 64], sizes = [16, 64], strides = [1, 1]} : vector<16x128xf32> to vector<16x64xf32>
    %170 = vector.extract_strided_slice %159 {offsets = [0, 128], sizes = [16, 64], strides = [1, 1]} : vector<16x192xf32> to vector<16x64xf32>
    %171 = arith.addf %170, %80 : vector<16x64xf32>
    %172 = arith.mulf %168, %171 : vector<16x64xf32>
    %173 = arith.addf %158, %172 : vector<16x64xf32>
    %174 = math.tanh %173 : vector<16x64xf32>
    %cst_46 = arith.constant 1.000000e+00 : f32
    %175 = vector.broadcast %cst_46 : f32 to vector<16x64xf32>
    %176 = arith.subf %175, %169 : vector<16x64xf32>
    %177 = arith.mulf %176, %174 : vector<16x64xf32>
    %178 = arith.mulf %169, %146 : vector<16x64xf32>
    %179 = arith.addf %177, %178 : vector<16x64xf32>
    %180 = arith.truncf %179 : vector<16x64xf32> to vector<16x64xbf16>
    %c32_47 = arith.constant 32 : index
    %c0_48 = arith.constant 0 : index
    %181 = vector.load %arg8[%c32_47, %c0_48] : memref<128x64xbf16, #tpu.memory_space<vmem>>, vector<16x64xbf16>
    tpu.vector_store %arg8[%c32_47, %c0_48], %180 {strides = array<i32>} : memref<128x64xbf16, #tpu.memory_space<vmem>>, vector<16x64xbf16>,
    %c48 = arith.constant 48 : index
    %c0_49 = arith.constant 0 : index
    %182 = vector.load %arg6[%c48, %c0_49] : memref<128x192xf32, #tpu.memory_space<vmem>>, vector<16x96xf32>
    %c64_50 = arith.constant 64 : index
    %c96_51 = arith.constant 96 : index
    %183 = vector.load %arg6[%c64_50, %c96_51] : memref<128x192xf32, #tpu.memory_space<vmem>>, vector<16x96xf32>
    %184 = vector.extract_strided_slice %182 {offsets = [0, 0], sizes = [16, 32], strides = [1, 1]} : vector<16x96xf32> to vector<16x32xf32>
    %185 = vector.extract_strided_slice %183 {offsets = [0, 0], sizes = [16, 32], strides = [1, 1]} : vector<16x96xf32> to vector<16x32xf32>
    %186 = vector.extract_strided_slice %182 {offsets = [0, 32], sizes = [16, 32], strides = [1, 1]} : vector<16x96xf32> to vector<16x32xf32>
    %187 = vector.extract_strided_slice %183 {offsets = [0, 32], sizes = [16, 32], strides = [1, 1]} : vector<16x96xf32> to vector<16x32xf32>
    %188 = tpu.concatenate %184, %185, %186, %187 in 1 : vector<16x32xf32>, vector<16x32xf32>, vector<16x32xf32>, vector<16x32xf32> -> vector<16x128xf32>
    %189 = vector.extract_strided_slice %182 {offsets = [0, 64], sizes = [16, 32], strides = [1, 1]} : vector<16x96xf32> to vector<16x32xf32>
    %190 = vector.extract_strided_slice %183 {offsets = [0, 64], sizes = [16, 32], strides = [1, 1]} : vector<16x96xf32> to vector<16x32xf32>
    %191 = tpu.concatenate %189, %190 in 1 : vector<16x32xf32>, vector<16x32xf32> -> vector<16x64xf32>
    %cst_52 = arith.constant dense<0.000000e+00> : vector<16x192xf32>
    %192 = tpu.matmul %180, %74, %cst_52 {dimension_numbers = #tpu.dot_dimension_numbers<[1], [0], [0], [1], [0, 0, 1, 1], [], []>} : vector<16x64xbf16>, vector<64x192xbf16>, vector<16x192xf32> -> vector<16x192xf32>
    %193 = vector.extract_strided_slice %192 {offsets = [0, 0], sizes = [16, 128], strides = [1, 1]} : vector<16x192xf32> to vector<16x128xf32>
    %194 = arith.addf %188, %193 : vector<16x128xf32>
    %195 = arith.addf %194, %77 : vector<16x128xf32>
    %196 = arith.negf %195 : vector<16x128xf32>
    %197 = math.exp %196 : vector<16x128xf32>
    %cst_53 = arith.constant 1.000000e+00 : f32
    %198 = vector.broadcast %cst_53 : f32 to vector<16x128xf32>
    %199 = arith.addf %198, %197 : vector<16x128xf32>
    %200 = arith.divf %198, %199 : vector<16x128xf32>
    %201 = vector.extract_strided_slice %200 {offsets = [0, 0], sizes = [16, 64], strides = [1, 1]} : vector<16x128xf32> to vector<16x64xf32>
    %202 = vector.extract_strided_slice %200 {offsets = [0, 64], sizes = [16, 64], strides = [1, 1]} : vector<16x128xf32> to vector<16x64xf32>
    %203 = vector.extract_strided_slice %192 {offsets = [0, 128], sizes = [16, 64], strides = [1, 1]} : vector<16x192xf32> to vector<16x64xf32>
    %204 = arith.addf %203, %80 : vector<16x64xf32>
    %205 = arith.mulf %201, %204 : vector<16x64xf32>
    %206 = arith.addf %191, %205 : vector<16x64xf32>
    %207 = math.tanh %206 : vector<16x64xf32>
    %cst_54 = arith.constant 1.000000e+00 : f32
    %208 = vector.broadcast %cst_54 : f32 to vector<16x64xf32>
    %209 = arith.subf %208, %202 : vector<16x64xf32>
    %210 = arith.mulf %209, %207 : vector<16x64xf32>
    %211 = arith.mulf %202, %179 : vector<16x64xf32>
    %212 = arith.addf %210, %211 : vector<16x64xf32>
    %213 = arith.truncf %212 : vector<16x64xf32> to vector<16x64xbf16>
    %c48_55 = arith.constant 48 : index
    %c0_56 = arith.constant 0 : index
    %214 = vector.load %arg8[%c48_55, %c0_56] : memref<128x64xbf16, #tpu.memory_space<vmem>>, vector<16x64xbf16>
    tpu.vector_store %arg8[%c48_55, %c0_56], %213 {strides = array<i32>} : memref<128x64xbf16, #tpu.memory_space<vmem>>, vector<16x64xbf16>,
    %c64_57 = arith.constant 64 : index
    %c0_58 = arith.constant 0 : index
    %215 = vector.load %arg6[%c64_57, %c0_58] : memref<128x192xf32, #tpu.memory_space<vmem>>, vector<16x96xf32>
    %c48_59 = arith.constant 48 : index
    %c96_60 = arith.constant 96 : index
    %216 = vector.load %arg6[%c48_59, %c96_60] : memref<128x192xf32, #tpu.memory_space<vmem>>, vector<16x96xf32>
    %217 = vector.extract_strided_slice %215 {offsets = [0, 0], sizes = [16, 32], strides = [1, 1]} : vector<16x96xf32> to vector<16x32xf32>
    %218 = vector.extract_strided_slice %216 {offsets = [0, 0], sizes = [16, 32], strides = [1, 1]} : vector<16x96xf32> to vector<16x32xf32>
    %219 = vector.extract_strided_slice %215 {offsets = [0, 32], sizes = [16, 32], strides = [1, 1]} : vector<16x96xf32> to vector<16x32xf32>
    %220 = vector.extract_strided_slice %216 {offsets = [0, 32], sizes = [16, 32], strides = [1, 1]} : vector<16x96xf32> to vector<16x32xf32>
    %221 = tpu.concatenate %217, %218, %219, %220 in 1 : vector<16x32xf32>, vector<16x32xf32>, vector<16x32xf32>, vector<16x32xf32> -> vector<16x128xf32>
    %222 = vector.extract_strided_slice %215 {offsets = [0, 64], sizes = [16, 32], strides = [1, 1]} : vector<16x96xf32> to vector<16x32xf32>
    %223 = vector.extract_strided_slice %216 {offsets = [0, 64], sizes = [16, 32], strides = [1, 1]} : vector<16x96xf32> to vector<16x32xf32>
    %224 = tpu.concatenate %222, %223 in 1 : vector<16x32xf32>, vector<16x32xf32> -> vector<16x64xf32>
    %cst_61 = arith.constant dense<0.000000e+00> : vector<16x192xf32>
    %225 = tpu.matmul %213, %74, %cst_61 {dimension_numbers = #tpu.dot_dimension_numbers<[1], [0], [0], [1], [0, 0, 1, 1], [], []>} : vector<16x64xbf16>, vector<64x192xbf16>, vector<16x192xf32> -> vector<16x192xf32>
    %226 = vector.extract_strided_slice %225 {offsets = [0, 0], sizes = [16, 128], strides = [1, 1]} : vector<16x192xf32> to vector<16x128xf32>
    %227 = arith.addf %221, %226 : vector<16x128xf32>
    %228 = arith.addf %227, %77 : vector<16x128xf32>
    %229 = arith.negf %228 : vector<16x128xf32>
    %230 = math.exp %229 : vector<16x128xf32>
    %cst_62 = arith.constant 1.000000e+00 : f32
    %231 = vector.broadcast %cst_62 : f32 to vector<16x128xf32>
    %232 = arith.addf %231, %230 : vector<16x128xf32>
    %233 = arith.divf %231, %232 : vector<16x128xf32>
    %234 = vector.extract_strided_slice %233 {offsets = [0, 0], sizes = [16, 64], strides = [1, 1]} : vector<16x128xf32> to vector<16x64xf32>
    %235 = vector.extract_strided_slice %233 {offsets = [0, 64], sizes = [16, 64], strides = [1, 1]} : vector<16x128xf32> to vector<16x64xf32>
    %236 = vector.extract_strided_slice %225 {offsets = [0, 128], sizes = [16, 64], strides = [1, 1]} : vector<16x192xf32> to vector<16x64xf32>
    %237 = arith.addf %236, %80 : vector<16x64xf32>
    %238 = arith.mulf %234, %237 : vector<16x64xf32>
    %239 = arith.addf %224, %238 : vector<16x64xf32>
    %240 = math.tanh %239 : vector<16x64xf32>
    %cst_63 = arith.constant 1.000000e+00 : f32
    %241 = vector.broadcast %cst_63 : f32 to vector<16x64xf32>
    %242 = arith.subf %241, %235 : vector<16x64xf32>
    %243 = arith.mulf %242, %240 : vector<16x64xf32>
    %244 = arith.mulf %235, %212 : vector<16x64xf32>
    %245 = arith.addf %243, %244 : vector<16x64xf32>
    %246 = arith.truncf %245 : vector<16x64xf32> to vector<16x64xbf16>
    %c64_64 = arith.constant 64 : index
    %c0_65 = arith.constant 0 : index
    %247 = vector.load %arg8[%c64_64, %c0_65] : memref<128x64xbf16, #tpu.memory_space<vmem>>, vector<16x64xbf16>
    tpu.vector_store %arg8[%c64_64, %c0_65], %246 {strides = array<i32>} : memref<128x64xbf16, #tpu.memory_space<vmem>>, vector<16x64xbf16>,
    %c80_66 = arith.constant 80 : index
    %c0_67 = arith.constant 0 : index
    %248 = vector.load %arg6[%c80_66, %c0_67] : memref<128x192xf32, #tpu.memory_space<vmem>>, vector<16x96xf32>
    %c32_68 = arith.constant 32 : index
    %c96_69 = arith.constant 96 : index
    %249 = vector.load %arg6[%c32_68, %c96_69] : memref<128x192xf32, #tpu.memory_space<vmem>>, vector<16x96xf32>
    %250 = vector.extract_strided_slice %248 {offsets = [0, 0], sizes = [16, 32], strides = [1, 1]} : vector<16x96xf32> to vector<16x32xf32>
    %251 = vector.extract_strided_slice %249 {offsets = [0, 0], sizes = [16, 32], strides = [1, 1]} : vector<16x96xf32> to vector<16x32xf32>
    %252 = vector.extract_strided_slice %248 {offsets = [0, 32], sizes = [16, 32], strides = [1, 1]} : vector<16x96xf32> to vector<16x32xf32>
    %253 = vector.extract_strided_slice %249 {offsets = [0, 32], sizes = [16, 32], strides = [1, 1]} : vector<16x96xf32> to vector<16x32xf32>
    %254 = tpu.concatenate %250, %251, %252, %253 in 1 : vector<16x32xf32>, vector<16x32xf32>, vector<16x32xf32>, vector<16x32xf32> -> vector<16x128xf32>
    %255 = vector.extract_strided_slice %248 {offsets = [0, 64], sizes = [16, 32], strides = [1, 1]} : vector<16x96xf32> to vector<16x32xf32>
    %256 = vector.extract_strided_slice %249 {offsets = [0, 64], sizes = [16, 32], strides = [1, 1]} : vector<16x96xf32> to vector<16x32xf32>
    %257 = tpu.concatenate %255, %256 in 1 : vector<16x32xf32>, vector<16x32xf32> -> vector<16x64xf32>
    %cst_70 = arith.constant dense<0.000000e+00> : vector<16x192xf32>
    %258 = tpu.matmul %246, %74, %cst_70 {dimension_numbers = #tpu.dot_dimension_numbers<[1], [0], [0], [1], [0, 0, 1, 1], [], []>} : vector<16x64xbf16>, vector<64x192xbf16>, vector<16x192xf32> -> vector<16x192xf32>
    %259 = vector.extract_strided_slice %258 {offsets = [0, 0], sizes = [16, 128], strides = [1, 1]} : vector<16x192xf32> to vector<16x128xf32>
    %260 = arith.addf %254, %259 : vector<16x128xf32>
    %261 = arith.addf %260, %77 : vector<16x128xf32>
    %262 = arith.negf %261 : vector<16x128xf32>
    %263 = math.exp %262 : vector<16x128xf32>
    %cst_71 = arith.constant 1.000000e+00 : f32
    %264 = vector.broadcast %cst_71 : f32 to vector<16x128xf32>
    %265 = arith.addf %264, %263 : vector<16x128xf32>
    %266 = arith.divf %264, %265 : vector<16x128xf32>
    %267 = vector.extract_strided_slice %266 {offsets = [0, 0], sizes = [16, 64], strides = [1, 1]} : vector<16x128xf32> to vector<16x64xf32>
    %268 = vector.extract_strided_slice %266 {offsets = [0, 64], sizes = [16, 64], strides = [1, 1]} : vector<16x128xf32> to vector<16x64xf32>
    %269 = vector.extract_strided_slice %258 {offsets = [0, 128], sizes = [16, 64], strides = [1, 1]} : vector<16x192xf32> to vector<16x64xf32>
    %270 = arith.addf %269, %80 : vector<16x64xf32>
    %271 = arith.mulf %267, %270 : vector<16x64xf32>
    %272 = arith.addf %257, %271 : vector<16x64xf32>
    %273 = math.tanh %272 : vector<16x64xf32>
    %cst_72 = arith.constant 1.000000e+00 : f32
    %274 = vector.broadcast %cst_72 : f32 to vector<16x64xf32>
    %275 = arith.subf %274, %268 : vector<16x64xf32>
    %276 = arith.mulf %275, %273 : vector<16x64xf32>
    %277 = arith.mulf %268, %245 : vector<16x64xf32>
    %278 = arith.addf %276, %277 : vector<16x64xf32>
    %279 = arith.truncf %278 : vector<16x64xf32> to vector<16x64xbf16>
    %c80_73 = arith.constant 80 : index
    %c0_74 = arith.constant 0 : index
    %280 = vector.load %arg8[%c80_73, %c0_74] : memref<128x64xbf16, #tpu.memory_space<vmem>>, vector<16x64xbf16>
    tpu.vector_store %arg8[%c80_73, %c0_74], %279 {strides = array<i32>} : memref<128x64xbf16, #tpu.memory_space<vmem>>, vector<16x64xbf16>,
    %c96_75 = arith.constant 96 : index
    %c0_76 = arith.constant 0 : index
    %281 = vector.load %arg6[%c96_75, %c0_76] : memref<128x192xf32, #tpu.memory_space<vmem>>, vector<16x96xf32>
    %c16_77 = arith.constant 16 : index
    %c96_78 = arith.constant 96 : index
    %282 = vector.load %arg6[%c16_77, %c96_78] : memref<128x192xf32, #tpu.memory_space<vmem>>, vector<16x96xf32>
    %283 = vector.extract_strided_slice %281 {offsets = [0, 0], sizes = [16, 32], strides = [1, 1]} : vector<16x96xf32> to vector<16x32xf32>
    %284 = vector.extract_strided_slice %282 {offsets = [0, 0], sizes = [16, 32], strides = [1, 1]} : vector<16x96xf32> to vector<16x32xf32>
    %285 = vector.extract_strided_slice %281 {offsets = [0, 32], sizes = [16, 32], strides = [1, 1]} : vector<16x96xf32> to vector<16x32xf32>
    %286 = vector.extract_strided_slice %282 {offsets = [0, 32], sizes = [16, 32], strides = [1, 1]} : vector<16x96xf32> to vector<16x32xf32>
    %287 = tpu.concatenate %283, %284, %285, %286 in 1 : vector<16x32xf32>, vector<16x32xf32>, vector<16x32xf32>, vector<16x32xf32> -> vector<16x128xf32>
    %288 = vector.extract_strided_slice %281 {offsets = [0, 64], sizes = [16, 32], strides = [1, 1]} : vector<16x96xf32> to vector<16x32xf32>
    %289 = vector.extract_strided_slice %282 {offsets = [0, 64], sizes = [16, 32], strides = [1, 1]} : vector<16x96xf32> to vector<16x32xf32>
    %290 = tpu.concatenate %288, %289 in 1 : vector<16x32xf32>, vector<16x32xf32> -> vector<16x64xf32>
    %cst_79 = arith.constant dense<0.000000e+00> : vector<16x192xf32>
    %291 = tpu.matmul %279, %74, %cst_79 {dimension_numbers = #tpu.dot_dimension_numbers<[1], [0], [0], [1], [0, 0, 1, 1], [], []>} : vector<16x64xbf16>, vector<64x192xbf16>, vector<16x192xf32> -> vector<16x192xf32>
    %292 = vector.extract_strided_slice %291 {offsets = [0, 0], sizes = [16, 128], strides = [1, 1]} : vector<16x192xf32> to vector<16x128xf32>
    %293 = arith.addf %287, %292 : vector<16x128xf32>
    %294 = arith.addf %293, %77 : vector<16x128xf32>
    %295 = arith.negf %294 : vector<16x128xf32>
    %296 = math.exp %295 : vector<16x128xf32>
    %cst_80 = arith.constant 1.000000e+00 : f32
    %297 = vector.broadcast %cst_80 : f32 to vector<16x128xf32>
    %298 = arith.addf %297, %296 : vector<16x128xf32>
    %299 = arith.divf %297, %298 : vector<16x128xf32>
    %300 = vector.extract_strided_slice %299 {offsets = [0, 0], sizes = [16, 64], strides = [1, 1]} : vector<16x128xf32> to vector<16x64xf32>
    %301 = vector.extract_strided_slice %299 {offsets = [0, 64], sizes = [16, 64], strides = [1, 1]} : vector<16x128xf32> to vector<16x64xf32>
    %302 = vector.extract_strided_slice %291 {offsets = [0, 128], sizes = [16, 64], strides = [1, 1]} : vector<16x192xf32> to vector<16x64xf32>
    %303 = arith.addf %302, %80 : vector<16x64xf32>
    %304 = arith.mulf %300, %303 : vector<16x64xf32>
    %305 = arith.addf %290, %304 : vector<16x64xf32>
    %306 = math.tanh %305 : vector<16x64xf32>
    %cst_81 = arith.constant 1.000000e+00 : f32
    %307 = vector.broadcast %cst_81 : f32 to vector<16x64xf32>
    %308 = arith.subf %307, %301 : vector<16x64xf32>
    %309 = arith.mulf %308, %306 : vector<16x64xf32>
    %310 = arith.mulf %301, %278 : vector<16x64xf32>
    %311 = arith.addf %309, %310 : vector<16x64xf32>
    %312 = arith.truncf %311 : vector<16x64xf32> to vector<16x64xbf16>
    %c96_82 = arith.constant 96 : index
    %c0_83 = arith.constant 0 : index
    %313 = vector.load %arg8[%c96_82, %c0_83] : memref<128x64xbf16, #tpu.memory_space<vmem>>, vector<16x64xbf16>
    tpu.vector_store %arg8[%c96_82, %c0_83], %312 {strides = array<i32>} : memref<128x64xbf16, #tpu.memory_space<vmem>>, vector<16x64xbf16>,
    %c112_84 = arith.constant 112 : index
    %c0_85 = arith.constant 0 : index
    %314 = vector.load %arg6[%c112_84, %c0_85] : memref<128x192xf32, #tpu.memory_space<vmem>>, vector<16x96xf32>
    %c0_86 = arith.constant 0 : index
    %c96_87 = arith.constant 96 : index
    %315 = vector.load %arg6[%c0_86, %c96_87] : memref<128x192xf32, #tpu.memory_space<vmem>>, vector<16x96xf32>
    %316 = vector.extract_strided_slice %314 {offsets = [0, 0], sizes = [16, 32], strides = [1, 1]} : vector<16x96xf32> to vector<16x32xf32>
    %317 = vector.extract_strided_slice %315 {offsets = [0, 0], sizes = [16, 32], strides = [1, 1]} : vector<16x96xf32> to vector<16x32xf32>
    %318 = vector.extract_strided_slice %314 {offsets = [0, 32], sizes = [16, 32], strides = [1, 1]} : vector<16x96xf32> to vector<16x32xf32>
    %319 = vector.extract_strided_slice %315 {offsets = [0, 32], sizes = [16, 32], strides = [1, 1]} : vector<16x96xf32> to vector<16x32xf32>
    %320 = tpu.concatenate %316, %317, %318, %319 in 1 : vector<16x32xf32>, vector<16x32xf32>, vector<16x32xf32>, vector<16x32xf32> -> vector<16x128xf32>
    %321 = vector.extract_strided_slice %314 {offsets = [0, 64], sizes = [16, 32], strides = [1, 1]} : vector<16x96xf32> to vector<16x32xf32>
    %322 = vector.extract_strided_slice %315 {offsets = [0, 64], sizes = [16, 32], strides = [1, 1]} : vector<16x96xf32> to vector<16x32xf32>
    %323 = tpu.concatenate %321, %322 in 1 : vector<16x32xf32>, vector<16x32xf32> -> vector<16x64xf32>
    %cst_88 = arith.constant dense<0.000000e+00> : vector<16x192xf32>
    %324 = tpu.matmul %312, %74, %cst_88 {dimension_numbers = #tpu.dot_dimension_numbers<[1], [0], [0], [1], [0, 0, 1, 1], [], []>} : vector<16x64xbf16>, vector<64x192xbf16>, vector<16x192xf32> -> vector<16x192xf32>
    %325 = vector.extract_strided_slice %324 {offsets = [0, 0], sizes = [16, 128], strides = [1, 1]} : vector<16x192xf32> to vector<16x128xf32>
    %326 = arith.addf %320, %325 : vector<16x128xf32>
    %327 = arith.addf %326, %77 : vector<16x128xf32>
    %328 = arith.negf %327 : vector<16x128xf32>
    %329 = math.exp %328 : vector<16x128xf32>
    %cst_89 = arith.constant 1.000000e+00 : f32
    %330 = vector.broadcast %cst_89 : f32 to vector<16x128xf32>
    %331 = arith.addf %330, %329 : vector<16x128xf32>
    %332 = arith.divf %330, %331 : vector<16x128xf32>
    %333 = vector.extract_strided_slice %332 {offsets = [0, 0], sizes = [16, 64], strides = [1, 1]} : vector<16x128xf32> to vector<16x64xf32>
    %334 = vector.extract_strided_slice %332 {offsets = [0, 64], sizes = [16, 64], strides = [1, 1]} : vector<16x128xf32> to vector<16x64xf32>
    %335 = vector.extract_strided_slice %324 {offsets = [0, 128], sizes = [16, 64], strides = [1, 1]} : vector<16x192xf32> to vector<16x64xf32>
    %336 = arith.addf %335, %80 : vector<16x64xf32>
    %337 = arith.mulf %333, %336 : vector<16x64xf32>
    %338 = arith.addf %323, %337 : vector<16x64xf32>
    %339 = math.tanh %338 : vector<16x64xf32>
    %cst_90 = arith.constant 1.000000e+00 : f32
    %340 = vector.broadcast %cst_90 : f32 to vector<16x64xf32>
    %341 = arith.subf %340, %334 : vector<16x64xf32>
    %342 = arith.mulf %341, %339 : vector<16x64xf32>
    %343 = arith.mulf %334, %311 : vector<16x64xf32>
    %344 = arith.addf %342, %343 : vector<16x64xf32>
    %345 = arith.truncf %344 : vector<16x64xf32> to vector<16x64xbf16>
    %c112_91 = arith.constant 112 : index
    %c0_92 = arith.constant 0 : index
    %346 = vector.load %arg8[%c112_91, %c0_92] : memref<128x64xbf16, #tpu.memory_space<vmem>>, vector<16x64xbf16>
    tpu.vector_store %arg8[%c112_91, %c0_92], %345 {strides = array<i32>} : memref<128x64xbf16, #tpu.memory_space<vmem>>, vector<16x64xbf16>,
    %c0_93 = arith.constant 0 : index
    %c0_94 = arith.constant 0 : index
    %347 = vector.load %arg8[%c0_93, %c0_94] : memref<128x64xbf16, #tpu.memory_space<vmem>>, vector<128x64xbf16>
    %c0_95 = arith.constant 0 : index
    %c192 = arith.constant 192 : index
    %348 = vector.load %arg3[%c0_95, %c192] : memref<64x544xbf16, #tpu.memory_space<vmem>>, vector<64x192xbf16>
    %cst_96 = arith.constant dense<0.000000e+00> : vector<128x192xf32>
    %349 = tpu.matmul %347, %348, %cst_96 {dimension_numbers = #tpu.dot_dimension_numbers<[1], [0], [0], [1], [0, 0, 1, 1], [], []>} : vector<128x64xbf16>, vector<64x192xbf16>, vector<128x192xf32> -> vector<128x192xf32>
    %350 = vector.extract_strided_slice %0 {offsets = [3, 0], sizes = [1, 192], strides = [1, 1]} : vector<7x192xf32> to vector<1x192xf32>
    %351 = vector.broadcast %350 : vector<1x192xf32> to vector<128x192xf32>
    %352 = arith.addf %349, %351 : vector<128x192xf32>
    %c0_97 = arith.constant 0 : index
    %c0_98 = arith.constant 0 : index
    %353 = vector.load %arg7[%c0_97, %c0_98] : memref<128x192xf32, #tpu.memory_space<vmem>>, vector<128x192xf32>
    tpu.vector_store %arg7[%c0_97, %c0_98], %352 {strides = array<i32>} : memref<128x192xf32, #tpu.memory_space<vmem>>, vector<128x192xf32>,
    %c0_99 = arith.constant 0 : index
    %c256 = arith.constant 256 : index
    %354 = vector.load %arg2[%c0_99, %c256] : memref<32x416xbf16, #tpu.memory_space<vmem>>, vector<32x96xbf16>
    %355 = vector.extract_strided_slice %0 {offsets = [5, 0], sizes = [1, 64], strides = [1, 1]} : vector<7x192xf32> to vector<1x64xf32>
    %356 = vector.shape_cast %355 : vector<1x64xf32> to vector<1x64xf32>
    %357 = vector.broadcast %356 : vector<1x64xf32> to vector<16x64xf32>
    %358 = vector.extract_strided_slice %0 {offsets = [5, 64], sizes = [1, 32], strides = [1, 1]} : vector<7x192xf32> to vector<1x32xf32>
    %359 = vector.shape_cast %358 : vector<1x32xf32> to vector<1x32xf32>
    %360 = vector.broadcast %359 : vector<1x32xf32> to vector<16x32xf32>
    %cst_100 = arith.constant 0.000000e+00 : f32
    %361 = vector.broadcast %cst_100 : f32 to vector<16x32xf32>
    %362 = arith.truncf %361 : vector<16x32xf32> to vector<16x32xbf16>
    %c0_101 = arith.constant 0 : index
    %c0_102 = arith.constant 0 : index
    %363 = vector.load %arg7[%c0_101, %c0_102] : memref<128x192xf32, #tpu.memory_space<vmem>>, vector<16x96xf32>
    %c112_103 = arith.constant 112 : index
    %c96_104 = arith.constant 96 : index
    %364 = vector.load %arg7[%c112_103, %c96_104] : memref<128x192xf32, #tpu.memory_space<vmem>>, vector<16x96xf32>
    %365 = arith.addf %363, %364 : vector<16x96xf32>
    %cst_105 = arith.constant dense<0.000000e+00> : vector<16x96xf32>
    %366 = tpu.matmul %362, %354, %cst_105 {dimension_numbers = #tpu.dot_dimension_numbers<[1], [0], [0], [1], [0, 0, 1, 1], [], []>} : vector<16x32xbf16>, vector<32x96xbf16>, vector<16x96xf32> -> vector<16x96xf32>
    %367 = vector.extract_strided_slice %365 {offsets = [0, 0], sizes = [16, 64], strides = [1, 1]} : vector<16x96xf32> to vector<16x64xf32>
    %368 = vector.extract_strided_slice %366 {offsets = [0, 0], sizes = [16, 64], strides = [1, 1]} : vector<16x96xf32> to vector<16x64xf32>
    %369 = arith.addf %367, %368 : vector<16x64xf32>
    %370 = arith.addf %369, %357 : vector<16x64xf32>
    %371 = arith.negf %370 : vector<16x64xf32>
    %372 = math.exp %371 : vector<16x64xf32>
    %cst_106 = arith.constant 1.000000e+00 : f32
    %373 = vector.broadcast %cst_106 : f32 to vector<16x64xf32>
    %374 = arith.addf %373, %372 : vector<16x64xf32>
    %375 = arith.divf %373, %374 : vector<16x64xf32>
    %376 = vector.extract_strided_slice %375 {offsets = [0, 0], sizes = [16, 32], strides = [1, 1]} : vector<16x64xf32> to vector<16x32xf32>
    %377 = vector.extract_strided_slice %375 {offsets = [0, 32], sizes = [16, 32], strides = [1, 1]} : vector<16x64xf32> to vector<16x32xf32>
    %378 = vector.extract_strided_slice %365 {offsets = [0, 64], sizes = [16, 32], strides = [1, 1]} : vector<16x96xf32> to vector<16x32xf32>
    %379 = vector.extract_strided_slice %366 {offsets = [0, 64], sizes = [16, 32], strides = [1, 1]} : vector<16x96xf32> to vector<16x32xf32>
    %380 = arith.addf %379, %360 : vector<16x32xf32>
    %381 = arith.mulf %376, %380 : vector<16x32xf32>
    %382 = arith.addf %378, %381 : vector<16x32xf32>
    %383 = math.tanh %382 : vector<16x32xf32>
    %cst_107 = arith.constant 1.000000e+00 : f32
    %384 = vector.broadcast %cst_107 : f32 to vector<16x32xf32>
    %385 = arith.subf %384, %377 : vector<16x32xf32>
    %386 = arith.mulf %385, %383 : vector<16x32xf32>
    %387 = arith.mulf %377, %361 : vector<16x32xf32>
    %388 = arith.addf %386, %387 : vector<16x32xf32>
    %389 = arith.truncf %388 : vector<16x32xf32> to vector<16x32xbf16>
    %c16_108 = arith.constant 16 : index
    %c0_109 = arith.constant 0 : index
    %390 = vector.load %arg7[%c16_108, %c0_109] : memref<128x192xf32, #tpu.memory_space<vmem>>, vector<16x96xf32>
    %c96_110 = arith.constant 96 : index
    %c96_111 = arith.constant 96 : index
    %391 = vector.load %arg7[%c96_110, %c96_111] : memref<128x192xf32, #tpu.memory_space<vmem>>, vector<16x96xf32>
    %392 = arith.addf %390, %391 : vector<16x96xf32>
    %cst_112 = arith.constant dense<0.000000e+00> : vector<16x96xf32>
    %393 = tpu.matmul %389, %354, %cst_112 {dimension_numbers = #tpu.dot_dimension_numbers<[1], [0], [0], [1], [0, 0, 1, 1], [], []>} : vector<16x32xbf16>, vector<32x96xbf16>, vector<16x96xf32> -> vector<16x96xf32>
    %394 = vector.extract_strided_slice %392 {offsets = [0, 0], sizes = [16, 64], strides = [1, 1]} : vector<16x96xf32> to vector<16x64xf32>
    %395 = vector.extract_strided_slice %393 {offsets = [0, 0], sizes = [16, 64], strides = [1, 1]} : vector<16x96xf32> to vector<16x64xf32>
    %396 = arith.addf %394, %395 : vector<16x64xf32>
    %397 = arith.addf %396, %357 : vector<16x64xf32>
    %398 = arith.negf %397 : vector<16x64xf32>
    %399 = math.exp %398 : vector<16x64xf32>
    %cst_113 = arith.constant 1.000000e+00 : f32
    %400 = vector.broadcast %cst_113 : f32 to vector<16x64xf32>
    %401 = arith.addf %400, %399 : vector<16x64xf32>
    %402 = arith.divf %400, %401 : vector<16x64xf32>
    %403 = vector.extract_strided_slice %402 {offsets = [0, 0], sizes = [16, 32], strides = [1, 1]} : vector<16x64xf32> to vector<16x32xf32>
    %404 = vector.extract_strided_slice %402 {offsets = [0, 32], sizes = [16, 32], strides = [1, 1]} : vector<16x64xf32> to vector<16x32xf32>
    %405 = vector.extract_strided_slice %392 {offsets = [0, 64], sizes = [16, 32], strides = [1, 1]} : vector<16x96xf32> to vector<16x32xf32>
    %406 = vector.extract_strided_slice %393 {offsets = [0, 64], sizes = [16, 32], strides = [1, 1]} : vector<16x96xf32> to vector<16x32xf32>
    %407 = arith.addf %406, %360 : vector<16x32xf32>
    %408 = arith.mulf %403, %407 : vector<16x32xf32>
    %409 = arith.addf %405, %408 : vector<16x32xf32>
    %410 = math.tanh %409 : vector<16x32xf32>
    %cst_114 = arith.constant 1.000000e+00 : f32
    %411 = vector.broadcast %cst_114 : f32 to vector<16x32xf32>
    %412 = arith.subf %411, %404 : vector<16x32xf32>
    %413 = arith.mulf %412, %410 : vector<16x32xf32>
    %414 = arith.mulf %404, %388 : vector<16x32xf32>
    %415 = arith.addf %413, %414 : vector<16x32xf32>
    %416 = arith.truncf %415 : vector<16x32xf32> to vector<16x32xbf16>
    %c32_115 = arith.constant 32 : index
    %c0_116 = arith.constant 0 : index
    %417 = vector.load %arg7[%c32_115, %c0_116] : memref<128x192xf32, #tpu.memory_space<vmem>>, vector<16x96xf32>
    %c80_117 = arith.constant 80 : index
    %c96_118 = arith.constant 96 : index
    %418 = vector.load %arg7[%c80_117, %c96_118] : memref<128x192xf32, #tpu.memory_space<vmem>>, vector<16x96xf32>
    %419 = arith.addf %417, %418 : vector<16x96xf32>
    %cst_119 = arith.constant dense<0.000000e+00> : vector<16x96xf32>
    %420 = tpu.matmul %416, %354, %cst_119 {dimension_numbers = #tpu.dot_dimension_numbers<[1], [0], [0], [1], [0, 0, 1, 1], [], []>} : vector<16x32xbf16>, vector<32x96xbf16>, vector<16x96xf32> -> vector<16x96xf32>
    %421 = vector.extract_strided_slice %419 {offsets = [0, 0], sizes = [16, 64], strides = [1, 1]} : vector<16x96xf32> to vector<16x64xf32>
    %422 = vector.extract_strided_slice %420 {offsets = [0, 0], sizes = [16, 64], strides = [1, 1]} : vector<16x96xf32> to vector<16x64xf32>
    %423 = arith.addf %421, %422 : vector<16x64xf32>
    %424 = arith.addf %423, %357 : vector<16x64xf32>
    %425 = arith.negf %424 : vector<16x64xf32>
    %426 = math.exp %425 : vector<16x64xf32>
    %cst_120 = arith.constant 1.000000e+00 : f32
    %427 = vector.broadcast %cst_120 : f32 to vector<16x64xf32>
    %428 = arith.addf %427, %426 : vector<16x64xf32>
    %429 = arith.divf %427, %428 : vector<16x64xf32>
    %430 = vector.extract_strided_slice %429 {offsets = [0, 0], sizes = [16, 32], strides = [1, 1]} : vector<16x64xf32> to vector<16x32xf32>
    %431 = vector.extract_strided_slice %429 {offsets = [0, 32], sizes = [16, 32], strides = [1, 1]} : vector<16x64xf32> to vector<16x32xf32>
    %432 = vector.extract_strided_slice %419 {offsets = [0, 64], sizes = [16, 32], strides = [1, 1]} : vector<16x96xf32> to vector<16x32xf32>
    %433 = vector.extract_strided_slice %420 {offsets = [0, 64], sizes = [16, 32], strides = [1, 1]} : vector<16x96xf32> to vector<16x32xf32>
    %434 = arith.addf %433, %360 : vector<16x32xf32>
    %435 = arith.mulf %430, %434 : vector<16x32xf32>
    %436 = arith.addf %432, %435 : vector<16x32xf32>
    %437 = math.tanh %436 : vector<16x32xf32>
    %cst_121 = arith.constant 1.000000e+00 : f32
    %438 = vector.broadcast %cst_121 : f32 to vector<16x32xf32>
    %439 = arith.subf %438, %431 : vector<16x32xf32>
    %440 = arith.mulf %439, %437 : vector<16x32xf32>
    %441 = arith.mulf %431, %415 : vector<16x32xf32>
    %442 = arith.addf %440, %441 : vector<16x32xf32>
    %443 = arith.truncf %442 : vector<16x32xf32> to vector<16x32xbf16>
    %c48_122 = arith.constant 48 : index
    %c0_123 = arith.constant 0 : index
    %444 = vector.load %arg7[%c48_122, %c0_123] : memref<128x192xf32, #tpu.memory_space<vmem>>, vector<16x96xf32>
    %c64_124 = arith.constant 64 : index
    %c96_125 = arith.constant 96 : index
    %445 = vector.load %arg7[%c64_124, %c96_125] : memref<128x192xf32, #tpu.memory_space<vmem>>, vector<16x96xf32>
    %446 = arith.addf %444, %445 : vector<16x96xf32>
    %cst_126 = arith.constant dense<0.000000e+00> : vector<16x96xf32>
    %447 = tpu.matmul %443, %354, %cst_126 {dimension_numbers = #tpu.dot_dimension_numbers<[1], [0], [0], [1], [0, 0, 1, 1], [], []>} : vector<16x32xbf16>, vector<32x96xbf16>, vector<16x96xf32> -> vector<16x96xf32>
    %448 = vector.extract_strided_slice %446 {offsets = [0, 0], sizes = [16, 64], strides = [1, 1]} : vector<16x96xf32> to vector<16x64xf32>
    %449 = vector.extract_strided_slice %447 {offsets = [0, 0], sizes = [16, 64], strides = [1, 1]} : vector<16x96xf32> to vector<16x64xf32>
    %450 = arith.addf %448, %449 : vector<16x64xf32>
    %451 = arith.addf %450, %357 : vector<16x64xf32>
    %452 = arith.negf %451 : vector<16x64xf32>
    %453 = math.exp %452 : vector<16x64xf32>
    %cst_127 = arith.constant 1.000000e+00 : f32
    %454 = vector.broadcast %cst_127 : f32 to vector<16x64xf32>
    %455 = arith.addf %454, %453 : vector<16x64xf32>
    %456 = arith.divf %454, %455 : vector<16x64xf32>
    %457 = vector.extract_strided_slice %456 {offsets = [0, 0], sizes = [16, 32], strides = [1, 1]} : vector<16x64xf32> to vector<16x32xf32>
    %458 = vector.extract_strided_slice %456 {offsets = [0, 32], sizes = [16, 32], strides = [1, 1]} : vector<16x64xf32> to vector<16x32xf32>
    %459 = vector.extract_strided_slice %446 {offsets = [0, 64], sizes = [16, 32], strides = [1, 1]} : vector<16x96xf32> to vector<16x32xf32>
    %460 = vector.extract_strided_slice %447 {offsets = [0, 64], sizes = [16, 32], strides = [1, 1]} : vector<16x96xf32> to vector<16x32xf32>
    %461 = arith.addf %460, %360 : vector<16x32xf32>
    %462 = arith.mulf %457, %461 : vector<16x32xf32>
    %463 = arith.addf %459, %462 : vector<16x32xf32>
    %464 = math.tanh %463 : vector<16x32xf32>
    %cst_128 = arith.constant 1.000000e+00 : f32
    %465 = vector.broadcast %cst_128 : f32 to vector<16x32xf32>
    %466 = arith.subf %465, %458 : vector<16x32xf32>
    %467 = arith.mulf %466, %464 : vector<16x32xf32>
    %468 = arith.mulf %458, %442 : vector<16x32xf32>
    %469 = arith.addf %467, %468 : vector<16x32xf32>
    %470 = arith.truncf %469 : vector<16x32xf32> to vector<16x32xbf16>
    %c64_129 = arith.constant 64 : index
    %c0_130 = arith.constant 0 : index
    %471 = vector.load %arg7[%c64_129, %c0_130] : memref<128x192xf32, #tpu.memory_space<vmem>>, vector<16x96xf32>
    %c48_131 = arith.constant 48 : index
    %c96_132 = arith.constant 96 : index
    %472 = vector.load %arg7[%c48_131, %c96_132] : memref<128x192xf32, #tpu.memory_space<vmem>>, vector<16x96xf32>
    %473 = arith.addf %471, %472 : vector<16x96xf32>
    %cst_133 = arith.constant dense<0.000000e+00> : vector<16x96xf32>
    %474 = tpu.matmul %470, %354, %cst_133 {dimension_numbers = #tpu.dot_dimension_numbers<[1], [0], [0], [1], [0, 0, 1, 1], [], []>} : vector<16x32xbf16>, vector<32x96xbf16>, vector<16x96xf32> -> vector<16x96xf32>
    %475 = vector.extract_strided_slice %473 {offsets = [0, 0], sizes = [16, 64], strides = [1, 1]} : vector<16x96xf32> to vector<16x64xf32>
    %476 = vector.extract_strided_slice %474 {offsets = [0, 0], sizes = [16, 64], strides = [1, 1]} : vector<16x96xf32> to vector<16x64xf32>
    %477 = arith.addf %475, %476 : vector<16x64xf32>
    %478 = arith.addf %477, %357 : vector<16x64xf32>
    %479 = arith.negf %478 : vector<16x64xf32>
    %480 = math.exp %479 : vector<16x64xf32>
    %cst_134 = arith.constant 1.000000e+00 : f32
    %481 = vector.broadcast %cst_134 : f32 to vector<16x64xf32>
    %482 = arith.addf %481, %480 : vector<16x64xf32>
    %483 = arith.divf %481, %482 : vector<16x64xf32>
    %484 = vector.extract_strided_slice %483 {offsets = [0, 0], sizes = [16, 32], strides = [1, 1]} : vector<16x64xf32> to vector<16x32xf32>
    %485 = vector.extract_strided_slice %483 {offsets = [0, 32], sizes = [16, 32], strides = [1, 1]} : vector<16x64xf32> to vector<16x32xf32>
    %486 = vector.extract_strided_slice %473 {offsets = [0, 64], sizes = [16, 32], strides = [1, 1]} : vector<16x96xf32> to vector<16x32xf32>
    %487 = vector.extract_strided_slice %474 {offsets = [0, 64], sizes = [16, 32], strides = [1, 1]} : vector<16x96xf32> to vector<16x32xf32>
    %488 = arith.addf %487, %360 : vector<16x32xf32>
    %489 = arith.mulf %484, %488 : vector<16x32xf32>
    %490 = arith.addf %486, %489 : vector<16x32xf32>
    %491 = math.tanh %490 : vector<16x32xf32>
    %cst_135 = arith.constant 1.000000e+00 : f32
    %492 = vector.broadcast %cst_135 : f32 to vector<16x32xf32>
    %493 = arith.subf %492, %485 : vector<16x32xf32>
    %494 = arith.mulf %493, %491 : vector<16x32xf32>
    %495 = arith.mulf %485, %469 : vector<16x32xf32>
    %496 = arith.addf %494, %495 : vector<16x32xf32>
    %497 = arith.truncf %496 : vector<16x32xf32> to vector<16x32xbf16>
    %c80_136 = arith.constant 80 : index
    %c0_137 = arith.constant 0 : index
    %498 = vector.load %arg7[%c80_136, %c0_137] : memref<128x192xf32, #tpu.memory_space<vmem>>, vector<16x96xf32>
    %c32_138 = arith.constant 32 : index
    %c96_139 = arith.constant 96 : index
    %499 = vector.load %arg7[%c32_138, %c96_139] : memref<128x192xf32, #tpu.memory_space<vmem>>, vector<16x96xf32>
    %500 = arith.addf %498, %499 : vector<16x96xf32>
    %cst_140 = arith.constant dense<0.000000e+00> : vector<16x96xf32>
    %501 = tpu.matmul %497, %354, %cst_140 {dimension_numbers = #tpu.dot_dimension_numbers<[1], [0], [0], [1], [0, 0, 1, 1], [], []>} : vector<16x32xbf16>, vector<32x96xbf16>, vector<16x96xf32> -> vector<16x96xf32>
    %502 = vector.extract_strided_slice %500 {offsets = [0, 0], sizes = [16, 64], strides = [1, 1]} : vector<16x96xf32> to vector<16x64xf32>
    %503 = vector.extract_strided_slice %501 {offsets = [0, 0], sizes = [16, 64], strides = [1, 1]} : vector<16x96xf32> to vector<16x64xf32>
    %504 = arith.addf %502, %503 : vector<16x64xf32>
    %505 = arith.addf %504, %357 : vector<16x64xf32>
    %506 = arith.negf %505 : vector<16x64xf32>
    %507 = math.exp %506 : vector<16x64xf32>
    %cst_141 = arith.constant 1.000000e+00 : f32
    %508 = vector.broadcast %cst_141 : f32 to vector<16x64xf32>
    %509 = arith.addf %508, %507 : vector<16x64xf32>
    %510 = arith.divf %508, %509 : vector<16x64xf32>
    %511 = vector.extract_strided_slice %510 {offsets = [0, 0], sizes = [16, 32], strides = [1, 1]} : vector<16x64xf32> to vector<16x32xf32>
    %512 = vector.extract_strided_slice %510 {offsets = [0, 32], sizes = [16, 32], strides = [1, 1]} : vector<16x64xf32> to vector<16x32xf32>
    %513 = vector.extract_strided_slice %500 {offsets = [0, 64], sizes = [16, 32], strides = [1, 1]} : vector<16x96xf32> to vector<16x32xf32>
    %514 = vector.extract_strided_slice %501 {offsets = [0, 64], sizes = [16, 32], strides = [1, 1]} : vector<16x96xf32> to vector<16x32xf32>
    %515 = arith.addf %514, %360 : vector<16x32xf32>
    %516 = arith.mulf %511, %515 : vector<16x32xf32>
    %517 = arith.addf %513, %516 : vector<16x32xf32>
    %518 = math.tanh %517 : vector<16x32xf32>
    %cst_142 = arith.constant 1.000000e+00 : f32
    %519 = vector.broadcast %cst_142 : f32 to vector<16x32xf32>
    %520 = arith.subf %519, %512 : vector<16x32xf32>
    %521 = arith.mulf %520, %518 : vector<16x32xf32>
    %522 = arith.mulf %512, %496 : vector<16x32xf32>
    %523 = arith.addf %521, %522 : vector<16x32xf32>
    %524 = arith.truncf %523 : vector<16x32xf32> to vector<16x32xbf16>
    %c96_143 = arith.constant 96 : index
    %c0_144 = arith.constant 0 : index
    %525 = vector.load %arg7[%c96_143, %c0_144] : memref<128x192xf32, #tpu.memory_space<vmem>>, vector<16x96xf32>
    %c16_145 = arith.constant 16 : index
    %c96_146 = arith.constant 96 : index
    %526 = vector.load %arg7[%c16_145, %c96_146] : memref<128x192xf32, #tpu.memory_space<vmem>>, vector<16x96xf32>
    %527 = arith.addf %525, %526 : vector<16x96xf32>
    %cst_147 = arith.constant dense<0.000000e+00> : vector<16x96xf32>
    %528 = tpu.matmul %524, %354, %cst_147 {dimension_numbers = #tpu.dot_dimension_numbers<[1], [0], [0], [1], [0, 0, 1, 1], [], []>} : vector<16x32xbf16>, vector<32x96xbf16>, vector<16x96xf32> -> vector<16x96xf32>
    %529 = vector.extract_strided_slice %527 {offsets = [0, 0], sizes = [16, 64], strides = [1, 1]} : vector<16x96xf32> to vector<16x64xf32>
    %530 = vector.extract_strided_slice %528 {offsets = [0, 0], sizes = [16, 64], strides = [1, 1]} : vector<16x96xf32> to vector<16x64xf32>
    %531 = arith.addf %529, %530 : vector<16x64xf32>
    %532 = arith.addf %531, %357 : vector<16x64xf32>
    %533 = arith.negf %532 : vector<16x64xf32>
    %534 = math.exp %533 : vector<16x64xf32>
    %cst_148 = arith.constant 1.000000e+00 : f32
    %535 = vector.broadcast %cst_148 : f32 to vector<16x64xf32>
    %536 = arith.addf %535, %534 : vector<16x64xf32>
    %537 = arith.divf %535, %536 : vector<16x64xf32>
    %538 = vector.extract_strided_slice %537 {offsets = [0, 0], sizes = [16, 32], strides = [1, 1]} : vector<16x64xf32> to vector<16x32xf32>
    %539 = vector.extract_strided_slice %537 {offsets = [0, 32], sizes = [16, 32], strides = [1, 1]} : vector<16x64xf32> to vector<16x32xf32>
    %540 = vector.extract_strided_slice %527 {offsets = [0, 64], sizes = [16, 32], strides = [1, 1]} : vector<16x96xf32> to vector<16x32xf32>
    %541 = vector.extract_strided_slice %528 {offsets = [0, 64], sizes = [16, 32], strides = [1, 1]} : vector<16x96xf32> to vector<16x32xf32>
    %542 = arith.addf %541, %360 : vector<16x32xf32>
    %543 = arith.mulf %538, %542 : vector<16x32xf32>
    %544 = arith.addf %540, %543 : vector<16x32xf32>
    %545 = math.tanh %544 : vector<16x32xf32>
    %cst_149 = arith.constant 1.000000e+00 : f32
    %546 = vector.broadcast %cst_149 : f32 to vector<16x32xf32>
    %547 = arith.subf %546, %539 : vector<16x32xf32>
    %548 = arith.mulf %547, %545 : vector<16x32xf32>
    %549 = arith.mulf %539, %523 : vector<16x32xf32>
    %550 = arith.addf %548, %549 : vector<16x32xf32>
    %551 = arith.truncf %550 : vector<16x32xf32> to vector<16x32xbf16>
    %c112_150 = arith.constant 112 : index
    %c0_151 = arith.constant 0 : index
    %552 = vector.load %arg7[%c112_150, %c0_151] : memref<128x192xf32, #tpu.memory_space<vmem>>, vector<16x96xf32>
    %c0_152 = arith.constant 0 : index
    %c96_153 = arith.constant 96 : index
    %553 = vector.load %arg7[%c0_152, %c96_153] : memref<128x192xf32, #tpu.memory_space<vmem>>, vector<16x96xf32>
    %554 = arith.addf %552, %553 : vector<16x96xf32>
    %cst_154 = arith.constant dense<0.000000e+00> : vector<16x96xf32>
    %555 = tpu.matmul %551, %354, %cst_154 {dimension_numbers = #tpu.dot_dimension_numbers<[1], [0], [0], [1], [0, 0, 1, 1], [], []>} : vector<16x32xbf16>, vector<32x96xbf16>, vector<16x96xf32> -> vector<16x96xf32>
    %556 = vector.extract_strided_slice %554 {offsets = [0, 0], sizes = [16, 64], strides = [1, 1]} : vector<16x96xf32> to vector<16x64xf32>
    %557 = vector.extract_strided_slice %555 {offsets = [0, 0], sizes = [16, 64], strides = [1, 1]} : vector<16x96xf32> to vector<16x64xf32>
    %558 = arith.addf %556, %557 : vector<16x64xf32>
    %559 = arith.addf %558, %357 : vector<16x64xf32>
    %560 = arith.negf %559 : vector<16x64xf32>
    %561 = math.exp %560 : vector<16x64xf32>
    %cst_155 = arith.constant 1.000000e+00 : f32
    %562 = vector.broadcast %cst_155 : f32 to vector<16x64xf32>
    %563 = arith.addf %562, %561 : vector<16x64xf32>
    %564 = arith.divf %562, %563 : vector<16x64xf32>
    %565 = vector.extract_strided_slice %564 {offsets = [0, 0], sizes = [16, 32], strides = [1, 1]} : vector<16x64xf32> to vector<16x32xf32>
    %566 = vector.extract_strided_slice %564 {offsets = [0, 32], sizes = [16, 32], strides = [1, 1]} : vector<16x64xf32> to vector<16x32xf32>
    %567 = vector.extract_strided_slice %554 {offsets = [0, 64], sizes = [16, 32], strides = [1, 1]} : vector<16x96xf32> to vector<16x32xf32>
    %568 = vector.extract_strided_slice %555 {offsets = [0, 64], sizes = [16, 32], strides = [1, 1]} : vector<16x96xf32> to vector<16x32xf32>
    %569 = arith.addf %568, %360 : vector<16x32xf32>
    %570 = arith.mulf %565, %569 : vector<16x32xf32>
    %571 = arith.addf %567, %570 : vector<16x32xf32>
    %572 = math.tanh %571 : vector<16x32xf32>
    %cst_156 = arith.constant 1.000000e+00 : f32
    %573 = vector.broadcast %cst_156 : f32 to vector<16x32xf32>
    %574 = arith.subf %573, %566 : vector<16x32xf32>
    %575 = arith.mulf %574, %572 : vector<16x32xf32>
    %576 = arith.mulf %566, %550 : vector<16x32xf32>
    %577 = arith.addf %575, %576 : vector<16x32xf32>
    %c112_157 = arith.constant 112 : index
    %c0_158 = arith.constant 0 : index
    %578 = vector.load %arg8[%c112_157, %c0_158] : memref<128x64xbf16, #tpu.memory_space<vmem>>, vector<16x32xbf16>
    %c0_159 = arith.constant 0 : index
    %c32_160 = arith.constant 32 : index
    %579 = vector.load %arg8[%c0_159, %c32_160] : memref<128x64xbf16, #tpu.memory_space<vmem>>, vector<16x32xbf16>
    %580 = tpu.concatenate %578, %579 in 1 : vector<16x32xbf16>, vector<16x32xbf16> -> vector<16x64xbf16>
    %c0_161 = arith.constant 0 : index
    %c384 = arith.constant 384 : index
    %581 = vector.load %arg3[%c0_161, %c384] : memref<64x544xbf16, #tpu.memory_space<vmem>>, vector<64x96xbf16>
    %cst_162 = arith.constant dense<0.000000e+00> : vector<16x96xf32>
    %582 = tpu.matmul %580, %581, %cst_162 {dimension_numbers = #tpu.dot_dimension_numbers<[1], [0], [0], [1], [0, 0, 1, 1], [], []>} : vector<16x64xbf16>, vector<64x96xbf16>, vector<16x96xf32> -> vector<16x96xf32>
    %583 = vector.extract_strided_slice %0 {offsets = [4, 0], sizes = [1, 96], strides = [1, 1]} : vector<7x192xf32> to vector<1x96xf32>
    %584 = vector.broadcast %583 : vector<1x96xf32> to vector<16x96xf32>
    %585 = arith.addf %582, %584 : vector<16x96xf32>
    %586 = vector.extract_strided_slice %585 {offsets = [0, 0], sizes = [16, 64], strides = [1, 1]} : vector<16x96xf32> to vector<16x64xf32>
    %587 = vector.extract_strided_slice %0 {offsets = [4, 96], sizes = [1, 64], strides = [1, 1]} : vector<7x192xf32> to vector<1x64xf32>
    %588 = vector.broadcast %587 : vector<1x64xf32> to vector<16x64xf32>
    %589 = arith.addf %586, %588 : vector<16x64xf32>
    %590 = arith.negf %589 : vector<16x64xf32>
    %591 = math.exp %590 : vector<16x64xf32>
    %cst_163 = arith.constant 1.000000e+00 : f32
    %592 = vector.broadcast %cst_163 : f32 to vector<16x64xf32>
    %593 = arith.addf %592, %591 : vector<16x64xf32>
    %594 = arith.divf %592, %593 : vector<16x64xf32>
    %595 = vector.extract_strided_slice %594 {offsets = [0, 0], sizes = [16, 32], strides = [1, 1]} : vector<16x64xf32> to vector<16x32xf32>
    %596 = vector.extract_strided_slice %594 {offsets = [0, 32], sizes = [16, 32], strides = [1, 1]} : vector<16x64xf32> to vector<16x32xf32>
    %597 = vector.extract_strided_slice %585 {offsets = [0, 64], sizes = [16, 32], strides = [1, 1]} : vector<16x96xf32> to vector<16x32xf32>
    %598 = vector.extract_strided_slice %0 {offsets = [4, 160], sizes = [1, 32], strides = [1, 1]} : vector<7x192xf32> to vector<1x32xf32>
    %599 = vector.broadcast %598 : vector<1x32xf32> to vector<16x32xf32>
    %600 = arith.mulf %595, %599 : vector<16x32xf32>
    %601 = arith.addf %597, %600 : vector<16x32xf32>
    %602 = math.tanh %601 : vector<16x32xf32>
    %cst_164 = arith.constant 1.000000e+00 : f32
    %603 = vector.broadcast %cst_164 : f32 to vector<16x32xf32>
    %604 = arith.subf %603, %596 : vector<16x32xf32>
    %605 = arith.mulf %604, %602 : vector<16x32xf32>
    %606 = tpu.concatenate %577, %605 in 1 : vector<16x32xf32>, vector<16x32xf32> -> vector<16x64xf32>
    %607 = arith.truncf %606 : vector<16x64xf32> to vector<16x64xbf16>
    %c0_165 = arith.constant 0 : index
    %c480 = arith.constant 480 : index
    %608 = vector.load %arg3[%c0_165, %c480] : memref<64x544xbf16, #tpu.memory_space<vmem>>, vector<64x32xbf16>
    %cst_166 = arith.constant dense<0.000000e+00> : vector<16x32xf32>
    %609 = tpu.matmul %607, %608, %cst_166 {dimension_numbers = #tpu.dot_dimension_numbers<[1], [0], [0], [1], [0, 0, 1, 1], [], []>} : vector<16x64xbf16>, vector<64x32xbf16>, vector<16x32xf32> -> vector<16x32xf32>
    %610 = vector.extract_strided_slice %0 {offsets = [5, 96], sizes = [1, 32], strides = [1, 1]} : vector<7x192xf32> to vector<1x32xf32>
    %611 = vector.broadcast %610 : vector<1x32xf32> to vector<16x32xf32>
    %612 = arith.addf %609, %611 : vector<16x32xf32>
    %613 = arith.truncf %612 : vector<16x32xf32> to vector<16x32xbf16>
    %c0_167 = arith.constant 0 : index
    %c352 = arith.constant 352 : index
    %614 = vector.load %arg2[%c0_167, %c352] : memref<32x416xbf16, #tpu.memory_space<vmem>>, vector<32x64xbf16>
    %cst_168 = arith.constant dense<0.000000e+00> : vector<16x64xf32>
    %615 = tpu.matmul %613, %614, %cst_168 {dimension_numbers = #tpu.dot_dimension_numbers<[1], [0], [0], [1], [0, 0, 1, 1], [], []>} : vector<16x32xbf16>, vector<32x64xbf16>, vector<16x64xf32> -> vector<16x64xf32>
    %616 = vector.extract_strided_slice %0 {offsets = [6, 0], sizes = [1, 64], strides = [1, 1]} : vector<7x192xf32> to vector<1x64xf32>
    %617 = vector.broadcast %616 : vector<1x64xf32> to vector<16x64xf32>
    %618 = arith.addf %615, %617 : vector<16x64xf32>
    %619 = vector.extract_strided_slice %0 {offsets = [6, 64], sizes = [1, 64], strides = [1, 1]} : vector<7x192xf32> to vector<1x64xf32>
    %620 = vector.extract_strided_slice %0 {offsets = [6, 128], sizes = [1, 64], strides = [1, 1]} : vector<7x192xf32> to vector<1x64xf32>
    %cst_169 = arith.constant dense<0.000000e+00> : vector<16xf32>
    %621 = vector.multi_reduction <add>, %618, %cst_169 [1] : vector<16x64xf32> to vector<16xf32>
    %622 = vector.shape_cast %621 : vector<16xf32> to vector<16x1xf32>
    %cst_170 = arith.constant 6.400000e+01 : f32
    %623 = vector.broadcast %cst_170 : f32 to vector<16x1xf32>
    %624 = arith.divf %622, %623 : vector<16x1xf32>
    %625 = vector.broadcast %624 : vector<16x1xf32> to vector<16x64xf32>
    %626 = arith.subf %618, %625 : vector<16x64xf32>
    %627 = arith.mulf %626, %626 : vector<16x64xf32>
    %cst_171 = arith.constant dense<0.000000e+00> : vector<16xf32>
    %628 = vector.multi_reduction <add>, %627, %cst_171 [1] : vector<16x64xf32> to vector<16xf32>
    %629 = vector.shape_cast %628 : vector<16xf32> to vector<16x1xf32>
    %cst_172 = arith.constant 6.400000e+01 : f32
    %630 = vector.broadcast %cst_172 : f32 to vector<16x1xf32>
    %631 = arith.divf %629, %630 : vector<16x1xf32>
    %632 = vector.broadcast %624 : vector<16x1xf32> to vector<16x64xf32>
    %633 = arith.subf %618, %632 : vector<16x64xf32>
    %cst_173 = arith.constant 9.99999974E-6 : f32
    %634 = vector.broadcast %cst_173 : f32 to vector<16x1xf32>
    %635 = arith.addf %631, %634 : vector<16x1xf32>
    %636 = math.rsqrt %635 : vector<16x1xf32>
    %637 = vector.broadcast %636 : vector<16x1xf32> to vector<16x64xf32>
    %638 = arith.mulf %633, %637 : vector<16x64xf32>
    %639 = vector.broadcast %619 : vector<1x64xf32> to vector<16x64xf32>
    %640 = arith.mulf %638, %639 : vector<16x64xf32>
    %641 = vector.broadcast %620 : vector<1x64xf32> to vector<16x64xf32>
    %642 = arith.addf %640, %641 : vector<16x64xf32>
    %cst_174 = arith.constant 0.000000e+00 : f32
    %643 = vector.broadcast %cst_174 : f32 to vector<16x64xf32>
    %644 = arith.maximumf %642, %643 : vector<16x64xf32>
    %645 = arith.truncf %644 : vector<16x64xf32> to vector<16x64xbf16>
    %c0_175 = arith.constant 0 : index
    %c512 = arith.constant 512 : index
    %646 = vector.load %arg3[%c0_175, %c512] : memref<64x544xbf16, #tpu.memory_space<vmem>>, vector<64x32xbf16>
    %cst_176 = arith.constant dense<0.000000e+00> : vector<16x32xf32>
    %647 = tpu.matmul %645, %646, %cst_176 {dimension_numbers = #tpu.dot_dimension_numbers<[1], [0], [0], [1], [0, 0, 1, 1], [], []>} : vector<16x64xbf16>, vector<64x32xbf16>, vector<16x32xf32> -> vector<16x32xf32>
    %648 = vector.extract_strided_slice %0 {offsets = [5, 128], sizes = [1, 32], strides = [1, 1]} : vector<7x192xf32> to vector<1x32xf32>
    %649 = vector.broadcast %648 : vector<1x32xf32> to vector<16x32xf32>
    %650 = arith.addf %647, %649 : vector<16x32xf32>
    %c0_177 = arith.constant 0 : index
    %c0_178 = arith.constant 0 : index
    %651 = vector.load %arg5[%c0_177, %c0_178] : memref<16x32xf32, #tpu.memory_space<vmem>>, vector<16x32xf32>
    tpu.vector_store %arg5[%c0_177, %c0_178], %650 {strides = array<i32>} : memref<16x32xf32, #tpu.memory_space<vmem>>, vector<16x32xf32>,
    return
  }
  func.func @transform_0(%arg0: i32) -> (i32, i32) {
    %c0_i32 = arith.constant 0 : i32
    %c0_i32_0 = arith.constant 0 : i32
    %c0_i32_1 = arith.constant 0 : i32
    return %c0_i32, %c0_i32_0 : i32, i32
  }
  func.func @transform_1(%arg0: i32) -> (i32, i32) {
    %c0_i32 = arith.constant 0 : i32
    %c0_i32_0 = arith.constant 0 : i32
    %c0_i32_1 = arith.constant 0 : i32
    return %c0_i32, %c0_i32_0 : i32, i32
  }
  func.func @transform_2(%arg0: i32) -> (i32, i32) {
    %c0_i32 = arith.constant 0 : i32
    %c0_i32_0 = arith.constant 0 : i32
    %c0_i32_1 = arith.constant 0 : i32
    return %c0_i32, %c0_i32_0 : i32, i32
  }
  func.func @transform_3(%arg0: i32) -> (i32, i32) {
    %c0_i32 = arith.constant 0 : i32
    %c0_i32_0 = arith.constant 0 : i32
    %c0_i32_1 = arith.constant 0 : i32
    return %c0_i32, %c0_i32_0 : i32, i32
  }
  func.func @transform_4(%arg0: i32) -> (i32, i32) {
    %c0_i32 = arith.constant 0 : i32
    %c0_i32_0 = arith.constant 0 : i32
    %c0_i32_1 = arith.constant 0 : i32
    return %c0_i32, %c0_i32_0 : i32, i32
  }
}

</mosaic_0001>

<bundles_post_ra>
// kernel: modular_traffic_predictor.1
= control target key start
LH: loop header
LB: loop body
LE: loop exit
PB: predicated region body
PF: predicated region fallthrough
CT: control target
= control target key end

     0   :  { %vm61_vm0 = vcmask 261120   ;;  %s4875_s11 = smov 96   ;;  %v4876_v62 = vmov 32.0   ;;  %s4878_s6 = smov 32   ;;  %s7076_s1 = inlined_call_operand.vmem [shape: bf16[32,416], index: 1, kind: input, shape index: {}]   ;;  %s7077_s0 = inlined_call_operand.vmem [shape: f32[128,32], index: 0, kind: input, shape index: {}]   ;;  %s7078_s3 = inlined_call_operand.vmem [shape: f32[7,192], index: 3, kind: input, shape index: {}]   ;;  %s7079_s2 = inlined_call_operand.vmem [shape: bf16[64,544], index: 2, kind: input, shape index: {}]   ;;  %s7080_s4 = inlined_call_operand.vmem [shape: f32[16,32], index: 4, kind: output, shape index: {}]  }
   0x1   :  { %v4244_v0 = vld [vmem:[%s7076_s1 + $0x20] sm:$0xf]  ;;  %v4530_v1 = vld [vmem:[%s7076_s1 + $0x2c] sm:$0xf0]  ;;  %v21_v7 = vld [vmem:[%s7077_s0 + $0x8] sm:$0xff]  ;;  %4590 = vrcp.f32 %v4876_v62 }
   0x2   :  { %v4240_v2 = vld [vmem:[%s7076_s1] sm:$0xf]  ;;  %v4915_v3 = vor.u32 %v4530_v1, %v4244_v0  ;;  %v4529_v4 = vld [vmem:[%s7076_s1 + $0xc] sm:$0xf0]  ;;  %v23_v10 = vld [vmem:[%s7077_s0 + $0x18] sm:$0xff] }
   0x3   :  { %v4921_v5 = vor.u32 %v4529_v4, %v4240_v2  ;;  %v20_v6 = vld [vmem:[%s7077_s0] sm:$0xff]  ;;  %v22_v9 = vld [vmem:[%s7077_s0 + $0x10] sm:$0xff]  ;;  %v25_v13 = vld [vmem:[%s7077_s0 + $0x28] sm:$0xff] }
   0x4   :  { %92 = vmatpush.bf16.msra.mxu0 %v4915_v3  ;;  %4575 = vmatpush.bf16.msra.mxu2 %v4915_v3  ;;  %v36_v8 = vpack.c.bf16 %v21_v7, %v20_v6  ;;  %v37_v11 = vpack.c.bf16 %v23_v10, %v22_v9  ;;  %v24_v12 = vld [vmem:[%s7077_s0 + $0x20] sm:$0xff]  ;;  %v26_v17 = vld [vmem:[%s7077_s0 + $0x30] sm:$0xff]  ;;  %v27_v18 = vld [vmem:[%s7077_s0 + $0x38] sm:$0xff] }
   0x5   :  { %v38_v14 = vpack.c.bf16 %v25_v13, %v24_v12  ;;  %v18_v15 = vld [vmem:[%s7078_s3] sm:$0x7f]  ;;  %v39_v19 = vpack.c.bf16 %v27_v18, %v26_v17  ;;  %v29_v21 = vld [vmem:[%s7077_s0 + $0x48] sm:$0xff]  ;;  %v30_v34 = vld [vmem:[%s7077_s0 + $0x50] sm:$0xff] }
   0x6   :  { %v4950_v16 = vperm.slane %v18_v15, 0  ;;  %v28_v20 = vld [vmem:[%s7077_s0 + $0x40] sm:$0xff]  ;;  %v31_v35 = vld [vmem:[%s7077_s0 + $0x58] sm:$0xff]  ;;  %v34_v41 = vld [vmem:[%s7077_s0 + $0x70] sm:$0xff] }
   0x7   :  { %v40_v22 = vpack.c.bf16 %v29_v21, %v28_v20  ;;  %v41_v36 = vpack.c.bf16 %v31_v35, %v30_v34  ;;  %v35_v42 = vld [vmem:[%s7077_s0 + $0x78] sm:$0xff]  ;;  %v32_v46 = vld [vmem:[%s7077_s0 + $0x60] sm:$0xff]  ;;  %v33_v47 = vld [vmem:[%s7077_s0 + $0x68] sm:$0xff]  ;;  %v4591_v63 = vpop.eup %4590  ;;  %s4877_s0 = smov 64  }
   0x8   :  { %93 = vmatpush.bf16.msra.mxu0 %v4921_v5  ;;  %4576 = vmatpush.bf16.msra.mxu2 %v4921_v5  ;;  %v43_v43 = vpack.c.bf16 %v35_v42, %v34_v41  ;;  %v42_v48 = vpack.c.bf16 %v33_v47, %v32_v46  ;;  %v184_v0 = vmul.f32 32.0, %v4591_v63  ;;  %vm188_vm1 = vweird.f32 %v4591_v63 }
   0x9   :  { %495 = vrot.lane.b32.xlu2 %v4950_v16, %s4875_s11 }
   0xa   :  { %v185_v1 = vsub.f32 1.0, %v184_v0 }
   0xb   :  { %4246 = vmatmul.msk.bf16.vlgmr.msra.gmra.mxu0 %vm61_vm0, %v36_v8  ;;  %4253 = vmatmul.msk.bf16.vlgmr.msra.gmra.mxu2 %vm61_vm0, %v43_v43 }
   0xc   :  { %v186_v2 = vmul.f32 %v4591_v63, %v185_v1 }
   0xe   :  { %v187_v4 = vadd.f32 %v4591_v63, %v186_v2 }
  0x10   :  { %v5036_v6 = vsel %vm188_vm1, %v4591_v63, %v187_v4 }
  0x1b   :  { %4247 = vmatmul.msk.bf16.gmra.mxu0 %vm61_vm0, %v37_v11 }
  0x2b   :  { %4248 = vmatmul.msk.bf16.gmra.mxu0 %vm61_vm0, %v38_v14 }
  0x3b   :  { %4249 = vmatmul.msk.bf16.gmra.mxu0 %vm61_vm0, %v39_v19 }
  0x4b   :  { %4250 = vmatmul.msk.bf16.gmra.mxu0 %vm61_vm0, %v40_v22 }
  0x5b   :  { %4251 = vmatmul.msk.bf16.gmra.mxu0 %vm61_vm0, %v41_v36 }
  0x6b   :  { %4252 = vmatmul.msk.bf16.gmra.mxu0 %vm61_vm0, %v42_v48 }
  0x88   :  { %v95_v23 = vpop.f32.mrf.mxu0 }
  0x89   :  { %v96_v24 = vadd.f32 %v95_v23, %v4950_v16 }
  0x8b   :  { %v135_v25 = vsel %vm61_vm0, %v96_v24, 0.0 }
  0x8c   :  { %136 = vadd.xlane.f32.xlu0 %v135_v25 }
  0x8e   :  { %v130_v36 = vpop.f32.mrf.mxu2 }
  0x8f   :  { %v5119_v62 = vadd.f32 %v130_v36, %v4950_v16 }
  0x90   :  { %v97_v26 = vpop.f32.mrf.mxu0 }
  0x91   :  { %v4971_v27 = vadd.f32 %v97_v26, %v4950_v16 }
  0x93   :  { %v138_v28 = vsel %vm61_vm0, %v4971_v27, 0.0 }
  0x94   :  { %139 = vadd.xlane.f32.xlu0 %v138_v28  ;;  %v5067_v28 = vpop.permute.xlu2 %495 }
  0x96   :  { %v132_v43 = vpop.f32.mrf.mxu2 }
  0x97   :  { %v5096_v47 = vadd.f32 %v132_v43, %v4950_v16 }
  0x98   :  { %v100_v29 = vpop.f32.mrf.mxu0 }
  0x99   :  { %v4976_v30 = vadd.f32 %v100_v29, %v4950_v16 }
  0x9b   :  { %v141_v31 = vsel %vm61_vm0, %v4976_v30, 0.0 }
  0x9c   :  { %142 = vadd.xlane.f32.xlu1 %v141_v31 }
  0xa0   :  { %v102_v32 = vpop.f32.mrf.mxu0 }
  0xa1   :  { %v4981_v33 = vadd.f32 %v102_v32, %v4950_v16 }
  0xa3   :  { %v144_v37 = vsel %vm61_vm0, %v4981_v33, 0.0 }
  0xa4   :  { %145 = vadd.xlane.f32.xlu1 %v144_v37 }
  0xa8   :  { %v105_v38 = vpop.f32.mrf.mxu0 }
  0xa9   :  { %v4993_v39 = vadd.f32 %v105_v38, %v4950_v16 }
  0xab   :  { %v147_v40 = vsel %vm61_vm0, %v4993_v39, 0.0 }
  0xac   :  { %148 = vadd.xlane.f32.xlu2 %v147_v40 }
  0xb0   :  { %v107_v44 = vpop.f32.mrf.mxu0 }
  0xb1   :  { %v5005_v45 = vadd.f32 %v107_v44, %v4950_v16 }
  0xb3   :  { %v150_v49 = vsel %vm61_vm0, %v5005_v45, 0.0 }
  0xb4   :  { %151 = vadd.xlane.f32.xlu2 %v150_v49 }
  0xb8   :  { %v110_v50 = vpop.f32.mrf.mxu0 }
  0xb9   :  { %v5017_v51 = vadd.f32 %v110_v50, %v4950_v16 }
  0xbb   :  { %v153_v52 = vsel %vm61_vm0, %v5017_v51, 0.0 }
  0xbc   :  { %154 = vadd.xlane.f32.xlu2 %v153_v52 }
  0xc0   :  { %v112_v53 = vpop.f32.mrf.mxu0 }
  0xc1   :  { %v5022_v54 = vadd.f32 %v112_v53, %v4950_v16  ;;  %v180_v53 = vsel %vm61_vm0, %v5096_v47, 0.0 }
  0xc3   :  { %v156_v55 = vsel %vm61_vm0, %v5022_v54, 0.0 }
  0xc4   :  { %157 = vadd.xlane.f32.xlu0 %v156_v55 }
  0xc8   :  { %v115_v56 = vpop.f32.mrf.mxu0 }
  0xc9   :  { %v5027_v57 = vadd.f32 %v115_v56, %v4950_v16 }
  0xcb   :  { %v159_v58 = vsel %vm61_vm0, %v5027_v57, 0.0 }
  0xcc   :  { %160 = vadd.xlane.f32.xlu0 %v159_v58 }
  0xd0   :  { %v117_v59 = vpop.f32.mrf.mxu0 }
  0xd1   :  { %v5032_v60 = vadd.f32 %v117_v59, %v4950_v16 }
  0xd3   :  { %v162_v61 = vsel %vm61_vm0, %v5032_v60, 0.0 }
  0xd4   :  { %163 = vadd.xlane.f32.xlu1 %v162_v61 }
  0xff   :  { %v137_v7 = vpop.xlane.xlu0 %136 }
 0x100   :  { %v190_v8 = vmul.f32 %v5036_v6, %v137_v7 }
 0x102   :  { %v5039_v9 = vsub.f32 %v96_v24, %v190_v8 }
 0x104   :  { %v222_v10 = vmul.f32 %v5039_v9, %v5039_v9 }
 0x106   :  { %v238_v11 = vsel %vm61_vm0, %v222_v10, 0.0 }
 0x107   :  { %239 = vadd.xlane.f32.xlu0 %v238_v11  ;;  %v140_v12 = vpop.xlane.xlu0 %139 }
 0x108   :  { %v191_v13 = vmul.f32 %v5036_v6, %v140_v12 }
 0x10a   :  { %v5046_v14 = vsub.f32 %v4971_v27, %v191_v13 }
 0x10c   :  { %v223_v15 = vmul.f32 %v5046_v14, %v5046_v14 }
 0x10e   :  { %v241_v17 = vsel %vm61_vm0, %v223_v15, 0.0 }
 0x10f   :  { %v143_v18 = vpop.xlane.xlu1 %142  ;;  %242 = vadd.xlane.f32.xlu1 %v241_v17 }
 0x110   :  { %v192_v19 = vmul.f32 %v5036_v6, %v143_v18 }
 0x112   :  { %v5053_v20 = vsub.f32 %v4976_v30, %v192_v19  ;;  %v120_v30 = vpop.f32.mrf.mxu0 }
 0x113   :  { %v5093_v46 = vadd.f32 %v120_v30, %v4950_v16 }
 0x114   :  { %v224_v21 = vmul.f32 %v5053_v20, %v5053_v20 }
 0x115   :  { %v165_v52 = vsel %vm61_vm0, %v5093_v46, 0.0 }
 0x116   :  { %v244_v22 = vsel %vm61_vm0, %v224_v21, 0.0 }
 0x117   :  { %v146_v23 = vpop.xlane.xlu1 %145  ;;  %245 = vadd.xlane.f32.xlu1 %v244_v22 }
 0x118   :  { %v193_v24 = vmul.f32 %v5036_v6, %v146_v23 }
 0x11a   :  { %v5060_v25 = vsub.f32 %v4981_v33, %v193_v24  ;;  %v122_v33 = vpop.f32.mrf.mxu0 }
 0x11b   :  { %559 = vrot.lane.b32.xlu0 %v4915_v3, %s4875_s11  ;;  %v5081_v35 = vadd.f32 %v122_v33, %v4950_v16 }
 0x11c   :  { %v225_v26 = vmul.f32 %v5060_v25, %v5060_v25 }
 0x11e   :  { %v247_v27 = vsel %vm61_vm0, %v225_v26, 0.0 }
 0x11f   :  { %248 = vadd.xlane.f32.xlu2 %v247_v27  ;;  %v149_v29 = vpop.xlane.xlu2 %148 }
 0x120   :  { %v194_v31 = vmul.f32 %v5036_v6, %v149_v29 }
 0x122   :  { %v5075_v3 = vsub.f32 %v4993_v39, %v194_v31  ;;  %v125_v37 = vpop.f32.mrf.mxu0 }
 0x123   :  { %v5086_v39 = vadd.f32 %v125_v37, %v4950_v16 }
 0x124   :  { %v226_v32 = vmul.f32 %v5075_v3, %v5075_v3 }
 0x125   :  { %v171_v41 = vsel %vm61_vm0, %v5086_v39, 0.0 }
 0x126   :  { %v250_v34 = vsel %vm61_vm0, %v226_v32, 0.0 }
 0x127   :  { %v152_v38 = vpop.xlane.xlu2 %151 }
 0x128   :  { %v195_v42 = vmul.f32 %v5036_v6, %v152_v38 }
 0x12a   :  { %v5099_v48 = vsub.f32 %v5005_v45, %v195_v42  ;;  %v127_v4 = vpop.f32.mrf.mxu0 }
 0x12b   :  { %v5132_v10 = vadd.f32 %v127_v4, %v4950_v16 }
 0x12c   :  { %v227_v56 = vmul.f32 %v5099_v48, %v5099_v48 }
 0x12d   :  { %v174_v13 = vsel %vm61_vm0, %v5132_v10, 0.0 }
 0x12f   :  { %v155_v49 = vpop.xlane.xlu2 %154 }
 0x130   :  { %514 = vrot.lane.b32.xlu1 %v4950_v16, %s4877_s0  ;;  %v196_v55 = vmul.f32 %v5036_v6, %v155_v49 }
 0x132   :  { %v5114_v58 = vsub.f32 %v5017_v51, %v196_v55  ;;  %v177_v51 = vsel %vm61_vm0, %v5119_v62, 0.0 }
 0x134   :  { %v228_v63 = vmul.f32 %v5114_v58, %v5114_v58 }
 0x136   :  { %v256_v1 = vsel %vm61_vm0, %v228_v63, 0.0 }
 0x137   :  { %557 = vrot.lane.b32.xlu2 %v4921_v5, %s4875_s11  ;;  %v168_v5 = vsel %vm61_vm0, %v5081_v35, 0.0  ;;  %v158_v40 = vpop.xlane.xlu0 %157 }
 0x138   :  { %v197_v44 = vmul.f32 %v5036_v6, %v158_v40 }
 0x13a   :  { %v5102_v50 = vsub.f32 %v5022_v54, %v197_v44  ;;  %v253_v54 = vsel %vm61_vm0, %v227_v56, 0.0 }
 0x13c   :  { %v229_v45 = vmul.f32 %v5102_v50, %v5102_v50 }
 0x13e   :  { %v259_v59 = vsel %vm61_vm0, %v229_v45, 0.0 }
 0x13f   :  { %v161_v2 = vpop.xlane.xlu0 %160 }
 0x140   :  { %v198_v8 = vmul.f32 %v5036_v6, %v161_v2 }
 0x142   :  { %v5137_v12 = vsub.f32 %v5027_v57, %v198_v8 }
 0x145   :  { %251 = vadd.xlane.f32.xlu0 %v250_v34 }
 0x147   :  { %v164_v61 = vpop.xlane.xlu1 %163 }
 0x148   :  { %v199_v0 = vmul.f32 %v5036_v6, %v164_v61 }
 0x14a   :  { %v5128_v7 = vsub.f32 %v5032_v60, %v199_v0  ;;  %v230_v60 = vmul.f32 %v5137_v12, %v5137_v12 }
 0x14c   :  { %v231_v11 = vmul.f32 %v5128_v7, %v5128_v7  ;;  %v262_v17 = vsel %vm61_vm0, %v230_v60, 0.0 }
 0x14d   :  { %169 = vadd.xlane.f32.xlu0 %v168_v5 }
 0x14e   :  { %v265_v15 = vsel %vm61_vm0, %v231_v11, 0.0 }
 0x155   :  { %172 = vadd.xlane.f32.xlu0 %v171_v41 }
 0x15a   :  { %166 = vadd.xlane.f32.xlu1 %v165_v52 }
 0x15d   :  { %181 = vadd.xlane.f32.xlu0 %v180_v53 }
 0x160   :  { %254 = vadd.xlane.f32.xlu2 %v253_v54 }
 0x162   :  { %260 = vadd.xlane.f32.xlu1 %v259_v59 }
 0x168   :  { %257 = vadd.xlane.f32.xlu2 %v256_v1 }
 0x16a   :  { %178 = vadd.xlane.f32.xlu1 %v177_v51 }
 0x170   :  { %175 = vadd.xlane.f32.xlu2 %v174_v13 }
 0x172   :  { %266 = vadd.xlane.f32.xlu1 %v265_v15 }
 0x178   :  { %263 = vadd.xlane.f32.xlu2 %v262_v17 }
 0x17a   :  { %v240_v18 = vpop.xlane.xlu0 %239 }
 0x17b   :  { %v286_v19 = vmul.f32 %v240_v18, %v5036_v6 }
 0x17d   :  { %v302_v21 = vadd.f32 1e-05, %v286_v19 }
 0x17f   :  { %4592 = vrsqrt.f32 %v302_v21  ;;  %vm324_vm4 = vweird.f32 %v302_v21 }
 0x182   :  { %v243_v57 = vpop.xlane.xlu1 %242 }
 0x183   :  { %v287_v22 = vmul.f32 %v243_v57, %v5036_v6 }
 0x185   :  { %v4593_v23 = vpop.eup %4592  ;;  %v303_v24 = vadd.f32 1e-05, %v287_v22 }
 0x186   :  { %v319_v26 = vmul.f32 %v4593_v23, %v302_v21  ;;  %vm325_vm2 = vweird.f32 %v4593_v23 }
 0x187   :  { %4594 = vrsqrt.f32 %v303_v24  ;;  %vm326_vm5 = vmor %vm324_vm4, %vm325_vm2  ;;  %vm334_vm6 = vweird.f32 %v303_v24 }
 0x188   :  { %v320_v27 = vmul.f32 %v4593_v23, %v319_v26 }
 0x18a   :  { %v246_v29 = vpop.xlane.xlu1 %245  ;;  %v321_v34 = vmul.f32 0.5, %v320_v27 }
 0x18b   :  { %v288_v30 = vmul.f32 %v246_v29, %v5036_v6 }
 0x18c   :  { %v322_v37 = vsub.f32 1.5, %v321_v34 }
 0x18d   :  { %v4595_v31 = vpop.eup %4594  ;;  %v304_v32 = vadd.f32 1e-05, %v288_v30  ;;  %v560_v33 = vpop.permute.xlu0 %559 }
 0x18e   :  { %v329_v36 = vmul.f32 %v4595_v31, %v303_v24  ;;  %596 = vmatpush.bf16.msra.mxu1 %v560_v33  ;;  %4577 = vmatpush.bf16.msra.mxu3 %v560_v33  ;;  %v323_v49 = vmul.f32 %v4593_v23, %v322_v37  ;;  %vm335_vm3 = vweird.f32 %v4595_v31 }
 0x18f   :  { %4596 = vrsqrt.f32 %v304_v32  ;;  %vm336_vm7 = vmor %vm334_vm6, %vm335_vm3  ;;  %vm344_vm9 = vweird.f32 %v304_v32 }
 0x190   :  { %v330_v5 = vmul.f32 %v4595_v31, %v329_v36  ;;  %v327_v56 = vsel %vm326_vm5, %v4593_v23, %v323_v49 }
 0x191   :  { %v478_v63 = vmul.f32 %v327_v56, %v5039_v9 }
 0x192   :  { %v331_v38 = vmul.f32 0.5, %v330_v5  ;;  %v249_v40 = vpop.xlane.xlu2 %248 }
 0x193   :  { %v289_v41 = vmul.f32 %v249_v40, %v5036_v6  ;;  %v498_v4 = vmul.f32 %v5067_v28, %v478_v63 }
 0x194   :  { %v332_v42 = vsub.f32 1.5, %v331_v38 }
 0x195   :  { %v4597_v43 = vpop.eup %4596  ;;  %v305_v44 = vadd.f32 1e-05, %v289_v41 }
 0x196   :  { %v333_v52 = vmul.f32 %v4595_v31, %v332_v42  ;;  %v339_v53 = vmul.f32 %v4597_v43, %v304_v32  ;;  %vm345_vm8 = vweird.f32 %v4597_v43 }
 0x197   :  { %4598 = vrsqrt.f32 %v305_v44  ;;  %vm346_vm11 = vmor %vm344_vm9, %vm345_vm8  ;;  %vm354_vm12 = vweird.f32 %v305_v44 }
 0x198   :  { %v340_v55 = vmul.f32 %v4597_v43, %v339_v53  ;;  %v337_v45 = vsel %vm336_vm7, %v4595_v31, %v333_v52 }
 0x199   :  { %v479_v0 = vmul.f32 %v337_v45, %v5046_v14 }
 0x19a   :  { %v341_v54 = vmul.f32 0.5, %v340_v55  ;;  %v558_v59 = vpop.permute.xlu2 %557 }
 0x19b   :  { %597 = vmatpush.bf16.msra.mxu1 %v558_v59  ;;  %4578 = vmatpush.bf16.msra.mxu3 %v558_v59  ;;  %v499_v8 = vmul.f32 %v5067_v28, %v479_v0 }
 0x19c   :  { %v342_v1 = vsub.f32 1.5, %v341_v54 }
 0x19d   :  { %v4599_v61 = vpop.eup %4598 }
 0x19e   :  { %v349_v51 = vmul.f32 %v4599_v61, %v305_v44  ;;  %v343_v11 = vmul.f32 %v4597_v43, %v342_v1  ;;  %vm355_vm10 = vweird.f32 %v4599_v61 }
 0x19f   :  { %vm356_vm13 = vmor %vm354_vm12, %vm355_vm10 }
 0x1a0   :  { %v350_v2 = vmul.f32 %v4599_v61, %v349_v51  ;;  %v347_v19 = vsel %vm346_vm11, %v4597_v43, %v343_v11 }
 0x1a1   :  { %v480_v23 = vmul.f32 %v347_v19, %v5053_v20 }
 0x1a2   :  { %v351_v13 = vmul.f32 0.5, %v350_v2  ;;  %v5153_v15 = vpop.permute.xlu1 %514 }
 0x1a3   :  { %v5156_v60 = vadd.f32 %v5153_v15, %v498_v4  ;;  %v5159_v17 = vadd.f32 %v5153_v15, %v499_v8  ;;  %v500_v27 = vmul.f32 %v5067_v28, %v480_v23 }
 0x1a4   :  { %v352_v9 = vsub.f32 1.5, %v351_v13 }
 0x1a5   :  { %v533_v14 = vmax.f32 %v5156_v60, 0.0  ;;  %v534_v18 = vmax.f32 %v5159_v17, 0.0  ;;  %v5176_v30 = vadd.f32 %v5153_v15, %v500_v27 }
 0x1a6   :  { %v353_v21 = vmul.f32 %v4599_v61, %v352_v9 }
 0x1a7   :  { %v549_v57 = vpack.c.bf16 %v534_v18, %v533_v14  ;;  %v535_v32 = vmax.f32 %v5176_v30, 0.0 }
 0x1a8   :  { %v357_v22 = vsel %vm356_vm13, %v4599_v61, %v353_v21 }
 0x1a9   :  { %4254 = vmatmul.msk.bf16.vlgmr.msra.gmra.mxu1 %vm61_vm0, %v549_v57  ;;  %v481_v24 = vmul.f32 %v357_v22, %v5060_v25 }
 0x1ab   :  { %v501_v26 = vmul.f32 %v5067_v28, %v481_v24 }
 0x1ad   :  { %v5173_v29 = vadd.f32 %v5153_v15, %v501_v26 }
 0x1af   :  { %v536_v31 = vmax.f32 %v5173_v29, 0.0 }
 0x1b1   :  { %v550_v20 = vpack.c.bf16 %v536_v31, %v535_v32 }
 0x1b8   :  { %v252_v25 = vpop.xlane.xlu0 %251 }
 0x1b9   :  { %4255 = vmatmul.msk.bf16.gmra.mxu1 %vm61_vm0, %v550_v20  ;;  %v290_v33 = vmul.f32 %v252_v25, %v5036_v6 }
 0x1bb   :  { %v306_v34 = vadd.f32 1e-05, %v290_v33 }
 0x1bd   :  { %4600 = vrsqrt.f32 %v306_v34  ;;  %vm364_vm15 = vweird.f32 %v306_v34 }
 0x1c0   :  { %v170_v36 = vpop.xlane.xlu0 %169 }
 0x1c1   :  { %v201_v5 = vmul.f32 %v5036_v6, %v170_v36 }
 0x1c3   :  { %v5188_v37 = vsub.f32 %v5081_v35, %v201_v5  ;;  %v4601_v43 = vpop.eup %4600 }
 0x1c4   :  { %v359_v49 = vmul.f32 %v4601_v43, %v306_v34  ;;  %vm365_vm14 = vweird.f32 %v4601_v43 }
 0x1c5   :  { %v233_v38 = vmul.f32 %v5188_v37, %v5188_v37  ;;  %vm366_vm1 = vmor %vm364_vm15, %vm365_vm14 }
 0x1c6   :  { %v360_v54 = vmul.f32 %v4601_v43, %v359_v49 }
 0x1c7   :  { %v271_v40 = vsel %vm61_vm0, %v233_v38, 0.0 }
 0x1c8   :  { %272 = vadd.xlane.f32.xlu2 %v271_v40  ;;  %v173_v41 = vpop.xlane.xlu0 %172  ;;  %v361_v51 = vmul.f32 0.5, %v360_v54 }
 0x1c9   :  { %v202_v42 = vmul.f32 %v5036_v6, %v173_v41 }
 0x1cb   :  { %v5195_v44 = vsub.f32 %v5086_v39, %v202_v42 }
 0x1cd   :  { %v167_v52 = vpop.xlane.xlu1 %166  ;;  %v234_v35 = vmul.f32 %v5195_v44, %v5195_v44 }
 0x1ce   :  { %v200_v53 = vmul.f32 %v5036_v6, %v167_v52 }
 0x1cf   :  { %v274_v55 = vsel %vm61_vm0, %v234_v35, 0.0 }
 0x1d0   :  { %v5202_v56 = vsub.f32 %v5093_v46, %v200_v53  ;;  %275 = vadd.xlane.f32.xlu1 %v274_v55  ;;  %v182_v45 = vpop.xlane.xlu0 %181 }
 0x1d1   :  { %v205_v59 = vmul.f32 %v5036_v6, %v182_v45 }
 0x1d2   :  { %v232_v39 = vmul.f32 %v5202_v56, %v5202_v56 }
 0x1d3   :  { %v5208_v61 = vsub.f32 %v5096_v47, %v205_v59  ;;  %v255_v63 = vpop.xlane.xlu2 %254  ;;  %v362_v47 = vsub.f32 1.5, %v361_v51 }
 0x1d4   :  { %v291_v0 = vmul.f32 %v255_v63, %v5036_v6  ;;  %v268_v1 = vsel %vm61_vm0, %v232_v39, 0.0 }
 0x1d5   :  { %269 = vadd.xlane.f32.xlu0 %v268_v1  ;;  %v261_v46 = vpop.xlane.xlu1 %260  ;;  %v237_v2 = vmul.f32 %v5208_v61, %v5208_v61  ;;  %v363_v21 = vmul.f32 %v4601_v43, %v362_v47 }
 0x1d6   :  { %v307_v4 = vadd.f32 1e-05, %v291_v0  ;;  %v293_v8 = vmul.f32 %v261_v46, %v5036_v6 }
 0x1d7   :  { %v283_v11 = vsel %vm61_vm0, %v237_v2, 0.0  ;;  %v367_v25 = vsel %vm366_vm1, %v4601_v43, %v363_v21 }
 0x1d8   :  { %4602 = vrsqrt.f32 %v307_v4  ;;  %v309_v13 = vadd.f32 1e-05, %v293_v8  ;;  %284 = vadd.xlane.f32.xlu1 %v283_v11  ;;  %v482_v49 = vmul.f32 %v367_v25, %v5075_v3  ;;  %vm374_vm3 = vweird.f32 %v307_v4 }
 0x1da   :  { %4604 = vrsqrt.f32 %v309_v13  ;;  %v502_v3 = vmul.f32 %v5067_v28, %v482_v49  ;;  %vm394_vm7 = vweird.f32 %v309_v13 }
 0x1db   :  { %v258_v9 = vpop.xlane.xlu2 %257 }
 0x1dc   :  { %v292_v19 = vmul.f32 %v258_v9, %v5036_v6  ;;  %v5243_v11 = vadd.f32 %v5153_v15, %v502_v3 }
 0x1dd   :  { %v179_v57 = vpop.xlane.xlu1 %178 }
 0x1de   :  { %v4603_v22 = vpop.eup %4602  ;;  %v308_v23 = vadd.f32 1e-05, %v292_v19  ;;  %v204_v24 = vmul.f32 %v5036_v6, %v179_v57 }
 0x1df   :  { %v369_v26 = vmul.f32 %v4603_v22, %v307_v4  ;;  %vm375_vm2 = vweird.f32 %v4603_v22 }
 0x1e0   :  { %v5218_v27 = vpop.eup %4604  ;;  %4606 = vrsqrt.f32 %v308_v23  ;;  %v5221_v20 = vsub.f32 %v5119_v62, %v204_v24  ;;  %vm376_vm4 = vmor %vm374_vm3, %vm375_vm2  ;;  %vm384_vm9 = vweird.f32 %v308_v23 }
 0x1e1   :  { %v370_v33 = vmul.f32 %v4603_v22, %v369_v26  ;;  %v389_v36 = vmul.f32 %v5218_v27, %v309_v13  ;;  %vm395_vm5 = vweird.f32 %v5218_v27 }
 0x1e2   :  { %v236_v5 = vmul.f32 %v5221_v20, %v5221_v20  ;;  %vm396_vm8 = vmor %vm394_vm7, %vm395_vm5 }
 0x1e3   :  { %v371_v38 = vmul.f32 0.5, %v370_v33  ;;  %v390_v40 = vmul.f32 %v5218_v27, %v389_v36  ;;  %v176_v41 = vpop.xlane.xlu2 %175 }
 0x1e4   :  { %v203_v34 = vmul.f32 %v5036_v6, %v176_v41  ;;  %v280_v42 = vsel %vm61_vm0, %v236_v5, 0.0 }
 0x1e5   :  { %v372_v52 = vsub.f32 1.5, %v371_v38  ;;  %v391_v62 = vmul.f32 0.5, %v390_v40  ;;  %v267_v43 = vpop.xlane.xlu1 %266  ;;  %281 = vadd.xlane.f32.xlu2 %v280_v42 }
 0x1e6   :  { %v4607_v35 = vpop.eup %4606  ;;  %v5231_v53 = vsub.f32 %v5132_v10, %v203_v34  ;;  %v295_v55 = vmul.f32 %v267_v43, %v5036_v6 }
 0x1e7   :  { %v373_v45 = vmul.f32 %v4603_v22, %v372_v52  ;;  %v379_v54 = vmul.f32 %v4607_v35, %v308_v23  ;;  %v392_v0 = vsub.f32 1.5, %v391_v62  ;;  %vm385_vm6 = vweird.f32 %v4607_v35 }
 0x1e8   :  { %v311_v59 = vadd.f32 1e-05, %v295_v55  ;;  %v235_v39 = vmul.f32 %v5231_v53, %v5231_v53  ;;  %vm386_vm10 = vmor %vm384_vm9, %vm385_vm6 }
 0x1e9   :  { %v377_v63 = vsel %vm376_vm4, %v4603_v22, %v373_v45  ;;  %v380_v1 = vmul.f32 %v4607_v35, %v379_v54  ;;  %v393_v47 = vmul.f32 %v5218_v27, %v392_v0  ;;  %v7092_v22 = vmax.f32 %v5243_v11, 0.0 }
 0x1ea   :  { %4608 = vrsqrt.f32 %v311_v59  ;;  %v277_v51 = vsel %vm61_vm0, %v235_v39, 0.0  ;;  %v483_v10 = vmul.f32 %v377_v63, %v5099_v48  ;;  %vm414_vm13 = vweird.f32 %v311_v59 }
 0x1eb   :  { %v381_v46 = vmul.f32 0.5, %v380_v1  ;;  %278 = vadd.xlane.f32.xlu0 %v277_v51  ;;  %v264_v2 = vpop.xlane.xlu2 %263  ;;  %v397_v26 = vsel %vm396_vm8, %v5218_v27, %v393_v47 }
 0x1ec   :  { %v294_v4 = vmul.f32 %v264_v2, %v5036_v6  ;;  %v503_v8 = vmul.f32 %v5067_v28, %v483_v10  ;;  %v485_v23 = vmul.f32 %v397_v26, %v5102_v50 }
 0x1ed   :  { %v382_v9 = vsub.f32 1.5, %v381_v46 }
 0x1ee   :  { %v310_v19 = vadd.f32 1e-05, %v294_v4  ;;  %v5247_v48 = vadd.f32 %v5153_v15, %v503_v8  ;;  %v505_v27 = vmul.f32 %v5067_v28, %v485_v23 }
 0x1ef   :  { %v383_v21 = vmul.f32 %v4607_v35, %v382_v9 }
 0x1f0   :  { %v4609_v57 = vpop.eup %4608  ;;  %4610 = vrsqrt.f32 %v310_v19  ;;  %v7091_v24 = vmax.f32 %v5247_v48, 0.0  ;;  %vm404_vm15 = vweird.f32 %v310_v19 }
 0x1f1   :  { %v387_v25 = vsel %vm386_vm10, %v4607_v35, %v383_v21  ;;  %v409_v33 = vmul.f32 %v4609_v57, %v311_v59  ;;  %vm415_vm11 = vweird.f32 %v4609_v57 }
 0x1f2   :  { %v551_v13 = vpack.c.bf16 %v7091_v24, %v7092_v22  ;;  %v484_v36 = vmul.f32 %v387_v25, %v5114_v58  ;;  %v5265_v58 = vadd.f32 %v5153_v15, %v505_v27  ;;  %vm416_vm14 = vmor %vm414_vm13, %vm415_vm11 }
 0x1f3   :  { %v410_v5 = vmul.f32 %v4609_v57, %v409_v33 }
 0x1f4   :  { %4256 = vmatmul.msk.bf16.gmra.mxu1 %vm61_vm0, %v551_v13  ;;  %v504_v41 = vmul.f32 %v5067_v28, %v484_v36  ;;  %v7089_v45 = vmax.f32 %v5265_v58, 0.0 }
 0x1f5   :  { %v411_v38 = vmul.f32 0.5, %v410_v5 }
 0x1f6   :  { %v4611_v40 = vpop.eup %4610  ;;  %v5262_v52 = vadd.f32 %v5153_v15, %v504_v41 }
 0x1f7   :  { %v399_v34 = vmul.f32 %v4611_v40, %v310_v19  ;;  %v412_v42 = vsub.f32 1.5, %v411_v38  ;;  %vm405_vm12 = vweird.f32 %v4611_v40 }
 0x1f8   :  { %v7090_v50 = vmax.f32 %v5262_v52, 0.0  ;;  %vm406_vm1 = vmor %vm404_vm15, %vm405_vm12 }
 0x1f9   :  { %v400_v49 = vmul.f32 %v4611_v40, %v399_v34  ;;  %v413_v43 = vmul.f32 %v4609_v57, %v412_v42 }
 0x1fa   :  { %v552_v3 = vpack.c.bf16 %v7089_v45, %v7090_v50 }
 0x1fb   :  { %v401_v62 = vmul.f32 0.5, %v400_v49  ;;  %v417_v54 = vsel %vm416_vm14, %v4609_v57, %v413_v43 }
 0x1fc   :  { %v487_v63 = vmul.f32 %v417_v54, %v5128_v7  ;;  %v5296_v7 = vld [vmem:[%s7078_s3 + $0x8] sm:$0x7f] }
 0x1fd   :  { %v402_v35 = vsub.f32 1.5, %v401_v62  ;;  %v5299_v2 = vperm.slane %v5296_v7, 0 }
 0x1ff   :  { %v403_v55 = vmul.f32 %v4611_v40, %v402_v35  ;;  %563 = vrot.lane.b32.xlu0 %v4950_v16, %s4878_s6  ;;  %v507_v16 = vmul.f32 %v5067_v28, %v487_v63  ;;  %1009 = vrot.lane.b32.xlu1 %v5299_v2, %s4875_s11 }
 0x201   :  { %v407_v39 = vsel %vm406_vm1, %v4611_v40, %v403_v55  ;;  %v5284_v51 = vadd.f32 %v5153_v15, %v507_v16 }
 0x202   :  { %v486_v59 = vmul.f32 %v407_v39, %v5137_v12 }
 0x203   :  { %v7088_v46 = vmax.f32 %v5284_v51, 0.0 }
 0x204   :  { %4257 = vmatmul.msk.bf16.gmra.mxu1 %vm61_vm0, %v552_v3  ;;  %v506_v0 = vmul.f32 %v5067_v28, %v486_v59 }
 0x206   :  { %v5281_v1 = vadd.f32 %v5153_v15, %v506_v0 }
 0x208   :  { %v7087_v10 = vmax.f32 %v5281_v1, 0.0 }
 0x20a   :  { %v553_v12 = vpack.c.bf16 %v7088_v46, %v7087_v10 }
 0x214   :  { %4258 = vmatmul.msk.bf16.gmra.mxu1 %vm61_vm0, %v553_v12 }
 0x226   :  { %v5306_v13 = vpop.f32.mrf.mxu1 }
 0x22e   :  { %v5314_v43 = vpop.f32.mrf.mxu1 }
 0x23b   :  { %v273_v4 = vpop.xlane.xlu2 %272 }
 0x23c   :  { %v297_v8 = vmul.f32 %v273_v4, %v5036_v6 }
 0x23e   :  { %v313_v47 = vadd.f32 1e-05, %v297_v8 }
 0x240   :  { %4612 = vrsqrt.f32 %v313_v47  ;;  %vm434_vm3 = vweird.f32 %v313_v47 }
 0x243   :  { %v276_v9 = vpop.xlane.xlu1 %275 }
 0x244   :  { %v298_v57 = vmul.f32 %v276_v9, %v5036_v6 }
 0x246   :  { %v4613_v19 = vpop.eup %4612  ;;  %v5308_v5 = vadd.f32 1e-05, %v298_v57 }
 0x247   :  { %v429_v21 = vmul.f32 %v4613_v19, %v313_v47  ;;  %vm435_vm2 = vweird.f32 %v4613_v19 }
 0x248   :  { %v270_v26 = vpop.xlane.xlu0 %269  ;;  %vm436_vm4 = vmor %vm434_vm3, %vm435_vm2  ;;  %vm444_vm12 = vweird.f32 %v5308_v5 }
 0x249   :  { %v430_v25 = vmul.f32 %v4613_v19, %v429_v21  ;;  %v296_v33 = vmul.f32 %v270_v26, %v5036_v6 }
 0x24b   :  { %v431_v36 = vmul.f32 0.5, %v430_v25  ;;  %v312_v23 = vadd.f32 1e-05, %v296_v33  ;;  %v285_v38 = vpop.xlane.xlu1 %284  ;;  %v5322_v33 = vpop.f32.mrf.mxu1 }
 0x24c   :  { %v301_v40 = vmul.f32 %v285_v38, %v5036_v6 }
 0x24d   :  { %4614 = vrsqrt.f32 %v312_v23  ;;  %v432_v41 = vsub.f32 1.5, %v431_v36  ;;  %vm424_vm6 = vweird.f32 %v312_v23 }
 0x24e   :  { %v317_v34 = vadd.f32 1e-05, %v301_v40  ;;  %4616 = vrsqrt.f32 %v5308_v5 }
 0x24f   :  { %v433_v27 = vmul.f32 %v4613_v19, %v432_v41 }
 0x250   :  { %4618 = vrsqrt.f32 %v317_v34  ;;  %vm474_vm9 = vweird.f32 %v317_v34 }
 0x251   :  { %v437_v55 = vsel %vm436_vm4, %v4613_v19, %v433_v27 }
 0x252   :  { %v489_v12 = vmul.f32 %v437_v55, %v5188_v37 }
 0x253   :  { %v4615_v42 = vpop.eup %4614 }
 0x254   :  { %v419_v49 = vmul.f32 %v4615_v42, %v312_v23  ;;  %v5312_v62 = vpop.eup %4616  ;;  %vm425_vm5 = vweird.f32 %v4615_v42  ;;  %v509_v19 = vmul.f32 %v5067_v28, %v489_v12 }
 0x255   :  { %v439_v3 = vmul.f32 %v5312_v62, %v5308_v5  ;;  %vm426_vm7 = vmor %vm424_vm6, %vm425_vm5  ;;  %vm445_vm11 = vweird.f32 %v5312_v62  ;;  %vm1098_vm5 = vcmask 523264  }
 0x256   :  { %v4619_v35 = vpop.eup %4618  ;;  %v420_v54 = vmul.f32 %v4615_v42, %v419_v49  ;;  %v5328_v27 = vadd.f32 %v5153_v15, %v509_v19  ;;  %vm446_vm14 = vmor %vm444_vm12, %vm445_vm11 }
 0x257   :  { %v469_v39 = vmul.f32 %v4619_v35, %v317_v34  ;;  %v440_v9 = vmul.f32 %v5312_v62, %v439_v3  ;;  %vm475_vm8 = vweird.f32 %v4619_v35  ;;  %v606_v34 = vpop.f32.mrf.mxu1 }
 0x258   :  { %v421_v59 = vmul.f32 0.5, %v420_v54  ;;  %v282_v63 = vpop.xlane.xlu2 %281  ;;  %vm476_vm10 = vmor %vm474_vm9, %vm475_vm8 }
 0x259   :  { %v470_v0 = vmul.f32 %v4619_v35, %v469_v39  ;;  %v300_v16 = vmul.f32 %v282_v63, %v5036_v6  ;;  %v441_v38 = vmul.f32 0.5, %v440_v9  ;;  %v7085_v39 = vmax.f32 %v5328_v27, 0.0 }
 0x25a   :  { %v422_v4 = vsub.f32 1.5, %v421_v59 }
 0x25b   :  { %v471_v8 = vmul.f32 0.5, %v470_v0  ;;  %v316_v47 = vadd.f32 1e-05, %v300_v16  ;;  %v442_v55 = vsub.f32 1.5, %v441_v38 }
 0x25c   :  { %v423_v21 = vmul.f32 %v4615_v42, %v422_v4 }
 0x25d   :  { %4620 = vrsqrt.f32 %v316_v47  ;;  %v472_v26 = vsub.f32 1.5, %v471_v8  ;;  %v443_v0 = vmul.f32 %v5312_v62, %v442_v55  ;;  %vm464_vm15 = vweird.f32 %v316_v47 }
 0x25e   :  { %v427_v57 = vsel %vm426_vm7, %v4615_v42, %v423_v21  ;;  %v279_v25 = vpop.xlane.xlu0 %278 }
 0x25f   :  { %v299_v36 = vmul.f32 %v279_v25, %v5036_v6  ;;  %v488_v37 = vmul.f32 %v427_v57, %v5202_v56  ;;  %v473_v23 = vmul.f32 %v4619_v35, %v472_v26  ;;  %v447_v9 = vsel %vm446_vm14, %v5312_v62, %v443_v0 }
 0x261   :  { %v315_v40 = vadd.f32 1e-05, %v299_v36  ;;  %v508_v41 = vmul.f32 %v5067_v28, %v488_v37  ;;  %v477_v3 = vsel %vm476_vm10, %v4619_v35, %v473_v23 }
 0x262   :  { %v493_v4 = vmul.f32 %v477_v3, %v5208_v61  ;;  %v490_v61 = vmul.f32 %v447_v9, %v5195_v44 }
 0x263   :  { %v4621_v49 = vpop.eup %4620  ;;  %4622 = vrsqrt.f32 %v315_v40  ;;  %v5331_v42 = vadd.f32 %v5153_v15, %v508_v41  ;;  %vm454_vm3 = vweird.f32 %v315_v40 }
 0x264   :  { %v459_v54 = vmul.f32 %v4621_v49, %v316_v47  ;;  %vm465_vm13 = vweird.f32 %v4621_v49  ;;  %v513_v57 = vmul.f32 %v5067_v28, %v493_v4 }
 0x265   :  { %v7086_v56 = vmax.f32 %v5331_v42, 0.0  ;;  %vm466_vm1 = vmor %vm464_vm15, %vm465_vm13 }
 0x266   :  { %v460_v59 = vmul.f32 %v4621_v49, %v459_v54  ;;  %v5352_v62 = vadd.f32 %v5153_v15, %v513_v57 }
 0x267   :  { %v554_v63 = vpack.c.bf16 %v7085_v39, %v7086_v56 }
 0x268   :  { %v461_v16 = vmul.f32 0.5, %v460_v59 }
 0x269   :  { %v4623_v12 = vpop.eup %4622  ;;  %4259 = vmatmul.msk.bf16.gmra.mxu1 %vm61_vm0, %v554_v63 }
 0x26a   :  { %v462_v35 = vsub.f32 1.5, %v461_v16  ;;  %v449_v8 = vmul.f32 %v4623_v12, %v315_v40  ;;  %vm455_vm2 = vweird.f32 %v4623_v12 }
 0x26b   :  { %vm456_vm4 = vmor %vm454_vm3, %vm455_vm2 }
 0x26c   :  { %v463_v21 = vmul.f32 %v4621_v49, %v462_v35  ;;  %v450_v19 = vmul.f32 %v4623_v12, %v449_v8 }
 0x26e   :  { %v467_v26 = vsel %vm466_vm1, %v4621_v49, %v463_v21  ;;  %v451_v25 = vmul.f32 0.5, %v450_v19  ;;  %v510_v49 = vmul.f32 %v5067_v28, %v490_v61 }
 0x26f   :  { %v492_v36 = vmul.f32 %v467_v26, %v5221_v20 }
 0x270   :  { %v452_v37 = vsub.f32 1.5, %v451_v25  ;;  %v5379_v0 = vadd.f32 %v5153_v15, %v510_v49 }
 0x271   :  { %v609_v5 = vpop.f32.mrf.mxu1  ;;  %v5348_v38 = vpop.permute.xlu0 %563  ;;  %v512_v41 = vmul.f32 %v5067_v28, %v492_v36 }
 0x272   :  { %v453_v47 = vmul.f32 %v4623_v12, %v452_v37  ;;  %v5356_v23 = vadd.f32 %v5314_v43, %v5348_v38  ;;  %v5360_v20 = vadd.f32 %v5306_v13, %v5348_v38  ;;  %v7081_v13 = vmax.f32 %v5352_v62, 0.0  ;;  %v4533_v37 = vld [vmem:[%s7076_s1 + $0x24] sm:$0xf] }
 0x273   :  { %v5363_v44 = vadd.f32 %v5153_v15, %v512_v41  ;;  %v5382_v16 = vadd.f32 %v606_v34, %v5348_v38  ;;  %v605_v4 = vadd.f32 %v5322_v33, %v5348_v38  ;;  %v5406_v19 = vadd.f32 %v609_v5, %v5348_v38  ;;  %v4274_v5 = vld [vmem:[%s7076_s1 + $0x30] sm:$0xf0] }
 0x274   :  { %v457_v55 = vsel %vm456_vm4, %v4623_v12, %v453_v47  ;;  %v642_v54 = vsel %vm61_vm0, %v5356_v23, 0.0  ;;  %v639_v40 = vsel %vm61_vm0, %v5360_v20, 0.0  ;;  %v4277_v47 = vor.u32 %v4533_v37, %v4274_v5 }
 0x275   :  { %643 = vadd.xlane.f32.xlu1 %v642_v54  ;;  %640 = vadd.xlane.f32.xlu2 %v639_v40  ;;  %v7082_v43 = vmax.f32 %v5363_v44, 0.0  ;;  %v491_v3 = vmul.f32 %v457_v55, %v5231_v53  ;;  %v648_v9 = vsel %vm61_vm0, %v5382_v16, 0.0  ;;  %v645_v33 = vsel %vm61_vm0, %v605_v4, 0.0  ;;  %v4531_v54 = vld [vmem:[%s7076_s1 + $0x4] sm:$0xf] }
 0x276   :  { %v651_v25 = vsel %vm61_vm0, %v5406_v19, 0.0  ;;  %v4266_v40 = vld [vmem:[%s7076_s1 + $0x10] sm:$0xf0] }
 0x277   :  { %v556_v59 = vpack.c.bf16 %v7081_v13, %v7082_v43  ;;  %v511_v63 = vmul.f32 %v5067_v28, %v491_v3  ;;  %v7083_v28 = vmax.f32 %v5379_v0, 0.0 }
 0x279   :  { %v611_v12 = vpop.f32.mrf.mxu1  ;;  %4261 = vmatmul.msk.bf16.vlgmr.msra.gmra.mxu3 %vm61_vm0, %v556_v59  ;;  %v5388_v53 = vadd.f32 %v5153_v15, %v511_v63  ;;  %v4269_v59 = vor.u32 %v4531_v54, %v4266_v40 }
 0x27a   :  { %v5391_v35 = vadd.f32 %v611_v12, %v5348_v38 }
 0x27b   :  { %v7084_v8 = vmax.f32 %v5388_v53, 0.0 }
 0x27c   :  { %v654_v34 = vsel %vm61_vm0, %v5391_v35, 0.0 }
 0x27d   :  { %655 = vadd.xlane.f32.xlu0 %v654_v34  ;;  %649 = vadd.xlane.f32.xlu1 %v648_v9  ;;  %v555_v15 = vpack.c.bf16 %v7084_v8, %v7083_v28  ;;  %v5438_v9 = vpop.permute.xlu1 %1009 }
 0x27e   :  { %646 = vadd.xlane.f32.xlu2 %v645_v33 }
 0x27f   :  { %4260 = vmatmul.msk.bf16.gmra.mxu1 %vm61_vm0, %v555_v15 }
 0x281   :  { %v614_v21 = vpop.f32.mrf.mxu1 }
 0x282   :  { %v5409_v57 = vadd.f32 %v614_v21, %v5348_v38 }
 0x284   :  { %v657_v26 = vsel %vm61_vm0, %v5409_v57, 0.0 }
 0x285   :  { %658 = vadd.xlane.f32.xlu1 %v657_v26 }
 0x286   :  { %652 = vadd.xlane.f32.xlu2 %v651_v25 }
 0x289   :  { %v616_v36 = vpop.f32.mrf.mxu1 }
 0x28a   :  { %v617_v61 = vadd.f32 %v616_v36, %v5348_v38 }
 0x28c   :  { %v660_v41 = vsel %vm61_vm0, %v617_v61, 0.0 }
 0x28e   :  { %661 = vadd.xlane.f32.xlu2 %v660_v41 }
 0x291   :  { %v619_v49 = vpop.f32.mrf.mxu1  ;;  %1096 = vrot.lane.b32.xlu0 %v4277_v47, %s4877_s0 }
 0x292   :  { %v620_v55 = vadd.f32 %v619_v49, %v5348_v38 }
 0x294   :  { %v663_v3 = vsel %vm61_vm0, %v620_v55, 0.0 }
 0x295   :  { %664 = vadd.xlane.f32.xlu1 %v663_v3 }
 0x299   :  { %v621_v63 = vpop.f32.mrf.mxu1  ;;  %1092 = vrot.lane.b32.xlu0 %v4269_v59, %s4877_s0 }
 0x29a   :  { %v5434_v12 = vadd.f32 %v621_v63, %v5348_v38 }
 0x29c   :  { %v666_v34 = vsel %vm61_vm0, %v5434_v12, 0.0 }
 0x29d   :  { %667 = vadd.xlane.f32.xlu2 %v666_v34 }
 0x2e6   :  { %v624_v33 = vpop.f32.mrf.mxu1 }
 0x2e7   :  { %v5441_v15 = vadd.f32 %v624_v33, %v5348_v38 }
 0x2e8   :  { %v644_v21 = vpop.xlane.xlu1 %643  ;;  %v641_v26 = vpop.xlane.xlu2 %640 }
 0x2e9   :  { %v688_v25 = vmul.f32 %v644_v21, %v5036_v6  ;;  %v687_v36 = vmul.f32 %v641_v26, %v5036_v6  ;;  %v669_v37 = vsel %vm61_vm0, %v5441_v15, 0.0 }
 0x2ea   :  { %670 = vadd.xlane.f32.xlu0 %v669_v37 }
 0x2eb   :  { %v5448_v5 = vsub.f32 %v5356_v23, %v688_v25  ;;  %v5451_v41 = vsub.f32 %v5360_v20, %v687_v36 }
 0x2ed   :  { %v720_v47 = vmul.f32 %v5448_v5, %v5448_v5  ;;  %v719_v49 = vmul.f32 %v5451_v41, %v5451_v41 }
 0x2ef   :  { %v738_v54 = vsel %vm61_vm0, %v720_v47, 0.0  ;;  %v735_v40 = vsel %vm61_vm0, %v719_v49, 0.0 }
 0x2f0   :  { %v650_v3 = vpop.xlane.xlu1 %649  ;;  %739 = vadd.xlane.f32.xlu2 %v738_v54  ;;  %736 = vadd.xlane.f32.xlu1 %v735_v40 }
 0x2f1   :  { %v690_v59 = vmul.f32 %v650_v3, %v5036_v6  ;;  %v647_v23 = vpop.xlane.xlu2 %646 }
 0x2f2   :  { %v689_v63 = vmul.f32 %v647_v23, %v5036_v6  ;;  %v4272_v23 = vld [vmem:[%s7076_s1 + $0x20] sm:$0xf] }
 0x2f3   :  { %v5462_v20 = vsub.f32 %v5382_v16, %v690_v59 }
 0x2f4   :  { %v5464_v34 = vsub.f32 %v605_v4, %v689_v63  ;;  %v4534_v63 = vld [vmem:[%s7076_s1 + $0x2c] sm:$0xf0] }
 0x2f5   :  { %v722_v33 = vmul.f32 %v5462_v20, %v5462_v20 }
 0x2f6   :  { %v721_v21 = vmul.f32 %v5464_v34, %v5464_v34 }
 0x2f7   :  { %v744_v26 = vsel %vm61_vm0, %v722_v33, 0.0  ;;  %v4264_v33 = vld [vmem:[%s7076_s1] sm:$0xf] }
 0x2f8   :  { %745 = vadd.xlane.f32.xlu2 %v744_v26  ;;  %v741_v25 = vsel %vm61_vm0, %v721_v21, 0.0  ;;  %v659_v37 = vpop.xlane.xlu1 %658  ;;  %v4532_v21 = vld [vmem:[%s7076_s1 + $0xc] sm:$0xf0]  ;;  %v4273_v26 = vor.u32 %v4534_v63, %v4272_v23 }
 0x2f9   :  { %742 = vadd.xlane.f32.xlu1 %v741_v25  ;;  %v653_v36 = vpop.xlane.xlu2 %652 }
 0x2fc   :  { %v634_v54 = vpop.f32.mrf.mxu3 }
 0x301   :  { %v662_v47 = vpop.xlane.xlu2 %661 }
 0x302   :  { %v694_v16 = vmul.f32 %v662_v47, %v5036_v6  ;;  %v4265_v47 = vor.u32 %v4532_v21, %v4264_v33  ;;  %v626_v21 = vpop.f32.mrf.mxu1 }
 0x304   :  { %v5473_v49 = vsub.f32 %v617_v61, %v694_v16 }
 0x306   :  { %v726_v4 = vmul.f32 %v5473_v49, %v5473_v49 }
 0x308   :  { %v665_v40 = vpop.xlane.xlu1 %664  ;;  %v756_v3 = vsel %vm61_vm0, %v726_v4, 0.0  ;;  %v636_v4 = vpop.f32.mrf.mxu3 }
 0x309   :  { %v695_v59 = vmul.f32 %v665_v40, %v5036_v6  ;;  %757 = vadd.xlane.f32.xlu0 %v756_v3  ;;  %v656_v3 = vpop.xlane.xlu0 %655 }
 0x30a   :  { %v692_v63 = vmul.f32 %v656_v3, %v5036_v6  ;;  %v5528_v3 = vadd.f32 %v626_v21, %v5348_v38 }
 0x30b   :  { %v5485_v61 = vsub.f32 %v620_v55, %v695_v59  ;;  %v5499_v55 = vadd.f32 %v636_v4, %v5348_v38  ;;  %v691_v59 = vmul.f32 %v653_v36, %v5036_v6  ;;  %v693_v36 = vmul.f32 %v659_v37, %v5036_v6 }
 0x30c   :  { %v672_v37 = vsel %vm61_vm0, %v5528_v3, 0.0 }
 0x30d   :  { %v727_v25 = vmul.f32 %v5485_v61, %v5485_v61  ;;  %v684_v40 = vsel %vm61_vm0, %v5499_v55, 0.0  ;;  %v5509_v33 = vsub.f32 %v5406_v19, %v691_v59  ;;  %v629_v19 = vpop.f32.mrf.mxu1 }
 0x30f   :  { %v759_v16 = vsel %vm61_vm0, %v727_v25, 0.0  ;;  %v723_v25 = vmul.f32 %v5509_v33, %v5509_v33 }
 0x310   :  { %1094 = vrot.lane.b32.xlu2 %v4273_v26, %s4877_s0  ;;  %v5512_v26 = vsub.f32 %v5391_v35, %v692_v63  ;;  %v668_v63 = vpop.xlane.xlu2 %667 }
 0x311   :  { %760 = vadd.xlane.f32.xlu0 %v759_v16  ;;  %v5504_v23 = vpop.permute.xlu0 %1096  ;;  %v747_v4 = vsel %vm61_vm0, %v723_v25, 0.0 }
 0x312   :  { %1090 = vrot.lane.b32.xlu1 %v4265_v47, %s4877_s0  ;;  %1184 = vmatpush.bf16.msrb.mxu3 %v5504_v23  ;;  %v724_v16 = vmul.f32 %v5512_v26, %v5512_v26 }
 0x314   :  { %v750_v35 = vsel %vm61_vm0, %v724_v16, 0.0 }
 0x319   :  { %685 = vadd.xlane.f32.xlu0 %v684_v40  ;;  %v5516_v47 = vpop.permute.xlu0 %1092  ;;  %v5524_v40 = vsub.f32 %v5409_v57, %v693_v36  ;;  %v631_v57 = vpop.f32.mrf.mxu1  ;;  %v696_v36 = vmul.f32 %v668_v63, %v5036_v6 }
 0x31a   :  { %1185 = vmatpush.bf16.msrb.mxu3 %v5516_v47  ;;  %v5540_v21 = vadd.f32 %v631_v57, %v5348_v38 }
 0x31b   :  { %v725_v59 = vmul.f32 %v5524_v40, %v5524_v40  ;;  %v5543_v16 = vsub.f32 %v5434_v12, %v696_v36 }
 0x31d   :  { %v753_v25 = vsel %vm61_vm0, %v725_v59, 0.0  ;;  %v678_v59 = vsel %vm61_vm0, %v5540_v21, 0.0 }
 0x339   :  { %748 = vadd.xlane.f32.xlu2 %v747_v4  ;;  %v5536_v4 = vadd.f32 %v629_v19, %v5348_v38  ;;  %v728_v19 = vmul.f32 %v5543_v16, %v5543_v16 }
 0x33b   :  { %v762_v63 = vsel %vm61_vm0, %v728_v19, 0.0 }
 0x33c   :  { %751 = vadd.xlane.f32.xlu1 %v750_v35  ;;  %v675_v35 = vsel %vm61_vm0, %v5536_v4, 0.0 }
 0x341   :  { %673 = vadd.xlane.f32.xlu2 %v672_v37  ;;  %v5552_v37 = vadd.f32 %v634_v54, %v5348_v38 }
 0x343   :  { %v681_v12 = vsel %vm61_vm0, %v5552_v37, 0.0 }
 0x344   :  { %754 = vadd.xlane.f32.xlu1 %v753_v25 }
 0x349   :  { %676 = vadd.xlane.f32.xlu2 %v675_v35 }
 0x34c   :  { %679 = vadd.xlane.f32.xlu1 %v678_v59 }
 0x351   :  { %763 = vadd.xlane.f32.xlu2 %v762_v63 }
 0x354   :  { %682 = vadd.xlane.f32.xlu1 %v681_v12 }
 0x35d   :  { %v671_v25 = vpop.xlane.xlu0 %670 }
 0x35e   :  { %v697_v57 = vmul.f32 %v671_v25, %v5036_v6 }
 0x360   :  { %v5559_v36 = vsub.f32 %v5441_v15, %v697_v57 }
 0x362   :  { %v729_v35 = vmul.f32 %v5559_v36, %v5559_v36 }
 0x363   :  { %v737_v59 = vpop.xlane.xlu1 %736  ;;  %v740_v13 = vpop.xlane.xlu2 %739 }
 0x364   :  { %v783_v38 = vmul.f32 %v737_v59, %v5036_v6  ;;  %v784_v54 = vmul.f32 %v740_v13, %v5036_v6  ;;  %v765_v19 = vsel %vm61_vm0, %v729_v35, 0.0 }
 0x365   :  { %766 = vadd.xlane.f32.xlu2 %v765_v19 }
 0x366   :  { %v799_v63 = vadd.f32 1e-05, %v783_v38  ;;  %v800_v12 = vadd.f32 1e-05, %v784_v54 }
 0x368   :  { %4624 = vrsqrt.f32 %v799_v63  ;;  %vm821_vm8 = vweird.f32 %v799_v63  ;;  %vm831_vm10 = vweird.f32 %v800_v12 }
 0x369   :  { %4626 = vrsqrt.f32 %v800_v12 }
 0x36b   :  { %v746_v25 = vpop.xlane.xlu2 %745 }
 0x36c   :  { %v743_v43 = vpop.xlane.xlu1 %742  ;;  %v786_v15 = vmul.f32 %v746_v25, %v5036_v6 }
 0x36d   :  { %v785_v57 = vmul.f32 %v743_v43, %v5036_v6 }
 0x36e   :  { %v4625_v28 = vpop.eup %4624  ;;  %v802_v8 = vadd.f32 1e-05, %v786_v15 }
 0x36f   :  { %v4627_v39 = vpop.eup %4626  ;;  %v816_v56 = vmul.f32 %v4625_v28, %v799_v63  ;;  %v801_v59 = vadd.f32 1e-05, %v785_v57  ;;  %vm822_vm6 = vweird.f32 %v4625_v28 }
 0x370   :  { %v826_v10 = vmul.f32 %v4627_v39, %v800_v12  ;;  %4628 = vrsqrt.f32 %v802_v8  ;;  %vm832_vm7 = vweird.f32 %v4627_v39  ;;  %vm823_vm9 = vmor %vm821_vm8, %vm822_vm6  ;;  %vm851_vm14 = vweird.f32 %v802_v8 }
 0x371   :  { %v817_v13 = vmul.f32 %v4625_v28, %v816_v56  ;;  %4630 = vrsqrt.f32 %v801_v59  ;;  %vm833_vm11 = vmor %vm831_vm10, %vm832_vm7  ;;  %vm841_vm15 = vweird.f32 %v801_v59 }
 0x372   :  { %v827_v35 = vmul.f32 %v4627_v39, %v826_v10 }
 0x373   :  { %v818_v38 = vmul.f32 0.5, %v817_v13  ;;  %v1095_v54 = vpop.permute.xlu2 %1094 }
 0x374   :  { %v828_v19 = vmul.f32 0.5, %v827_v35  ;;  %v1100_v46 = vsel %vm1098_vm5, %v1095_v54, %v5504_v23 }
 0x375   :  { %v819_v25 = vsub.f32 1.5, %v818_v38  ;;  %1135 = vmatpush.bf16.msrb.mxu2 %v1100_v46 }
 0x376   :  { %v4629_v43 = vpop.eup %4628  ;;  %v829_v15 = vsub.f32 1.5, %v828_v19 }
 0x377   :  { %v4631_v45 = vpop.eup %4630  ;;  %v820_v57 = vmul.f32 %v4625_v28, %v819_v25  ;;  %v846_v50 = vmul.f32 %v4629_v43, %v802_v8  ;;  %vm852_vm12 = vweird.f32 %v4629_v43 }
 0x378   :  { %v830_v56 = vmul.f32 %v4627_v39, %v829_v15  ;;  %v836_v10 = vmul.f32 %v4631_v45, %v801_v59  ;;  %vm842_vm13 = vweird.f32 %v4631_v45  ;;  %vm853_vm1 = vmor %vm851_vm14, %vm852_vm12 }
 0x379   :  { %v824_v13 = vsel %vm823_vm9, %v4625_v28, %v820_v57  ;;  %v847_v35 = vmul.f32 %v4629_v43, %v846_v50  ;;  %vm843_vm2 = vmor %vm841_vm15, %vm842_vm13 }
 0x37a   :  { %v975_v24 = vmul.f32 %v824_v13, %v5451_v41  ;;  %v834_v23 = vsel %vm833_vm11, %v4627_v39, %v830_v56  ;;  %v837_v38 = vmul.f32 %v4631_v45, %v836_v10 }
 0x37b   :  { %v976_v46 = vmul.f32 %v834_v23, %v5448_v5  ;;  %v848_v54 = vmul.f32 0.5, %v847_v35 }
 0x37c   :  { %v992_v19 = vmul.f32 %v5299_v2, %v975_v24  ;;  %v838_v22 = vmul.f32 0.5, %v837_v38 }
 0x37d   :  { %v993_v63 = vmul.f32 %v5299_v2, %v976_v46  ;;  %v849_v25 = vsub.f32 1.5, %v848_v54 }
 0x37e   :  { %v839_v15 = vsub.f32 1.5, %v838_v22  ;;  %v1012_v28 = vadd.f32 %v5438_v9, %v992_v19 }
 0x37f   :  { %v850_v12 = vmul.f32 %v4629_v43, %v849_v25  ;;  %v1013_v50 = vadd.f32 %v5438_v9, %v993_v63 }
 0x380   :  { %v840_v39 = vmul.f32 %v4631_v45, %v839_v15  ;;  %v1028_v5 = vmax.f32 %v1012_v28, 0.0 }
 0x381   :  { %v854_v41 = vsel %vm853_vm1, %v4629_v43, %v850_v12  ;;  %v1029_v24 = vmax.f32 %v1013_v50, 0.0 }
 0x382   :  { %v844_v57 = vsel %vm843_vm2, %v4631_v45, %v840_v39  ;;  %v978_v56 = vmul.f32 %v854_v41, %v5462_v20  ;;  %v1044_v22 = vadd.f32 %v1028_v5, %v533_v14 }
 0x383   :  { %v977_v10 = vmul.f32 %v844_v57, %v5464_v34  ;;  %v1045_v8 = vadd.f32 %v1029_v24, %v534_v18 }
 0x384   :  { %v1091_v13 = vpop.permute.xlu1 %1090  ;;  %v995_v43 = vmul.f32 %v5299_v2, %v978_v56 }
 0x385   :  { %v1099_v59 = vsel %vm1098_vm5, %v1091_v13, %v5516_v47  ;;  %v1060_v35 = vpack.c.bf16 %v1045_v8, %v1044_v22  ;;  %v994_v23 = vmul.f32 %v5299_v2, %v977_v10  ;;  %v758_v47 = vpop.xlane.xlu0 %757 }
 0x386   :  { %1136 = vmatpush.bf16.msrb.mxu2 %v1099_v59  ;;  %v1015_v14 = vadd.f32 %v5438_v9, %v995_v43  ;;  %v790_v38 = vmul.f32 %v758_v47, %v5036_v6 }
 0x387   :  { %4286 = vmatmul.msk.bf16.vlgmr.msrb.gmra.mxu3 %vm61_vm0, %v1060_v35  ;;  %v1014_v60 = vadd.f32 %v5438_v9, %v994_v23 }
 0x388   :  { %v1031_v18 = vmax.f32 %v1015_v14, 0.0  ;;  %v5597_v46 = vadd.f32 1e-05, %v790_v38 }
 0x389   :  { %4278 = vmatmul.msk.bf16.vlgmr.msrb.gmra.mxu2 %vm61_vm0, %v1060_v35  ;;  %v1030_v17 = vmax.f32 %v1014_v60, 0.0 }
 0x38a   :  { %v1047_v20 = vadd.f32 %v1031_v18, %v536_v31  ;;  %4632 = vrsqrt.f32 %v5597_v46  ;;  %vm891_vm11 = vweird.f32 %v5597_v46 }
 0x38b   :  { %v1046_v45 = vadd.f32 %v1030_v17, %v535_v32 }
 0x38d   :  { %v1061_v34 = vpack.c.bf16 %v1047_v20, %v1046_v45  ;;  %v761_v25 = vpop.xlane.xlu0 %760 }
 0x38e   :  { %v791_v50 = vmul.f32 %v761_v25, %v5036_v6 }
 0x390   :  { %v5602_v63 = vpop.eup %4632  ;;  %v5615_v8 = vadd.f32 1e-05, %v791_v50 }
 0x391   :  { %v886_v12 = vmul.f32 %v5602_v63, %v5597_v46  ;;  %vm892_vm10 = vweird.f32 %v5602_v63 }
 0x392   :  { %vm893_vm12 = vmor %vm891_vm11, %vm892_vm10 }
 0x393   :  { %v887_v10 = vmul.f32 %v5602_v63, %v886_v12 }
 0x395   :  { %v686_v60 = vpop.xlane.xlu0 %685  ;;  %v888_v18 = vmul.f32 0.5, %v887_v10 }
 0x396   :  { %v702_v38 = vmul.f32 %v686_v60, %v5036_v6 }
 0x397   :  { %4287 = vmatmul.msk.bf16.gmra.mxu3 %vm61_vm0, %v1061_v34 }
 0x399   :  { %4279 = vmatmul.msk.bf16.gmra.mxu2 %vm61_vm0, %v1061_v34 }
 0x3ac   :  { %v749_v54 = vpop.xlane.xlu2 %748 }
 0x3ad   :  { %v787_v19 = vmul.f32 %v749_v54, %v5036_v6 }
 0x3af   :  { %v803_v30 = vadd.f32 1e-05, %v787_v19  ;;  %v752_v32 = vpop.xlane.xlu1 %751 }
 0x3b0   :  { %v788_v29 = vmul.f32 %v752_v32, %v5036_v6 }
 0x3b1   :  { %4634 = vrsqrt.f32 %v803_v30  ;;  %vm861_vm4 = vweird.f32 %v803_v30 }
 0x3b2   :  { %v804_v31 = vadd.f32 1e-05, %v788_v29 }
 0x3b4   :  { %4636 = vrsqrt.f32 %v804_v31  ;;  %v674_v15 = vpop.xlane.xlu2 %673  ;;  %vm871_vm8 = vweird.f32 %v804_v31 }
 0x3b5   :  { %v698_v28 = vmul.f32 %v674_v15, %v5036_v6  ;;  %v889_v15 = vsub.f32 1.5, %v888_v18 }
 0x3b7   :  { %v4635_v39 = vpop.eup %4634  ;;  %v5609_v5 = vsub.f32 %v5528_v3, %v698_v28  ;;  %v755_v41 = vpop.xlane.xlu1 %754 }
 0x3b8   :  { %v856_v24 = vmul.f32 %v4635_v39, %v803_v30  ;;  %v789_v57 = vmul.f32 %v755_v41, %v5036_v6  ;;  %vm862_vm3 = vweird.f32 %v4635_v39 }
 0x3b9   :  { %v730_v56 = vmul.f32 %v5609_v5, %v5609_v5  ;;  %vm863_vm6 = vmor %vm861_vm4, %vm862_vm3  ;;  %vm901_vm4 = vweird.f32 %v5615_v8 }
 0x3ba   :  { %v4637_v22 = vpop.eup %4636  ;;  %v857_v13 = vmul.f32 %v4635_v39, %v856_v24  ;;  %v5617_v59 = vadd.f32 1e-05, %v789_v57  ;;  %v5638_v24 = vsub.f32 %v5499_v55, %v702_v38 }
 0x3bb   :  { %v866_v35 = vmul.f32 %v4637_v22, %v804_v31  ;;  %v768_v23 = vsel %vm61_vm0, %v730_v56, 0.0  ;;  %vm872_vm7 = vweird.f32 %v4637_v22 }
 0x3bc   :  { %v858_v3 = vmul.f32 0.5, %v857_v13  ;;  %4638 = vrsqrt.f32 %v5617_v59  ;;  %769 = vadd.xlane.f32.xlu1 %v768_v23  ;;  %v677_v43 = vpop.xlane.xlu2 %676  ;;  %vm873_vm9 = vmor %vm871_vm8, %vm872_vm7  ;;  %v890_v13 = vmul.f32 %v5602_v63, %v889_v15  ;;  %vm881_vm14 = vweird.f32 %v5617_v59 }
 0x3bd   :  { %v867_v14 = vmul.f32 %v4637_v22, %v866_v35  ;;  %v699_v17 = vmul.f32 %v677_v43, %v5036_v6  ;;  %4640 = vrsqrt.f32 %v5615_v8 }
 0x3be   :  { %v859_v45 = vsub.f32 1.5, %v858_v3 }
 0x3bf   :  { %v868_v20 = vmul.f32 0.5, %v867_v14  ;;  %v5624_v34 = vsub.f32 %v5536_v4, %v699_v17  ;;  %v680_v47 = vpop.xlane.xlu1 %679  ;;  %v734_v17 = vmul.f32 %v5638_v24, %v5638_v24 }
 0x3c0   :  { %v860_v54 = vmul.f32 %v4635_v39, %v859_v45  ;;  %v700_v19 = vmul.f32 %v680_v47, %v5036_v6  ;;  %v894_v45 = vsel %vm893_vm12, %v5602_v63, %v890_v13 }
 0x3c1   :  { %v869_v32 = vsub.f32 1.5, %v868_v20  ;;  %v731_v29 = vmul.f32 %v5624_v34, %v5624_v34  ;;  %v982_v63 = vmul.f32 %v894_v45, %v5473_v49 }
 0x3c2   :  { %v4639_v25 = vpop.eup %4638  ;;  %v864_v28 = vsel %vm863_vm6, %v4635_v39, %v860_v54  ;;  %v5631_v12 = vsub.f32 %v5540_v21, %v700_v19  ;;  %v780_v19 = vsel %vm61_vm0, %v734_v17, 0.0 }
 0x3c3   :  { %v979_v4 = vmul.f32 %v864_v28, %v5509_v33  ;;  %v870_v50 = vmul.f32 %v4637_v22, %v869_v32  ;;  %v876_v30 = vmul.f32 %v4639_v25, %v5617_v59  ;;  %v5635_v41 = vpop.eup %4640  ;;  %v771_v57 = vsel %vm61_vm0, %v731_v29, 0.0 }
 0x3c4   :  { %v764_v56 = vpop.xlane.xlu2 %763  ;;  %v732_v39 = vmul.f32 %v5631_v12, %v5631_v12  ;;  %772 = vadd.xlane.f32.xlu0 %v771_v57  ;;  %v896_v23 = vmul.f32 %v5635_v41, %v5615_v8  ;;  %vm882_vm13 = vweird.f32 %v4639_v25  ;;  %v7094_v59 = vmax.f32 %v5247_v48, 0.0 }
 0x3c5   :  { %v874_v21 = vsel %vm873_vm9, %v4637_v22, %v870_v50  ;;  %v877_v10 = vmul.f32 %v4639_v25, %v876_v30  ;;  %v792_v33 = vmul.f32 %v764_v56, %v5036_v6  ;;  %v996_v31 = vmul.f32 %v5299_v2, %v979_v4  ;;  %vm883_vm15 = vmor %vm881_vm14, %vm882_vm13 }
 0x3c6   :  { %v980_v55 = vmul.f32 %v874_v21, %v5512_v26  ;;  %v774_v35 = vsel %vm61_vm0, %v732_v39, 0.0  ;;  %v897_v46 = vmul.f32 %v5635_v41, %v896_v23  ;;  %v7093_v4 = vmax.f32 %v5243_v11, 0.0 }
 0x3c7   :  { %v878_v3 = vmul.f32 0.5, %v877_v10  ;;  %v808_v43 = vadd.f32 1e-05, %v792_v33  ;;  %v683_v22 = vpop.xlane.xlu1 %682  ;;  %775 = vadd.xlane.f32.xlu2 %v774_v35  ;;  %v1016_v60 = vadd.f32 %v5438_v9, %v996_v31  ;;  %vm902_vm2 = vweird.f32 %v5635_v41 }
 0x3c8   :  { %v701_v14 = vmul.f32 %v683_v22, %v5036_v6  ;;  %v997_v26 = vmul.f32 %v5299_v2, %v980_v55  ;;  %v898_v56 = vmul.f32 0.5, %v897_v46  ;;  %vm903_vm7 = vmor %vm901_vm4, %vm902_vm2 }
 0x3c9   :  { %v879_v18 = vsub.f32 1.5, %v878_v3  ;;  %4642 = vrsqrt.f32 %v808_v43  ;;  %v1032_v38 = vmax.f32 %v1016_v60, 0.0  ;;  %vm911_vm3 = vweird.f32 %v808_v43 }
 0x3ca   :  { %v5659_v20 = vsub.f32 %v5552_v37, %v701_v14  ;;  %v1017_v47 = vadd.f32 %v5438_v9, %v997_v26  ;;  %v7095_v14 = vmax.f32 %v5262_v52, 0.0 }
 0x3cb   :  { %v880_v54 = vmul.f32 %v4639_v25, %v879_v18  ;;  %v1048_v50 = vadd.f32 %v1032_v38, %v7093_v4  ;;  %v7096_v18 = vmax.f32 %v5265_v58, 0.0  ;;  %v7098_v58 = vmax.f32 %v5281_v1, 0.0 }
 0x3cc   :  { %v733_v32 = vmul.f32 %v5659_v20, %v5659_v20  ;;  %v1033_v29 = vmax.f32 %v1017_v47, 0.0  ;;  %781 = vadd.xlane.f32.xlu0 %v780_v19 }
 0x3cd   :  { %v884_v15 = vsel %vm883_vm15, %v4639_v25, %v880_v54  ;;  %v899_v25 = vsub.f32 1.5, %v898_v56 }
 0x3ce   :  { %v981_v37 = vmul.f32 %v884_v15, %v5524_v40  ;;  %v777_v28 = vsel %vm61_vm0, %v733_v32, 0.0  ;;  %v1049_v30 = vadd.f32 %v1033_v29, %v7094_v59  ;;  %v999_v40 = vmul.f32 %v5299_v2, %v982_v63  ;;  %v5708_v29 = vld [vmem:[%s7078_s3] sm:$0x7f] }
 0x3cf   :  { %v4643_v57 = vpop.eup %4642  ;;  %778 = vadd.xlane.f32.xlu1 %v777_v28  ;;  %v900_v13 = vmul.f32 %v5635_v41, %v899_v25  ;;  %v5703_v32 = vperm.slane %v5296_v7, 1  ;;  %v5711_v63 = vperm.slane %v5708_v29, 1 }
 0x3d0   :  { %v906_v39 = vmul.f32 %v4643_v57, %v808_v43  ;;  %v1062_v21 = vpack.c.bf16 %v1049_v30, %v1048_v50  ;;  %v998_v10 = vmul.f32 %v5299_v2, %v981_v37  ;;  %vm912_vm1 = vweird.f32 %v4643_v57 }
 0x3d1   :  { %v1019_v31 = vadd.f32 %v5438_v9, %v999_v40  ;;  %vm913_vm6 = vmor %vm911_vm3, %vm912_vm1  ;;  %v904_v22 = vsel %vm903_vm7, %v5635_v41, %v900_v13 }
 0x3d2   :  { %v907_v49 = vmul.f32 %v4643_v57, %v906_v39  ;;  %4280 = vmatmul.msk.bf16.gmra.mxu2 %vm61_vm0, %v1062_v21  ;;  %4288 = vmatmul.msk.bf16.gmra.mxu3 %vm61_vm0, %v1062_v21  ;;  %v1018_v33 = vadd.f32 %v5438_v9, %v998_v10  ;;  %v983_v26 = vmul.f32 %v904_v22, %v5485_v61  ;;  %v7097_v61 = vmax.f32 %v5284_v51, 0.0 }
 0x3d3   :  { %v1035_v3 = vmax.f32 %v1019_v31, 0.0 }
 0x3d4   :  { %v908_v11 = vmul.f32 0.5, %v907_v49  ;;  %v1034_v35 = vmax.f32 %v1018_v33, 0.0  ;;  %v1000_v8 = vmul.f32 %v5299_v2, %v983_v26 }
 0x3d5   :  { %v1051_v45 = vadd.f32 %v1035_v3, %v7096_v18 }
 0x3d6   :  { %v909_v48 = vsub.f32 1.5, %v908_v11  ;;  %v1050_v17 = vadd.f32 %v1034_v35, %v7095_v14 }
 0x3d8   :  { %v910_v55 = vmul.f32 %v4643_v57, %v909_v48  ;;  %v1063_v43 = vpack.c.bf16 %v1051_v45, %v1050_v17  ;;  %v767_v28 = vpop.xlane.xlu2 %766 }
 0x3d9   :  { %v793_v30 = vmul.f32 %v767_v28, %v5036_v6 }
 0x3da   :  { %v914_v23 = vsel %vm913_vm6, %v4643_v57, %v910_v55 }
 0x3db   :  { %v984_v60 = vmul.f32 %v914_v23, %v5543_v16  ;;  %v1020_v16 = vadd.f32 %v5438_v9, %v1000_v8  ;;  %v809_v57 = vadd.f32 1e-05, %v793_v30 }
 0x3dd   :  { %v1001_v47 = vmul.f32 %v5299_v2, %v984_v60  ;;  %v1036_v38 = vmax.f32 %v1020_v16, 0.0  ;;  %4644 = vrsqrt.f32 %v809_v57  ;;  %vm921_vm9 = vweird.f32 %v809_v57 }
 0x3df   :  { %v1021_v41 = vadd.f32 %v5438_v9, %v1001_v47  ;;  %v1052_v54 = vadd.f32 %v1036_v38, %v7098_v58 }
 0x3e1   :  { %v1037_v52 = vmax.f32 %v1021_v41, 0.0 }
 0x3e2   :  { %4281 = vmatmul.msk.bf16.gmra.mxu2 %vm61_vm0, %v1063_v43  ;;  %4289 = vmatmul.msk.bf16.gmra.mxu3 %vm61_vm0, %v1063_v43 }
 0x3e3   :  { %v1053_v46 = vadd.f32 %v1037_v52, %v7097_v61  ;;  %v4645_v25 = vpop.eup %4644 }
 0x3e4   :  { %v916_v48 = vmul.f32 %v4645_v25, %v809_v57  ;;  %vm922_vm8 = vweird.f32 %v4645_v25 }
 0x3e5   :  { %v1064_v19 = vpack.c.bf16 %v1053_v46, %v1052_v54  ;;  %vm923_vm10 = vmor %vm921_vm9, %vm922_vm8 }
 0x3e6   :  { %v917_v31 = vmul.f32 %v4645_v25, %v916_v48 }
 0x3e8   :  { %v918_v13 = vmul.f32 0.5, %v917_v31 }
 0x3ea   :  { %v919_v3 = vsub.f32 1.5, %v918_v13 }
 0x3ec   :  { %v920_v22 = vmul.f32 %v4645_v25, %v919_v3 }
 0x3ee   :  { %v924_v18 = vsel %vm923_vm10, %v4645_v25, %v920_v22 }
 0x3ef   :  { %v985_v16 = vmul.f32 %v924_v18, %v5559_v36  ;;  %v7100_v18 = vmax.f32 %v5328_v27, 0.0 }
 0x3f1   :  { %v1002_v54 = vmul.f32 %v5299_v2, %v985_v16 }
 0x3f2   :  { %4282 = vmatmul.msk.bf16.gmra.mxu2 %vm61_vm0, %v1064_v19  ;;  %4290 = vmatmul.msk.bf16.gmra.mxu3 %vm61_vm0, %v1064_v19 }
 0x40a   :  { %v1187_v51 = vpop.f32.mrf.mxu3 }
 0x40b   :  { %v1188_v1 = vadd.f32 %v1187_v51, %v5703_v32 }
 0x40c   :  { %v1138_v15 = vpop.f32.mrf.mxu2 }
 0x40d   :  { %1229 = vst.msk [vmem:[#allocation2 + $0x8] sm:$0xff] %vm1098_vm5, %v1188_v1  ;;  %v5716_v37 = vadd.f32 %v1138_v15, %v5711_v63 }
 0x40f   :  { %1227 = vst [vmem:[#allocation2] sm:$0xff] %v5716_v37  ;;  %1286 = vrot.lane.b32.xlu0 %v5716_v37, %s4878_s6 }
 0x412   :  { %v1189_v7 = vpop.f32.mrf.mxu3 }
 0x413   :  { %v1190_v4 = vadd.f32 %v1189_v7, %v5703_v32 }
 0x414   :  { %v1140_v50 = vpop.f32.mrf.mxu2 }
 0x415   :  { %1231 = vst.msk [vmem:[#allocation2 + $0x18] sm:$0xff] %vm1098_vm5, %v1190_v4  ;;  %v5724_v59 = vadd.f32 %v1140_v50, %v5711_v63 }
 0x417   :  { %1230 = vst [vmem:[#allocation2 + $0x10] sm:$0xff] %v5724_v59 }
 0x41a   :  { %v1192_v56 = vpop.f32.mrf.mxu3 }
 0x41b   :  { %v1193_v39 = vadd.f32 %v1192_v56, %v5703_v32  ;;  %v1022_v56 = vadd.f32 %v5438_v9, %v1002_v54 }
 0x41c   :  { %v1143_v21 = vpop.f32.mrf.mxu2 }
 0x41d   :  { %1233 = vst.msk [vmem:[#allocation2 + $0x28] sm:$0xff] %vm1098_vm5, %v1193_v39  ;;  %v5731_v10 = vadd.f32 %v1143_v21, %v5711_v63  ;;  %v1038_v48 = vmax.f32 %v1022_v56, 0.0 }
 0x41f   :  { %1232 = vst [vmem:[#allocation2 + $0x20] sm:$0xff] %v5731_v10 }
 0x422   :  { %v1194_v49 = vpop.f32.mrf.mxu3 }
 0x423   :  { %v1195_v40 = vadd.f32 %v1194_v49, %v5703_v32 }
 0x424   :  { %v1145_v11 = vpop.f32.mrf.mxu2 }
 0x425   :  { %1235 = vst.msk [vmem:[#allocation2 + $0x38] sm:$0xff] %vm1098_vm5, %v1195_v40  ;;  %v5737_v33 = vadd.f32 %v1145_v11, %v5711_v63 }
 0x427   :  { %1234 = vst [vmem:[#allocation2 + $0x30] sm:$0xff] %v5737_v33 }
 0x42f   :  { %v770_v55 = vpop.xlane.xlu1 %769 }
 0x430   :  { %v794_v35 = vmul.f32 %v770_v55, %v5036_v6 }
 0x432   :  { %v810_v23 = vadd.f32 1e-05, %v794_v35 }
 0x434   :  { %4646 = vrsqrt.f32 %v810_v23  ;;  %vm931_vm12 = vweird.f32 %v810_v23 }
 0x437   :  { %v773_v60 = vpop.xlane.xlu0 %772 }
 0x438   :  { %v795_v14 = vmul.f32 %v773_v60, %v5036_v6 }
 0x43a   :  { %v4647_v17 = vpop.eup %4646  ;;  %v776_v26 = vpop.xlane.xlu2 %775  ;;  %v811_v43 = vadd.f32 1e-05, %v795_v14 }
 0x43b   :  { %v926_v45 = vmul.f32 %v4647_v17, %v810_v23  ;;  %v796_v47 = vmul.f32 %v776_v26, %v5036_v6  ;;  %vm932_vm11 = vweird.f32 %v4647_v17 }
 0x43c   :  { %4648 = vrsqrt.f32 %v811_v43  ;;  %vm933_vm13 = vmor %vm931_vm12, %vm932_vm11  ;;  %vm941_vm15 = vweird.f32 %v811_v43  ;;  %vm1304_vm12 = vcmask 785408  }
 0x43d   :  { %v927_v8 = vmul.f32 %v4647_v17, %v926_v45  ;;  %v812_v41 = vadd.f32 1e-05, %v796_v47 }
 0x43f   :  { %v928_v52 = vmul.f32 0.5, %v927_v8  ;;  %4650 = vrsqrt.f32 %v812_v41  ;;  %v782_v38 = vpop.xlane.xlu0 %781  ;;  %vm951_vm3 = vweird.f32 %v812_v41 }
 0x440   :  { %v798_v46 = vmul.f32 %v782_v38, %v5036_v6 }
 0x441   :  { %v929_v61 = vsub.f32 1.5, %v928_v52 }
 0x442   :  { %v779_v58 = vpop.xlane.xlu1 %778  ;;  %v4649_v19 = vpop.eup %4648  ;;  %v5746_v1 = vadd.f32 1e-05, %v798_v46 }
 0x443   :  { %v930_v51 = vmul.f32 %v4647_v17, %v929_v61  ;;  %v797_v15 = vmul.f32 %v779_v58, %v5036_v6  ;;  %v936_v7 = vmul.f32 %v4649_v19, %v811_v43  ;;  %vm942_vm14 = vweird.f32 %v4649_v19 }
 0x444   :  { %4652 = vrsqrt.f32 %v5746_v1  ;;  %vm943_vm2 = vmor %vm941_vm15, %vm942_vm14  ;;  %vm971_vm10 = vweird.f32 %v5746_v1 }
 0x445   :  { %v4651_v36 = vpop.eup %4650  ;;  %v934_v28 = vsel %vm933_vm13, %v4647_v17, %v930_v51  ;;  %v813_v4 = vadd.f32 1e-05, %v797_v15  ;;  %v937_v30 = vmul.f32 %v4649_v19, %v936_v7  ;;  %v7099_v17 = vmax.f32 %v5331_v42, 0.0 }
 0x446   :  { %v986_v50 = vmul.f32 %v934_v28, %v5609_v5  ;;  %v946_v57 = vmul.f32 %v4651_v36, %v812_v41  ;;  %vm952_vm1 = vweird.f32 %v4651_v36 }
 0x447   :  { %4654 = vrsqrt.f32 %v813_v4  ;;  %v938_v39 = vmul.f32 0.5, %v937_v30  ;;  %vm953_vm4 = vmor %vm951_vm3, %vm952_vm1  ;;  %v1054_v26 = vadd.f32 %v1038_v48, %v7099_v17  ;;  %vm961_vm8 = vweird.f32 %v813_v4  ;;  %v4538_v17 = vld [vmem:[%s7079_s2 + $0x38] sm:$0xf0] }
 0x448   :  { %v947_v21 = vmul.f32 %v4651_v36, %v946_v57  ;;  %v1003_v49 = vmul.f32 %v5299_v2, %v986_v50 }
 0x449   :  { %v939_v40 = vsub.f32 1.5, %v938_v39  ;;  %v7101_v39 = vmax.f32 %v5388_v53, 0.0  ;;  %v4320_v53 = vld [vmem:[%s7079_s2 + $0x78] sm:$0xf] }
 0x44a   :  { %v948_v6 = vmul.f32 0.5, %v947_v21  ;;  %v1023_v25 = vadd.f32 %v5438_v9, %v1003_v49  ;;  %v4653_v11 = vpop.eup %4652 }
 0x44b   :  { %v940_v31 = vmul.f32 %v4649_v19, %v939_v40  ;;  %v966_v5 = vmul.f32 %v4653_v11, %v5746_v1  ;;  %vm972_vm7 = vweird.f32 %v4653_v11  ;;  %v7102_v1 = vmax.f32 %v5379_v0, 0.0  ;;  %v4312_v0 = vld [vmem:[%s7079_s2 + $0x50] sm:$0xf] }
 0x44c   :  { %v949_v13 = vsub.f32 1.5, %v948_v6  ;;  %v1039_v35 = vmax.f32 %v1023_v25, 0.0  ;;  %vm973_vm11 = vmor %vm971_vm10, %vm972_vm7 }
 0x44d   :  { %v4655_v55 = vpop.eup %4654  ;;  %v944_v23 = vsel %vm943_vm2, %v4649_v19, %v940_v31  ;;  %v967_v22 = vmul.f32 %v4653_v11, %v966_v5  ;;  %v4541_v31 = vld [vmem:[%s7079_s2 + $0x7c] sm:$0xf]  ;;  %v4322_v5 = vld [vmem:[%s7079_s2 + $0x8c] sm:$0xf0] }
 0x44e   :  { %v950_v3 = vmul.f32 %v4651_v36, %v949_v13  ;;  %v956_v60 = vmul.f32 %v4655_v55, %v813_v4  ;;  %v987_v14 = vmul.f32 %v944_v23, %v5624_v34  ;;  %v1055_v45 = vadd.f32 %v1039_v35, %v7100_v18  ;;  %v4539_v23 = vld [vmem:[%s7079_s2 + $0x54] sm:$0xf] }
 0x44f   :  { %v968_v47 = vmul.f32 0.5, %v967_v22  ;;  %vm962_vm6 = vweird.f32 %v4655_v55  ;;  %v5813_v35 = vor.u32 %v4541_v31, %v4322_v5 }
 0x450   :  { %v954_v43 = vsel %vm953_vm4, %v4651_v36, %v950_v3  ;;  %v957_v8 = vmul.f32 %v4655_v55, %v956_v60  ;;  %v1065_v41 = vpack.c.bf16 %v1055_v45, %v1054_v26  ;;  %v1004_v34 = vmul.f32 %v5299_v2, %v987_v14  ;;  %vm963_vm9 = vmor %vm961_vm8, %vm962_vm6  ;;  %v4314_v3 = vld [vmem:[%s7079_s2 + $0x64] sm:$0xf0] }
 0x451   :  { %v988_v16 = vmul.f32 %v954_v43, %v5631_v12  ;;  %v969_v42 = vsub.f32 1.5, %v968_v47  ;;  %v4304_v14 = vld [vmem:[%s7079_s2 + $0x28] sm:$0xf]  ;;  %1376 = vmatpush.bf16.msrb.mxu1 %v5813_v35  ;;  %v5834_v45 = vor.u32 %v4539_v23, %v4314_v3  ;;  %1535 = vmatpush.bf16.msra.mxu3 %v5813_v35 }
 0x452   :  { %v958_v52 = vmul.f32 0.5, %v957_v8  ;;  %4283 = vmatmul.msk.bf16.gmra.mxu2 %vm61_vm0, %v1065_v41  ;;  %4291 = vmatmul.msk.bf16.gmra.mxu3 %vm61_vm0, %v1065_v41  ;;  %v1024_v51 = vadd.f32 %v5438_v9, %v1004_v34  ;;  %v5840_v47 = vor.u32 %v4538_v17, %v4304_v14 }
 0x453   :  { %v1005_v38 = vmul.f32 %v5299_v2, %v988_v16  ;;  %v970_v15 = vmul.f32 %v4653_v11, %v969_v42 }
 0x454   :  { %v959_v61 = vsub.f32 1.5, %v958_v52  ;;  %v1040_v28 = vmax.f32 %v1024_v51, 0.0  ;;  %v7103_v52 = vmax.f32 %v5363_v44, 0.0 }
 0x455   :  { %v1148_v46 = vpop.f32.mrf.mxu2  ;;  %v1197_v27 = vpop.f32.mrf.mxu3  ;;  %v1025_v58 = vadd.f32 %v5438_v9, %v1005_v38  ;;  %v974_v50 = vsel %vm973_vm11, %v4653_v11, %v970_v15  ;;  %v4542_v11 = vld [vmem:[%s7079_s2 + $0x88] sm:$0xf0]  ;;  %1377 = vmatpush.bf16.msrb.mxu1 %v5834_v45  ;;  %1536 = vmatpush.bf16.msra.mxu3 %v5834_v45 }
 0x456   :  { %v960_v54 = vmul.f32 %v4655_v55, %v959_v61  ;;  %v5767_v12 = vadd.f32 %v1148_v46, %v5711_v63  ;;  %v1198_v19 = vadd.f32 %v1197_v27, %v5703_v32  ;;  %v990_v40 = vmul.f32 %v974_v50, %v5638_v24  ;;  %v4540_v24 = vld [vmem:[%s7079_s2 + $0x60] sm:$0xf0]  ;;  %v4537_v50 = vld [vmem:[%s7079_s2 + $0x2c] sm:$0xf] }
 0x457   :  { %v1041_v7 = vmax.f32 %v1025_v58, 0.0  ;;  %v1056_v6 = vadd.f32 %v1040_v28, %v7102_v1  ;;  %v5793_v48 = vor.u32 %v4542_v11, %v4320_v53  ;;  %v7104_v61 = vmax.f32 %v5352_v62, 0.0  ;;  %v4536_v28 = vld [vmem:[%s7079_s2 + $0x10] sm:$0xf0] }
 0x458   :  { %1236 = vst [vmem:[#allocation2 + $0x40] sm:$0xff] %v5767_v12  ;;  %v964_v36 = vsel %vm963_vm9, %v4655_v55, %v960_v54  ;;  %v1007_v13 = vmul.f32 %v5299_v2, %v990_v40  ;;  %v5811_v55 = vor.u32 %v4540_v24, %v4312_v0 }
 0x459   :  { %1237 = vst.msk [vmem:[#allocation2 + $0x48] sm:$0xff] %vm1098_vm5, %v1198_v19  ;;  %v989_v30 = vmul.f32 %v964_v36, %v5659_v20  ;;  %v1057_v21 = vadd.f32 %v1041_v7, %v7101_v39  ;;  %1362 = vmatpush.bf16.msrb.mxu0 %v5793_v48  ;;  %1521 = vmatpush.bf16.msra.mxu2 %v5793_v48  ;;  %v4296_v36 = vld [vmem:[%s7079_s2] sm:$0xf]  ;;  %v4879_v39 = vmov 0  }
 0x45a   :  { %v1027_v43 = vadd.f32 %v5438_v9, %v1007_v13 }
 0x45b   :  { %v1066_v20 = vpack.c.bf16 %v1057_v21, %v1056_v6  ;;  %v1006_v25 = vmul.f32 %v5299_v2, %v989_v30  ;;  %v5881_v30 = vor.u32 %v4536_v28, %v4296_v36  ;;  %v4535_v6 = vld [vmem:[%s7079_s2 + $0x4] sm:$0xf] }
 0x45c   :  { %v1043_v16 = vmax.f32 %v1027_v43, 0.0 }
 0x45d   :  { %v1150_v57 = vpop.f32.mrf.mxu2  ;;  %v1199_v56 = vpop.f32.mrf.mxu3  ;;  %v1026_v60 = vadd.f32 %v5438_v9, %v1006_v25  ;;  %1363 = vmatpush.bf16.msrb.mxu0 %v5811_v55  ;;  %1522 = vmatpush.bf16.msra.mxu2 %v5811_v55 }
 0x45e   :  { %v5778_v4 = vadd.f32 %v1150_v57, %v5711_v63  ;;  %v1200_v49 = vadd.f32 %v1199_v56, %v5703_v32  ;;  %v1059_v46 = vadd.f32 %v1043_v16, %v7104_v61  ;;  %v4306_v57 = vld [vmem:[%s7079_s2 + $0x3c] sm:$0xf0] }
 0x45f   :  { %v1042_v8 = vmax.f32 %v1026_v60, 0.0  ;;  %v5886_v56 = vor.u32 %v4537_v50, %v4306_v57 }
 0x460   :  { %1238 = vst [vmem:[#allocation2 + $0x50] sm:$0xff] %v5778_v4 }
 0x461   :  { %1239 = vst.msk [vmem:[#allocation2 + $0x58] sm:$0xff] %vm1098_vm5, %v1200_v49  ;;  %1364 = vmatpush.bf16.msrb.mxu0 %v5840_v47  ;;  %1523 = vmatpush.bf16.msra.mxu2 %v5840_v47  ;;  %v1058_v34 = vadd.f32 %v1042_v8, %v7103_v52 }
 0x462   :  { %4284 = vmatmul.msk.bf16.gmra.mxu2 %vm61_vm0, %v1066_v20  ;;  %4292 = vmatmul.msk.bf16.gmra.mxu3 %vm61_vm0, %v1066_v20  ;;  %v4298_v20 = vld [vmem:[%s7079_s2 + $0x14] sm:$0xf0] }
 0x463   :  { %v1067_v27 = vpack.c.bf16 %v1059_v46, %v1058_v34  ;;  %1378 = vmatpush.bf16.msrb.mxu1 %v5886_v56  ;;  %1537 = vmatpush.bf16.msra.mxu3 %v5886_v56  ;;  %v5916_v25 = vor.u32 %v4535_v6, %v4298_v20 }
 0x465   :  { %v1153_v2 = vpop.f32.mrf.mxu2  ;;  %v1202_v22 = vpop.f32.mrf.mxu3  ;;  %1365 = vmatpush.bf16.msrb.mxu0 %v5881_v30  ;;  %1524 = vmatpush.bf16.msra.mxu2 %v5881_v30 }
 0x466   :  { %v5830_v26 = vadd.f32 %v1153_v2, %v5711_v63  ;;  %v1203_v18 = vadd.f32 %v1202_v22, %v5703_v32 }
 0x467   :  { %1379 = vmatpush.bf16.msrb.mxu1 %v5916_v25  ;;  %1538 = vmatpush.bf16.msra.mxu3 %v5916_v25 }
 0x468   :  { %1240 = vst [vmem:[#allocation2 + $0x60] sm:$0xff] %v5830_v26  ;;  %1366 = vmatmul.bf16.vlgmr.msrb.gmra.mxu0 %v4879_v39 }
 0x469   :  { %1241 = vst.msk [vmem:[#allocation2 + $0x68] sm:$0xff] %vm1098_vm5, %v1203_v18  ;;  %1679 = vmatpush.bf16.msra.mxu0 %v5793_v48  ;;  %1837 = vmatpush.bf16.msrb.mxu2 %v5793_v48 }
 0x46a   :  { %1380 = vmatmul.bf16.vlgmr.msrb.gmra.mxu1 %v4879_v39 }
 0x46b   :  { %1693 = vmatpush.bf16.msra.mxu1 %v5813_v35  ;;  %1851 = vmatpush.bf16.msrb.mxu3 %v5813_v35 }
 0x46d   :  { %v1155_v9 = vpop.f32.mrf.mxu2  ;;  %v1204_v41 = vpop.f32.mrf.mxu3  ;;  %1680 = vmatpush.bf16.msra.mxu0 %v5811_v55  ;;  %1838 = vmatpush.bf16.msrb.mxu2 %v5811_v55 }
 0x46e   :  { %v5851_v38 = vadd.f32 %v1155_v9, %v5711_v63  ;;  %v1205_v42 = vadd.f32 %v1204_v41, %v5703_v32 }
 0x46f   :  { %1694 = vmatpush.bf16.msra.mxu1 %v5834_v45  ;;  %1852 = vmatpush.bf16.msrb.mxu3 %v5834_v45 }
 0x470   :  { %1242 = vst [vmem:[#allocation2 + $0x70] sm:$0xff] %v5851_v38 }
 0x471   :  { %1243 = vst.msk [vmem:[#allocation2 + $0x78] sm:$0xff] %vm1098_vm5, %v1205_v42  ;;  %1681 = vmatpush.bf16.msra.mxu0 %v5840_v47  ;;  %1839 = vmatpush.bf16.msrb.mxu2 %v5840_v47 }
 0x472   :  { %4285 = vmatmul.msk.bf16.gmra.mxu2 %vm61_vm0, %v1067_v27  ;;  %4293 = vmatmul.msk.bf16.gmra.mxu3 %vm61_vm0, %v1067_v27  ;;  %v5977_v27 = vperm.slane %v5708_v29, 2 }
 0x473   :  { %1695 = vmatpush.bf16.msra.mxu1 %v5886_v56  ;;  %1853 = vmatpush.bf16.msrb.mxu3 %v5886_v56 }
 0x475   :  { %v1158_v58 = vpop.f32.mrf.mxu2  ;;  %v1207_v44 = vpop.f32.mrf.mxu3  ;;  %1682 = vmatpush.bf16.msra.mxu0 %v5881_v30  ;;  %1840 = vmatpush.bf16.msrb.mxu2 %v5881_v30 }
 0x476   :  { %v5861_v54 = vadd.f32 %v1158_v58, %v5711_v63  ;;  %v1208_v19 = vadd.f32 %v1207_v44, %v5703_v32 }
 0x477   :  { %1696 = vmatpush.bf16.msra.mxu1 %v5916_v25  ;;  %1854 = vmatpush.bf16.msrb.mxu3 %v5916_v25 }
 0x478   :  { %1244 = vst [vmem:[#allocation2 + $0x80] sm:$0xff] %v5861_v54 }
 0x479   :  { %1245 = vst.msk [vmem:[#allocation2 + $0x88] sm:$0xff] %vm1098_vm5, %v1208_v19  ;;  %1995 = vmatpush.bf16.msrb.mxu0 %v5793_v48 }
 0x47b   :  { %2009 = vmatpush.bf16.msrb.mxu1 %v5813_v35 }
 0x47d   :  { %v1160_v62 = vpop.f32.mrf.mxu2  ;;  %v1209_v51 = vpop.f32.mrf.mxu3  ;;  %1996 = vmatpush.bf16.msrb.mxu0 %v5811_v55 }
 0x47e   :  { %v5867_v15 = vadd.f32 %v1160_v62, %v5711_v63  ;;  %v1210_v7 = vadd.f32 %v1209_v51, %v5703_v32 }
 0x47f   :  { %2010 = vmatpush.bf16.msrb.mxu1 %v5834_v45 }
 0x480   :  { %1246 = vst [vmem:[#allocation2 + $0x90] sm:$0xff] %v5867_v15 }
 0x481   :  { %1247 = vst.msk [vmem:[#allocation2 + $0x98] sm:$0xff] %vm1098_vm5, %v1210_v7  ;;  %1997 = vmatpush.bf16.msrb.mxu0 %v5840_v47 }
 0x483   :  { %2011 = vmatpush.bf16.msrb.mxu1 %v5886_v56 }
 0x485   :  { %1998 = vmatpush.bf16.msrb.mxu0 %v5881_v30 }
 0x487   :  { %2012 = vmatpush.bf16.msrb.mxu1 %v5916_v25 }
 0x4d5   :  { %v1163_v21 = vpop.f32.mrf.mxu2  ;;  %v1212_v49 = vpop.f32.mrf.mxu3 }
 0x4d6   :  { %v5904_v40 = vadd.f32 %v1163_v21, %v5711_v63  ;;  %v1213_v1 = vadd.f32 %v1212_v49, %v5703_v32 }
 0x4d8   :  { %1248 = vst [vmem:[#allocation2 + $0xa0] sm:$0xff] %v5904_v40 }
 0x4d9   :  { %1249 = vst.msk [vmem:[#allocation2 + $0xa8] sm:$0xff] %vm1098_vm5, %v1213_v1 }
 0x4dd   :  { %v1165_v53 = vpop.f32.mrf.mxu2  ;;  %v1214_v11 = vpop.f32.mrf.mxu3 }
 0x4de   :  { %v5923_v0 = vadd.f32 %v1165_v53, %v5711_v63  ;;  %v1215_v24 = vadd.f32 %v1214_v11, %v5703_v32 }
 0x4e0   :  { %1250 = vst [vmem:[#allocation2 + $0xb0] sm:$0xff] %v5923_v0 }
 0x4e1   :  { %1251 = vst.msk [vmem:[#allocation2 + $0xb8] sm:$0xff] %vm1098_vm5, %v1215_v24 }
 0x4e5   :  { %v1168_v31 = vpop.f32.mrf.mxu2  ;;  %v1217_v13 = vpop.f32.mrf.mxu3 }
 0x4e6   :  { %v5935_v5 = vadd.f32 %v1168_v31, %v5711_v63  ;;  %v1218_v23 = vadd.f32 %v1217_v13, %v5703_v32  ;;  %v1367_v61 = vpop.f32.mrf.mxu0  ;;  %v4867_v31 = vld [vmem:[%s7078_s3 + $0x8] sm:$0x7f] }
 0x4e7   :  { %v5990_v13 = vperm.slane %v4867_v31, 2 }
 0x4e8   :  { %1252 = vst [vmem:[#allocation2 + $0xc0] sm:$0xff] %v5935_v5 }
 0x4e9   :  { %1253 = vst.msk [vmem:[#allocation2 + $0xc8] sm:$0xff] %vm1098_vm5, %v1218_v23 }
 0x4ed   :  { %v1170_v3 = vpop.f32.mrf.mxu2  ;;  %v1219_v2 = vpop.f32.mrf.mxu3 }
 0x4ee   :  { %v5944_v22 = vadd.f32 %v1170_v3, %v5711_v63  ;;  %v1220_v60 = vadd.f32 %v1219_v2, %v5703_v32  ;;  %v1369_v57 = vpop.f32.mrf.mxu0  ;;  %v1381_v3 = vpop.f32.mrf.mxu1 }
 0x4f0   :  { %1254 = vst [vmem:[#allocation2 + $0xd0] sm:$0xff] %v5944_v22 }
 0x4f1   :  { %1255 = vst.msk [vmem:[#allocation2 + $0xd8] sm:$0xff] %vm1098_vm5, %v1220_v60 }
 0x4f5   :  { %v1173_v14 = vpop.f32.mrf.mxu2  ;;  %v1222_v17 = vpop.f32.mrf.mxu3 }
 0x4f6   :  { %v1174_v18 = vadd.f32 %v1173_v14, %v5711_v63  ;;  %v1223_v43 = vadd.f32 %v1222_v17, %v5703_v32 }
 0x4f8   :  { %1256 = vst [vmem:[#allocation2 + $0xe0] sm:$0xff] %v1174_v18  ;;  %1278 = vrot.lane.b32.xlu2 %v1174_v18, %s4877_s0  ;;  %v1428_v18 = vadd.f32 %v1381_v3, %v5990_v13 }
 0x4f9   :  { %1257 = vst.msk [vmem:[#allocation2 + $0xe8] sm:$0xff] %vm1098_vm5, %v1223_v43 }
 0x4fd   :  { %v1175_v8 = vpop.f32.mrf.mxu2  ;;  %v1224_v16 = vpop.f32.mrf.mxu3 }
 0x4fe   :  { %v1176_v9 = vadd.f32 %v1175_v8, %v5711_v63  ;;  %v1225_v41 = vadd.f32 %v1224_v16, %v5703_v32  ;;  %v1287_v32 = vpop.permute.xlu0 %1286 }
 0x500   :  { %1258 = vst [vmem:[#allocation2 + $0xf0] sm:$0xff] %v1176_v9  ;;  %v5958_v52 = vld [vmem:[#allocation2 + $0xe8] sm:$0xff]  ;;  %1280 = vrot.lane.b32.xlu1 %v1176_v9, %s4877_s0  ;;  %1288 = vrot.lane.b32.xlu2 %v5724_v59, %s4878_s6 }
 0x501   :  { %1259 = vst.msk [vmem:[#allocation2 + $0xf8] sm:$0xff] %vm1098_vm5, %v1225_v41  ;;  %1294 = vrot.lane.b32.xlu0 %v5958_v52, %s4875_s11 }
 0x508   :  { %v5966_v34 = vld [vmem:[#allocation2 + $0xf8] sm:$0xff]  ;;  %1307 = vrot.lane.b32.xlu2 %v5716_v37, %s4877_s0 }
 0x509   :  { %1309 = vrot.lane.b32.xlu0 %v5724_v59, %s4877_s0  ;;  %1296 = vrot.lane.b32.xlu1 %v5966_v34, %s4875_s11 }
 0x552   :  { %v1279_v63 = vpop.permute.xlu2 %1278 }
 0x553   :  { %v1300_v42 = vsel %vm61_vm0, %v5716_v37, %v1279_v63 }
 0x554   :  { %v1302_v44 = vsel %vm1098_vm5, %v1300_v42, %v1287_v32 }
 0x55a   :  { %v1289_v28 = vpop.permute.xlu2 %1288 }
 0x562   :  { %v1308_v16 = vpop.permute.xlu2 %1307 }
 0x572   :  { %v1281_v46 = vpop.permute.xlu1 %1280 }
 0x573   :  { %v1295_v58 = vpop.permute.xlu0 %1294  ;;  %v1301_v7 = vsel %vm61_vm0, %v5724_v59, %v1281_v46 }
 0x574   :  { %v1305_v19 = vsel %vm1304_vm12, %v1302_v44, %v1295_v58  ;;  %v1303_v50 = vsel %vm1098_vm5, %v1301_v7, %v1289_v28 }
 0x575   :  { %v1386_v62 = vadd.f32 %v1367_v61, %v1305_v19  ;;  %v1313_v61 = vsel %vm61_vm0, %v1308_v16, %v5958_v52 }
 0x577   :  { %v1388_v51 = vadd.f32 %v1386_v62, %v5977_v27  ;;  %v1383_v62 = vpop.f32.mrf.mxu1 }
 0x579   :  { %v4326_v36 = vmul.f32 -1.442695, %v1388_v51 }
 0x57b   :  { %4656 = vpow2.f32 %v4326_v36  ;;  %v1297_v37 = vpop.permute.xlu1 %1296  ;;  %v1310_v36 = vpop.permute.xlu0 %1309 }
 0x57c   :  { %v1306_v29 = vsel %vm1304_vm12, %v1303_v50, %v1297_v37  ;;  %v1429_v37 = vadd.f32 %v1383_v62, %v5990_v13  ;;  %v1314_v52 = vsel %vm61_vm0, %v1310_v36, %v5966_v34 }
 0x57d   :  { %v1387_v21 = vadd.f32 %v1369_v57, %v1306_v29 }
 0x57f   :  { %v1389_v49 = vadd.f32 %v1387_v21, %v5977_v27 }
 0x581   :  { %v4657_v1 = vpop.eup %4656  ;;  %v4327_v6 = vmul.f32 -1.442695, %v1389_v49 }
 0x582   :  { %v1396_v20 = vadd.f32 1.0, %v4657_v1  ;;  %v6006_v1 = vld [vmem:[#allocation2 + $0xc8] sm:$0xff] }
 0x583   :  { %4658 = vpow2.f32 %v4327_v6 }
 0x584   :  { %4660 = vrcp.f32 %v1396_v20  ;;  %v1409_v2 = vand.u32 2147483648, %v1396_v20  ;;  %v1407_v14 = vand.u32 2147483647, %v1396_v20  ;;  %vm1403_vm14 = vweird.f32 %v1396_v20 }
 0x586   :  { %v1410_v8 = vor.u32 1.1754944e-38, %v1409_v2  ;;  %vm1408_vm1 = vcmp.eq.f32.partialorder %v1407_v14, 8.507059e+37 }
 0x589   :  { %v4659_v53 = vpop.eup %4658 }
 0x58a   :  { %v4661_v11 = vpop.eup %4660  ;;  %v1397_v59 = vadd.f32 1.0, %v4659_v53 }
 0x58b   :  { %v1399_v24 = vmul.f32 %v4661_v11, %v1396_v20  ;;  %vm1404_vm13 = vweird.f32 %v4661_v11 }
 0x58c   :  { %4662 = vrcp.f32 %v1397_v59  ;;  %vm1405_vm15 = vmor %vm1403_vm14, %vm1404_vm13  ;;  %v1424_v46 = vand.u32 2147483648, %v1397_v59  ;;  %v1422_v19 = vand.u32 2147483647, %v1397_v59  ;;  %vm1418_vm3 = vweird.f32 %v1397_v59 }
 0x58d   :  { %v1400_v23 = vsub.f32 1.0, %v1399_v24 }
 0x58e   :  { %v1425_v7 = vor.u32 1.1754944e-38, %v1424_v46  ;;  %vm1423_vm6 = vcmp.eq.f32.partialorder %v1422_v19, 8.507059e+37 }
 0x58f   :  { %v1401_v60 = vmul.f32 %v4661_v11, %v1400_v23 }
 0x591   :  { %v1402_v17 = vadd.f32 %v4661_v11, %v1401_v60 }
 0x592   :  { %v4663_v43 = vpop.eup %4662 }
 0x593   :  { %v1406_v9 = vsel %vm1405_vm15, %v4661_v11, %v1402_v17  ;;  %v1414_v41 = vmul.f32 %v4663_v43, %v1397_v59  ;;  %vm1419_vm2 = vweird.f32 %v4663_v43  ;;  %v6031_v17 = vld [vmem:[#allocation2 + $0xd8] sm:$0xff] }
 0x594   :  { %v1411_v32 = vsel %vm1408_vm1, %v1410_v8, %v1406_v9  ;;  %vm1420_vm4 = vmor %vm1418_vm3, %vm1419_vm2 }
 0x595   :  { %v1430_v63 = vmul.f32 %v1428_v18, %v1411_v32  ;;  %v1415_v42 = vsub.f32 1.0, %v1414_v41  ;;  %v1436_v11 = vsub.f32 1.0, %v1411_v32 }
 0x597   :  { %v1432_v58 = vadd.f32 %v1430_v63, %v1313_v61  ;;  %v1416_v44 = vmul.f32 %v4663_v43, %v1415_v42 }
 0x599   :  { %4664 = vtanh.f32 %v1432_v58  ;;  %v1417_v51 = vadd.f32 %v4663_v43, %v1416_v44 }
 0x59b   :  { %v1421_v28 = vsel %vm1420_vm4, %v4663_v43, %v1417_v51 }
 0x59c   :  { %v1426_v50 = vsel %vm1423_vm6, %v1425_v7, %v1421_v28 }
 0x59d   :  { %v1431_v57 = vmul.f32 %v1429_v37, %v1426_v50  ;;  %v1437_v34 = vsub.f32 1.0, %v1426_v50  ;;  %v1449_v20 = vmul.f32 0.0, %v1426_v50 }
 0x59f   :  { %v4665_v29 = vpop.eup %4664  ;;  %v1433_v21 = vadd.f32 %v1431_v57, %v1314_v52 }
 0x5a0   :  { %1440 = vrot.lane.b32.xlu1 %v4665_v29, %s4877_s0 }
 0x5a1   :  { %4666 = vtanh.f32 %v1433_v21 }
 0x5a7   :  { %v4667_v49 = vpop.eup %4666 }
 0x5a8   :  { %1473 = vrot.lane.b32.xlu1 %v5935_v5, %s4877_s0  ;;  %1442 = vrot.lane.b32.xlu2 %v4667_v49, %s4877_s0 }
 0x5b0   :  { %1483 = vrot.lane.b32.xlu1 %v5737_v33, %s4878_s6  ;;  %1475 = vrot.lane.b32.xlu2 %v5944_v22, %s4877_s0  ;;  %v1448_v22 = vmul.f32 0.0, %v1411_v32 }
 0x5b8   :  { %1501 = vrot.lane.b32.xlu1 %v5731_v10, %s4877_s0  ;;  %1489 = vrot.lane.b32.xlu2 %v6006_v1, %s4875_s11 }
 0x5c0   :  { %1503 = vrot.lane.b32.xlu2 %v5737_v33, %s4877_s0 }
 0x602   :  { %v1443_v5 = vpop.permute.xlu2 %1442 }
 0x603   :  { %v1447_v6 = vmul.f32 %v1443_v5, %v1437_v34 }
 0x605   :  { %v6014_v53 = vadd.f32 %v1449_v20, %v1447_v6 }
 0x607   :  { %v6018_v31 = vpack.c.bf16 %v6014_v53, %v6014_v53 }
 0x609   :  { %v1510_v60 = vunpack.c.l.b16 %v6018_v31 }
 0x60a   :  { %v1476_v43 = vpop.permute.xlu2 %1475 }
 0x60b   :  { %v1496_v62 = vsel %vm61_vm0, %v5737_v33, %v1476_v43 }
 0x612   :  { %v1441_v59 = vpop.permute.xlu1 %1440  ;;  %v1490_v32 = vpop.permute.xlu2 %1489 }
 0x613   :  { %v1446_v24 = vmul.f32 %v1441_v59, %v1436_v11 }
 0x615   :  { %v6020_v23 = vadd.f32 %v1448_v22, %v1446_v24 }
 0x617   :  { %v6024_v3 = vpack.c.bf16 %v6020_v23, %v6020_v23 }
 0x619   :  { %v1509_v2 = vunpack.c.l.b16 %v6024_v3 }
 0x61a   :  { %v1474_v8 = vpop.permute.xlu1 %1473 }
 0x61b   :  { %v1511_v14 = vpack.c.b16 %v1510_v60, %v1509_v2  ;;  %v1495_v9 = vsel %vm61_vm0, %v5731_v10, %v1474_v8 }
 0x61d   :  { %1512 = vrot.lane.b32.xlu0 %v1511_v14, %s4877_s0 }
 0x622   :  { %v1484_v58 = vpop.permute.xlu1 %1483 }
 0x623   :  { %v1498_v51 = vsel %vm1098_vm5, %v1496_v62, %v1484_v58  ;;  %v1504_v58 = vpop.permute.xlu2 %1503 }
 0x625   :  { %1481 = vrot.lane.b32.xlu0 %v5731_v10, %s4878_s6 }
 0x62a   :  { %v1502_v24 = vpop.permute.xlu1 %1501 }
 0x62d   :  { %1491 = vrot.lane.b32.xlu0 %v6031_v17, %s4875_s11 }
 0x68f   :  { %v1513_v18 = vpop.permute.xlu0 %1512 }
 0x690   :  { %4328 = vmatmul.msk.bf16.vlgmr.msra.gmra.mxu2 %vm1098_vm5, %v1513_v18  ;;  %4329 = vmatmul.msk.bf16.vlgmr.msra.gmra.mxu3 %vm1098_vm5, %v1513_v18 }
 0x691   :  { %2153 = vmatpush.bf16.msra.mxu2 %v5793_v48  ;;  %2167 = vmatpush.bf16.msra.mxu3 %v5813_v35 }
 0x695   :  { %2154 = vmatpush.bf16.msra.mxu2 %v5811_v55  ;;  %2168 = vmatpush.bf16.msra.mxu3 %v5834_v45 }
 0x697   :  { %v1482_v16 = vpop.permute.xlu0 %1481 }
 0x698   :  { %v1497_v41 = vsel %vm1098_vm5, %v1495_v9, %v1482_v16  ;;  %v1507_v16 = vsel %vm61_vm0, %v1502_v24, %v6006_v1  ;;  %v1508_v1 = vsel %vm61_vm0, %v1504_v58, %v6031_v17 }
 0x699   :  { %2155 = vmatpush.bf16.msra.mxu2 %v5840_v47  ;;  %2169 = vmatpush.bf16.msra.mxu3 %v5886_v56  ;;  %v1499_v63 = vsel %vm1304_vm12, %v1497_v41, %v1490_v32 }
 0x69d   :  { %2156 = vmatpush.bf16.msra.mxu2 %v5881_v30  ;;  %2170 = vmatpush.bf16.msra.mxu3 %v5916_v25 }
 0x69f   :  { %v1492_v44 = vpop.permute.xlu0 %1491 }
 0x6a0   :  { %v1500_v10 = vsel %vm1304_vm12, %v1498_v51, %v1492_v44 }
 0x713   :  { %v1526_v42 = vpop.f32.mrf.mxu2  ;;  %v1540_v5 = vpop.f32.mrf.mxu3 }
 0x714   :  { %v1545_v61 = vadd.f32 %v1526_v42, %v1499_v63  ;;  %v1587_v60 = vadd.f32 %v1540_v5, %v5990_v13 }
 0x716   :  { %v1547_v46 = vadd.f32 %v1545_v61, %v5977_v27 }
 0x718   :  { %v4330_v19 = vmul.f32 -1.442695, %v1547_v46 }
 0x71a   :  { %4668 = vpow2.f32 %v4330_v19 }
 0x71b   :  { %v1528_v7 = vpop.f32.mrf.mxu2  ;;  %v1542_v42 = vpop.f32.mrf.mxu3 }
 0x71c   :  { %v1546_v36 = vadd.f32 %v1528_v7, %v1500_v10  ;;  %v1588_v19 = vadd.f32 %v1542_v42, %v5990_v13 }
 0x71e   :  { %v1548_v28 = vadd.f32 %v1546_v36, %v5977_v27 }
 0x720   :  { %v4669_v37 = vpop.eup %4668  ;;  %v4331_v50 = vmul.f32 -1.442695, %v1548_v28  ;;  %v6069_v28 = vld [vmem:[#allocation2 + $0xa8] sm:$0xff] }
 0x721   :  { %v1555_v57 = vadd.f32 1.0, %v4669_v37 }
 0x722   :  { %4670 = vpow2.f32 %v4331_v50 }
 0x723   :  { %4672 = vrcp.f32 %v1555_v57  ;;  %v1568_v34 = vand.u32 2147483648, %v1555_v57  ;;  %v1566_v20 = vand.u32 2147483647, %v1555_v57  ;;  %vm1562_vm8 = vweird.f32 %v1555_v57 }
 0x725   :  { %v1569_v22 = vor.u32 1.1754944e-38, %v1568_v34  ;;  %vm1567_vm10 = vcmp.eq.f32.partialorder %v1566_v20, 8.507059e+37 }
 0x728   :  { %v4671_v52 = vpop.eup %4670 }
 0x729   :  { %v4673_v29 = vpop.eup %4672  ;;  %v1556_v21 = vadd.f32 1.0, %v4671_v52 }
 0x72a   :  { %v1558_v49 = vmul.f32 %v4673_v29, %v1555_v57  ;;  %vm1563_vm7 = vweird.f32 %v4673_v29 }
 0x72b   :  { %4674 = vrcp.f32 %v1556_v21  ;;  %vm1564_vm9 = vmor %vm1562_vm8, %vm1563_vm7  ;;  %v1583_v9 = vand.u32 2147483648, %v1556_v21  ;;  %v1581_v63 = vand.u32 2147483647, %v1556_v21  ;;  %vm1577_vm13 = vweird.f32 %v1556_v21 }
 0x72c   :  { %v1559_v33 = vsub.f32 1.0, %v1558_v49 }
 0x72d   :  { %v1584_v46 = vor.u32 1.1754944e-38, %v1583_v9  ;;  %vm1582_vm15 = vcmp.eq.f32.partialorder %v1581_v63, 8.507059e+37 }
 0x72e   :  { %v1560_v6 = vmul.f32 %v4673_v29, %v1559_v33 }
 0x730   :  { %v1561_v11 = vadd.f32 %v4673_v29, %v1560_v6 }
 0x731   :  { %v4675_v59 = vpop.eup %4674 }
 0x732   :  { %v1565_v2 = vsel %vm1564_vm9, %v4673_v29, %v1561_v11  ;;  %v1573_v14 = vmul.f32 %v4675_v59, %v1556_v21  ;;  %vm1578_vm11 = vweird.f32 %v4675_v59 }
 0x733   :  { %v1570_v18 = vsel %vm1567_vm10, %v1569_v22, %v1565_v2  ;;  %vm1579_vm14 = vmor %vm1577_vm13, %vm1578_vm11 }
 0x734   :  { %v1589_v43 = vmul.f32 %v1587_v60, %v1570_v18  ;;  %v1574_v8 = vsub.f32 1.0, %v1573_v14  ;;  %v1595_v37 = vsub.f32 1.0, %v1570_v18  ;;  %v1607_v50 = vmul.f32 %v1570_v18, %v6020_v23 }
 0x736   :  { %v1591_v41 = vadd.f32 %v1589_v43, %v1507_v16  ;;  %v1575_v32 = vmul.f32 %v4675_v59, %v1574_v8 }
 0x738   :  { %4676 = vtanh.f32 %v1591_v41  ;;  %v1576_v61 = vadd.f32 %v4675_v59, %v1575_v32 }
 0x73a   :  { %v1580_v44 = vsel %vm1579_vm14, %v4675_v59, %v1576_v61 }
 0x73b   :  { %v1585_v62 = vsel %vm1582_vm15, %v1584_v46, %v1580_v44 }
 0x73c   :  { %v1590_v51 = vmul.f32 %v1588_v19, %v1585_v62  ;;  %v1596_v57 = vsub.f32 1.0, %v1585_v62  ;;  %v1608_v29 = vmul.f32 %v1585_v62, %v6014_v53  ;;  %v6096_v53 = vld [vmem:[#allocation2 + $0xb8] sm:$0xff] }
 0x73e   :  { %v4677_v10 = vpop.eup %4676  ;;  %v1592_v7 = vadd.f32 %v1590_v51, %v1508_v1 }
 0x73f   :  { %1599 = vrot.lane.b32.xlu0 %v4677_v10, %s4877_s0 }
 0x740   :  { %4678 = vtanh.f32 %v1592_v7 }
 0x746   :  { %v4679_v36 = vpop.eup %4678 }
 0x747   :  { %1601 = vrot.lane.b32.xlu1 %v4679_v36, %s4877_s0  ;;  %1631 = vrot.lane.b32.xlu0 %v5904_v40, %s4877_s0 }
 0x74f   :  { %1633 = vrot.lane.b32.xlu1 %v5923_v0, %s4877_s0  ;;  %1641 = vrot.lane.b32.xlu0 %v5778_v4, %s4878_s6 }
 0x757   :  { %1647 = vrot.lane.b32.xlu1 %v6069_v28, %s4875_s11  ;;  %1659 = vrot.lane.b32.xlu0 %v5767_v12, %s4877_s0 }
 0x75f   :  { %1661 = vrot.lane.b32.xlu1 %v5778_v4, %s4877_s0 }
 0x7b1   :  { %v1600_v17 = vpop.permute.xlu0 %1599 }
 0x7b2   :  { %v1605_v40 = vmul.f32 %v1600_v17, %v1595_v37 }
 0x7b4   :  { %v6078_v0 = vadd.f32 %v1607_v50, %v1605_v40 }
 0x7b6   :  { %v6083_v49 = vpack.c.bf16 %v6078_v0, %v6078_v0 }
 0x7b8   :  { %v1667_v34 = vunpack.c.l.b16 %v6083_v49 }
 0x7b9   :  { %v1602_v52 = vpop.permute.xlu1 %1601  ;;  %v1632_v59 = vpop.permute.xlu0 %1631 }
 0x7ba   :  { %v1606_v21 = vmul.f32 %v1602_v52, %v1596_v57  ;;  %v1653_v24 = vsel %vm61_vm0, %v5767_v12, %v1632_v59 }
 0x7bc   :  { %v6085_v33 = vadd.f32 %v1608_v29, %v1606_v21 }
 0x7be   :  { %v6089_v5 = vpack.c.bf16 %v6085_v33, %v6085_v33 }
 0x7c0   :  { %v1668_v23 = vunpack.c.l.b16 %v6089_v5 }
 0x7c1   :  { %v1634_v11 = vpop.permute.xlu1 %1633  ;;  %v1642_v16 = vpop.permute.xlu0 %1641 }
 0x7c2   :  { %v1669_v6 = vpack.c.b16 %v1668_v23, %v1667_v34  ;;  %v1654_v9 = vsel %vm61_vm0, %v5778_v4, %v1634_v11 }
 0x7c3   :  { %v1656_v63 = vsel %vm1098_vm5, %v1654_v9, %v1642_v16 }
 0x7c4   :  { %1670 = vrot.lane.b32.xlu2 %v1669_v6, %s4877_s0 }
 0x7c9   :  { %v1648_v60 = vpop.permute.xlu1 %1647  ;;  %v1660_v52 = vpop.permute.xlu0 %1659 }
 0x7ca   :  { %v1665_v11 = vsel %vm61_vm0, %v1660_v52, %v6069_v28 }
 0x7cc   :  { %1639 = vrot.lane.b32.xlu2 %v5767_v12, %s4878_s6 }
 0x7d4   :  { %1649 = vrot.lane.b32.xlu2 %v6096_v53, %s4875_s11 }
 0x81e   :  { %v1671_v20 = vpop.permute.xlu2 %1670 }
 0x81f   :  { %4332 = vmatmul.msk.bf16.vlgmr.msra.gmra.mxu0 %vm1098_vm5, %v1671_v20  ;;  %4333 = vmatmul.msk.bf16.vlgmr.msra.gmra.mxu1 %vm1098_vm5, %v1671_v20 }
 0x820   :  { %2311 = vmatpush.bf16.msra.mxu0 %v5793_v48  ;;  %2325 = vmatpush.bf16.msra.mxu1 %v5813_v35 }
 0x824   :  { %2312 = vmatpush.bf16.msra.mxu0 %v5811_v55  ;;  %2326 = vmatpush.bf16.msra.mxu1 %v5834_v45 }
 0x826   :  { %v1640_v22 = vpop.permute.xlu2 %1639 }
 0x827   :  { %v1655_v2 = vsel %vm1098_vm5, %v1653_v24, %v1640_v22 }
 0x828   :  { %2313 = vmatpush.bf16.msra.mxu0 %v5840_v47  ;;  %2327 = vmatpush.bf16.msra.mxu1 %v5886_v56  ;;  %v1657_v14 = vsel %vm1304_vm12, %v1655_v2, %v1648_v60 }
 0x82c   :  { %2314 = vmatpush.bf16.msra.mxu0 %v5881_v30  ;;  %2328 = vmatpush.bf16.msra.mxu1 %v5916_v25 }
 0x82e   :  { %v1650_v41 = vpop.permute.xlu2 %1649 }
 0x82f   :  { %v1658_v12 = vsel %vm1304_vm12, %v1656_v63, %v1650_v41 }
 0x89c   :  { %v1684_v18 = vpop.f32.mrf.mxu0  ;;  %v1698_v7 = vpop.f32.mrf.mxu1 }
 0x89d   :  { %v1703_v43 = vadd.f32 %v1684_v18, %v1657_v14  ;;  %v1745_v21 = vadd.f32 %v1698_v7, %v5990_v13 }
 0x89f   :  { %v1705_v8 = vadd.f32 %v1703_v43, %v5977_v27  ;;  %v1662_v43 = vpop.permute.xlu1 %1661 }
 0x8a0   :  { %v1666_v28 = vsel %vm61_vm0, %v1662_v43, %v6096_v53 }
 0x8a1   :  { %v4334_v32 = vmul.f32 -1.442695, %v1705_v8 }
 0x8a3   :  { %4680 = vpow2.f32 %v4334_v32 }
 0x8a4   :  { %v1686_v42 = vpop.f32.mrf.mxu0  ;;  %v1700_v60 = vpop.f32.mrf.mxu1 }
 0x8a5   :  { %v1704_v61 = vadd.f32 %v1686_v42, %v1658_v12  ;;  %v1746_v16 = vadd.f32 %v1700_v60, %v5990_v13  ;;  %v6134_v42 = vld [vmem:[#allocation2 + $0x88] sm:$0xff] }
 0x8a7   :  { %v1706_v46 = vadd.f32 %v1704_v61, %v5977_v27 }
 0x8a9   :  { %v4681_v58 = vpop.eup %4680  ;;  %v4335_v44 = vmul.f32 -1.442695, %v1706_v46 }
 0x8aa   :  { %v1713_v19 = vadd.f32 1.0, %v4681_v58 }
 0x8ab   :  { %4682 = vpow2.f32 %v4335_v44 }
 0x8ac   :  { %4684 = vrcp.f32 %v1713_v19  ;;  %v1726_v36 = vand.u32 2147483648, %v1713_v19  ;;  %v1724_v37 = vand.u32 2147483647, %v1713_v19  ;;  %vm1720_vm2 = vweird.f32 %v1713_v19 }
 0x8ae   :  { %v1727_v57 = vor.u32 1.1754944e-38, %v1726_v36  ;;  %vm1725_vm4 = vcmp.eq.f32.partialorder %v1724_v37, 8.507059e+37 }
 0x8b1   :  { %v4683_v62 = vpop.eup %4682 }
 0x8b2   :  { %v4685_v51 = vpop.eup %4684  ;;  %v1714_v1 = vadd.f32 1.0, %v4683_v62 }
 0x8b3   :  { %v1716_v4 = vmul.f32 %v4685_v51, %v1713_v19  ;;  %vm1721_vm1 = vweird.f32 %v4685_v51 }
 0x8b4   :  { %4686 = vrcp.f32 %v1714_v1  ;;  %vm1722_vm3 = vmor %vm1720_vm2, %vm1721_vm1  ;;  %v1741_v59 = vand.u32 2147483648, %v1714_v1  ;;  %v1739_v2 = vand.u32 2147483647, %v1714_v1  ;;  %vm1735_vm7 = vweird.f32 %v1714_v1 }
 0x8b5   :  { %v1717_v10 = vsub.f32 1.0, %v1716_v4 }
 0x8b6   :  { %v1742_v18 = vor.u32 1.1754944e-38, %v1741_v59  ;;  %vm1740_vm9 = vcmp.eq.f32.partialorder %v1739_v2, 8.507059e+37 }
 0x8b7   :  { %v1718_v17 = vmul.f32 %v4685_v51, %v1717_v10 }
 0x8b9   :  { %v1719_v40 = vadd.f32 %v4685_v51, %v1718_v17 }
 0x8ba   :  { %v4687_v50 = vpop.eup %4686 }
 0x8bb   :  { %v1723_v29 = vsel %vm1722_vm3, %v4685_v51, %v1719_v40  ;;  %v1731_v34 = vmul.f32 %v4687_v50, %v1714_v1  ;;  %vm1736_vm6 = vweird.f32 %v4687_v50 }
 0x8bc   :  { %v1728_v23 = vsel %vm1725_vm4, %v1727_v57, %v1723_v29  ;;  %vm1737_vm8 = vmor %vm1735_vm7, %vm1736_vm6 }
 0x8bd   :  { %v1747_v6 = vmul.f32 %v1745_v21, %v1728_v23  ;;  %v1732_v20 = vsub.f32 1.0, %v1731_v34  ;;  %v1753_v61 = vsub.f32 1.0, %v1728_v23  ;;  %v1765_v58 = vmul.f32 %v1728_v23, %v6078_v0 }
 0x8bf   :  { %v1749_v22 = vadd.f32 %v1747_v6, %v1665_v11  ;;  %v1733_v24 = vmul.f32 %v4687_v50, %v1732_v20 }
 0x8c1   :  { %4688 = vtanh.f32 %v1749_v22  ;;  %v1734_v14 = vadd.f32 %v4687_v50, %v1733_v24 }
 0x8c3   :  { %v1738_v8 = vsel %vm1737_vm8, %v4687_v50, %v1734_v14 }
 0x8c4   :  { %v1743_v9 = vsel %vm1740_vm9, %v1742_v18, %v1738_v8 }
 0x8c5   :  { %v1748_v41 = vmul.f32 %v1746_v16, %v1743_v9  ;;  %v1754_v19 = vsub.f32 1.0, %v1743_v9  ;;  %v1766_v51 = vmul.f32 %v1743_v9, %v6085_v33  ;;  %v6161_v33 = vld [vmem:[#allocation2 + $0x98] sm:$0xff] }
 0x8c7   :  { %v4689_v32 = vpop.eup %4688  ;;  %v1750_v63 = vadd.f32 %v1748_v41, %v1666_v28 }
 0x8c8   :  { %1757 = vrot.lane.b32.xlu2 %v4689_v32, %s4877_s0 }
 0x8c9   :  { %4690 = vtanh.f32 %v1750_v63 }
 0x8cf   :  { %v4691_v12 = vpop.eup %4690 }
 0x8d0   :  { %1789 = vrot.lane.b32.xlu2 %v5861_v54, %s4877_s0  ;;  %1759 = vrot.lane.b32.xlu0 %v4691_v12, %s4877_s0 }
 0x8d8   :  { %1799 = vrot.lane.b32.xlu2 %v5851_v38, %s4878_s6  ;;  %1791 = vrot.lane.b32.xlu0 %v5867_v15, %s4877_s0 }
 0x8e0   :  { %1817 = vrot.lane.b32.xlu2 %v5830_v26, %s4877_s0  ;;  %1805 = vrot.lane.b32.xlu0 %v6134_v42, %s4875_s11 }
 0x8e8   :  { %1819 = vrot.lane.b32.xlu0 %v5851_v38, %s4877_s0 }
 0x922   :  { %v1758_v53 = vpop.permute.xlu2 %1757 }
 0x923   :  { %v1763_v46 = vmul.f32 %v1758_v53, %v1753_v61 }
 0x925   :  { %v6143_v44 = vadd.f32 %v1765_v58, %v1763_v46 }
 0x927   :  { %v6148_v4 = vpack.c.bf16 %v6143_v44, %v6143_v44 }
 0x929   :  { %v1825_v36 = vunpack.c.l.b16 %v6148_v4 }
 0x92a   :  { %v1790_v50 = vpop.permute.xlu2 %1789 }
 0x932   :  { %v1800_v21 = vpop.permute.xlu2 %1799 }
 0x93a   :  { %v1818_v32 = vpop.permute.xlu2 %1817 }
 0x942   :  { %v1760_v62 = vpop.permute.xlu0 %1759 }
 0x943   :  { %v1764_v1 = vmul.f32 %v1760_v62, %v1754_v19  ;;  %v1823_v19 = vsel %vm61_vm0, %v1818_v32, %v6134_v42 }
 0x945   :  { %v6150_v10 = vadd.f32 %v1766_v51, %v1764_v1 }
 0x947   :  { %v6154_v7 = vpack.c.bf16 %v6150_v10, %v6150_v10 }
 0x949   :  { %v1826_v0 = vunpack.c.l.b16 %v6154_v7 }
 0x94a   :  { %v1792_v40 = vpop.permute.xlu0 %1791 }
 0x94b   :  { %v1827_v17 = vpack.c.b16 %v1826_v0, %v1825_v36 }
 0x94d   :  { %1828 = vrot.lane.b32.xlu1 %v1827_v17, %s4877_s0 }
 0x952   :  { %v1806_v52 = vpop.permute.xlu0 %1805 }
 0x955   :  { %1797 = vrot.lane.b32.xlu1 %v5830_v26, %s4878_s6 }
 0x95d   :  { %1807 = vrot.lane.b32.xlu1 %v6161_v33, %s4875_s11 }
 0x9bf   :  { %v1829_v37 = vpop.permute.xlu1 %1828 }
 0x9c0   :  { %4336 = vmatmul.msk.bf16.vlgmr.msrb.gmra.mxu2 %vm1098_vm5, %v1829_v37  ;;  %4337 = vmatmul.msk.bf16.vlgmr.msrb.gmra.mxu3 %vm1098_vm5, %v1829_v37 }
 0x9c1   :  { %2469 = vmatpush.bf16.msrb.mxu2 %v5793_v48  ;;  %2483 = vmatpush.bf16.msrb.mxu3 %v5813_v35  ;;  %v1811_v48 = vsel %vm61_vm0, %v5830_v26, %v1790_v50 }
 0x9c5   :  { %2470 = vmatpush.bf16.msrb.mxu2 %v5811_v55  ;;  %2484 = vmatpush.bf16.msrb.mxu3 %v5834_v45 }
 0x9c7   :  { %v1798_v57 = vpop.permute.xlu1 %1797 }
 0x9c8   :  { %v1813_v35 = vsel %vm1098_vm5, %v1811_v48, %v1798_v57 }
 0x9c9   :  { %2471 = vmatpush.bf16.msrb.mxu2 %v5840_v47  ;;  %2485 = vmatpush.bf16.msrb.mxu3 %v5886_v56  ;;  %v1815_v55 = vsel %vm1304_vm12, %v1813_v35, %v1806_v52 }
 0x9cd   :  { %2472 = vmatpush.bf16.msrb.mxu2 %v5881_v30  ;;  %2486 = vmatpush.bf16.msrb.mxu3 %v5916_v25  ;;  %v1812_v30 = vsel %vm61_vm0, %v5851_v38, %v1792_v40  ;;  %v1820_v40 = vpop.permute.xlu0 %1819 }
 0x9ce   :  { %v1814_v34 = vsel %vm1098_vm5, %v1812_v30, %v1800_v21  ;;  %v1824_v42 = vsel %vm61_vm0, %v1820_v40, %v6161_v33  ;;  %v6197_v30 = vld [vmem:[#allocation2 + $0x68] sm:$0xff] }
 0x9cf   :  { %v1808_v56 = vpop.permute.xlu1 %1807 }
 0x9d0   :  { %v1816_v26 = vsel %vm1304_vm12, %v1814_v34, %v1808_v56 }
 0xa43   :  { %v1842_v45 = vpop.f32.mrf.mxu2  ;;  %v1856_v18 = vpop.f32.mrf.mxu3 }
 0xa44   :  { %v1861_v29 = vadd.f32 %v1842_v45, %v1815_v55  ;;  %v1903_v12 = vadd.f32 %v1856_v18, %v5990_v13 }
 0xa46   :  { %v1863_v47 = vadd.f32 %v1861_v29, %v5977_v27  ;;  %v1941_v29 = vld [vmem:[#allocation2 + $0x60] sm:$0xff] }
 0xa48   :  { %v4338_v25 = vmul.f32 -1.442695, %v1863_v47  ;;  %v1943_v47 = vld [vmem:[#allocation2 + $0x70] sm:$0xff] }
 0xa4a   :  { %4692 = vpow2.f32 %v4338_v25 }
 0xa4b   :  { %v1844_v23 = vpop.f32.mrf.mxu2  ;;  %v1858_v0 = vpop.f32.mrf.mxu3 }
 0xa4c   :  { %v1862_v6 = vadd.f32 %v1844_v23, %v1816_v26  ;;  %v1904_v57 = vadd.f32 %v1858_v0, %v5990_v13 }
 0xa4e   :  { %v1864_v20 = vadd.f32 %v1862_v6, %v5977_v27 }
 0xa50   :  { %v4693_v11 = vpop.eup %4692  ;;  %v4339_v59 = vmul.f32 -1.442695, %v1864_v20 }
 0xa51   :  { %v1871_v22 = vadd.f32 1.0, %v4693_v11 }
 0xa52   :  { %4694 = vpow2.f32 %v4339_v59 }
 0xa53   :  { %4696 = vrcp.f32 %v1871_v22  ;;  %v1884_v43 = vand.u32 2147483648, %v1871_v22  ;;  %v1882_v16 = vand.u32 2147483647, %v1871_v22  ;;  %vm1878_vm11 = vweird.f32 %v1871_v22 }
 0xa55   :  { %v1885_v28 = vor.u32 1.1754944e-38, %v1884_v43  ;;  %vm1883_vm14 = vcmp.eq.f32.partialorder %v1882_v16, 8.507059e+37 }
 0xa58   :  { %v4695_v24 = vpop.eup %4694 }
 0xa59   :  { %v4697_v2 = vpop.eup %4696  ;;  %v1872_v38 = vadd.f32 1.0, %v4695_v24  ;;  %v4868_v24 = vld [vmem:[#allocation2 + $0x80] sm:$0xff] }
 0xa5a   :  { %v1874_v60 = vmul.f32 %v4697_v2, %v1871_v22  ;;  %vm1879_vm10 = vweird.f32 %v4697_v2 }
 0xa5b   :  { %4698 = vrcp.f32 %v1872_v38  ;;  %vm1880_vm13 = vmor %vm1878_vm11, %vm1879_vm10  ;;  %v1899_v62 = vand.u32 2147483648, %v1872_v38  ;;  %v1897_v36 = vand.u32 2147483647, %v1872_v38  ;;  %vm1893_vm1 = vweird.f32 %v1872_v38 }
 0xa5c   :  { %v1875_v14 = vsub.f32 1.0, %v1874_v60 }
 0xa5d   :  { %v1900_v37 = vor.u32 1.1754944e-38, %v1899_v62  ;;  %vm1898_vm3 = vcmp.eq.f32.partialorder %v1897_v36, 8.507059e+37 }
 0xa5e   :  { %v1876_v8 = vmul.f32 %v4697_v2, %v1875_v14 }
 0xa60   :  { %v1877_v9 = vadd.f32 %v4697_v2, %v1876_v8 }
 0xa61   :  { %v4699_v41 = vpop.eup %4698 }
 0xa62   :  { %v1881_v63 = vsel %vm1880_vm13, %v4697_v2, %v1877_v9  ;;  %v1889_v53 = vmul.f32 %v4699_v41, %v1872_v38  ;;  %vm1894_vm15 = vweird.f32 %v4699_v41 }
 0xa63   :  { %v1886_v61 = vsel %vm1883_vm14, %v1885_v28, %v1881_v63  ;;  %vm1895_vm2 = vmor %vm1893_vm1, %vm1894_vm15 }
 0xa64   :  { %v1905_v46 = vmul.f32 %v1903_v12, %v1886_v61  ;;  %v1890_v58 = vsub.f32 1.0, %v1889_v53  ;;  %v1911_v26 = vsub.f32 1.0, %v1886_v61  ;;  %v1923_v6 = vmul.f32 %v1886_v61, %v6143_v44  ;;  %v6223_v44 = vld [vmem:[#allocation2 + $0x78] sm:$0xff]  ;;  %v4869_v53 = vld [vmem:[#allocation2 + $0x90] sm:$0xff] }
 0xa66   :  { %v1907_v51 = vadd.f32 %v1905_v46, %v1823_v19  ;;  %v1891_v1 = vmul.f32 %v4699_v41, %v1890_v58 }
 0xa68   :  { %4700 = vtanh.f32 %v1907_v51  ;;  %v1892_v17 = vadd.f32 %v4699_v41, %v1891_v1 }
 0xa6a   :  { %v1896_v50 = vsel %vm1895_vm2, %v4699_v41, %v1892_v17 }
 0xa6b   :  { %v1901_v48 = vsel %vm1898_vm3, %v1900_v37, %v1896_v50 }
 0xa6c   :  { %v1906_v35 = vmul.f32 %v1904_v57, %v1901_v48  ;;  %v1912_v56 = vsub.f32 1.0, %v1901_v48  ;;  %v1924_v21 = vmul.f32 %v1901_v48, %v6150_v10 }
 0xa6e   :  { %v4701_v52 = vpop.eup %4700  ;;  %v1908_v55 = vadd.f32 %v1906_v35, %v1824_v42 }
 0xa6f   :  { %1915 = vrot.lane.b32.xlu1 %v4701_v52, %s4877_s0 }
 0xa70   :  { %4702 = vtanh.f32 %v1908_v55 }
 0xa76   :  { %v4703_v45 = vpop.eup %4702 }
 0xa77   :  { %1947 = vrot.lane.b32.xlu1 %v1941_v29, %s4877_s0  ;;  %1917 = vrot.lane.b32.xlu2 %v4703_v45, %s4877_s0 }
 0xa7f   :  { %1957 = vrot.lane.b32.xlu1 %v5867_v15, %s4878_s6  ;;  %1949 = vrot.lane.b32.xlu2 %v1943_v47, %s4877_s0 }
 0xa87   :  { %1975 = vrot.lane.b32.xlu1 %v5861_v54, %s4877_s0  ;;  %1963 = vrot.lane.b32.xlu2 %v6197_v30, %s4875_s11 }
 0xa8f   :  { %1977 = vrot.lane.b32.xlu2 %v5867_v15, %s4877_s0 }
 0xad1   :  { %v1918_v33 = vpop.permute.xlu2 %1917 }
 0xad2   :  { %v1922_v25 = vmul.f32 %v1918_v33, %v1912_v56 }
 0xad4   :  { %v6206_v34 = vadd.f32 %v1924_v21, %v1922_v25 }
 0xad6   :  { %v6211_v54 = vpack.c.bf16 %v6206_v34, %v6206_v34 }
 0xad8   :  { %v1984_v10 = vunpack.c.l.b16 %v6211_v54 }
 0xad9   :  { %v1950_v38 = vpop.permute.xlu2 %1949 }
 0xada   :  { %v1970_v61 = vsel %vm61_vm0, %v4869_v53, %v1950_v38  ;;  %v6248_v53 = vld [vmem:[#allocation2 + $0x48] sm:$0xff] }
 0xae1   :  { %v1916_v23 = vpop.permute.xlu1 %1915  ;;  %v1964_v8 = vpop.permute.xlu2 %1963 }
 0xae2   :  { %v1921_v20 = vmul.f32 %v1916_v23, %v1911_v26 }
 0xae4   :  { %v6213_v11 = vadd.f32 %v1923_v6, %v1921_v20 }
 0xae6   :  { %v6217_v15 = vpack.c.bf16 %v6213_v11, %v6213_v11 }
 0xae8   :  { %v1983_v59 = vunpack.c.l.b16 %v6217_v15 }
 0xae9   :  { %v1948_v60 = vpop.permute.xlu1 %1947 }
 0xaea   :  { %v1985_v22 = vpack.c.b16 %v1984_v10, %v1983_v59  ;;  %v1969_v18 = vsel %vm61_vm0, %v4868_v24, %v1948_v60  ;;  %v1978_v60 = vpop.permute.xlu2 %1977 }
 0xaec   :  { %1986 = vrot.lane.b32.xlu0 %v1985_v22, %s4877_s0 }
 0xaf1   :  { %v1958_v32 = vpop.permute.xlu1 %1957 }
 0xaf2   :  { %v1972_v46 = vsel %vm1098_vm5, %v1970_v61, %v1958_v32  ;;  %v2098_v32 = vld [vmem:[#allocation2 + $0xb0] sm:$0xff] }
 0xaf4   :  { %1955 = vrot.lane.b32.xlu0 %v4868_v24, %s4878_s6 }
 0xaf9   :  { %v1976_v47 = vpop.permute.xlu1 %1975 }
 0xafa   :  { %v1981_v6 = vsel %vm61_vm0, %v1976_v47, %v6197_v30  ;;  %v1982_v30 = vsel %vm61_vm0, %v1978_v60, %v6223_v44 }
 0xafc   :  { %1965 = vrot.lane.b32.xlu0 %v6223_v44, %s4875_s11 }
 0xb5e   :  { %v1987_v2 = vpop.permute.xlu0 %1986 }
 0xb5f   :  { %4340 = vmatmul.msk.bf16.vlgmr.msrb.gmra.mxu0 %vm1098_vm5, %v1987_v2  ;;  %4341 = vmatmul.msk.bf16.vlgmr.msrb.gmra.mxu1 %vm1098_vm5, %v1987_v2 }
 0xb66   :  { %v1956_v14 = vpop.permute.xlu0 %1955 }
 0xb67   :  { %v1971_v43 = vsel %vm1098_vm5, %v1969_v18, %v1956_v14 }
 0xb68   :  { %v1973_v16 = vsel %vm1304_vm12, %v1971_v43, %v1964_v8 }
 0xb6e   :  { %v1966_v63 = vpop.permute.xlu0 %1965 }
 0xb6f   :  { %v1974_v58 = vsel %vm1304_vm12, %v1972_v46, %v1966_v63  ;;  %v2101_v63 = vld [vmem:[#allocation2 + $0x50] sm:$0xff] }
 0xbdc   :  { %v2000_v9 = vpop.f32.mrf.mxu0  ;;  %v2014_v48 = vpop.f32.mrf.mxu1 }
 0xbdd   :  { %v2019_v41 = vadd.f32 %v2000_v9, %v1973_v16  ;;  %v2061_v56 = vadd.f32 %v2014_v48, %v5990_v13 }
 0xbdf   :  { %v2021_v28 = vadd.f32 %v2019_v41, %v5977_v27 }
 0xbe1   :  { %v4342_v12 = vmul.f32 -1.442695, %v2021_v28  ;;  %v2099_v28 = vld [vmem:[#allocation2 + $0x40] sm:$0xff] }
 0xbe3   :  { %4704 = vpow2.f32 %v4342_v12  ;;  %v2097_v12 = vld [vmem:[#allocation2 + $0xa0] sm:$0xff] }
 0xbe4   :  { %v2002_v19 = vpop.f32.mrf.mxu0  ;;  %v2016_v24 = vpop.f32.mrf.mxu1 }
 0xbe5   :  { %v2020_v62 = vadd.f32 %v2002_v19, %v1974_v58  ;;  %v2062_v18 = vadd.f32 %v2016_v24, %v5990_v13 }
 0xbe7   :  { %v2022_v51 = vadd.f32 %v2020_v62, %v5977_v27 }
 0xbe9   :  { %v4705_v1 = vpop.eup %4704  ;;  %v4343_v36 = vmul.f32 -1.442695, %v2022_v51 }
 0xbea   :  { %v2029_v0 = vadd.f32 1.0, %v4705_v1 }
 0xbeb   :  { %4706 = vpow2.f32 %v4343_v36 }
 0xbec   :  { %4708 = vrcp.f32 %v2029_v0  ;;  %v2042_v35 = vand.u32 2147483648, %v2029_v0  ;;  %v2040_v52 = vand.u32 2147483647, %v2029_v0  ;;  %vm2036_vm6 = vweird.f32 %v2029_v0 }
 0xbee   :  { %v2043_v29 = vor.u32 1.1754944e-38, %v2042_v35  ;;  %vm2041_vm8 = vcmp.eq.f32.partialorder %v2040_v52, 8.507059e+37 }
 0xbf1   :  { %v4707_v17 = vpop.eup %4706 }
 0xbf2   :  { %v4709_v37 = vpop.eup %4708  ;;  %v2030_v40 = vadd.f32 1.0, %v4707_v17 }
 0xbf3   :  { %v2032_v50 = vmul.f32 %v4709_v37, %v2029_v0  ;;  %vm2037_vm4 = vweird.f32 %v4709_v37 }
 0xbf4   :  { %4710 = vrcp.f32 %v2030_v40  ;;  %vm2038_vm7 = vmor %vm2036_vm6, %vm2037_vm4  ;;  %v2057_v20 = vand.u32 2147483648, %v2030_v40  ;;  %v2055_v22 = vand.u32 2147483647, %v2030_v40  ;;  %vm2051_vm10 = vweird.f32 %v2030_v40 }
 0xbf5   :  { %v2033_v57 = vsub.f32 1.0, %v2032_v50 }
 0xbf6   :  { %v2058_v38 = vor.u32 1.1754944e-38, %v2057_v20  ;;  %vm2056_vm13 = vcmp.eq.f32.partialorder %v2055_v22, 8.507059e+37 }
 0xbf7   :  { %v2034_v42 = vmul.f32 %v4709_v37, %v2033_v57 }
 0xbf9   :  { %v2035_v55 = vadd.f32 %v4709_v37, %v2034_v42 }
 0xbfa   :  { %v4711_v45 = vpop.eup %4710 }
 0xbfb   :  { %v2039_v33 = vsel %vm2038_vm7, %v4709_v37, %v2035_v55  ;;  %v2047_v25 = vmul.f32 %v4711_v45, %v2030_v40  ;;  %vm2052_vm9 = vweird.f32 %v4711_v45 }
 0xbfc   :  { %v2044_v21 = vsel %vm2041_vm8, %v2043_v29, %v2039_v33  ;;  %vm2053_vm11 = vmor %vm2051_vm10, %vm2052_vm9 }
 0xbfd   :  { %v2063_v26 = vmul.f32 %v2061_v56, %v2044_v21  ;;  %v2048_v23 = vsub.f32 1.0, %v2047_v25  ;;  %v2069_v61 = vsub.f32 1.0, %v2044_v21  ;;  %v2081_v58 = vmul.f32 %v2044_v21, %v6213_v11 }
 0xbff   :  { %v2065_v59 = vadd.f32 %v2063_v26, %v1981_v6  ;;  %v2049_v10 = vmul.f32 %v4711_v45, %v2048_v23 }
 0xc01   :  { %4712 = vtanh.f32 %v2065_v59  ;;  %v2050_v2 = vadd.f32 %v4711_v45, %v2049_v10 }
 0xc03   :  { %v2054_v14 = vsel %vm2053_vm11, %v4711_v45, %v2050_v2 }
 0xc04   :  { %v2059_v43 = vsel %vm2056_vm13, %v2058_v38, %v2054_v14 }
 0xc05   :  { %v2064_v8 = vmul.f32 %v2062_v18, %v2059_v43  ;;  %v2070_v62 = vsub.f32 1.0, %v2059_v43  ;;  %v2082_v1 = vmul.f32 %v2059_v43, %v6206_v34  ;;  %v6272_v34 = vld [vmem:[#allocation2 + $0x58] sm:$0xff] }
 0xc07   :  { %v4713_v16 = vpop.eup %4712  ;;  %v2066_v9 = vadd.f32 %v2064_v8, %v1982_v30 }
 0xc08   :  { %2073 = vrot.lane.b32.xlu0 %v4713_v16, %s4877_s0 }
 0xc09   :  { %4714 = vtanh.f32 %v2066_v9 }
 0xc0f   :  { %v4715_v41 = vpop.eup %4714 }
 0xc10   :  { %2105 = vrot.lane.b32.xlu0 %v2099_v28, %s4877_s0  ;;  %2075 = vrot.lane.b32.xlu1 %v4715_v41, %s4877_s0 }
 0xc18   :  { %2115 = vrot.lane.b32.xlu0 %v2098_v32, %s4878_s6  ;;  %2107 = vrot.lane.b32.xlu1 %v2101_v63, %s4877_s0 }
 0xc20   :  { %2133 = vrot.lane.b32.xlu0 %v2097_v12, %s4877_s0  ;;  %2121 = vrot.lane.b32.xlu1 %v6248_v53, %s4875_s11 }
 0xc28   :  { %2135 = vrot.lane.b32.xlu1 %v2098_v32, %s4877_s0 }
 0xc7a   :  { %v2074_v44 = vpop.permute.xlu0 %2073 }
 0xc7b   :  { %v2079_v46 = vmul.f32 %v2074_v44, %v2069_v61 }
 0xc7d   :  { %v6255_v19 = vadd.f32 %v2081_v58, %v2079_v46 }
 0xc7f   :  { %v6260_v0 = vpack.c.bf16 %v6255_v19, %v6255_v19 }
 0xc81   :  { %v2141_v40 = vunpack.c.l.b16 %v6260_v0 }
 0xc82   :  { %v2076_v51 = vpop.permute.xlu1 %2075  ;;  %v2106_v35 = vpop.permute.xlu0 %2105 }
 0xc83   :  { %v2080_v36 = vmul.f32 %v2076_v51, %v2070_v62  ;;  %v2127_v52 = vsel %vm61_vm0, %v2097_v12, %v2106_v35 }
 0xc85   :  { %v6262_v17 = vadd.f32 %v2082_v1, %v2080_v36 }
 0xc87   :  { %v6266_v37 = vpack.c.bf16 %v6262_v17, %v6262_v17 }
 0xc89   :  { %v2142_v11 = vunpack.c.l.b16 %v6266_v37 }
 0xc8a   :  { %v2108_v48 = vpop.permute.xlu1 %2107  ;;  %v2116_v25 = vpop.permute.xlu0 %2115 }
 0xc8b   :  { %v2143_v50 = vpack.c.b16 %v2142_v11, %v2141_v40  ;;  %v2128_v21 = vsel %vm61_vm0, %v2098_v32, %v2108_v48 }
 0xc8c   :  { %v2130_v6 = vsel %vm1098_vm5, %v2128_v21, %v2116_v25  ;;  %v2257_v25 = vld [vmem:[#allocation2 + $0x20] sm:$0xff]  ;;  %v2256_v21 = vld [vmem:[#allocation2 + $0xd0] sm:$0xff] }
 0xc8d   :  { %2144 = vrot.lane.b32.xlu2 %v2143_v50, %s4877_s0 }
 0xc92   :  { %v2122_v45 = vpop.permute.xlu1 %2121 }
 0xc95   :  { %2113 = vrot.lane.b32.xlu2 %v2097_v12, %s4878_s6  ;;  %v2134_v12 = vpop.permute.xlu0 %2133 }
 0xc96   :  { %v2139_v1 = vsel %vm61_vm0, %v2134_v12, %v6248_v53 }
 0xc9d   :  { %2123 = vrot.lane.b32.xlu2 %v6272_v34, %s4875_s11 }
 0xce7   :  { %v2145_v57 = vpop.permute.xlu2 %2144 }
 0xce8   :  { %4344 = vmatmul.msk.bf16.vlgmr.msra.gmra.mxu2 %vm1098_vm5, %v2145_v57  ;;  %4345 = vmatmul.msk.bf16.vlgmr.msra.gmra.mxu3 %vm1098_vm5, %v2145_v57 }
 0xcef   :  { %v2114_v42 = vpop.permute.xlu2 %2113 }
 0xcf0   :  { %v2129_v55 = vsel %vm1098_vm5, %v2127_v52, %v2114_v42  ;;  %v2136_v42 = vpop.permute.xlu1 %2135 }
 0xcf1   :  { %v2131_v29 = vsel %vm1304_vm12, %v2129_v55, %v2122_v45  ;;  %v2140_v53 = vsel %vm61_vm0, %v2136_v42, %v6272_v34 }
 0xcf7   :  { %v2124_v26 = vpop.permute.xlu2 %2123 }
 0xcf8   :  { %v2132_v20 = vsel %vm1304_vm12, %v2130_v6, %v2124_v26  ;;  %v2259_v26 = vld [vmem:[#allocation2 + $0x30] sm:$0xff]  ;;  %v6297_v6 = vld [vmem:[#allocation2 + $0x28] sm:$0xff] }
 0xd6b   :  { %v2158_v47 = vpop.f32.mrf.mxu2  ;;  %v2172_v30 = vpop.f32.mrf.mxu3 }
 0xd6c   :  { %v2177_v33 = vadd.f32 %v2158_v47, %v2131_v29  ;;  %v2219_v61 = vadd.f32 %v2172_v30, %v5990_v13 }
 0xd6e   :  { %v2179_v56 = vadd.f32 %v2177_v33, %v5977_v27 }
 0xd70   :  { %v4346_v23 = vmul.f32 -1.442695, %v2179_v56 }
 0xd72   :  { %4716 = vpow2.f32 %v4346_v23  ;;  %v2255_v23 = vld [vmem:[#allocation2 + $0xc0] sm:$0xff] }
 0xd73   :  { %v2160_v59 = vpop.f32.mrf.mxu2  ;;  %v2174_v57 = vpop.f32.mrf.mxu3 }
 0xd74   :  { %v2178_v10 = vadd.f32 %v2160_v59, %v2132_v20  ;;  %v2220_v55 = vadd.f32 %v2174_v57, %v5990_v13 }
 0xd76   :  { %v2180_v22 = vadd.f32 %v2178_v10, %v5977_v27 }
 0xd78   :  { %v4717_v24 = vpop.eup %4716  ;;  %v4347_v2 = vmul.f32 -1.442695, %v2180_v22 }
 0xd79   :  { %v2187_v38 = vadd.f32 1.0, %v4717_v24 }
 0xd7a   :  { %4718 = vpow2.f32 %v4347_v2 }
 0xd7b   :  { %4720 = vrcp.f32 %v2187_v38  ;;  %v2200_v16 = vand.u32 2147483648, %v2187_v38  ;;  %v2198_v41 = vand.u32 2147483647, %v2187_v38  ;;  %vm2194_vm15 = vweird.f32 %v2187_v38 }
 0xd7d   :  { %v2201_v63 = vor.u32 1.1754944e-38, %v2200_v16  ;;  %vm2199_vm2 = vcmp.eq.f32.partialorder %v2198_v41, 8.507059e+37 }
 0xd80   :  { %v4719_v60 = vpop.eup %4718 }
 0xd81   :  { %v4721_v14 = vpop.eup %4720  ;;  %v2188_v18 = vadd.f32 1.0, %v4719_v60 }
 0xd82   :  { %v2190_v43 = vmul.f32 %v4721_v14, %v2187_v38  ;;  %vm2195_vm14 = vweird.f32 %v4721_v14 }
 0xd83   :  { %4722 = vrcp.f32 %v2188_v18  ;;  %vm2196_vm1 = vmor %vm2194_vm15, %vm2195_vm14  ;;  %v2215_v36 = vand.u32 2147483648, %v2188_v18  ;;  %v2213_v50 = vand.u32 2147483647, %v2188_v18  ;;  %vm2209_vm4 = vweird.f32 %v2188_v18 }
 0xd84   :  { %v2191_v8 = vsub.f32 1.0, %v2190_v43 }
 0xd85   :  { %v2216_v35 = vor.u32 1.1754944e-38, %v2215_v36  ;;  %vm2214_vm7 = vcmp.eq.f32.partialorder %v2213_v50, 8.507059e+37 }
 0xd86   :  { %v2192_v9 = vmul.f32 %v4721_v14, %v2191_v8 }
 0xd88   :  { %v2193_v28 = vadd.f32 %v4721_v14, %v2192_v9 }
 0xd89   :  { %v4723_v32 = vpop.eup %4722 }
 0xd8a   :  { %v2197_v44 = vsel %vm2196_vm1, %v4721_v14, %v2193_v28  ;;  %v2205_v46 = vmul.f32 %v4723_v32, %v2188_v18  ;;  %vm2210_vm3 = vweird.f32 %v4723_v32 }
 0xd8b   :  { %v2202_v58 = vsel %vm2199_vm2, %v2201_v63, %v2197_v44  ;;  %vm2211_vm6 = vmor %vm2209_vm4, %vm2210_vm3  ;;  %vm1462_vm2 = vcmask 519168  }
 0xd8c   :  { %v2221_v62 = vmul.f32 %v2219_v61, %v2202_v58  ;;  %v2206_v51 = vsub.f32 1.0, %v2205_v46  ;;  %v2227_v20 = vsub.f32 1.0, %v2202_v58  ;;  %v2239_v10 = vmul.f32 %v2202_v58, %v6255_v19 }
 0xd8e   :  { %v2223_v40 = vadd.f32 %v2221_v62, %v2139_v1  ;;  %v2207_v11 = vmul.f32 %v4723_v32, %v2206_v51 }
 0xd90   :  { %4724 = vtanh.f32 %v2223_v40  ;;  %v2208_v48 = vadd.f32 %v4723_v32, %v2207_v11 }
 0xd92   :  { %v2212_v52 = vsel %vm2211_vm6, %v4723_v32, %v2208_v48 }
 0xd93   :  { %v2217_v45 = vsel %vm2214_vm7, %v2216_v35, %v2212_v52 }
 0xd94   :  { %v2222_v29 = vmul.f32 %v2220_v55, %v2217_v45  ;;  %v2228_v24 = vsub.f32 1.0, %v2217_v45  ;;  %v2240_v38 = vmul.f32 %v2217_v45, %v6262_v17  ;;  %v6321_v17 = vld [vmem:[#allocation2 + $0x38] sm:$0xff] }
 0xd96   :  { %v4725_v47 = vpop.eup %4724  ;;  %v2224_v33 = vadd.f32 %v2222_v29, %v2140_v53 }
 0xd97   :  { %2231 = vrot.lane.b32.xlu2 %v4725_v47, %s4877_s0 }
 0xd98   :  { %4726 = vtanh.f32 %v2224_v33 }
 0xd9e   :  { %v4727_v56 = vpop.eup %4726 }
 0xd9f   :  { %2263 = vrot.lane.b32.xlu2 %v2257_v25, %s4877_s0  ;;  %2233 = vrot.lane.b32.xlu0 %v4727_v56, %s4877_s0 }
 0xda7   :  { %2273 = vrot.lane.b32.xlu2 %v2256_v21, %s4878_s6  ;;  %2265 = vrot.lane.b32.xlu0 %v2259_v26, %s4877_s0 }
 0xdaf   :  { %2291 = vrot.lane.b32.xlu2 %v2255_v23, %s4877_s0  ;;  %2279 = vrot.lane.b32.xlu0 %v6297_v6, %s4875_s11 }
 0xdb7   :  { %2293 = vrot.lane.b32.xlu0 %v2256_v21, %s4877_s0 }
 0xdf1   :  { %v2232_v34 = vpop.permute.xlu2 %2231 }
 0xdf2   :  { %v2237_v59 = vmul.f32 %v2232_v34, %v2227_v20 }
 0xdf4   :  { %v6304_v22 = vadd.f32 %v2239_v10, %v2237_v59 }
 0xdf6   :  { %v6309_v14 = vpack.c.bf16 %v6304_v22, %v6304_v22 }
 0xdf8   :  { %v2299_v8 = vunpack.c.l.b16 %v6309_v14 }
 0xdf9   :  { %v2264_v41 = vpop.permute.xlu2 %2263 }
 0xdfa   :  { %v2285_v32 = vsel %vm61_vm0, %v2255_v23, %v2264_v41 }
 0xe01   :  { %v2274_v36 = vpop.permute.xlu2 %2273 }
 0xe09   :  { %v2292_v20 = vpop.permute.xlu2 %2291 }
 0xe11   :  { %v2234_v2 = vpop.permute.xlu0 %2233 }
 0xe12   :  { %v2238_v60 = vmul.f32 %v2234_v2, %v2228_v24 }
 0xe14   :  { %v6311_v18 = vadd.f32 %v2240_v38, %v2238_v60 }
 0xe16   :  { %v6315_v43 = vpack.c.bf16 %v6311_v18, %v6311_v18 }
 0xe18   :  { %v2300_v19 = vunpack.c.l.b16 %v6315_v43 }
 0xe19   :  { %v2266_v9 = vpop.permute.xlu0 %2265 }
 0xe1a   :  { %v2301_v30 = vpack.c.b16 %v2300_v19, %v2299_v8  ;;  %v2286_v62 = vsel %vm61_vm0, %v2256_v21, %v2266_v9  ;;  %v2297_v8 = vsel %vm61_vm0, %v2292_v20, %v6297_v6 }
 0xe1b   :  { %v2288_v40 = vsel %vm1098_vm5, %v2286_v62, %v2274_v36  ;;  %v6347_v36 = vld [vmem:[#allocation2 + $0xf0] sm:$0xff] }
 0xe1c   :  { %2302 = vrot.lane.b32.xlu1 %v2301_v30, %s4877_s0 }
 0xe21   :  { %v2280_v12 = vpop.permute.xlu0 %2279 }
 0xe24   :  { %2271 = vrot.lane.b32.xlu1 %v2255_v23, %s4878_s6 }
 0xe2c   :  { %2281 = vrot.lane.b32.xlu1 %v6321_v17, %s4875_s11 }
 0xe8e   :  { %v2303_v16 = vpop.permute.xlu1 %2302 }
 0xe8f   :  { %4348 = vmatmul.msk.bf16.vlgmr.msra.gmra.mxu0 %vm1098_vm5, %v2303_v16  ;;  %4349 = vmatmul.msk.bf16.vlgmr.msra.gmra.mxu1 %vm1098_vm5, %v2303_v16 }
 0xe96   :  { %v2272_v28 = vpop.permute.xlu1 %2271 }
 0xe97   :  { %v2287_v63 = vsel %vm1098_vm5, %v2285_v32, %v2272_v28 }
 0xe98   :  { %v2289_v44 = vsel %vm1304_vm12, %v2287_v63, %v2280_v12  ;;  %v2294_v63 = vpop.permute.xlu0 %2293 }
 0xe99   :  { %v2298_v6 = vsel %vm61_vm0, %v2294_v63, %v6321_v17  ;;  %v4414_v17 = vld [vmem:[%s7079_s2 + $0x7c] sm:$0xf] }
 0xe9e   :  { %v2282_v51 = vpop.permute.xlu1 %2281 }
 0xe9f   :  { %v2290_v11 = vsel %vm1304_vm12, %v2288_v40, %v2282_v51  ;;  %v2417_v40 = vld [vmem:[#allocation2 + $0x10] sm:$0xff] }
 0xf0c   :  { %v2316_v61 = vpop.f32.mrf.mxu0  ;;  %v2330_v33 = vpop.f32.mrf.mxu1 }
 0xf0d   :  { %v2335_v46 = vadd.f32 %v2316_v61, %v2289_v44  ;;  %v2377_v10 = vadd.f32 %v2330_v33, %v5990_v13  ;;  %v4551_v33 = vld [vmem:[%s7079_s2 + $0x8] sm:$0xf] }
 0xf0f   :  { %v2337_v58 = vadd.f32 %v2335_v46, %v5977_v27 }
 0xf11   :  { %v4350_v1 = vmul.f32 -1.442695, %v2337_v58 }
 0xf13   :  { %4728 = vpow2.f32 %v4350_v1  ;;  %v2415_v1 = vld [vmem:[#allocation2] sm:$0xff] }
 0xf14   :  { %v2318_v50 = vpop.f32.mrf.mxu0  ;;  %v2332_v41 = vpop.f32.mrf.mxu1 }
 0xf15   :  { %v2336_v57 = vadd.f32 %v2318_v50, %v2290_v11  ;;  %v2378_v44 = vadd.f32 %v2332_v41, %v5990_v13  ;;  %v4558_v11 = vld [vmem:[%s7079_s2 + $0x8c] sm:$0xf0] }
 0xf16   :  { %v4415_v50 = vor.u32 %v4558_v11, %v4414_v17  ;;  %v4552_v17 = vld [vmem:[%s7079_s2 + $0x14] sm:$0xf0] }
 0xf17   :  { %v2338_v48 = vadd.f32 %v2336_v57, %v5977_v27  ;;  %v6358_v57 = vld [vmem:[#allocation2 + $0x8] sm:$0xff] }
 0xf19   :  { %v4729_v35 = vpop.eup %4728  ;;  %v4351_v42 = vmul.f32 -1.442695, %v2338_v48  ;;  %v4555_v48 = vld [vmem:[%s7079_s2 + $0x58] sm:$0xf] }
 0xf1a   :  { %v2345_v52 = vadd.f32 1.0, %v4729_v35  ;;  %v4408_v35 = vld [vmem:[%s7079_s2 + $0x68] sm:$0xf0] }
 0xf1b   :  { %4730 = vpow2.f32 %v4351_v42  ;;  %v4557_v42 = vld [vmem:[%s7079_s2 + $0x80] sm:$0xf] }
 0xf1c   :  { %4732 = vrcp.f32 %v2345_v52  ;;  %v2358_v56 = vand.u32 2147483648, %v2345_v52  ;;  %v2356_v21 = vand.u32 2147483647, %v2345_v52  ;;  %vm2352_vm9 = vweird.f32 %v2345_v52 }
 0xf1e   :  { %v2359_v34 = vor.u32 1.1754944e-38, %v2358_v56  ;;  %vm2357_vm11 = vcmp.eq.f32.partialorder %v2356_v21, 8.507059e+37  ;;  %v4392_v56 = vld [vmem:[%s7079_s2 + $0x18] sm:$0xf0]  ;;  %v4400_v21 = vld [vmem:[%s7079_s2 + $0x40] sm:$0xf0] }
 0xf21   :  { %v4731_v55 = vpop.eup %4730 }
 0xf22   :  { %v4733_v45 = vpop.eup %4732  ;;  %v2346_v29 = vadd.f32 1.0, %v4731_v55  ;;  %v4411_v55 = vor.u32 %v4555_v48, %v4408_v35 }
 0xf23   :  { %v2348_v53 = vmul.f32 %v4733_v45, %v2345_v52  ;;  %vm2353_vm8 = vweird.f32 %v4733_v45  ;;  %v4416_v52 = vld [vmem:[%s7079_s2 + $0x90] sm:$0xf0] }
 0xf24   :  { %4734 = vrcp.f32 %v2346_v29  ;;  %vm2354_vm10 = vmor %vm2352_vm9, %vm2353_vm8  ;;  %v2373_v19 = vand.u32 2147483648, %v2346_v29  ;;  %v2371_v9 = vand.u32 2147483647, %v2346_v29  ;;  %vm2367_vm14 = vweird.f32 %v2346_v29 }
 0xf25   :  { %v2349_v47 = vsub.f32 1.0, %v2348_v53  ;;  %v4554_v53 = vld [vmem:[%s7079_s2 + $0x3c] sm:$0xf0] }
 0xf26   :  { %v2374_v32 = vor.u32 1.1754944e-38, %v2373_v19  ;;  %vm2372_vm1 = vcmp.eq.f32.partialorder %v2371_v9, 8.507059e+37 }
 0xf27   :  { %v2350_v25 = vmul.f32 %v4733_v45, %v2349_v47 }
 0xf29   :  { %v2351_v26 = vadd.f32 %v4733_v45, %v2350_v25  ;;  %v4553_v25 = vld [vmem:[%s7079_s2 + $0x30] sm:$0xf] }
 0xf2a   :  { %v4735_v23 = vpop.eup %4734 }
 0xf2b   :  { %v2355_v59 = vsel %vm2354_vm10, %v4733_v45, %v2351_v26  ;;  %v2363_v24 = vmul.f32 %v4735_v23, %v2346_v29  ;;  %vm2368_vm13 = vweird.f32 %v4735_v23  ;;  %v4419_v45 = vor.u32 %v4557_v42, %v4416_v52  ;;  %v4398_v29 = vld [vmem:[%s7079_s2 + $0x2c] sm:$0xf] }
 0xf2c   :  { %v6336_v2 = vsel %vm2357_vm11, %v2359_v34, %v2355_v59  ;;  %vm2369_vm15 = vmor %vm2367_vm14, %vm2368_vm13  ;;  %v4399_v47 = vor.u32 %v4554_v53, %v4398_v29  ;;  %v4395_v26 = vor.u32 %v4551_v33, %v4392_v56 }
 0xf2d   :  { %v2379_v38 = vmul.f32 %v2377_v10, %v6336_v2  ;;  %v2364_v60 = vsub.f32 1.0, %v2363_v24 }
 0xf2f   :  { %v2381_v30 = vadd.f32 %v2379_v38, %v2297_v8  ;;  %v2365_v16 = vmul.f32 %v4735_v23, %v2364_v60 }
 0xf31   :  { %4736 = vtanh.f32 %v2381_v30  ;;  %v2366_v28 = vadd.f32 %v4735_v23, %v2365_v16 }
 0xf33   :  { %v2370_v12 = vsel %vm2369_vm15, %v4735_v23, %v2366_v28  ;;  %v4403_v23 = vor.u32 %v4553_v25, %v4400_v21 }
 0xf34   :  { %v2375_v61 = vsel %vm2372_vm1, %v2374_v32, %v2370_v12 }
 0xf35   :  { %v2380_v46 = vmul.f32 %v2378_v44, %v2375_v61  ;;  %v2386_v34 = vsub.f32 1.0, %v2375_v61  ;;  %v2398_v20 = vmul.f32 %v2375_v61, %v6311_v18  ;;  %v2418_v44 = vld [vmem:[#allocation2 + $0x18] sm:$0xff]  ;;  %v4406_v61 = vld [vmem:[%s7079_s2 + $0x54] sm:$0xf] }
 0xf37   :  { %v4737_v58 = vpop.eup %4736  ;;  %v2382_v62 = vadd.f32 %v2380_v46, %v2298_v6  ;;  %v4556_v46 = vld [vmem:[%s7079_s2 + $0x64] sm:$0xf0] }
 0xf38   :  { %2389 = vrot.lane.b32.xlu1 %v4737_v58, %s4877_s0  ;;  %v4407_v6 = vor.u32 %v4556_v46, %v4406_v61 }
 0xf39   :  { %4738 = vtanh.f32 %v2382_v62 }
 0xf3f   :  { %v4739_v51 = vpop.eup %4738 }
 0xf40   :  { %2421 = vrot.lane.b32.xlu1 %v2415_v1, %s4877_s0  ;;  %2391 = vrot.lane.b32.xlu2 %v4739_v51, %s4877_s0 }
 0xf48   :  { %2431 = vrot.lane.b32.xlu1 %v6347_v36, %s4878_s6  ;;  %2423 = vrot.lane.b32.xlu2 %v2417_v40, %s4877_s0  ;;  %v4390_v40 = vld [vmem:[%s7079_s2 + $0x4] sm:$0xf] }
 0xf49   :  { %v4391_v11 = vor.u32 %v4552_v17, %v4390_v40 }
 0xf50   :  { %2681 = vrot.lane.b32.xlu1 %v4415_v50, %s4877_s0  ;;  %2437 = vrot.lane.b32.xlu2 %v6358_v57, %s4875_s11 }
 0xf58   :  { %2679 = vrot.lane.b32.xlu1 %v4411_v55, %s4877_s0  ;;  %2683 = vrot.lane.b32.xlu2 %v4419_v45, %s4877_s0 }
 0xf60   :  { %2673 = vrot.lane.b32.xlu1 %v4399_v47, %s4877_s0  ;;  %1456 = vrot.lane.b32.xlu2 %v6024_v3, %s4877_s0  ;;  %v6400_v3 = vld [vmem:[#allocation2 + $0xe0] sm:$0xff] }
 0xf68   :  { %2671 = vrot.lane.b32.xlu1 %v4395_v26, %s4877_s0  ;;  %2675 = vrot.lane.b32.xlu2 %v4403_v23, %s4877_s0 }
 0xf70   :  { %2449 = vrot.lane.b32.xlu1 %v6400_v3, %s4877_s0  ;;  %1615 = vrot.lane.b32.xlu2 %v6083_v49, %s4877_s0 }
 0xf78   :  { %1775 = vrot.lane.b32.xlu1 %v6154_v7, %s4877_s0  ;;  %2451 = vrot.lane.b32.xlu2 %v6347_v36, %s4877_s0 }
 0xf80   :  { %2089 = vrot.lane.b32.xlu1 %v6260_v0, %s4877_s0  ;;  %1931 = vrot.lane.b32.xlu2 %v6217_v15, %s4877_s0  ;;  %v2385_v15 = vsub.f32 1.0, %v6336_v2 }
 0xf88   :  { %2091 = vrot.lane.b32.xlu2 %v6266_v37, %s4877_s0 }
 0xf90   :  { %2247 = vrot.lane.b32.xlu2 %v6309_v14, %s4877_s0  ;;  %v2397_v14 = vmul.f32 %v6336_v2, %v6304_v22 }
 0xf9a   :  { %v2392_v49 = vpop.permute.xlu2 %2391 }
 0xf9b   :  { %v2396_v7 = vmul.f32 %v2392_v49, %v2386_v34 }
 0xf9d   :  { %v6419_v59 = vadd.f32 %v2398_v20, %v2396_v7 }
 0xf9f   :  { %v2402_v10 = vpack.c.bf16 %v6419_v59, %v6419_v59 }
 0xfa1   :  { %2407 = vrot.lane.b32.xlu2 %v2402_v10, %s4877_s0  ;;  %v2458_v19 = vunpack.c.l.b16 %v2402_v10 }
 0xfa2   :  { %v2424_v0 = vpop.permute.xlu2 %2423 }
 0xfa3   :  { %v2444_v22 = vsel %vm61_vm0, %v6347_v36, %v2424_v0 }
 0xfaa   :  { %v2390_v24 = vpop.permute.xlu1 %2389  ;;  %v6425_v37 = vpop.permute.xlu2 %2437 }
 0xfab   :  { %v2395_v38 = vmul.f32 %v2390_v24, %v2385_v15 }
 0xfad   :  { %v6429_v60 = vadd.f32 %v2397_v14, %v2395_v38 }
 0xfaf   :  { %v6433_v18 = vpack.c.bf16 %v6429_v60, %v6429_v60 }
 0xfb1   :  { %v2457_v8 = vunpack.c.l.b16 %v6433_v18 }
 0xfb2   :  { %v2422_v30 = vpop.permute.xlu1 %2421  ;;  %v2684_v16 = vpop.permute.xlu2 %2683 }
 0xfb3   :  { %v2459_v9 = vpack.c.b16 %v2458_v19, %v2457_v8  ;;  %2774 = vmatpush.bf16.msrb.mxu1 %v2684_v16 }
 0xfb5   :  { %2460 = vrot.lane.b32.xlu0 %v2459_v9, %s4877_s0 }
 0xfba   :  { %v2432_v2 = vpop.permute.xlu1 %2431  ;;  %v1457_v41 = vpop.permute.xlu2 %1456 }
 0xfbb   :  { %v2446_v28 = vsel %vm1098_vm5, %v2444_v22, %v2432_v2  ;;  %1463 = vst.msk [vmem:[#allocation4] sm:$0xf] %vm1462_vm2, %v1457_v41 }
 0xfbd   :  { %2429 = vrot.lane.b32.xlu0 %v6400_v3, %s4878_s6 }
 0xfc2   :  { %v2682_v32 = vpop.permute.xlu1 %2681  ;;  %v2676_v63 = vpop.permute.xlu2 %2675 }
 0xfc3   :  { %v2688_v12 = vsel %vm1098_vm5, %v2682_v32, %v2684_v16 }
 0xfc4   :  { %2725 = vmatpush.bf16.msrb.mxu0 %v2688_v12 }
 0xfc5   :  { %2439 = vrot.lane.b32.xlu0 %v2418_v44, %s4875_s11 }
 0xfca   :  { %v2680_v58 = vpop.permute.xlu1 %2679  ;;  %v1616_v62 = vpop.permute.xlu2 %1615 }
 0xfcb   :  { %1621 = vst.msk [vmem:[#allocation4 + $0x8] sm:$0xf] %vm1462_vm2, %v1616_v62  ;;  %2775 = vmatpush.bf16.msrb.mxu1 %v2680_v58 }
 0xfcd   :  { %2677 = vrot.lane.b32.xlu0 %v4407_v6, %s4877_s0 }
 0xfcf   :  { %2776 = vmatpush.bf16.msrb.mxu1 %v2676_v63 }
 0xfd2   :  { %v2674_v51 = vpop.permute.xlu1 %2673  ;;  %v2452_v1 = vpop.permute.xlu2 %2451 }
 0xfd3   :  { %v6454_v36 = vsel %vm61_vm0, %v2452_v1, %v2418_v44  ;;  %v2686_v25 = vsel %vm1098_vm5, %v2674_v51, %v2676_v63 }
 0xfd5   :  { %1458 = vrot.lane.b32.xlu0 %v6018_v31, %s4877_s0 }
 0xfda   :  { %v2672_v50 = vpop.permute.xlu1 %2671  ;;  %v1932_v48 = vpop.permute.xlu2 %1931 }
 0xfdb   :  { %1937 = vst.msk [vmem:[#allocation4 + $0x18] sm:$0xf] %vm1462_vm2, %v1932_v48  ;;  %2777 = vmatpush.bf16.msrb.mxu1 %v2672_v50 }
 0xfdd   :  { %2669 = vrot.lane.b32.xlu0 %v4391_v11, %s4877_s0  ;;  %v4870_v11 = vld [vmem:[%s7078_s3 + $0x8] sm:$0x7f] }
 0xfe2   :  { %v6466_v35 = vpop.permute.xlu1 %2449  ;;  %v2092_v42 = vpop.permute.xlu2 %2091 }
 0xfe3   :  { %2096 = vst.msk [vmem:[#allocation4 + $0x24] sm:$0xf] %vm1462_vm2, %v2092_v42 }
 0xfe5   :  { %1617 = vrot.lane.b32.xlu0 %v6089_v5, %s4877_s0  ;;  %v2443_v5 = vsel %vm61_vm0, %v6400_v3, %v2422_v30 }
 0xfea   :  { %v1776_v31 = vpop.permute.xlu1 %1775  ;;  %v2248_v52 = vpop.permute.xlu2 %2247 }
 0xfeb   :  { %1780 = vst.msk [vmem:[#allocation4 + $0x14] sm:$0xf] %vm1462_vm2, %v1776_v31  ;;  %v2455_v31 = vsel %vm61_vm0, %v6466_v35, %v6358_v57 }
 0xfec   :  { %2253 = vst.msk [vmem:[#allocation4 + $0x28] sm:$0xf] %vm1462_vm2, %v2248_v52 }
 0xfed   :  { %1773 = vrot.lane.b32.xlu0 %v6148_v4, %s4877_s0 }
 0xff2   :  { %v2090_v55 = vpop.permute.xlu1 %2089 }
 0xff3   :  { %2095 = vst.msk [vmem:[#allocation4 + $0x20] sm:$0xf] %vm1462_vm2, %v2090_v55  ;;  %v6521_v55 = vld [vmem:[%s7078_s3] sm:$0x7f] }
 0xff5   :  { %1933 = vrot.lane.b32.xlu0 %v6211_v54, %s4877_s0 }
 0xffa   :  { %v4547_v15 = vld [vmem:[#allocation4 + $0x20] sm:$0xff] }
 0xffb   :  { %v2408_v45 = vpop.permute.xlu2 %2407 }
 0xffc   :  { %2412 = vst.msk [vmem:[#allocation4 + $0x34] sm:$0xf] %vm1462_vm2, %v2408_v45  ;;  %v6524_v45 = vperm.slane %v6521_v55, 3 }
0x1027   :  { %v2461_v29 = vpop.permute.xlu0 %2460 }
0x1028   :  { %4352 = vmatmul.msk.bf16.vlgmr.msrb.gmra.mxu2 %vm1098_vm5, %v2461_v29  ;;  %4353 = vmatmul.msk.bf16.vlgmr.msrb.gmra.mxu3 %vm1098_vm5, %v2461_v29 }
0x102f   :  { %v2430_v53 = vpop.permute.xlu0 %2429 }
0x1030   :  { %v2445_v4 = vsel %vm1098_vm5, %v2443_v5, %v2430_v53 }
0x1031   :  { %v2447_v24 = vsel %vm1304_vm12, %v2445_v4, %v6425_v37 }
0x1037   :  { %v2440_v47 = vpop.permute.xlu0 %2439 }
0x1038   :  { %v2448_v33 = vsel %vm1304_vm12, %v2446_v28, %v2440_v47 }
0x103f   :  { %v2678_v56 = vpop.permute.xlu0 %2677 }
0x1040   :  { %v2687_v54 = vsel %vm1098_vm5, %v2678_v56, %v2680_v58 }
0x1041   :  { %2726 = vmatpush.bf16.msrb.mxu0 %v2687_v54 }
0x1045   :  { %2727 = vmatpush.bf16.msrb.mxu0 %v2686_v25 }
0x1047   :  { %v1459_v21 = vpop.permute.xlu0 %1458 }
0x1048   :  { %1464 = vst.msk [vmem:[#allocation4 + $0x4] sm:$0xf] %vm1462_vm2, %v1459_v21 }
0x104f   :  { %v2670_v26 = vpop.permute.xlu0 %2669  ;;  %v4543_v23 = vld [vmem:[#allocation4] sm:$0xff] }
0x1050   :  { %v2685_v3 = vsel %vm1098_vm5, %v2670_v26, %v2672_v50  ;;  %4428 = vmatmul.msk.bf16.vlgmr.msrb.gmra.mxu1 %vm1098_vm5, %v4543_v23  ;;  %v6512_v50 = vperm.slane %v4870_v11, 3 }
0x1051   :  { %2728 = vmatpush.bf16.msrb.mxu0 %v2685_v3 }
0x1054   :  { %4420 = vmatmul.msk.bf16.vlgmr.msrb.gmra.mxu0 %vm1098_vm5, %v4543_v23 }
0x1057   :  { %v1618_v34 = vpop.permute.xlu0 %1617 }
0x1058   :  { %1622 = vst.msk [vmem:[#allocation4 + $0xc] sm:$0xf] %vm1462_vm2, %v1618_v34 }
0x105f   :  { %v1774_v49 = vpop.permute.xlu0 %1773  ;;  %v4544_v20 = vld [vmem:[#allocation4 + $0x8] sm:$0xff] }
0x1060   :  { %1779 = vst.msk [vmem:[#allocation4 + $0x10] sm:$0xf] %vm1462_vm2, %v1774_v49  ;;  %4429 = vmatmul.msk.bf16.gmra.mxu1 %vm1098_vm5, %v4544_v20 }
0x1064   :  { %4421 = vmatmul.msk.bf16.gmra.mxu0 %vm1098_vm5, %v4544_v20 }
0x1067   :  { %v1934_v7 = vpop.permute.xlu0 %1933  ;;  %v4545_v10 = vld [vmem:[#allocation4 + $0x10] sm:$0xff] }
0x1068   :  { %1938 = vst.msk [vmem:[#allocation4 + $0x1c] sm:$0xf] %vm1462_vm2, %v1934_v7 }
0x106f   :  { %v4546_v0 = vld [vmem:[#allocation4 + $0x18] sm:$0xff] }
0x1070   :  { %4430 = vmatmul.msk.bf16.gmra.mxu1 %vm1098_vm5, %v4545_v10 }
0x1074   :  { %4422 = vmatmul.msk.bf16.gmra.mxu0 %vm1098_vm5, %v4545_v10 }
0x1080   :  { %4431 = vmatmul.msk.bf16.gmra.mxu1 %vm1098_vm5, %v4546_v0 }
0x1084   :  { %4423 = vmatmul.msk.bf16.gmra.mxu0 %vm1098_vm5, %v4546_v0 }
0x1090   :  { %4432 = vmatmul.msk.bf16.gmra.mxu1 %vm1098_vm5, %v4547_v15 }
0x1094   :  { %4424 = vmatmul.msk.bf16.gmra.mxu0 %vm1098_vm5, %v4547_v15 }
0x10ab   :  { %v2474_v14 = vpop.f32.mrf.mxu2  ;;  %v2488_v44 = vpop.f32.mrf.mxu3 }
0x10ac   :  { %v2493_v38 = vadd.f32 %v2474_v14, %v2447_v24  ;;  %v2535_v1 = vadd.f32 %v2488_v44, %v5990_v13 }
0x10ae   :  { %v2495_v8 = vadd.f32 %v2493_v38, %v5977_v27 }
0x10b0   :  { %v4354_v19 = vmul.f32 -1.442695, %v2495_v8 }
0x10b2   :  { %4740 = vpow2.f32 %v4354_v19 }
0x10b3   :  { %v2476_v30 = vpop.f32.mrf.mxu2  ;;  %v2490_v47 = vpop.f32.mrf.mxu3 }
0x10b4   :  { %v2494_v16 = vadd.f32 %v2476_v30, %v2448_v33  ;;  %v2536_v25 = vadd.f32 %v2490_v47, %v5990_v13 }
0x10b6   :  { %v2496_v9 = vadd.f32 %v2494_v16, %v5977_v27 }
0x10b8   :  { %v4741_v22 = vpop.eup %4740  ;;  %v4355_v2 = vmul.f32 -1.442695, %v2496_v9 }
0x10b9   :  { %v2503_v41 = vadd.f32 1.0, %v4741_v22 }
0x10ba   :  { %4742 = vpow2.f32 %v4355_v2 }
0x10bb   :  { %4744 = vrcp.f32 %v2503_v41  ;;  %v2516_v61 = vand.u32 2147483648, %v2503_v41  ;;  %v2514_v6 = vand.u32 2147483647, %v2503_v41  ;;  %vm2510_vm3 = vweird.f32 %v2503_v41 }
0x10bd   :  { %v2517_v27 = vor.u32 1.1754944e-38, %v2516_v61  ;;  %vm2515_vm6 = vcmp.eq.f32.partialorder %v2514_v6, 8.507059e+37 }
0x10c0   :  { %v4743_v28 = vpop.eup %4742 }
0x10c1   :  { %v4745_v32 = vpop.eup %4744  ;;  %v2504_v63 = vadd.f32 1.0, %v4743_v28 }
0x10c2   :  { %v2506_v12 = vmul.f32 %v4745_v32, %v2503_v41  ;;  %vm2511_vm12 = vweird.f32 %v4745_v32 }
0x10c3   :  { %4746 = vrcp.f32 %v2504_v63  ;;  %vm2512_vm4 = vmor %vm2510_vm3, %vm2511_vm12  ;;  %v2531_v52 = vand.u32 2147483648, %v2504_v63  ;;  %v2529_v53 = vand.u32 2147483647, %v2504_v63  ;;  %vm2525_vm8 = vweird.f32 %v2504_v63 }
0x10c4   :  { %v2507_v37 = vsub.f32 1.0, %v2506_v12 }
0x10c5   :  { %v2532_v57 = vor.u32 1.1754944e-38, %v2531_v52  ;;  %vm2530_vm10 = vcmp.eq.f32.partialorder %v2529_v53, 8.507059e+37 }
0x10c6   :  { %v2508_v46 = vmul.f32 %v4745_v32, %v2507_v37 }
0x10c8   :  { %v2509_v58 = vadd.f32 %v4745_v32, %v2508_v46 }
0x10c9   :  { %v4747_v62 = vpop.eup %4746 }
0x10ca   :  { %v2513_v51 = vsel %vm2512_vm4, %v4745_v32, %v2509_v58  ;;  %v2521_v40 = vmul.f32 %v4747_v62, %v2504_v63  ;;  %vm2526_vm7 = vweird.f32 %v4747_v62 }
0x10cb   :  { %v6507_v17 = vsel %vm2515_vm6, %v2517_v27, %v2513_v51  ;;  %vm2527_vm9 = vmor %vm2525_vm8, %vm2526_vm7 }
0x10cc   :  { %v2537_v48 = vmul.f32 %v2535_v1, %v6507_v17  ;;  %v2522_v42 = vsub.f32 1.0, %v2521_v40 }
0x10cd   :  { %v2779_v4 = vpop.f32.mrf.mxu1 }
0x10ce   :  { %v2539_v29 = vadd.f32 %v2537_v48, %v2455_v31  ;;  %v2523_v5 = vmul.f32 %v4747_v62, %v2522_v42  ;;  %v2780_v33 = vadd.f32 %v2779_v4, %v6512_v50  ;;  %v2543_v48 = vsub.f32 1.0, %v6507_v17 }
0x10cf   :  { %v2555_v31 = vmul.f32 %v6507_v17, %v6429_v60 }
0x10d0   :  { %4748 = vtanh.f32 %v2539_v29  ;;  %v2524_v56 = vadd.f32 %v4747_v62, %v2523_v5  ;;  %2820 = vst.msk [vmem:[#allocation3 + $0x8] sm:$0xff] %vm1098_vm5, %v2780_v33 }
0x10d1   :  { %v2730_v35 = vpop.f32.mrf.mxu0 }
0x10d2   :  { %v2528_v54 = vsel %vm2527_vm9, %v4747_v62, %v2524_v56  ;;  %v6530_v21 = vadd.f32 %v2730_v35, %v6524_v45 }
0x10d3   :  { %v6532_v26 = vsel %vm2530_vm10, %v2532_v57, %v2528_v54 }
0x10d4   :  { %v2538_v23 = vmul.f32 %v2536_v25, %v6532_v26  ;;  %2819 = vst [vmem:[#allocation3] sm:$0xff] %v6530_v21  ;;  %v2544_v53 = vsub.f32 1.0, %v6532_v26  ;;  %v2556_v33 = vmul.f32 %v6532_v26, %v6419_v59  ;;  %v4442_v59 = vld [vmem:[%s7076_s1 + $0x28] sm:$0xf]  ;;  %v4560_v25 = vld [vmem:[%s7076_s1 + $0x34] sm:$0xf0] }
0x10d5   :  { %v2781_v49 = vpop.f32.mrf.mxu1  ;;  %v6613_v26 = vor.u32 %v4560_v25, %v4442_v59 }
0x10d6   :  { %v4749_v3 = vpop.eup %4748  ;;  %v2540_v34 = vadd.f32 %v2538_v23, %v6454_v36  ;;  %v2782_v20 = vadd.f32 %v2781_v49, %v6512_v50 }
0x10d7   :  { %2547 = vrot.lane.b32.xlu0 %v4749_v3, %s4877_s0  ;;  %2900 = vmatpush.bf16.msra.mxu2 %v6613_v26  ;;  %v4438_v3 = vld [vmem:[%s7076_s1 + $0x8] sm:$0xf] }
0x10d8   :  { %4750 = vtanh.f32 %v2540_v34  ;;  %2822 = vst.msk [vmem:[#allocation3 + $0x18] sm:$0xff] %vm1098_vm5, %v2782_v20  ;;  %3027 = vmatpush.bf16.msra.mxu3 %v6613_v26  ;;  %v4559_v34 = vld [vmem:[%s7076_s1 + $0x14] sm:$0xf0] }
0x10d9   :  { %v2732_v13 = vpop.f32.mrf.mxu0  ;;  %v6624_v49 = vor.u32 %v4559_v34, %v4438_v3 }
0x10da   :  { %v6541_v7 = vadd.f32 %v2732_v13, %v6524_v45 }
0x10db   :  { %2901 = vmatpush.bf16.msra.mxu2 %v6624_v49 }
0x10dc   :  { %2821 = vst [vmem:[#allocation3 + $0x10] sm:$0xff] %v6541_v7  ;;  %3028 = vmatpush.bf16.msra.mxu3 %v6624_v49 }
0x10dd   :  { %v2784_v0 = vpop.f32.mrf.mxu1 }
0x10de   :  { %v4751_v10 = vpop.eup %4750  ;;  %v2785_v36 = vadd.f32 %v2784_v0, %v6512_v50  ;;  %2902 = vmatmul.bf16.vlgmr.msra.gmra.mxu2 %v4879_v39 }
0x10df   :  { %2249 = vrot.lane.b32.xlu0 %v6315_v43, %s4877_s0  ;;  %2549 = vrot.lane.b32.xlu1 %v4751_v10, %s4877_s0 }
0x10e0   :  { %2824 = vst.msk [vmem:[#allocation3 + $0x28] sm:$0xff] %vm1098_vm5, %v2785_v36  ;;  %3154 = vmatpush.bf16.msrb.mxu2 %v6613_v26  ;;  %3281 = vmatpush.bf16.msrb.mxu3 %v6613_v26 }
0x10e1   :  { %v2735_v15 = vpop.f32.mrf.mxu0 }
0x10e2   :  { %v6550_v24 = vadd.f32 %v2735_v15, %v6524_v45 }
0x10e4   :  { %2823 = vst [vmem:[#allocation3 + $0x20] sm:$0xff] %v6550_v24  ;;  %3155 = vmatpush.bf16.msrb.mxu2 %v6624_v49  ;;  %3282 = vmatpush.bf16.msrb.mxu3 %v6624_v49 }
0x10e5   :  { %v2786_v14 = vpop.f32.mrf.mxu1 }
0x10e6   :  { %v2787_v38 = vadd.f32 %v2786_v14, %v6512_v50 }
0x10e7   :  { %2405 = vrot.lane.b32.xlu1 %v6433_v18, %s4877_s0 }
0x10e8   :  { %2826 = vst.msk [vmem:[#allocation3 + $0x38] sm:$0xff] %vm1098_vm5, %v2787_v38  ;;  %3408 = vmatpush.bf16.msra.mxu2 %v6613_v26 }
0x10e9   :  { %v2737_v43 = vpop.f32.mrf.mxu0 }
0x10ea   :  { %v6558_v8 = vadd.f32 %v2737_v43, %v6524_v45 }
0x10ec   :  { %2825 = vst [vmem:[#allocation3 + $0x30] sm:$0xff] %v6558_v8  ;;  %3409 = vmatpush.bf16.msra.mxu2 %v6624_v49 }
0x10ed   :  { %v2789_v19 = vpop.f32.mrf.mxu1 }
0x10ee   :  { %v2790_v30 = vadd.f32 %v2789_v19, %v6512_v50 }
0x10f0   :  { %2828 = vst.msk [vmem:[#allocation3 + $0x48] sm:$0xff] %vm1098_vm5, %v2790_v30 }
0x10f1   :  { %v2740_v16 = vpop.f32.mrf.mxu0 }
0x10f2   :  { %v6564_v9 = vadd.f32 %v2740_v16, %v6524_v45 }
0x10f4   :  { %2827 = vst [vmem:[#allocation3 + $0x40] sm:$0xff] %v6564_v9 }
0x10f5   :  { %v2791_v18 = vpop.f32.mrf.mxu1 }
0x10f6   :  { %v2792_v22 = vadd.f32 %v2791_v18, %v6512_v50 }
0x10f8   :  { %2830 = vst.msk [vmem:[#allocation3 + $0x58] sm:$0xff] %vm1098_vm5, %v2792_v22 }
0x10f9   :  { %v2742_v2 = vpop.f32.mrf.mxu0 }
0x10fa   :  { %v6570_v41 = vadd.f32 %v2742_v2, %v6524_v45 }
0x10fc   :  { %2829 = vst [vmem:[#allocation3 + $0x50] sm:$0xff] %v6570_v41 }
0x10fd   :  { %v2794_v28 = vpop.f32.mrf.mxu1 }
0x10fe   :  { %v2795_v32 = vadd.f32 %v2794_v28, %v6512_v50 }
0x1100   :  { %2832 = vst.msk [vmem:[#allocation3 + $0x68] sm:$0xff] %vm1098_vm5, %v2795_v32 }
0x1101   :  { %v2745_v63 = vpop.f32.mrf.mxu0 }
0x1102   :  { %v6576_v12 = vadd.f32 %v2745_v63, %v6524_v45 }
0x1105   :  { %v2796_v37 = vpop.f32.mrf.mxu1 }
0x1106   :  { %v2797_v44 = vadd.f32 %v2796_v37, %v6512_v50 }
0x1108   :  { %2834 = vst.msk [vmem:[#allocation3 + $0x78] sm:$0xff] %vm1098_vm5, %v2797_v44 }
0x1109   :  { %v2747_v61 = vpop.f32.mrf.mxu0 }
0x110a   :  { %v6581_v46 = vadd.f32 %v2747_v61, %v6524_v45 }
0x110d   :  { %v2799_v6 = vpop.f32.mrf.mxu1 }
0x110e   :  { %v2800_v58 = vadd.f32 %v2799_v6, %v6512_v50 }
0x1110   :  { %2836 = vst.msk [vmem:[#allocation3 + $0x88] sm:$0xff] %vm1098_vm5, %v2800_v58 }
0x1111   :  { %v2750_v62 = vpop.f32.mrf.mxu0 }
0x1112   :  { %v6586_v27 = vadd.f32 %v2750_v62, %v6524_v45 }
0x1115   :  { %v2801_v51 = vpop.f32.mrf.mxu1 }
0x1116   :  { %v2802_v1 = vadd.f32 %v2801_v51, %v6512_v50 }
0x1118   :  { %2838 = vst.msk [vmem:[#allocation3 + $0x98] sm:$0xff] %vm1098_vm5, %v2802_v1 }
0x1119   :  { %v2752_v40 = vpop.f32.mrf.mxu0 }
0x111a   :  { %v6591_v11 = vadd.f32 %v2752_v40, %v6524_v45  ;;  %v6668_v40 = vperm.slane %v6521_v55, 5 }
0x1149   :  { %v2548_v42 = vpop.permute.xlu0 %2547 }
0x114a   :  { %v2553_v52 = vmul.f32 %v2548_v42, %v2543_v48 }
0x114c   :  { %v2557_v29 = vadd.f32 %v2555_v31, %v2553_v52 }
0x114e   :  { %v2559_v5 = vpack.c.bf16 %v2557_v29, %v2557_v29 }
0x1150   :  { %2563 = vrot.lane.b32.xlu0 %v2559_v5, %s4877_s0 }
0x1151   :  { %v2250_v4 = vpop.permute.xlu0 %2249  ;;  %v2550_v47 = vpop.permute.xlu1 %2549 }
0x1152   :  { %2254 = vst.msk [vmem:[#allocation4 + $0x2c] sm:$0xf] %vm1462_vm2, %v2250_v4  ;;  %v2554_v56 = vmul.f32 %v2550_v47, %v2544_v53 }
0x1154   :  { %v2558_v57 = vadd.f32 %v2556_v33, %v2554_v56 }
0x1156   :  { %v2560_v35 = vpack.c.bf16 %v2558_v57, %v2558_v57 }
0x1158   :  { %2565 = vrot.lane.b32.xlu1 %v2560_v35, %s4877_s0 }
0x1159   :  { %v2406_v60 = vpop.permute.xlu1 %2405  ;;  %v4548_v17 = vld [vmem:[#allocation4 + $0x28] sm:$0xff] }
0x115a   :  { %2411 = vst.msk [vmem:[#allocation4 + $0x30] sm:$0xf] %vm1462_vm2, %v2406_v60  ;;  %4425 = vmatmul.msk.bf16.gmra.mxu0 %vm1098_vm5, %v4548_v17  ;;  %4433 = vmatmul.msk.bf16.gmra.mxu1 %vm1098_vm5, %v4548_v17 }
0x1161   :  { %v4549_v54 = vld [vmem:[#allocation4 + $0x30] sm:$0xff]  ;;  %v2903_v6 = vpop.f32.mrf.mxu2 }
0x1162   :  { %v2950_v52 = vadd.f32 %v2903_v6, %v6668_v40 }
0x1169   :  { %v2905_v42 = vpop.f32.mrf.mxu2 }
0x116a   :  { %4426 = vmatmul.msk.bf16.gmra.mxu0 %vm1098_vm5, %v4549_v54  ;;  %4434 = vmatmul.msk.bf16.gmra.mxu1 %vm1098_vm5, %v4549_v54  ;;  %v2951_v31 = vadd.f32 %v2905_v42, %v6668_v40 }
0x11c2   :  { %v2564_v23 = vpop.permute.xlu0 %2563 }
0x11c3   :  { %2569 = vst.msk [vmem:[#allocation4 + $0x38] sm:$0xf] %vm1462_vm2, %v2564_v23 }
0x11ca   :  { %v2566_v20 = vpop.permute.xlu1 %2565 }
0x11cb   :  { %2570 = vst.msk [vmem:[#allocation4 + $0x3c] sm:$0xf] %vm1462_vm2, %v2566_v20 }
0x11d2   :  { %v4550_v13 = vld [vmem:[#allocation4 + $0x38] sm:$0xff] }
0x11d3   :  { %4427 = vmatmul.msk.bf16.gmra.mxu0 %vm1098_vm5, %v4550_v13  ;;  %4435 = vmatmul.msk.bf16.gmra.mxu1 %vm1098_vm5, %v4550_v13 }
0x11d7   :  { %v2755_v10 = vpop.f32.mrf.mxu0  ;;  %v2804_v0 = vpop.f32.mrf.mxu1 }
0x11d8   :  { %v6639_v36 = vadd.f32 %v2755_v10, %v6524_v45  ;;  %v2805_v39 = vadd.f32 %v2804_v0, %v6512_v50 }
0x11da   :  { %2839 = vst [vmem:[#allocation3 + $0xa0] sm:$0xff] %v6639_v36 }
0x11db   :  { %2840 = vst.msk [vmem:[#allocation3 + $0xa8] sm:$0xff] %vm1098_vm5, %v2805_v39 }
0x11df   :  { %v2757_v15 = vpop.f32.mrf.mxu0  ;;  %v2806_v14 = vpop.f32.mrf.mxu1 }
0x11e0   :  { %v6645_v38 = vadd.f32 %v2757_v15, %v6524_v45  ;;  %v2807_v43 = vadd.f32 %v2806_v14, %v6512_v50 }
0x11e2   :  { %2842 = vst.msk [vmem:[#allocation3 + $0xb8] sm:$0xff] %vm1098_vm5, %v2807_v43 }
0x11e7   :  { %v2760_v19 = vpop.f32.mrf.mxu0  ;;  %v2809_v30 = vpop.f32.mrf.mxu1 }
0x11e8   :  { %v6650_v16 = vadd.f32 %v2760_v19, %v6524_v45  ;;  %v2810_v18 = vadd.f32 %v2809_v30, %v6512_v50 }
0x11ea   :  { %2843 = vst [vmem:[#allocation3 + $0xc0] sm:$0xff] %v6650_v16 }
0x11eb   :  { %2844 = vst.msk [vmem:[#allocation3 + $0xc8] sm:$0xff] %vm1098_vm5, %v2810_v18 }
0x11ef   :  { %v2762_v22 = vpop.f32.mrf.mxu0  ;;  %v2811_v2 = vpop.f32.mrf.mxu1 }
0x11f0   :  { %v6656_v28 = vadd.f32 %v2762_v22, %v6524_v45  ;;  %v2812_v32 = vadd.f32 %v2811_v2, %v6512_v50 }
0x11f2   :  { %2845 = vst [vmem:[#allocation3 + $0xd0] sm:$0xff] %v6656_v28 }
0x11f3   :  { %2846 = vst.msk [vmem:[#allocation3 + $0xd8] sm:$0xff] %vm1098_vm5, %v2812_v32 }
0x1250   :  { %v2765_v63 = vpop.f32.mrf.mxu0  ;;  %v2814_v37 = vpop.f32.mrf.mxu1 }
0x1251   :  { %v2766_v44 = vadd.f32 %v2765_v63, %v6524_v45  ;;  %v2815_v61 = vadd.f32 %v2814_v37, %v6512_v50 }
0x1253   :  { %2847 = vst [vmem:[#allocation3 + $0xe0] sm:$0xff] %v2766_v44  ;;  %2866 = vrot.lane.b32.xlu2 %v2766_v44, %s4878_s6 }
0x1254   :  { %2848 = vst.msk [vmem:[#allocation3 + $0xe8] sm:$0xff] %vm1098_vm5, %v2815_v61 }
0x1258   :  { %v2767_v58 = vpop.f32.mrf.mxu0  ;;  %v2816_v62 = vpop.f32.mrf.mxu1 }
0x1259   :  { %v2768_v51 = vadd.f32 %v2767_v58, %v6524_v45  ;;  %v2817_v1 = vadd.f32 %v2816_v62, %v6512_v50 }
0x125b   :  { %2849 = vst [vmem:[#allocation3 + $0xf0] sm:$0xff] %v2768_v51  ;;  %v2859_v48 = vld [vmem:[#allocation3 + $0xe8] sm:$0xff]  ;;  %2870 = vrot.lane.b32.xlu1 %v2768_v51, %s4878_s6 }
0x125c   :  { %2850 = vst.msk [vmem:[#allocation3 + $0xf8] sm:$0xff] %vm1098_vm5, %v2817_v1  ;;  %2868 = vrot.lane.b32.xlu0 %v2859_v48, %s4878_s6 }
0x1263   :  { %v2861_v29 = vld [vmem:[#allocation3 + $0xf8] sm:$0xff]  ;;  %2956 = vrot.lane.b32.xlu1 %v2951_v31, %s4877_s0 }
0x1264   :  { %2872 = vrot.lane.b32.xlu2 %v2861_v29, %s4878_s6  ;;  %2954 = vrot.lane.b32.xlu0 %v2950_v52, %s4877_s0  ;;  %v2996_v52 = vld [vmem:[#allocation3 + $0xd8] sm:$0xff] }
0x12ad   :  { %v2867_v50 = vpop.permute.xlu2 %2866 }
0x12be   :  { %v2873_v55 = vpop.permute.xlu2 %2872 }
0x12cd   :  { %v2871_v45 = vpop.permute.xlu1 %2870 }
0x12ce   :  { %v2869_v5 = vpop.permute.xlu0 %2868  ;;  %v2875_v53 = vsel %vm61_vm0, %v2871_v45, %v2873_v55 }
0x12cf   :  { %v2874_v4 = vsel %vm61_vm0, %v2867_v50, %v2869_v5  ;;  %v2879_v47 = vadd.f32 %v2875_v53, %v6541_v7  ;;  %v2994_v50 = vld [vmem:[#allocation3 + $0xc8] sm:$0xff] }
0x12d0   :  { %v2878_v33 = vadd.f32 %v2874_v4, %v6530_v21 }
0x12d1   :  { %v2909_v56 = vadd.f32 %v2905_v42, %v2879_v47 }
0x12d2   :  { %v2908_v57 = vadd.f32 %v2903_v6, %v2878_v33 }
0x12d3   :  { %v2911_v35 = vadd.f32 %v2909_v56, %v6668_v40 }
0x12d4   :  { %v2910_v60 = vadd.f32 %v2908_v57, %v6668_v40 }
0x12d5   :  { %v4445_v17 = vmul.f32 -1.442695, %v2911_v35  ;;  %v2957_v37 = vpop.permute.xlu1 %2956 }
0x12d6   :  { %v4444_v54 = vmul.f32 -1.442695, %v2910_v60  ;;  %v2955_v61 = vpop.permute.xlu0 %2954 }
0x12d7   :  { %4752 = vpow2.f32 %v4445_v17 }
0x12d8   :  { %4754 = vpow2.f32 %v4444_v54 }
0x12dd   :  { %v4753_v59 = vpop.eup %4752 }
0x12de   :  { %v4755_v25 = vpop.eup %4754  ;;  %v2919_v23 = vadd.f32 1.0, %v4753_v59 }
0x12df   :  { %v2918_v3 = vadd.f32 1.0, %v4755_v25 }
0x12e0   :  { %4756 = vrcp.f32 %v2919_v23  ;;  %v2946_v0 = vand.u32 2147483648, %v2919_v23  ;;  %v2944_v14 = vand.u32 2147483647, %v2919_v23  ;;  %vm2940_vm14 = vweird.f32 %v2919_v23 }
0x12e1   :  { %4758 = vrcp.f32 %v2918_v3  ;;  %v2931_v39 = vand.u32 2147483648, %v2918_v3  ;;  %v2929_v19 = vand.u32 2147483647, %v2918_v3  ;;  %vm2925_vm15 = vweird.f32 %v2918_v3 }
0x12e2   :  { %v2947_v22 = vor.u32 1.1754944e-38, %v2946_v0  ;;  %vm2945_vm12 = vcmp.eq.f32.partialorder %v2944_v14, 8.507059e+37 }
0x12e3   :  { %v2932_v2 = vor.u32 1.1754944e-38, %v2931_v39  ;;  %vm2930_vm3 = vcmp.eq.f32.partialorder %v2929_v19, 8.507059e+37 }
0x12e6   :  { %v4757_v34 = vpop.eup %4756 }
0x12e7   :  { %v4759_v7 = vpop.eup %4758  ;;  %v2936_v20 = vmul.f32 %v4757_v34, %v2919_v23  ;;  %vm2941_vm11 = vweird.f32 %v4757_v34 }
0x12e8   :  { %v2921_v21 = vmul.f32 %v4759_v7, %v2918_v3  ;;  %vm2926_vm13 = vweird.f32 %v4759_v7  ;;  %vm2942_vm1 = vmor %vm2940_vm14, %vm2941_vm11 }
0x12e9   :  { %v2937_v13 = vsub.f32 1.0, %v2936_v20  ;;  %vm2927_vm2 = vmor %vm2925_vm15, %vm2926_vm13 }
0x12ea   :  { %v2922_v10 = vsub.f32 1.0, %v2921_v21 }
0x12eb   :  { %v2938_v15 = vmul.f32 %v4757_v34, %v2937_v13 }
0x12ec   :  { %v2923_v43 = vmul.f32 %v4759_v7, %v2922_v10 }
0x12ed   :  { %v2939_v30 = vadd.f32 %v4757_v34, %v2938_v15 }
0x12ee   :  { %v2924_v18 = vadd.f32 %v4759_v7, %v2923_v43 }
0x12ef   :  { %v2943_v32 = vsel %vm2942_vm1, %v4757_v34, %v2939_v30 }
0x12f0   :  { %v2928_v63 = vsel %vm2927_vm2, %v4759_v7, %v2924_v18  ;;  %v2948_v44 = vsel %vm2945_vm12, %v2947_v22, %v2943_v32 }
0x12f1   :  { %v2933_v6 = vsel %vm2930_vm3, %v2932_v2, %v2928_v63  ;;  %v2961_v58 = vmul.f32 %v2957_v37, %v2948_v44  ;;  %v2975_v55 = vsub.f32 1.0, %v2948_v44  ;;  %v2987_v4 = vmul.f32 0.0, %v2948_v44 }
0x12f2   :  { %v2960_v62 = vmul.f32 %v2955_v61, %v2933_v6  ;;  %v2974_v45 = vsub.f32 1.0, %v2933_v6  ;;  %v2986_v56 = vmul.f32 0.0, %v2933_v6 }
0x12f3   :  { %2966 = vrot.lane.b32.xlu0 %v2961_v58, %s4877_s0 }
0x12f4   :  { %2964 = vrot.lane.b32.xlu2 %v2960_v62, %s4877_s0 }
0x134e   :  { %v2965_v51 = vpop.permute.xlu2 %2964 }
0x134f   :  { %v2970_v1 = vadd.f32 %v2965_v51, %v2878_v33 }
0x1351   :  { %4760 = vtanh.f32 %v2970_v1 }
0x1357   :  { %v4761_v48 = vpop.eup %4760 }
0x1358   :  { %2978 = vrot.lane.b32.xlu1 %v4761_v48, %s4875_s11 }
0x1360   :  { %3001 = vrot.lane.b32.xlu1 %v6650_v16, %s4878_s6 }
0x1365   :  { %v2967_v42 = vpop.permute.xlu0 %2966 }
0x1366   :  { %v2971_v31 = vadd.f32 %v2967_v42, %v2879_v47 }
0x1368   :  { %3007 = vrot.lane.b32.xlu1 %v2996_v52, %s4878_s6  ;;  %4762 = vtanh.f32 %v2971_v31 }
0x136e   :  { %v4763_v29 = vpop.eup %4762 }
0x136f   :  { %2980 = vrot.lane.b32.xlu2 %v4763_v29, %s4875_s11 }
0x1377   :  { %3003 = vrot.lane.b32.xlu2 %v2994_v50, %s4878_s6 }
0x13c9   :  { %v2981_v5 = vpop.permute.xlu2 %2980 }
0x13ca   :  { %v2979_v53 = vpop.permute.xlu1 %2978  ;;  %v2985_v33 = vmul.f32 %v2981_v5, %v2975_v55 }
0x13cb   :  { %v2984_v16 = vmul.f32 %v2979_v53, %v2974_v45 }
0x13cc   :  { %v6692_v57 = vadd.f32 %v2987_v4, %v2985_v33 }
0x13cd   :  { %v6694_v47 = vadd.f32 %v2986_v56, %v2984_v16 }
0x13cf   :  { %v2990_v35 = vpack.c.bf16 %v6692_v57, %v6694_v47 }
0x13d1   :  { %3016 = vrot.lane.b32.xlu0 %v2990_v35, %s4875_s11  ;;  %v3004_v3 = vpop.permute.xlu2 %3003 }
0x13d2   :  { %v3002_v23 = vpop.permute.xlu1 %3001 }
0x13d9   :  { %3005 = vrot.lane.b32.xlu0 %v6656_v28, %s4878_s6  ;;  %v3009_v28 = vsel %vm61_vm0, %v3002_v23, %v3004_v3 }
0x13da   :  { %v3013_v34 = vadd.f32 %v3009_v28, %v6550_v24  ;;  %v3008_v39 = vpop.permute.xlu1 %3007 }
0x1443   :  { %v3017_v60 = vpop.permute.xlu0 %3016 }
0x1444   :  { %4446 = vmatmul.msk.bf16.vlgmr.msra.gmra.mxu3 %vm61_vm0, %v3017_v60 }
0x1445   :  { %3535 = vmatpush.bf16.msra.mxu3 %v6613_v26 }
0x1449   :  { %3536 = vmatpush.bf16.msra.mxu3 %v6624_v49 }
0x144b   :  { %v3006_v0 = vpop.permute.xlu0 %3005 }
0x144c   :  { %v3010_v15 = vsel %vm61_vm0, %v3006_v0, %v3008_v39 }
0x144d   :  { %v3014_v14 = vadd.f32 %v3010_v15, %v6558_v8 }
0x14c7   :  { %v3030_v17 = vpop.f32.mrf.mxu3 }
0x14c8   :  { %v3077_v54 = vadd.f32 %v3030_v17, %v6668_v40  ;;  %v3035_v7 = vadd.f32 %v3030_v17, %v3013_v34 }
0x14ca   :  { %3081 = vrot.lane.b32.xlu2 %v3077_v54, %s4877_s0  ;;  %v3037_v20 = vadd.f32 %v3035_v7, %v6668_v40  ;;  %v3121_v54 = vld [vmem:[#allocation3 + $0xa8] sm:$0xff] }
0x14cc   :  { %v4447_v21 = vmul.f32 -1.442695, %v3037_v20 }
0x14ce   :  { %4764 = vpow2.f32 %v4447_v21 }
0x14cf   :  { %v3032_v59 = vpop.f32.mrf.mxu3 }
0x14d0   :  { %v3078_v25 = vadd.f32 %v3032_v59, %v6668_v40  ;;  %v3036_v19 = vadd.f32 %v3032_v59, %v3014_v14  ;;  %v3123_v59 = vld [vmem:[#allocation3 + $0xb8] sm:$0xff] }
0x14d2   :  { %3083 = vrot.lane.b32.xlu0 %v3078_v25, %s4877_s0  ;;  %v3038_v18 = vadd.f32 %v3036_v19, %v6668_v40 }
0x14d4   :  { %v4765_v13 = vpop.eup %4764  ;;  %v4448_v22 = vmul.f32 -1.442695, %v3038_v18 }
0x14d5   :  { %v3045_v10 = vadd.f32 1.0, %v4765_v13 }
0x14d7   :  { %4766 = vrcp.f32 %v3045_v10  ;;  %v3058_v63 = vand.u32 2147483648, %v3045_v10  ;;  %vm3052_vm6 = vweird.f32 %v3045_v10  ;;  %v3056_v37 = vand.u32 2147483647, %v3045_v10 }
0x14d8   :  { %4768 = vpow2.f32 %v4448_v22 }
0x14d9   :  { %v3059_v6 = vor.u32 1.1754944e-38, %v3058_v63  ;;  %vm3057_vm8 = vcmp.eq.f32.partialorder %v3056_v37, 8.507059e+37 }
0x14dd   :  { %v4767_v43 = vpop.eup %4766 }
0x14de   :  { %v3048_v30 = vmul.f32 %v4767_v43, %v3045_v10  ;;  %vm3053_vm4 = vweird.f32 %v4767_v43  ;;  %v4769_v44 = vpop.eup %4768 }
0x14df   :  { %vm3054_vm7 = vmor %vm3052_vm6, %vm3053_vm4  ;;  %v3046_v8 = vadd.f32 1.0, %v4769_v44 }
0x14e0   :  { %v3049_v24 = vsub.f32 1.0, %v3048_v30 }
0x14e1   :  { %4770 = vrcp.f32 %v3046_v8  ;;  %v3073_v29 = vand.u32 2147483648, %v3046_v8  ;;  %vm3067_vm10 = vweird.f32 %v3046_v8  ;;  %v3071_v50 = vand.u32 2147483647, %v3046_v8 }
0x14e2   :  { %v3050_v2 = vmul.f32 %v4767_v43, %v3049_v24 }
0x14e3   :  { %v3074_v45 = vor.u32 1.1754944e-38, %v3073_v29  ;;  %vm3072_vm13 = vcmp.eq.f32.partialorder %v3071_v50, 8.507059e+37 }
0x14e4   :  { %v3051_v32 = vadd.f32 %v4767_v43, %v3050_v2 }
0x14e6   :  { %v3055_v61 = vsel %vm3054_vm7, %v4767_v43, %v3051_v32 }
0x14e7   :  { %v3060_v62 = vsel %vm3057_vm8, %v3059_v6, %v3055_v61  ;;  %v4771_v1 = vpop.eup %4770 }
0x14e8   :  { %v3063_v48 = vmul.f32 %v4771_v1, %v3046_v8  ;;  %vm3068_vm9 = vweird.f32 %v4771_v1  ;;  %v3101_v23 = vsub.f32 1.0, %v3060_v62  ;;  %v3113_v7 = vmul.f32 %v3060_v62, %v6694_v47 }
0x14e9   :  { %vm3069_vm11 = vmor %vm3067_vm10, %vm3068_vm9 }
0x14ea   :  { %v3064_v42 = vsub.f32 1.0, %v3063_v48 }
0x14ec   :  { %v3065_v31 = vmul.f32 %v4771_v1, %v3064_v42 }
0x14ee   :  { %v3066_v52 = vadd.f32 %v4771_v1, %v3065_v31 }
0x14f0   :  { %v3070_v55 = vsel %vm3069_vm11, %v4771_v1, %v3066_v52 }
0x14f1   :  { %v3075_v53 = vsel %vm3072_vm13, %v3074_v45, %v3070_v55 }
0x14f2   :  { %v3102_v28 = vsub.f32 1.0, %v3075_v53  ;;  %v3114_v20 = vmul.f32 %v3075_v53, %v6692_v57 }
0x1524   :  { %v3082_v58 = vpop.permute.xlu2 %3081 }
0x1525   :  { %v3087_v51 = vmul.f32 %v3082_v58, %v3060_v62 }
0x1527   :  { %3091 = vrot.lane.b32.xlu1 %v3087_v51, %s4877_s0 }
0x1544   :  { %v3084_v5 = vpop.permute.xlu0 %3083 }
0x1545   :  { %v3088_v4 = vmul.f32 %v3084_v5, %v3075_v53 }
0x1547   :  { %3093 = vrot.lane.b32.xlu2 %v3088_v4, %s4877_s0 }
0x1599   :  { %v3092_v33 = vpop.permute.xlu1 %3091 }
0x159a   :  { %v3097_v56 = vadd.f32 %v3092_v33, %v3013_v34 }
0x159c   :  { %4772 = vtanh.f32 %v3097_v56 }
0x15a1   :  { %v3094_v16 = vpop.permute.xlu2 %3093 }
0x15a2   :  { %v4773_v35 = vpop.eup %4772  ;;  %v3098_v60 = vadd.f32 %v3094_v16, %v3014_v14 }
0x15a3   :  { %3105 = vrot.lane.b32.xlu0 %v4773_v35, %s4875_s11 }
0x15a4   :  { %4774 = vtanh.f32 %v3098_v60 }
0x15aa   :  { %v4775_v17 = vpop.eup %4774 }
0x15ab   :  { %3107 = vrot.lane.b32.xlu1 %v4775_v17, %s4875_s11  ;;  %3128 = vrot.lane.b32.xlu0 %v6639_v36, %s4878_s6 }
0x15b3   :  { %3130 = vrot.lane.b32.xlu1 %v3121_v54, %s4878_s6  ;;  %3134 = vrot.lane.b32.xlu0 %v3123_v59, %s4878_s6 }
0x1615   :  { %v3106_v25 = vpop.permute.xlu0 %3105 }
0x1616   :  { %v3111_v3 = vmul.f32 %v3106_v25, %v3101_v23 }
0x1618   :  { %v6724_v13 = vadd.f32 %v3113_v7, %v3111_v3 }
0x161d   :  { %v3108_v34 = vpop.permute.xlu1 %3107  ;;  %v3129_v14 = vpop.permute.xlu0 %3128 }
0x161e   :  { %v3112_v21 = vmul.f32 %v3108_v34, %v3102_v28 }
0x1620   :  { %v6726_v10 = vadd.f32 %v3114_v20, %v3112_v21  ;;  %v3248_v21 = vld [vmem:[#allocation3 + $0x88] sm:$0xff] }
0x1622   :  { %v3117_v36 = vpack.c.bf16 %v6726_v10, %v6724_v13 }
0x1624   :  { %3143 = vrot.lane.b32.xlu2 %v3117_v36, %s4875_s11 }
0x1625   :  { %v3135_v19 = vpop.permute.xlu0 %3134  ;;  %v3131_v2 = vpop.permute.xlu1 %3130 }
0x1626   :  { %v3136_v63 = vsel %vm61_vm0, %v3129_v14, %v3131_v2 }
0x1627   :  { %v3140_v37 = vadd.f32 %v3136_v63, %v6564_v9 }
0x162c   :  { %3132 = vrot.lane.b32.xlu2 %v6645_v38, %s4878_s6 }
0x167e   :  { %v3144_v0 = vpop.permute.xlu2 %3143 }
0x167f   :  { %4449 = vmatmul.msk.bf16.vlgmr.msrb.gmra.mxu2 %vm61_vm0, %v3144_v0  ;;  %v3250_v0 = vld [vmem:[#allocation3 + $0x98] sm:$0xff] }
0x1680   :  { %3662 = vmatpush.bf16.msrb.mxu2 %v6613_v26 }
0x1684   :  { %3663 = vmatpush.bf16.msrb.mxu2 %v6624_v49 }
0x1686   :  { %v3133_v43 = vpop.permute.xlu2 %3132 }
0x1687   :  { %v3137_v30 = vsel %vm61_vm0, %v3133_v43, %v3135_v19 }
0x1688   :  { %v3141_v18 = vadd.f32 %v3137_v30, %v6570_v41 }
0x1702   :  { %v3157_v57 = vpop.f32.mrf.mxu2 }
0x1703   :  { %v3204_v47 = vadd.f32 %v3157_v57, %v6668_v40  ;;  %v3162_v44 = vadd.f32 %v3157_v57, %v3140_v37 }
0x1705   :  { %3208 = vrot.lane.b32.xlu1 %v3204_v47, %s4877_s0  ;;  %v3164_v6 = vadd.f32 %v3162_v44, %v6668_v40 }
0x1707   :  { %v4450_v58 = vmul.f32 -1.442695, %v3164_v6 }
0x170a   :  { %v3159_v39 = vpop.f32.mrf.mxu2 }
0x170b   :  { %v3205_v15 = vadd.f32 %v3159_v39, %v6668_v40  ;;  %v3163_v24 = vadd.f32 %v3159_v39, %v3141_v18 }
0x170d   :  { %3210 = vrot.lane.b32.xlu2 %v3205_v15, %s4877_s0  ;;  %v3165_v22 = vadd.f32 %v3163_v24, %v6668_v40 }
0x170f   :  { %v4451_v32 = vmul.f32 -1.442695, %v3165_v22 }
0x1711   :  { %4776 = vpow2.f32 %v4451_v32 }
0x1717   :  { %v4777_v61 = vpop.eup %4776 }
0x1718   :  { %v3173_v8 = vadd.f32 1.0, %v4777_v61 }
0x171a   :  { %4778 = vrcp.f32 %v3173_v8  ;;  %v3200_v29 = vand.u32 2147483648, %v3173_v8  ;;  %vm3194_vm15 = vweird.f32 %v3173_v8  ;;  %v3198_v9 = vand.u32 2147483647, %v3173_v8 }
0x171b   :  { %4780 = vpow2.f32 %v4450_v58 }
0x171c   :  { %v3201_v45 = vor.u32 1.1754944e-38, %v3200_v29  ;;  %vm3199_vm2 = vcmp.eq.f32.partialorder %v3198_v9, 8.507059e+37 }
0x1720   :  { %v4779_v62 = vpop.eup %4778 }
0x1721   :  { %v4781_v41 = vpop.eup %4780  ;;  %v3190_v51 = vmul.f32 %v4779_v62, %v3173_v8  ;;  %vm3195_vm14 = vweird.f32 %v4779_v62 }
0x1722   :  { %v3172_v1 = vadd.f32 1.0, %v4781_v41  ;;  %vm3196_vm1 = vmor %vm3194_vm15, %vm3195_vm14 }
0x1723   :  { %v3191_v48 = vsub.f32 1.0, %v3190_v51 }
0x1724   :  { %4782 = vrcp.f32 %v3172_v1  ;;  %v3185_v35 = vand.u32 2147483648, %v3172_v1  ;;  %vm3179_vm3 = vweird.f32 %v3172_v1  ;;  %v3183_v60 = vand.u32 2147483647, %v3172_v1 }
0x1725   :  { %v3192_v42 = vmul.f32 %v4779_v62, %v3191_v48 }
0x1726   :  { %v3186_v54 = vor.u32 1.1754944e-38, %v3185_v35  ;;  %vm3184_vm6 = vcmp.eq.f32.partialorder %v3183_v60, 8.507059e+37 }
0x1727   :  { %v3193_v31 = vadd.f32 %v4779_v62, %v3192_v42 }
0x1729   :  { %v3197_v50 = vsel %vm3196_vm1, %v4779_v62, %v3193_v31 }
0x172a   :  { %v4783_v52 = vpop.eup %4782  ;;  %v3202_v5 = vsel %vm3199_vm2, %v3201_v45, %v3197_v50 }
0x172b   :  { %v3175_v55 = vmul.f32 %v4783_v52, %v3172_v1  ;;  %vm3180_vm12 = vweird.f32 %v4783_v52  ;;  %v3229_v15 = vsub.f32 1.0, %v3202_v5  ;;  %v3241_v19 = vmul.f32 %v3202_v5, %v6726_v10 }
0x172c   :  { %vm3181_vm4 = vmor %vm3179_vm3, %vm3180_vm12 }
0x172d   :  { %v3176_v33 = vsub.f32 1.0, %v3175_v55 }
0x172f   :  { %v3177_v56 = vmul.f32 %v4783_v52, %v3176_v33 }
0x1731   :  { %v3178_v16 = vadd.f32 %v4783_v52, %v3177_v56 }
0x1733   :  { %v3182_v17 = vsel %vm3181_vm4, %v4783_v52, %v3178_v16 }
0x1734   :  { %v3187_v59 = vsel %vm3184_vm6, %v3186_v54, %v3182_v17 }
0x1735   :  { %v3228_v47 = vsub.f32 1.0, %v3187_v59  ;;  %v3240_v43 = vmul.f32 %v3187_v59, %v6724_v13 }
0x1767   :  { %v3211_v53 = vpop.permute.xlu2 %3210 }
0x1768   :  { %v3215_v4 = vmul.f32 %v3211_v53, %v3202_v5 }
0x176a   :  { %3220 = vrot.lane.b32.xlu1 %v3215_v4, %s4877_s0 }
0x1777   :  { %v3209_v25 = vpop.permute.xlu1 %3208 }
0x1778   :  { %v3214_v23 = vmul.f32 %v3209_v25, %v3187_v59 }
0x177a   :  { %3218 = vrot.lane.b32.xlu0 %v3214_v23, %s4877_s0 }
0x17dc   :  { %v3221_v3 = vpop.permute.xlu1 %3220 }
0x17dd   :  { %v3225_v28 = vadd.f32 %v3221_v3, %v3141_v18 }
0x17df   :  { %4784 = vtanh.f32 %v3225_v28 }
0x17e5   :  { %v4785_v34 = vpop.eup %4784 }
0x17e6   :  { %3234 = vrot.lane.b32.xlu0 %v4785_v34, %s4875_s11 }
0x17ec   :  { %v3219_v7 = vpop.permute.xlu0 %3218 }
0x17ed   :  { %v3224_v20 = vadd.f32 %v3219_v7, %v3140_v37 }
0x17ee   :  { %3257 = vrot.lane.b32.xlu0 %v3248_v21, %s4878_s6 }
0x17ef   :  { %4786 = vtanh.f32 %v3224_v20 }
0x17f5   :  { %v4787_v36 = vpop.eup %4786 }
0x17f6   :  { %3232 = vrot.lane.b32.xlu2 %v4787_v36, %s4875_s11 }
0x17fe   :  { %3255 = vrot.lane.b32.xlu2 %v6586_v27, %s4878_s6 }
0x1806   :  { %3261 = vrot.lane.b32.xlu2 %v3250_v0, %s4878_s6 }
0x1850   :  { %v3233_v57 = vpop.permute.xlu2 %3232 }
0x1851   :  { %v3238_v39 = vmul.f32 %v3233_v57, %v3228_v47 }
0x1853   :  { %v6756_v18 = vadd.f32 %v3240_v43, %v3238_v39 }
0x1858   :  { %v3235_v14 = vpop.permute.xlu0 %3234  ;;  %v3256_v37 = vpop.permute.xlu2 %3255 }
0x1859   :  { %v3239_v30 = vmul.f32 %v3235_v14, %v3229_v15  ;;  %v3377_v15 = vld [vmem:[#allocation3 + $0x78] sm:$0xff] }
0x185b   :  { %v6758_v24 = vadd.f32 %v3241_v19, %v3239_v30  ;;  %v3375_v30 = vld [vmem:[#allocation3 + $0x68] sm:$0xff] }
0x185d   :  { %v3244_v22 = vpack.c.bf16 %v6758_v24, %v6756_v18 }
0x185f   :  { %3270 = vrot.lane.b32.xlu1 %v3244_v22, %s4875_s11 }
0x1860   :  { %v3258_v44 = vpop.permute.xlu0 %3257  ;;  %v3262_v58 = vpop.permute.xlu2 %3261 }
0x1861   :  { %v3263_v61 = vsel %vm61_vm0, %v3256_v37, %v3258_v44 }
0x1862   :  { %v3267_v6 = vadd.f32 %v3263_v61, %v6576_v12 }
0x1867   :  { %3259 = vrot.lane.b32.xlu1 %v6591_v11, %s4878_s6 }
0x18d1   :  { %v3271_v2 = vpop.permute.xlu1 %3270 }
0x18d2   :  { %4452 = vmatmul.msk.bf16.vlgmr.msrb.gmra.mxu3 %vm61_vm0, %v3271_v2 }
0x18d3   :  { %3789 = vmatpush.bf16.msrb.mxu3 %v6613_v26 }
0x18d7   :  { %3790 = vmatpush.bf16.msrb.mxu3 %v6624_v49 }
0x18d9   :  { %v3260_v8 = vpop.permute.xlu1 %3259 }
0x18da   :  { %v3264_v49 = vsel %vm61_vm0, %v3260_v8, %v3262_v58 }
0x18db   :  { %v3268_v41 = vadd.f32 %v3264_v49, %v6581_v46 }
0x1955   :  { %v3284_v13 = vpop.f32.mrf.mxu3 }
0x1956   :  { %v3331_v10 = vadd.f32 %v3284_v13, %v6668_v40  ;;  %v3289_v26 = vadd.f32 %v3284_v13, %v3267_v6 }
0x1958   :  { %3335 = vrot.lane.b32.xlu0 %v3331_v10, %s4877_s0  ;;  %v3291_v62 = vadd.f32 %v3289_v26, %v6668_v40 }
0x195a   :  { %v4453_v51 = vmul.f32 -1.442695, %v3291_v62 }
0x195c   :  { %4788 = vpow2.f32 %v4453_v51 }
0x195d   :  { %v3286_v32 = vpop.f32.mrf.mxu3 }
0x195e   :  { %v3332_v63 = vadd.f32 %v3286_v32, %v6668_v40  ;;  %v3290_v1 = vadd.f32 %v3286_v32, %v3268_v41 }
0x1960   :  { %3337 = vrot.lane.b32.xlu1 %v3332_v63, %s4877_s0  ;;  %v3292_v48 = vadd.f32 %v3290_v1, %v6668_v40 }
0x1962   :  { %v4454_v42 = vmul.f32 -1.442695, %v3292_v48  ;;  %v4789_v31 = vpop.eup %4788 }
0x1963   :  { %v3299_v52 = vadd.f32 1.0, %v4789_v31 }
0x1964   :  { %4790 = vpow2.f32 %v4454_v42 }
0x1965   :  { %4792 = vrcp.f32 %v3299_v52  ;;  %v3312_v16 = vand.u32 2147483648, %v3299_v52  ;;  %vm3306_vm8 = vweird.f32 %v3299_v52  ;;  %v3310_v35 = vand.u32 2147483647, %v3299_v52 }
0x1967   :  { %v3313_v54 = vor.u32 1.1754944e-38, %v3312_v16  ;;  %vm3311_vm10 = vcmp.eq.f32.partialorder %v3310_v35, 8.507059e+37 }
0x196a   :  { %v4791_v29 = vpop.eup %4790 }
0x196b   :  { %v3300_v9 = vadd.f32 1.0, %v4791_v29  ;;  %v4793_v50 = vpop.eup %4792 }
0x196c   :  { %v3302_v55 = vmul.f32 %v4793_v50, %v3299_v52  ;;  %vm3307_vm7 = vweird.f32 %v4793_v50 }
0x196d   :  { %4794 = vrcp.f32 %v3300_v9  ;;  %vm3308_vm9 = vmor %vm3306_vm8, %vm3307_vm7  ;;  %v3327_v28 = vand.u32 2147483648, %v3300_v9  ;;  %vm3321_vm13 = vweird.f32 %v3300_v9  ;;  %v3325_v34 = vand.u32 2147483647, %v3300_v9 }
0x196e   :  { %v3303_v45 = vsub.f32 1.0, %v3302_v55 }
0x196f   :  { %v3328_v20 = vor.u32 1.1754944e-38, %v3327_v28  ;;  %vm3326_vm15 = vcmp.eq.f32.partialorder %v3325_v34, 8.507059e+37 }
0x1970   :  { %v3304_v53 = vmul.f32 %v4793_v50, %v3303_v45 }
0x1972   :  { %v3305_v33 = vadd.f32 %v4793_v50, %v3304_v53 }
0x1973   :  { %v4795_v5 = vpop.eup %4794 }
0x1974   :  { %v3317_v4 = vmul.f32 %v4795_v5, %v3300_v9  ;;  %v3309_v60 = vsel %vm3308_vm9, %v4793_v50, %v3305_v33  ;;  %vm3322_vm11 = vweird.f32 %v4795_v5 }
0x1975   :  { %v3314_v59 = vsel %vm3311_vm10, %v3313_v54, %v3309_v60  ;;  %vm3323_vm14 = vmor %vm3321_vm13, %vm3322_vm11 }
0x1976   :  { %v3318_v56 = vsub.f32 1.0, %v3317_v4  ;;  %v3355_v2 = vsub.f32 1.0, %v3314_v59  ;;  %v3367_v63 = vmul.f32 %v3314_v59, %v6756_v18 }
0x1978   :  { %v3319_v17 = vmul.f32 %v4795_v5, %v3318_v56 }
0x197a   :  { %v3320_v3 = vadd.f32 %v4795_v5, %v3319_v17 }
0x197c   :  { %v3324_v7 = vsel %vm3323_vm14, %v4795_v5, %v3320_v3 }
0x197d   :  { %v3329_v21 = vsel %vm3326_vm15, %v3328_v20, %v3324_v7 }
0x197e   :  { %v3356_v10 = vsub.f32 1.0, %v3329_v21 }
0x19ca   :  { %v3336_v25 = vpop.permute.xlu0 %3335 }
0x19cb   :  { %v3341_v23 = vmul.f32 %v3336_v25, %v3314_v59 }
0x19cd   :  { %3345 = vrot.lane.b32.xlu2 %v3341_v23, %s4877_s0 }
0x19d2   :  { %v3338_v36 = vpop.permute.xlu1 %3337 }
0x19d3   :  { %v3342_v0 = vmul.f32 %v3338_v36, %v3329_v21 }
0x19d5   :  { %3347 = vrot.lane.b32.xlu0 %v3342_v0, %s4877_s0 }
0x1a27   :  { %v3346_v57 = vpop.permute.xlu2 %3345 }
0x1a28   :  { %v3351_v47 = vadd.f32 %v3346_v57, %v3267_v6 }
0x1a2a   :  { %4796 = vtanh.f32 %v3351_v47 }
0x1a30   :  { %v4797_v39 = vpop.eup %4796 }
0x1a31   :  { %3359 = vrot.lane.b32.xlu1 %v4797_v39, %s4875_s11 }
0x1a39   :  { %3382 = vrot.lane.b32.xlu1 %v6576_v12, %s4878_s6  ;;  %v3368_v12 = vmul.f32 %v3329_v21, %v6758_v24 }
0x1a41   :  { %3388 = vrot.lane.b32.xlu1 %v3377_v15, %s4878_s6 }
0x1a47   :  { %v3348_v14 = vpop.permute.xlu0 %3347 }
0x1a48   :  { %v3352_v43 = vadd.f32 %v3348_v14, %v3268_v41 }
0x1a4a   :  { %4798 = vtanh.f32 %v3352_v43 }
0x1a50   :  { %v4799_v19 = vpop.eup %4798 }
0x1a51   :  { %3361 = vrot.lane.b32.xlu2 %v4799_v19, %s4875_s11 }
0x1a59   :  { %3384 = vrot.lane.b32.xlu2 %v3375_v30, %s4878_s6 }
0x1aa3   :  { %v3360_v22 = vpop.permute.xlu1 %3359 }
0x1aa4   :  { %v3365_v13 = vmul.f32 %v3360_v22, %v3355_v2 }
0x1aa6   :  { %v6788_v44 = vadd.f32 %v3367_v63, %v3365_v13  ;;  %v3501_v13 = vld [vmem:[#allocation3 + $0x40] sm:$0xff] }
0x1aab   :  { %v3362_v32 = vpop.permute.xlu2 %3361  ;;  %v3383_v62 = vpop.permute.xlu1 %3382 }
0x1aac   :  { %v3366_v37 = vmul.f32 %v3362_v32, %v3356_v10  ;;  %v3504_v10 = vld [vmem:[#allocation3 + $0x58] sm:$0xff]  ;;  %v3502_v32 = vld [vmem:[#allocation3 + $0x48] sm:$0xff] }
0x1aae   :  { %v6790_v61 = vadd.f32 %v3368_v12, %v3366_v37 }
0x1ab0   :  { %v3371_v6 = vpack.c.bf16 %v6790_v61, %v6788_v44 }
0x1ab2   :  { %3397 = vrot.lane.b32.xlu0 %v3371_v6, %s4875_s11 }
0x1ab3   :  { %v3385_v49 = vpop.permute.xlu2 %3384  ;;  %v3389_v29 = vpop.permute.xlu1 %3388 }
0x1ab4   :  { %v3390_v41 = vsel %vm61_vm0, %v3383_v62, %v3385_v49 }
0x1ab5   :  { %v3394_v51 = vadd.f32 %v3390_v41, %v6586_v27  ;;  %v3503_v41 = vld [vmem:[#allocation3 + $0x50] sm:$0xff] }
0x1aba   :  { %3386 = vrot.lane.b32.xlu0 %v6581_v46, %s4878_s6 }
0x1b24   :  { %v3398_v8 = vpop.permute.xlu0 %3397 }
0x1b25   :  { %4455 = vmatmul.msk.bf16.vlgmr.msra.gmra.mxu2 %vm61_vm0, %v3398_v8 }
0x1b2c   :  { %v3387_v52 = vpop.permute.xlu0 %3386 }
0x1b2d   :  { %v3391_v9 = vsel %vm61_vm0, %v3387_v52, %v3389_v29 }
0x1b2e   :  { %v3395_v50 = vadd.f32 %v3391_v9, %v6591_v11 }
0x1ba8   :  { %v3411_v26 = vpop.f32.mrf.mxu2 }
0x1ba9   :  { %v3458_v18 = vadd.f32 %v3411_v26, %v6668_v40  ;;  %v3416_v46 = vadd.f32 %v3411_v26, %v3394_v51 }
0x1bab   :  { %3462 = vrot.lane.b32.xlu2 %v3458_v18, %s4877_s0  ;;  %v3418_v1 = vadd.f32 %v3416_v46, %v6668_v40 }
0x1bad   :  { %v4456_v48 = vmul.f32 -1.442695, %v3418_v1 }
0x1baf   :  { %4800 = vpow2.f32 %v4456_v48 }
0x1bb0   :  { %v3413_v24 = vpop.f32.mrf.mxu2 }
0x1bb1   :  { %v3459_v58 = vadd.f32 %v3413_v24, %v6668_v40  ;;  %v3417_v45 = vadd.f32 %v3413_v24, %v3395_v50 }
0x1bb3   :  { %3464 = vrot.lane.b32.xlu0 %v3459_v58, %s4877_s0  ;;  %v3419_v53 = vadd.f32 %v3417_v45, %v6668_v40 }
0x1bb5   :  { %v4801_v42 = vpop.eup %4800  ;;  %v4457_v4 = vmul.f32 -1.442695, %v3419_v53  ;;  %v4872_v53 = vld [vmem:[#allocation3 + $0xa0] sm:$0xff] }
0x1bb6   :  { %v3426_v31 = vadd.f32 1.0, %v4801_v42 }
0x1bb8   :  { %4802 = vrcp.f32 %v3426_v31  ;;  %v3439_v16 = vand.u32 2147483648, %v3426_v31  ;;  %vm3433_vm2 = vweird.f32 %v3426_v31  ;;  %v3437_v35 = vand.u32 2147483647, %v3426_v31 }
0x1bb9   :  { %4804 = vpow2.f32 %v4457_v4 }
0x1bba   :  { %v3440_v54 = vor.u32 1.1754944e-38, %v3439_v16  ;;  %vm3438_vm3 = vcmp.eq.f32.partialorder %v3437_v35, 8.507059e+37 }
0x1bbe   :  { %v4803_v55 = vpop.eup %4802 }
0x1bbf   :  { %v3429_v5 = vmul.f32 %v4803_v55, %v3426_v31  ;;  %vm3434_vm1 = vweird.f32 %v4803_v55  ;;  %v4805_v60 = vpop.eup %4804 }
0x1bc0   :  { %vm3435_vm12 = vmor %vm3433_vm2, %vm3434_vm1  ;;  %v3427_v11 = vadd.f32 1.0, %v4805_v60 }
0x1bc1   :  { %v3430_v27 = vsub.f32 1.0, %v3429_v5 }
0x1bc2   :  { %4806 = vrcp.f32 %v3427_v11  ;;  %v3454_v21 = vand.u32 2147483648, %v3427_v11  ;;  %vm3448_vm6 = vweird.f32 %v3427_v11  ;;  %v3452_v36 = vand.u32 2147483647, %v3427_v11 }
0x1bc3   :  { %v3431_v33 = vmul.f32 %v4803_v55, %v3430_v27 }
0x1bc4   :  { %v3455_v57 = vor.u32 1.1754944e-38, %v3454_v21  ;;  %vm3453_vm8 = vcmp.eq.f32.partialorder %v3452_v36, 8.507059e+37 }
0x1bc5   :  { %v3432_v56 = vadd.f32 %v4803_v55, %v3431_v33 }
0x1bc7   :  { %v3436_v17 = vsel %vm3435_vm12, %v4803_v55, %v3432_v56 }
0x1bc8   :  { %v3441_v59 = vsel %vm3438_vm3, %v3440_v54, %v3436_v17  ;;  %v4807_v3 = vpop.eup %4806 }
0x1bc9   :  { %v3444_v28 = vmul.f32 %v4807_v3, %v3427_v11  ;;  %vm3449_vm4 = vweird.f32 %v4807_v3  ;;  %v3482_v12 = vsub.f32 1.0, %v3441_v59  ;;  %v3494_v26 = vmul.f32 %v3441_v59, %v6788_v44 }
0x1bca   :  { %vm3450_vm7 = vmor %vm3448_vm6, %vm3449_vm4 }
0x1bcb   :  { %v3445_v34 = vsub.f32 1.0, %v3444_v28 }
0x1bcd   :  { %v3446_v7 = vmul.f32 %v4807_v3, %v3445_v34 }
0x1bcf   :  { %v3447_v20 = vadd.f32 %v4807_v3, %v3446_v7 }
0x1bd1   :  { %v3451_v0 = vsel %vm3450_vm7, %v4807_v3, %v3447_v20 }
0x1bd2   :  { %v3456_v47 = vsel %vm3453_vm8, %v3455_v57, %v3451_v0 }
0x1bd3   :  { %v3483_v6 = vsub.f32 1.0, %v3456_v47  ;;  %v3495_v18 = vmul.f32 %v3456_v47, %v6790_v61 }
0x1c05   :  { %v3463_v25 = vpop.permute.xlu2 %3462 }
0x1c06   :  { %v3468_v23 = vmul.f32 %v3463_v25, %v3441_v59 }
0x1c08   :  { %3472 = vrot.lane.b32.xlu1 %v3468_v23, %s4877_s0 }
0x1c25   :  { %v3465_v39 = vpop.permute.xlu0 %3464 }
0x1c26   :  { %v3469_v15 = vmul.f32 %v3465_v39, %v3456_v47 }
0x1c28   :  { %3474 = vrot.lane.b32.xlu2 %v3469_v15, %s4877_s0 }
0x1c7a   :  { %v3473_v14 = vpop.permute.xlu1 %3472 }
0x1c7b   :  { %v3478_v43 = vadd.f32 %v3473_v14, %v3394_v51 }
0x1c7d   :  { %4808 = vtanh.f32 %v3478_v43 }
0x1c82   :  { %v3475_v19 = vpop.permute.xlu2 %3474 }
0x1c83   :  { %v4809_v30 = vpop.eup %4808  ;;  %v3479_v22 = vadd.f32 %v3475_v19, %v3395_v50 }
0x1c84   :  { %3486 = vrot.lane.b32.xlu0 %v4809_v30, %s4875_s11 }
0x1c85   :  { %4810 = vtanh.f32 %v3479_v22 }
0x1c8b   :  { %v4811_v2 = vpop.eup %4810 }
0x1c8c   :  { %3509 = vrot.lane.b32.xlu0 %v3501_v13, %s4878_s6  ;;  %3488 = vrot.lane.b32.xlu1 %v4811_v2, %s4875_s11 }
0x1c94   :  { %3515 = vrot.lane.b32.xlu0 %v3504_v10, %s4878_s6  ;;  %3511 = vrot.lane.b32.xlu1 %v3502_v32, %s4878_s6 }
0x1cf6   :  { %v3487_v63 = vpop.permute.xlu0 %3486 }
0x1cf7   :  { %v3492_v37 = vmul.f32 %v3487_v63, %v3482_v12 }
0x1cf9   :  { %v6817_v58 = vadd.f32 %v3494_v26, %v3492_v37  ;;  %v3629_v37 = vld [vmem:[#allocation3 + $0x28] sm:$0xff]  ;;  %v3631_v26 = vld [vmem:[#allocation3 + $0x38] sm:$0xff] }
0x1cfe   :  { %v3489_v8 = vpop.permute.xlu1 %3488  ;;  %v3510_v48 = vpop.permute.xlu0 %3509 }
0x1cff   :  { %v3493_v24 = vmul.f32 %v3489_v8, %v3483_v6  ;;  %v3628_v8 = vld [vmem:[#allocation3 + $0x20] sm:$0xff] }
0x1d01   :  { %v6819_v49 = vadd.f32 %v3495_v18, %v3493_v24 }
0x1d03   :  { %v3498_v62 = vpack.c.bf16 %v6819_v49, %v6817_v58 }
0x1d05   :  { %3524 = vrot.lane.b32.xlu2 %v3498_v62, %s4875_s11 }
0x1d06   :  { %v3516_v31 = vpop.permute.xlu0 %3515  ;;  %v3512_v55 = vpop.permute.xlu1 %3511 }
0x1d07   :  { %v3517_v5 = vsel %vm61_vm0, %v3510_v48, %v3512_v55  ;;  %v4481_v55 = vld [vmem:[%s7079_s2 + $0x34] sm:$0xf] }
0x1d08   :  { %v3521_v27 = vadd.f32 %v4872_v53, %v3517_v5  ;;  %v4477_v53 = vld [vmem:[%s7079_s2 + $0xc] sm:$0xf] }
0x1d0d   :  { %3513 = vrot.lane.b32.xlu2 %v3503_v41, %s4878_s6 }
0x1d5f   :  { %v3525_v51 = vpop.permute.xlu2 %3524 }
0x1d60   :  { %4458 = vmatmul.msk.bf16.vlgmr.msra.gmra.mxu3 %vm61_vm0, %v3525_v51 }
0x1d67   :  { %v3514_v42 = vpop.permute.xlu2 %3513 }
0x1d68   :  { %v3518_v52 = vsel %vm61_vm0, %v3514_v42, %v3516_v31  ;;  %v3630_v31 = vld [vmem:[#allocation3 + $0x30] sm:$0xff] }
0x1d69   :  { %v3522_v29 = vadd.f32 %v3518_v52, %v6645_v38  ;;  %v4489_v52 = vld [vmem:[%s7079_s2 + $0x84] sm:$0xf] }
0x1de3   :  { %v3538_v46 = vpop.f32.mrf.mxu3 }
0x1de4   :  { %v3585_v44 = vadd.f32 %v3538_v46, %v6668_v40  ;;  %v3543_v4 = vadd.f32 %v3538_v46, %v3521_v27 }
0x1de6   :  { %3589 = vrot.lane.b32.xlu1 %v3585_v44, %s4877_s0  ;;  %v3545_v56 = vadd.f32 %v3543_v4, %v6668_v40 }
0x1de8   :  { %v4459_v35 = vmul.f32 -1.442695, %v3545_v56  ;;  %v4561_v56 = vld [vmem:[#allocation4 + $0x38] sm:$0xff] }
0x1deb   :  { %v3540_v61 = vpop.f32.mrf.mxu3 }
0x1dec   :  { %v3586_v1 = vadd.f32 %v3540_v61, %v6668_v40  ;;  %v3544_v9 = vadd.f32 %v3540_v61, %v3522_v29 }
0x1dee   :  { %3591 = vrot.lane.b32.xlu2 %v3586_v1, %s4877_s0  ;;  %v3546_v50 = vadd.f32 %v3544_v9, %v6668_v40  ;;  %v4565_v9 = vld [vmem:[%s7079_s2 + $0x6c] sm:$0xf0] }
0x1df0   :  { %v4460_v45 = vmul.f32 -1.442695, %v3546_v50 }
0x1df2   :  { %4812 = vpow2.f32 %v4460_v45  ;;  %v4564_v45 = vld [vmem:[%s7079_s2 + $0x44] sm:$0xf0] }
0x1df3   :  { %v6876_v5 = vor.u32 %v4564_v45, %v4481_v55 }
0x1df8   :  { %v4813_v33 = vpop.eup %4812 }
0x1df9   :  { %v3554_v16 = vadd.f32 1.0, %v4813_v33 }
0x1dfb   :  { %4814 = vrcp.f32 %v3554_v16  ;;  %v3581_v3 = vand.u32 2147483648, %v3554_v16  ;;  %vm3575_vm10 = vweird.f32 %v3554_v16  ;;  %v3579_v28 = vand.u32 2147483647, %v3554_v16 }
0x1dfc   :  { %4816 = vpow2.f32 %v4459_v35 }
0x1dfd   :  { %v3582_v20 = vor.u32 1.1754944e-38, %v3581_v3  ;;  %vm3580_vm13 = vcmp.eq.f32.partialorder %v3579_v28, 8.507059e+37 }
0x1e01   :  { %v4815_v60 = vpop.eup %4814 }
0x1e02   :  { %v4817_v38 = vpop.eup %4816  ;;  %v3571_v17 = vmul.f32 %v4815_v60, %v3554_v16  ;;  %vm3576_vm9 = vweird.f32 %v4815_v60  ;;  %v4562_v16 = vld [vmem:[#allocation4] sm:$0xff] }
0x1e03   :  { %v3553_v54 = vadd.f32 1.0, %v4817_v38  ;;  %vm3577_vm11 = vmor %vm3575_vm10, %vm3576_vm9  ;;  %v3895_v35 = vsel %vm61_vm0, %v4561_v56, %v4562_v16 }
0x1e04   :  { %v3572_v11 = vsub.f32 1.0, %v3571_v17 }
0x1e05   :  { %4818 = vrcp.f32 %v3553_v54  ;;  %v3566_v15 = vand.u32 2147483648, %v3553_v54  ;;  %vm3560_vm15 = vweird.f32 %v3553_v54  ;;  %v3564_v14 = vand.u32 2147483647, %v3553_v54 }
0x1e06   :  { %v3573_v59 = vmul.f32 %v4815_v60, %v3572_v11 }
0x1e07   :  { %v3567_v19 = vor.u32 1.1754944e-38, %v3566_v15  ;;  %vm3565_vm2 = vcmp.eq.f32.partialorder %v3564_v14, 8.507059e+37 }
0x1e08   :  { %v3574_v25 = vadd.f32 %v4815_v60, %v3573_v59 }
0x1e0a   :  { %v3578_v34 = vsel %vm3577_vm11, %v4815_v60, %v3574_v25 }
0x1e0b   :  { %v4819_v23 = vpop.eup %4818  ;;  %v3583_v21 = vsel %vm3580_vm13, %v3582_v20, %v3578_v34 }
0x1e0c   :  { %v3556_v7 = vmul.f32 %v4819_v23, %v3553_v54  ;;  %vm3561_vm14 = vweird.f32 %v4819_v23  ;;  %v3610_v41 = vsub.f32 1.0, %v3583_v21  ;;  %v3622_v44 = vmul.f32 %v3583_v21, %v6819_v49 }
0x1e0d   :  { %vm3562_vm1 = vmor %vm3560_vm15, %vm3561_vm14 }
0x1e0e   :  { %v3557_v57 = vsub.f32 1.0, %v3556_v7 }
0x1e10   :  { %v3558_v47 = vmul.f32 %v4819_v23, %v3557_v57 }
0x1e12   :  { %v3559_v39 = vadd.f32 %v4819_v23, %v3558_v47 }
0x1e14   :  { %v3563_v43 = vsel %vm3562_vm1, %v4819_v23, %v3559_v39  ;;  %v3626_v23 = vld [vmem:[#allocation3 + $0xc0] sm:$0xff] }
0x1e15   :  { %v3568_v30 = vsel %vm3565_vm2, %v3567_v19, %v3563_v43 }
0x1e16   :  { %v3609_v24 = vsub.f32 1.0, %v3568_v30  ;;  %v3621_v46 = vmul.f32 %v3568_v30, %v6817_v58  ;;  %v4566_v58 = vld [vmem:[%s7079_s2 + $0x94] sm:$0xf0] }
0x1e17   :  { %v6858_v49 = vor.u32 %v4566_v58, %v4489_v52 }
0x1e19   :  { %3935 = vmatpush.bf16.msra.mxu2 %v6858_v49 }
0x1e48   :  { %v3592_v36 = vpop.permute.xlu2 %3591 }
0x1e49   :  { %v3596_v0 = vmul.f32 %v3592_v36, %v3583_v21  ;;  %v3627_v36 = vld [vmem:[#allocation3 + $0xd0] sm:$0xff] }
0x1e4b   :  { %3601 = vrot.lane.b32.xlu1 %v3596_v0, %s4877_s0 }
0x1e58   :  { %v3590_v22 = vpop.permute.xlu1 %3589 }
0x1e59   :  { %v3595_v2 = vmul.f32 %v3590_v22, %v3568_v30 }
0x1e5b   :  { %3599 = vrot.lane.b32.xlu0 %v3595_v2, %s4877_s0 }
0x1ebd   :  { %v3602_v13 = vpop.permute.xlu1 %3601 }
0x1ebe   :  { %v3606_v10 = vadd.f32 %v3602_v13, %v3522_v29  ;;  %v4485_v29 = vld [vmem:[%s7079_s2 + $0x5c] sm:$0xf] }
0x1ebf   :  { %v6867_v50 = vor.u32 %v4565_v9, %v4485_v29 }
0x1ec0   :  { %4820 = vtanh.f32 %v3606_v10 }
0x1ec1   :  { %3936 = vmatpush.bf16.msra.mxu2 %v6867_v50 }
0x1ec5   :  { %3937 = vmatpush.bf16.msra.mxu2 %v6876_v5 }
0x1ec6   :  { %v4821_v32 = vpop.eup %4820 }
0x1ec7   :  { %3615 = vrot.lane.b32.xlu0 %v4821_v32, %s4875_s11 }
0x1ecd   :  { %v3600_v63 = vpop.permute.xlu0 %3599 }
0x1ece   :  { %v3605_v12 = vadd.f32 %v3600_v63, %v3521_v27  ;;  %v4563_v27 = vld [vmem:[%s7079_s2 + $0x1c] sm:$0xf0] }
0x1ecf   :  { %3638 = vrot.lane.b32.xlu0 %v3629_v37, %s4878_s6  ;;  %v6885_v4 = vor.u32 %v4563_v27, %v4477_v53  ;;  %v3755_v53 = vld [vmem:[#allocation3] sm:$0xff]  ;;  %v3758_v27 = vld [vmem:[#allocation3 + $0x18] sm:$0xff] }
0x1ed0   :  { %4822 = vtanh.f32 %v3605_v12 }
0x1ed1   :  { %3938 = vmatpush.bf16.msra.mxu2 %v6885_v4 }
0x1ed6   :  { %v4823_v6 = vpop.eup %4822 }
0x1ed7   :  { %3613 = vrot.lane.b32.xlu2 %v4823_v6, %s4875_s11 }
0x1edf   :  { %3636 = vrot.lane.b32.xlu2 %v3628_v8, %s4878_s6 }
0x1ee7   :  { %3642 = vrot.lane.b32.xlu2 %v3631_v26, %s4878_s6 }
0x1f31   :  { %v3614_v18 = vpop.permute.xlu2 %3613 }
0x1f32   :  { %v3619_v62 = vmul.f32 %v3614_v18, %v3609_v24 }
0x1f34   :  { %v6844_v1 = vadd.f32 %v3621_v46, %v3619_v62 }
0x1f39   :  { %v3616_v51 = vpop.permute.xlu0 %3615  ;;  %v3637_v11 = vpop.permute.xlu2 %3636 }
0x1f3a   :  { %v3620_v61 = vmul.f32 %v3616_v51, %v3610_v41 }
0x1f3c   :  { %v6846_v48 = vadd.f32 %v3622_v44, %v3620_v61 }
0x1f3e   :  { %v3625_v42 = vpack.c.bf16 %v6846_v48, %v6844_v1 }
0x1f40   :  { %3651 = vrot.lane.b32.xlu1 %v3625_v42, %s4875_s11 }
0x1f41   :  { %v3639_v59 = vpop.permute.xlu0 %3638  ;;  %v3643_v7 = vpop.permute.xlu2 %3642 }
0x1f42   :  { %v3644_v25 = vsel %vm61_vm0, %v3637_v11, %v3639_v59 }
0x1f43   :  { %v3648_v3 = vadd.f32 %v3644_v25, %v3626_v23 }
0x1f48   :  { %3640 = vrot.lane.b32.xlu1 %v3630_v31, %s4878_s6 }
0x1fb2   :  { %v3652_v33 = vpop.permute.xlu1 %3651 }
0x1fb3   :  { %4461 = vmatmul.msk.bf16.vlgmr.msrb.gmra.mxu2 %vm61_vm0, %v3652_v33  ;;  %v6907_v33 = vld [vmem:[%s7078_s3] sm:$0x7f] }
0x1fb4   :  { %v6910_v56 = vperm.slane %v6907_v33, 4 }
0x1fba   :  { %v3641_v28 = vpop.permute.xlu1 %3640 }
0x1fbb   :  { %v3645_v20 = vsel %vm61_vm0, %v3641_v28, %v3643_v7 }
0x1fbc   :  { %v3649_v0 = vadd.f32 %v3645_v20, %v3627_v36 }
0x1fc3   :  { %4491 = vmatmul.msk.bf16.vlgmr.msra.gmra.mxu2 %vm1098_vm5, %v3895_v35 }
0x2036   :  { %v3665_v60 = vpop.f32.mrf.mxu2 }
0x2037   :  { %v3712_v38 = vadd.f32 %v3665_v60, %v6668_v40  ;;  %v3670_v34 = vadd.f32 %v3665_v60, %v3648_v3 }
0x2039   :  { %3716 = vrot.lane.b32.xlu0 %v3712_v38, %s4877_s0  ;;  %v3672_v21 = vadd.f32 %v3670_v34, %v6668_v40  ;;  %v3756_v38 = vld [vmem:[#allocation3 + $0x8] sm:$0xff] }
0x203b   :  { %v4462_v57 = vmul.f32 -1.442695, %v3672_v21  ;;  %v3757_v21 = vld [vmem:[#allocation3 + $0x10] sm:$0xff] }
0x203d   :  { %4824 = vpow2.f32 %v4462_v57 }
0x203e   :  { %v3667_v17 = vpop.f32.mrf.mxu2 }
0x203f   :  { %v3713_v54 = vadd.f32 %v3667_v17, %v6668_v40  ;;  %v3671_v47 = vadd.f32 %v3667_v17, %v3649_v0 }
0x2041   :  { %3718 = vrot.lane.b32.xlu1 %v3713_v54, %s4877_s0  ;;  %v3673_v39 = vadd.f32 %v3671_v47, %v6668_v40 }
0x2043   :  { %v4463_v15 = vmul.f32 -1.442695, %v3673_v39  ;;  %v4825_v14 = vpop.eup %4824 }
0x2044   :  { %v3680_v43 = vadd.f32 1.0, %v4825_v14 }
0x2045   :  { %4826 = vpow2.f32 %v4463_v15 }
0x2046   :  { %4828 = vrcp.f32 %v3680_v43  ;;  %v3693_v6 = vand.u32 2147483648, %v3680_v43  ;;  %vm3687_vm3 = vweird.f32 %v3680_v43  ;;  %v3691_v8 = vand.u32 2147483647, %v3680_v43 }
0x2048   :  { %v3694_v24 = vor.u32 1.1754944e-38, %v3693_v6  ;;  %vm3692_vm6 = vcmp.eq.f32.partialorder %v3691_v8, 8.507059e+37  ;;  %v3754_v6 = vld [vmem:[#allocation3 + $0xf0] sm:$0xff] }
0x204b   :  { %v4827_v19 = vpop.eup %4826 }
0x204c   :  { %v3681_v30 = vadd.f32 1.0, %v4827_v19  ;;  %v4829_v22 = vpop.eup %4828  ;;  %v3753_v19 = vld [vmem:[#allocation3 + $0xe0] sm:$0xff] }
0x204d   :  { %v3683_v2 = vmul.f32 %v4829_v22, %v3680_v43  ;;  %vm3688_vm12 = vweird.f32 %v4829_v22 }
0x204e   :  { %4830 = vrcp.f32 %v3681_v30  ;;  %vm3689_vm4 = vmor %vm3687_vm3, %vm3688_vm12  ;;  %v3708_v44 = vand.u32 2147483648, %v3681_v30  ;;  %vm3702_vm8 = vweird.f32 %v3681_v30  ;;  %v3706_v61 = vand.u32 2147483647, %v3681_v30 }
0x204f   :  { %v3684_v13 = vsub.f32 1.0, %v3683_v2 }
0x2050   :  { %v3709_v31 = vor.u32 1.1754944e-38, %v3708_v44  ;;  %vm3707_vm10 = vcmp.eq.f32.partialorder %v3706_v61, 8.507059e+37 }
0x2051   :  { %v3685_v32 = vmul.f32 %v4829_v22, %v3684_v13 }
0x2053   :  { %v3686_v12 = vadd.f32 %v4829_v22, %v3685_v32 }
0x2054   :  { %v4831_v10 = vpop.eup %4830 }
0x2055   :  { %v3698_v63 = vmul.f32 %v4831_v10, %v3681_v30  ;;  %v3690_v26 = vsel %vm3689_vm4, %v4829_v22, %v3686_v12  ;;  %vm3703_vm7 = vweird.f32 %v4831_v10 }
0x2056   :  { %v3695_v62 = vsel %vm3692_vm6, %v3694_v24, %v3690_v26  ;;  %vm3704_vm9 = vmor %vm3702_vm8, %vm3703_vm7 }
0x2057   :  { %v3699_v37 = vsub.f32 1.0, %v3698_v63  ;;  %v3736_v54 = vsub.f32 1.0, %v3695_v62  ;;  %v3748_v23 = vmul.f32 %v3695_v62, %v6844_v1 }
0x2059   :  { %v3700_v18 = vmul.f32 %v4831_v10, %v3699_v37 }
0x205b   :  { %v3701_v46 = vadd.f32 %v4831_v10, %v3700_v18 }
0x205d   :  { %v3705_v42 = vsel %vm3704_vm9, %v4831_v10, %v3701_v46 }
0x205e   :  { %v3710_v52 = vsel %vm3707_vm10, %v3709_v31, %v3705_v42  ;;  %v3940_v42 = vpop.f32.mrf.mxu2 }
0x205f   :  { %v3737_v59 = vsub.f32 1.0, %v3710_v52 }
0x20ab   :  { %v3717_v41 = vpop.permute.xlu0 %3716 }
0x20ac   :  { %v3722_v51 = vmul.f32 %v3717_v41, %v3695_v62 }
0x20ae   :  { %3726 = vrot.lane.b32.xlu2 %v3722_v51, %s4877_s0 }
0x20b3   :  { %v3719_v58 = vpop.permute.xlu1 %3718 }
0x20b4   :  { %v3723_v29 = vmul.f32 %v3719_v58, %v3710_v52 }
0x20b6   :  { %3728 = vrot.lane.b32.xlu0 %v3723_v29, %s4877_s0 }
0x2108   :  { %v3727_v9 = vpop.permute.xlu2 %3726 }
0x2109   :  { %v3732_v55 = vadd.f32 %v3727_v9, %v3648_v3  ;;  %v3749_v3 = vmul.f32 %v3710_v52, %v6846_v48  ;;  %v6932_v48 = vld [vmem:[%s7078_s3 + $0x8] sm:$0x7f] }
0x210a   :  { %v3945_v57 = vperm.slane %v6932_v48, 4 }
0x210b   :  { %4832 = vtanh.f32 %v3732_v55 }
0x2111   :  { %v4833_v45 = vpop.eup %4832 }
0x2112   :  { %3740 = vrot.lane.b32.xlu1 %v4833_v45, %s4875_s11 }
0x211a   :  { %3763 = vrot.lane.b32.xlu1 %v3755_v53, %s4878_s6 }
0x2122   :  { %3769 = vrot.lane.b32.xlu1 %v3758_v27, %s4878_s6  ;;  %v3942_v27 = vpop.f32.mrf.mxu2 }
0x2128   :  { %v3729_v16 = vpop.permute.xlu0 %3728 }
0x2129   :  { %v3733_v35 = vadd.f32 %v3729_v16, %v3649_v0 }
0x212a   :  { %3948 = vrot.lane.b32.xlu1 %v6910_v56, %s4878_s6 }
0x212b   :  { %4834 = vtanh.f32 %v3733_v35  ;;  %v6954_v35 = vadd.f32 %v3940_v42, %v6910_v56 }
0x2131   :  { %v4835_v60 = vpop.eup %4834 }
0x2132   :  { %3742 = vrot.lane.b32.xlu2 %v4835_v60, %s4875_s11  ;;  %v6957_v60 = vadd.f32 %v3942_v27, %v6910_v56 }
0x213a   :  { %3765 = vrot.lane.b32.xlu2 %v3756_v38, %s4878_s6 }
0x2184   :  { %v3741_v17 = vpop.permute.xlu1 %3740 }
0x2185   :  { %v3746_v11 = vmul.f32 %v3741_v17, %v3736_v54 }
0x2187   :  { %v6918_v34 = vadd.f32 %v3748_v23, %v3746_v11 }
0x218c   :  { %v3743_v25 = vpop.permute.xlu2 %3742  ;;  %v3764_v14 = vpop.permute.xlu1 %3763 }
0x218d   :  { %v3747_v28 = vmul.f32 %v3743_v25, %v3737_v59 }
0x218f   :  { %v6920_v7 = vadd.f32 %v3749_v3, %v3747_v28 }
0x2191   :  { %v3752_v20 = vpack.c.bf16 %v6920_v7, %v6918_v34 }
0x2193   :  { %3778 = vrot.lane.b32.xlu0 %v3752_v20, %s4875_s11 }
0x2194   :  { %v3766_v15 = vpop.permute.xlu2 %3765  ;;  %v3770_v12 = vpop.permute.xlu1 %3769 }
0x2195   :  { %v3771_v43 = vsel %vm61_vm0, %v3764_v14, %v3766_v15 }
0x2196   :  { %v6940_v30 = vadd.f32 %v3771_v43, %v3753_v19 }
0x219b   :  { %3767 = vrot.lane.b32.xlu0 %v3757_v21, %s4878_s6 }
0x219c   :  { %v3949_v16 = vpop.permute.xlu1 %3948 }
0x2205   :  { %v3779_v36 = vpop.permute.xlu0 %3778 }
0x2206   :  { %4464 = vmatmul.msk.bf16.vlgmr.msrb.gmra.mxu3 %vm61_vm0, %v3779_v36 }
0x220d   :  { %v3768_v63 = vpop.permute.xlu0 %3767 }
0x220e   :  { %v3772_v37 = vsel %vm61_vm0, %v3768_v63, %v3770_v12 }
0x220f   :  { %v6945_v8 = vadd.f32 %v3772_v37, %v3754_v6 }
0x2289   :  { %v3792_v0 = vpop.f32.mrf.mxu3 }
0x228a   :  { %v3839_v1 = vadd.f32 %v3792_v0, %v6668_v40  ;;  %v3797_v22 = vadd.f32 %v3792_v0, %v6940_v30 }
0x228c   :  { %3843 = vrot.lane.b32.xlu2 %v3839_v1, %s4877_s0  ;;  %v3799_v2 = vadd.f32 %v3797_v22, %v6668_v40 }
0x228e   :  { %v4465_v13 = vmul.f32 -1.442695, %v3799_v2 }
0x2290   :  { %4836 = vpow2.f32 %v4465_v13 }
0x2291   :  { %v3794_v47 = vpop.f32.mrf.mxu3 }
0x2292   :  { %v3840_v39 = vadd.f32 %v3794_v47, %v6668_v40  ;;  %v3798_v18 = vadd.f32 %v3794_v47, %v6945_v8 }
0x2294   :  { %3950 = vrot.lane.b32.xlu2 %v3945_v57, %s4878_s6  ;;  %3845 = vrot.lane.b32.xlu0 %v3840_v39, %s4877_s0  ;;  %v3800_v62 = vadd.f32 %v3798_v18, %v6668_v40 }
0x2296   :  { %v4837_v10 = vpop.eup %4836  ;;  %v4466_v51 = vmul.f32 -1.442695, %v3800_v62 }
0x2297   :  { %v3807_v32 = vadd.f32 1.0, %v4837_v10 }
0x2299   :  { %4838 = vrcp.f32 %v3807_v32  ;;  %v3820_v61 = vand.u32 2147483648, %v3807_v32  ;;  %vm3814_vm13 = vweird.f32 %v3807_v32  ;;  %v3818_v31 = vand.u32 2147483647, %v3807_v32 }
0x229a   :  { %4840 = vpow2.f32 %v4466_v51 }
0x229b   :  { %v3821_v29 = vor.u32 1.1754944e-38, %v3820_v61  ;;  %vm3819_vm15 = vcmp.eq.f32.partialorder %v3818_v31, 8.507059e+37 }
0x229c   :  { %3994 = vrot.lane.b32.xlu2 %v3945_v57, %s4875_s11 }
0x229f   :  { %v4839_v26 = vpop.eup %4838 }
0x22a0   :  { %v3810_v24 = vmul.f32 %v4839_v26, %v3807_v32  ;;  %vm3815_vm11 = vweird.f32 %v4839_v26  ;;  %v4841_v52 = vpop.eup %4840 }
0x22a1   :  { %vm3816_vm14 = vmor %vm3814_vm13, %vm3815_vm11  ;;  %v3808_v9 = vadd.f32 1.0, %v4841_v52 }
0x22a2   :  { %v3811_v41 = vsub.f32 1.0, %v3810_v24 }
0x22a3   :  { %4842 = vrcp.f32 %v3808_v9  ;;  %v3835_v57 = vand.u32 2147483648, %v3808_v9  ;;  %vm3829_vm2 = vweird.f32 %v3808_v9  ;;  %v3833_v47 = vand.u32 2147483647, %v3808_v9 }
0x22a4   :  { %v3812_v46 = vmul.f32 %v4839_v26, %v3811_v41 }
0x22a5   :  { %v3836_v43 = vor.u32 1.1754944e-38, %v3835_v57  ;;  %vm3834_vm3 = vcmp.eq.f32.partialorder %v3833_v47, 8.507059e+37  ;;  %v4570_v57 = vld [vmem:[%s7076_s1 + $0x34] sm:$0xf0] }
0x22a6   :  { %v3813_v44 = vadd.f32 %v4839_v26, %v3812_v46 }
0x22a8   :  { %v3817_v58 = vsel %vm3816_vm14, %v4839_v26, %v3813_v44 }
0x22a9   :  { %v6949_v55 = vsel %vm3819_vm15, %v3821_v29, %v3817_v58  ;;  %v4843_v54 = vpop.eup %4842 }
0x22aa   :  { %v3825_v3 = vmul.f32 %v4843_v54, %v3808_v9  ;;  %vm3830_vm1 = vweird.f32 %v4843_v54 }
0x22ab   :  { %vm3831_vm12 = vmor %vm3829_vm2, %vm3830_vm1 }
0x22ac   :  { %v3826_v28 = vsub.f32 1.0, %v3825_v3 }
0x22ae   :  { %v3827_v0 = vmul.f32 %v4843_v54, %v3826_v28 }
0x22b0   :  { %v3828_v1 = vadd.f32 %v4843_v54, %v3827_v0 }
0x22b2   :  { %v3832_v15 = vsel %vm3831_vm12, %v4843_v54, %v3828_v1  ;;  %v4569_v1 = vld [vmem:[%s7076_s1 + $0x2c] sm:$0xf] }
0x22b3   :  { %v6962_v2 = vsel %vm3834_vm3, %v3836_v43, %v3832_v15  ;;  %v4499_v15 = vld [vmem:[%s7076_s1 + $0x18] sm:$0xf0]  ;;  %v4568_v43 = vld [vmem:[%s7076_s1 + $0x14] sm:$0xf0] }
0x22e6   :  { %v3844_v45 = vpop.permute.xlu2 %3843 }
0x22e7   :  { %v3849_v53 = vmul.f32 %v3844_v45, %v6949_v55 }
0x22e9   :  { %3853 = vrot.lane.b32.xlu0 %v3849_v53, %s4877_s0 }
0x22ee   :  { %v3951_v38 = vpop.permute.xlu2 %3950 }
0x22ef   :  { %v3952_v17 = vsel %vm61_vm0, %v3949_v16, %v3951_v38 }
0x22f0   :  { %v3954_v11 = vadd.f32 %v3952_v17, %v6954_v35  ;;  %v3955_v59 = vadd.f32 %v3952_v17, %v6957_v60 }
0x22f2   :  { %v4492_v25 = vmul.f32 -1.442695, %v3954_v11  ;;  %v4493_v23 = vmul.f32 -1.442695, %v3955_v59 }
0x22f4   :  { %4844 = vpow2.f32 %v4492_v25 }
0x22f5   :  { %4846 = vpow2.f32 %v4493_v23  ;;  %v3864_v23 = vsub.f32 1.0, %v6962_v2 }
0x22f6   :  { %v3995_v46 = vpop.permute.xlu2 %3994 }
0x22fa   :  { %v4845_v20 = vpop.eup %4844 }
0x22fb   :  { %v4847_v21 = vpop.eup %4846  ;;  %v3962_v36 = vadd.f32 1.0, %v4845_v20 }
0x22fc   :  { %v3963_v56 = vadd.f32 1.0, %v4847_v21 }
0x22fd   :  { %4848 = vrcp.f32 %v3962_v36  ;;  %v3975_v63 = vand.u32 2147483648, %v3962_v36  ;;  %v3973_v6 = vand.u32 2147483647, %v3962_v36  ;;  %vm3969_vm7 = vweird.f32 %v3962_v36 }
0x22fe   :  { %4850 = vrcp.f32 %v3963_v56  ;;  %v3990_v26 = vand.u32 2147483648, %v3963_v56  ;;  %v3988_v24 = vand.u32 2147483647, %v3963_v56  ;;  %vm3984_vm9 = vweird.f32 %v3963_v56 }
0x22ff   :  { %v3976_v41 = vor.u32 1.1754944e-38, %v3975_v63  ;;  %vm3974_vm10 = vcmp.eq.f32.partialorder %v3973_v6, 8.507059e+37 }
0x2300   :  { %v3991_v61 = vor.u32 1.1754944e-38, %v3990_v26  ;;  %vm3989_vm13 = vcmp.eq.f32.partialorder %v3988_v24, 8.507059e+37 }
0x2303   :  { %v4849_v39 = vpop.eup %4848 }
0x2304   :  { %v4851_v14 = vpop.eup %4850  ;;  %v3965_v19 = vmul.f32 %v4849_v39, %v3962_v36  ;;  %vm3970_vm4 = vweird.f32 %v4849_v39 }
0x2305   :  { %v3980_v22 = vmul.f32 %v4851_v14, %v3963_v56  ;;  %vm3985_vm6 = vweird.f32 %v4851_v14  ;;  %vm3971_vm8 = vmor %vm3969_vm7, %vm3970_vm4 }
0x2306   :  { %v3846_v13 = vpop.permute.xlu0 %3845  ;;  %v3966_v10 = vsub.f32 1.0, %v3965_v19  ;;  %vm3986_vm11 = vmor %vm3984_vm9, %vm3985_vm6 }
0x2307   :  { %v3850_v32 = vmul.f32 %v3846_v13, %v6962_v2  ;;  %v3981_v12 = vsub.f32 1.0, %v3980_v22 }
0x2308   :  { %v3967_v37 = vmul.f32 %v4849_v39, %v3966_v10 }
0x2309   :  { %3855 = vrot.lane.b32.xlu1 %v3850_v32, %s4877_s0  ;;  %v3982_v18 = vmul.f32 %v4851_v14, %v3981_v12 }
0x230a   :  { %v3968_v62 = vadd.f32 %v4849_v39, %v3967_v37 }
0x230b   :  { %v3983_v51 = vadd.f32 %v4851_v14, %v3982_v18 }
0x230c   :  { %v3972_v44 = vsel %vm3971_vm8, %v4849_v39, %v3968_v62  ;;  %v4567_v39 = vld [vmem:[%s7076_s1 + $0xc] sm:$0xf] }
0x230d   :  { %v6966_v42 = vsel %vm3974_vm10, %v3976_v41, %v3972_v44  ;;  %v3987_v31 = vsel %vm3986_vm11, %v4851_v14, %v3983_v51  ;;  %v4497_v14 = vld [vmem:[%s7076_s1 + $0x8] sm:$0xf]  ;;  %v4502_v19 = vor.u32 %v4567_v39, %v4499_v15 }
0x230e   :  { %v6968_v52 = vsel %vm3989_vm13, %v3991_v61, %v3987_v31  ;;  %v3997_v58 = vmul.f32 %v3995_v46, %v6966_v42  ;;  %v4498_v22 = vor.u32 %v4568_v43, %v4497_v14  ;;  %v4011_v10 = vsub.f32 1.0, %v6966_v42  ;;  %v4514_v14 = vld [vmem:[%s7079_s2 + $0x10] sm:$0xf]  ;;  %v4571_v43 = vld [vmem:[%s7079_s2 + $0x20] sm:$0xf0] }
0x230f   :  { %v3998_v29 = vmul.f32 %v3995_v46, %v6968_v52  ;;  %v4012_v13 = vsub.f32 1.0, %v6968_v52 }
0x2310   :  { %4001 = vrot.lane.b32.xlu0 %v3997_v58, %s4877_s0 }
0x2311   :  { %4003 = vrot.lane.b32.xlu1 %v3998_v29, %s4877_s0 }
0x2319   :  { %4040 = vrot.lane.b32.xlu1 %v6858_v49, %s4878_s6 }
0x235b   :  { %v3854_v9 = vpop.permute.xlu0 %3853 }
0x235c   :  { %v3859_v45 = vadd.f32 %v3854_v9, %v6940_v30 }
0x235e   :  { %4852 = vtanh.f32 %v3859_v45  ;;  %v4072_v45 = vperm.slane %v6907_v33, 6 }
0x2364   :  { %v4853_v53 = vpop.eup %4852 }
0x2365   :  { %3867 = vrot.lane.b32.xlu2 %v4853_v53, %s4875_s11 }
0x236d   :  { %4038 = vrot.lane.b32.xlu2 %v6867_v50, %s4878_s6 }
0x237b   :  { %v3856_v27 = vpop.permute.xlu1 %3855 }
0x237c   :  { %v3860_v16 = vadd.f32 %v3856_v27, %v6945_v8 }
0x237e   :  { %4854 = vtanh.f32 %v3860_v16 }
0x2382   :  { %v4002_v38 = vpop.permute.xlu0 %4001 }
0x2383   :  { %v4007_v17 = vadd.f32 %v4002_v38, %v6954_v35  ;;  %v4004_v54 = vpop.permute.xlu1 %4003 }
0x2384   :  { %v4855_v11 = vpop.eup %4854  ;;  %v4008_v49 = vadd.f32 %v4004_v54, %v6957_v60  ;;  %v3863_v60 = vsub.f32 1.0, %v6949_v55 }
0x2385   :  { %4856 = vtanh.f32 %v4007_v17  ;;  %3869 = vrot.lane.b32.xlu0 %v4855_v11, %s4875_s11  ;;  %v4880_v11 = vmov 64.0  }
0x2386   :  { %4858 = vtanh.f32 %v4008_v49 }
0x2387   :  { %4860 = vrcp.f32 %v4880_v11 }
0x238b   :  { %v4857_v30 = vpop.eup %4856  ;;  %v4041_v8 = vpop.permute.xlu1 %4040 }
0x238c   :  { %v4859_v59 = vpop.eup %4858  ;;  %4015 = vrot.lane.b32.xlu1 %v4857_v30, %s4875_s11  ;;  %4057 = vmatpush.bf16.msra.mxu3 %v4041_v8 }
0x238d   :  { %4017 = vrot.lane.b32.xlu2 %v4859_v59, %s4875_s11  ;;  %4036 = vrot.lane.b32.xlu0 %v6876_v5, %s4878_s6  ;;  %v3875_v5 = vmul.f32 %v6949_v55, %v6918_v34  ;;  %v4507_v34 = vld [vmem:[%s7076_s1 + $0x38] sm:$0xf0]  ;;  %v4505_v55 = vld [vmem:[%s7076_s1 + $0x28] sm:$0xf]  ;;  %v4861_v49 = vpop.eup %4860 }
0x238e   :  { %v4506_v47 = vor.u32 %v4570_v57, %v4505_v55  ;;  %v4126_v30 = vmul.f32 64.0, %v4861_v49  ;;  %vm4130_vm14 = vweird.f32 %v4861_v49  ;;  %v4518_v55 = vld [vmem:[%s7079_s2 + $0x38] sm:$0xf]  ;;  %v4572_v57 = vld [vmem:[%s7079_s2 + $0x48] sm:$0xf0] }
0x238f   :  { %v4519_v39 = vor.u32 %v4572_v57, %v4518_v55 }
0x2390   :  { %v4127_v59 = vsub.f32 1.0, %v4126_v30 }
0x2394   :  { %4034 = vrot.lane.b32.xlu1 %v6885_v4, %s4878_s6  ;;  %v3876_v4 = vmul.f32 %v6962_v2, %v6920_v7  ;;  %v4510_v7 = vor.u32 %v4569_v1, %v4507_v34  ;;  %v4573_v1 = vld [vmem:[%s7079_s2 + $0x70] sm:$0xf0] }
0x2395   :  { %4093 = vrot.lane.b32.xlu2 %v4506_v47, %s4878_s6 }
0x239c   :  { %4047 = vrot.lane.b32.xlu1 %v6668_v40, %s4878_s6 }
0x239d   :  { %4089 = vrot.lane.b32.xlu2 %v4498_v22, %s4878_s6 }
0x23bf   :  { %v3868_v50 = vpop.permute.xlu2 %3867 }
0x23c0   :  { %v3873_v25 = vmul.f32 %v3868_v50, %v3863_v60  ;;  %v4128_v50 = vmul.f32 %v4861_v49, %v4127_v59 }
0x23c2   :  { %v3877_v20 = vadd.f32 %v3875_v5, %v3873_v25  ;;  %v4129_v8 = vadd.f32 %v4861_v49, %v4128_v50 }
0x23c4   :  { %v4131_v33 = vsel %vm4130_vm14, %v4861_v49, %v4129_v8 }
0x23c7   :  { %v4039_v35 = vpop.permute.xlu2 %4038 }
0x23c8   :  { %4058 = vmatpush.bf16.msra.mxu3 %v4039_v35 }
0x23e7   :  { %v4018_v2 = vpop.permute.xlu2 %4017 }
0x23e8   :  { %v4022_v63 = vmul.f32 %v4018_v2, %v4012_v13 }
0x23ef   :  { %v4094_v62 = vpop.permute.xlu2 %4093 }
0x23f7   :  { %v3870_v3 = vpop.permute.xlu0 %3869  ;;  %v4090_v44 = vpop.permute.xlu2 %4089 }
0x23f8   :  { %v3874_v28 = vmul.f32 %v3870_v3, %v3864_v23 }
0x23fa   :  { %v3878_v40 = vadd.f32 %v3876_v4, %v3874_v28 }
0x23fc   :  { %v4585_v21 = vpack.i.bf16 %v3878_v40, %v3877_v20 }
0x23fe   :  { %4586 = vrot.lane.b32.xlu0 %v4585_v21, %s4875_s11  ;;  %v4016_v0 = vpop.permute.xlu1 %4015  ;;  %v4526_v21 = vld [vmem:[%s7079_s2 + $0x88] sm:$0xf] }
0x23ff   :  { %v4037_v36 = vpop.permute.xlu0 %4036  ;;  %v4021_v12 = vmul.f32 %v4016_v0, %v4011_v10 }
0x2400   :  { %4059 = vmatpush.bf16.msra.mxu3 %v4037_v36  ;;  %v4574_v36 = vld [vmem:[%s7079_s2 + $0x98] sm:$0xf0] }
0x2401   :  { %v4527_v0 = vor.u32 %v4574_v36, %v4526_v21 }
0x2406   :  { %v4035_v56 = vpop.permute.xlu1 %4034  ;;  %4095 = vrot.lane.b32.xlu0 %v4510_v7, %s4878_s6 }
0x2407   :  { %4060 = vmatpush.bf16.msra.mxu3 %v4035_v56  ;;  %v4522_v56 = vld [vmem:[%s7079_s2 + $0x60] sm:$0xf] }
0x2408   :  { %v4523_v34 = vor.u32 %v4573_v1, %v4522_v56 }
0x240b   :  { %4222 = vmatpush.bf16.msrb.mxu3 %v4527_v0 }
0x240e   :  { %4091 = vrot.lane.b32.xlu0 %v4502_v19, %s4878_s6  ;;  %v4048_v31 = vpop.permute.xlu1 %4047  ;;  %v4515_v19 = vor.u32 %v4571_v43, %v4514_v14 }
0x240f   :  { %4223 = vmatpush.bf16.msrb.mxu3 %v4523_v34 }
0x2413   :  { %4224 = vmatpush.bf16.msrb.mxu3 %v4519_v39 }
0x2417   :  { %4225 = vmatpush.bf16.msrb.mxu3 %v4515_v19 }
0x2470   :  { %v4587_v32 = vpop.permute.xlu0 %4586 }
0x2471   :  { %v4589_v37 = vunpack.i.h.bf16 %v4587_v32  ;;  %v4588_v6 = vunpack.i.l.bf16 %v4587_v32 }
0x2473   :  { %v4031_v26 = vsel %vm61_vm0, %v4588_v6, %v4021_v12  ;;  %v4032_v18 = vsel %vm61_vm0, %v4589_v37, %v4022_v63 }
0x2474   :  { %v4033_v24 = vpack.c.bf16 %v4032_v18, %v4031_v26 }
0x2476   :  { %4494 = vmatmul.msk.bf16.vlgmr.msra.gmra.mxu3 %vm1098_vm5, %v4033_v24 }
0x2478   :  { %v4096_v41 = vpop.permute.xlu0 %4095 }
0x2479   :  { %v4099_v51 = vsel %vm61_vm0, %v4094_v62, %v4096_v41 }
0x247a   :  { %4111 = vmatpush.bf16.msrb.mxu2 %v4099_v51 }
0x2480   :  { %v4092_v46 = vpop.permute.xlu0 %4091 }
0x2481   :  { %v4098_v61 = vsel %vm61_vm0, %v4090_v44, %v4092_v46 }
0x2482   :  { %4112 = vmatpush.bf16.msrb.mxu2 %v4098_v61 }
0x24f9   :  { %v4062_v42 = vpop.f32.mrf.mxu3 }
0x24fa   :  { %v4063_v58 = vadd.f32 %v4062_v42, %v4048_v31  ;;  %v4176_v42 = vperm.slane %v6932_v48, 6 }
0x2501   :  { %v4064_v52 = vpop.f32.mrf.mxu3 }
0x2502   :  { %v4065_v29 = vadd.f32 %v4064_v52, %v4048_v31 }
0x2504   :  { %v4067_v9 = vpack.c.bf16 %v4065_v29, %v4063_v58 }
0x2506   :  { %4511 = vmatmul.msk.bf16.vlgmr.msrb.gmra.mxu2 %vm61_vm0, %v4067_v9 }
0x2589   :  { %v4114_v53 = vpop.f32.mrf.mxu2 }
0x258a   :  { %v4115_v27 = vadd.f32 %v4114_v53, %v4072_v45 }
0x258c   :  { %v4119_v16 = vsel %vm1098_vm5, %v4115_v27, 0.0 }
0x258d   :  { %4120 = vadd.xlane.f32.xlu1 %v4119_v16 }
0x2591   :  { %v4116_v38 = vpop.f32.mrf.mxu2 }
0x2592   :  { %v4117_v17 = vadd.f32 %v4116_v38, %v4072_v45  ;;  %v4190_v38 = vperm.slane %v6932_v48, 5 }
0x2594   :  { %v4122_v54 = vsel %vm1098_vm5, %v4117_v17, 0.0 }
0x2595   :  { %4123 = vadd.xlane.f32.xlu2 %v4122_v54 }
0x25ad   :  { %4171 = vrot.lane.b32.xlu2 %v4072_v45, %s4877_s0 }
0x2600   :  { %v4121_v35 = vpop.xlane.xlu1 %4120 }
0x2601   :  { %v4132_v60 = vmul.f32 %v4131_v33, %v4121_v35 }
0x2603   :  { %v4134_v25 = vsub.f32 %v4115_v27, %v4132_v60 }
0x2605   :  { %v4136_v23 = vmul.f32 %v4134_v25, %v4134_v25 }
0x2607   :  { %v4138_v3 = vsel %vm1098_vm5, %v4136_v23, 0.0 }
0x2608   :  { %v4124_v5 = vpop.xlane.xlu2 %4123  ;;  %4139 = vadd.xlane.f32.xlu0 %v4138_v3 }
0x2609   :  { %v4133_v4 = vmul.f32 %v4131_v33, %v4124_v5 }
0x260b   :  { %v4135_v28 = vsub.f32 %v4117_v17, %v4133_v4 }
0x260d   :  { %v4137_v20 = vmul.f32 %v4135_v28, %v4135_v28 }
0x260f   :  { %v4141_v40 = vsel %vm1098_vm5, %v4137_v20, 0.0 }
0x2610   :  { %4142 = vadd.xlane.f32.xlu1 %v4141_v40  ;;  %v4172_v44 = vpop.permute.xlu2 %4171 }
0x267b   :  { %v4140_v7 = vpop.xlane.xlu0 %4139 }
0x267c   :  { %v4144_v47 = vmul.f32 %v4140_v7, %v4131_v33 }
0x267e   :  { %v4146_v15 = vadd.f32 1e-05, %v4144_v47 }
0x2680   :  { %4862 = vrsqrt.f32 %v4146_v15  ;;  %vm4154_vm1 = vweird.f32 %v4146_v15 }
0x2683   :  { %v4143_v22 = vpop.xlane.xlu1 %4142 }
0x2684   :  { %v4145_v2 = vmul.f32 %v4143_v22, %v4131_v33 }
0x2686   :  { %v4863_v13 = vpop.eup %4862  ;;  %v4147_v10 = vadd.f32 1e-05, %v4145_v2 }
0x2687   :  { %v4149_v32 = vmul.f32 %v4863_v13, %v4146_v15  ;;  %vm4155_vm15 = vweird.f32 %v4863_v13 }
0x2688   :  { %4864 = vrsqrt.f32 %v4147_v10  ;;  %vm4156_vm2 = vmor %vm4154_vm1, %vm4155_vm15  ;;  %vm4164_vm3 = vweird.f32 %v4147_v10 }
0x2689   :  { %v4150_v63 = vmul.f32 %v4863_v13, %v4149_v32 }
0x268b   :  { %v4151_v12 = vmul.f32 0.5, %v4150_v63 }
0x268d   :  { %v4152_v37 = vsub.f32 1.5, %v4151_v12 }
0x268e   :  { %v4865_v6 = vpop.eup %4864 }
0x268f   :  { %v4159_v26 = vmul.f32 %v4865_v6, %v4147_v10  ;;  %v4153_v18 = vmul.f32 %v4863_v13, %v4152_v37  ;;  %vm4165_vm12 = vweird.f32 %v4865_v6 }
0x2690   :  { %vm4166_vm4 = vmor %vm4164_vm3, %vm4165_vm12 }
0x2691   :  { %v4160_v24 = vmul.f32 %v4865_v6, %v4159_v26  ;;  %v4157_v62 = vsel %vm4156_vm2, %v4863_v13, %v4153_v18 }
0x2692   :  { %v4168_v51 = vmul.f32 %v4157_v62, %v4134_v25 }
0x2693   :  { %v4161_v41 = vmul.f32 0.5, %v4160_v24 }
0x2694   :  { %v4174_v31 = vmul.f32 %v4172_v44, %v4168_v51 }
0x2695   :  { %v4162_v46 = vsub.f32 1.5, %v4161_v41 }
0x2696   :  { %v4177_v9 = vadd.f32 %v4176_v42, %v4174_v31 }
0x2697   :  { %v4163_v61 = vmul.f32 %v4865_v6, %v4162_v46 }
0x2698   :  { %v4179_v53 = vmax.f32 %v4177_v9, 0.0 }
0x2699   :  { %v4167_v52 = vsel %vm4166_vm4, %v4865_v6, %v4163_v61 }
0x269a   :  { %v4169_v58 = vmul.f32 %v4167_v52, %v4135_v28 }
0x269c   :  { %v4175_v29 = vmul.f32 %v4172_v44, %v4169_v58 }
0x269e   :  { %v4178_v45 = vadd.f32 %v4176_v42, %v4175_v29 }
0x26a0   :  { %v4180_v27 = vmax.f32 %v4178_v45, 0.0 }
0x26a2   :  { %v4181_v16 = vpack.c.bf16 %v4180_v27, %v4179_v53 }
0x26a4   :  { %4528 = vmatmul.msk.bf16.vlgmr.msrb.gmra.mxu3 %vm1098_vm5, %v4181_v16 }
0x2727   :  { %v4227_v17 = vpop.f32.mrf.mxu3 }
0x2728   :  { %v4228_v54 = vadd.f32 %v4227_v17, %v4190_v38 }
0x272a   :  { %4232 = vst.msk [vmem:[%s7080_s4] sm:$0xff] %vm61_vm0, %v4228_v54 }
0x272f   :  { %v4229_v11 = vpop.f32.mrf.mxu3 }
0x2730   :  { %v4230_v49 = vadd.f32 %v4229_v11, %v4190_v38 }
0x2732   :  { %4233 = vst.msk [vmem:[%s7080_s4 + $0x8] sm:$0xff] %vm61_vm0, %v4230_v49 }

</bundles_post_ra>
